<compile_context>
chip_gen: v6e
topology: v6e:2x2x1
jax: 0.10.0
libtpu: 0.0.40
codegen_flags: <defaults>
</compile_context>

<pallas_src>
import functools
import math

import jax
import jax.numpy as jnp
from jax.experimental import pallas as pl
from jax.experimental.pallas import tpu as pltpu


# ----------------------------- helpers --------------------------------------
def _erf(x):
    # Abramowitz & Stegun 7.1.26 polynomial (max abs err ~1.5e-7).
    p = 0.3275911
    a1, a2, a3, a4, a5 = 0.254829592, -0.284496736, 1.421413741, -1.453152027, 1.061405429
    s = jnp.where(x >= 0.0, 1.0, -1.0)
    ax = jnp.abs(x)
    t = 1.0 / (1.0 + p * ax)
    poly = ((((a5 * t + a4) * t + a3) * t + a2) * t + a1) * t
    return s * (1.0 - poly * jnp.exp(-ax * ax))


def _gelu_exact(x):
    # PyTorch nn.GELU() default: 0.5*x*(1+erf(x/sqrt(2)))
    return 0.5 * x * (1.0 + _erf(x * (1.0 / math.sqrt(2.0))))


def _round_up(n, m):
    return ((n + m - 1) // m) * m


# ----------------------------- kernel ---------------------------------------
def kan_linear_kernel(x_ref, grid_ref, inv_dl_ref, neg_inv_dr_ref, w_ref,
                      out_ref, slab_ref,
                      *, spline_order, in_pad, compute_dtype, basis_dtype):
    # slab_ref: (TB, (coeff+1)*in_pad) VMEM scratch.  It persists across grid
    # steps, so the GELU + Cox-de Boor work is done only on the first out tile
    # of each batch tile and reused for all subsequent out tiles.
    @pl.when(pl.program_id(1) == 0)
    def _build_slab():
        x = x_ref[...]                                       # (TB, in_pad) f32

        # ---- base branch: GELU(x) goes into the first in_pad lanes ----
        slab_ref[:, 0:in_pad] = _gelu_exact(x).astype(compute_dtype)

        # ---- B-spline bases (Cox-de Boor), fully unrolled over knot windows ----
        xb = x.astype(basis_dtype)
        g = grid_ref[...].astype(basis_dtype)                # (n_knots, in_pad)
        inv_dl = inv_dl_ref[...].astype(basis_dtype)         # (n_inv, in_pad)
        ninv_dr = neg_inv_dr_ref[...].astype(basis_dtype)    # (n_inv, in_pad), pre-negated
        n_knots = g.shape[0]

        def row(a, r):                                       # static (1, in_pad) slice
            return a[r:r + 1, :]

        # d_j = x - g[j], computed once and reused across all recursion levels.
        d = [xb - row(g, j) for j in range(n_knots)]

        bases = [
            jnp.logical_and(xb >= row(g, j), xb < row(g, j + 1)).astype(basis_dtype)
            for j in range(n_knots - 1)
        ]
        off = 0
        for k in range(1, spline_order + 1):
            width = n_knots - 1 - k
            bases = [
                d[j] * row(inv_dl, off + j) * bases[j]
                + d[j + k + 1] * row(ninv_dr, off + j) * bases[j + 1]
                for j in range(width)
            ]
            off += width

        # Store each final basis directly at its static, 128-aligned lane
        # offset (no concatenate pass).
        for j, b in enumerate(bases):
            c0 = (j + 1) * in_pad
            slab_ref[:, c0:c0 + in_pad] = b.astype(compute_dtype)

    # ---- ONE fused contraction: K = (coeff+1) * in_pad ----
    out_ref[...] = jnp.dot(slab_ref[...], w_ref[...],
                           preferred_element_type=jnp.float32).astype(out_ref.dtype)


# ----------------------------- wrapper --------------------------------------
def kan_linear_forward(x, grid, base_weight, spline_weight, spline_scaler=None,
                       *, grid_size, spline_order,
                       batch_tile=256, out_tile=None,
                       compute_dtype=jnp.bfloat16,
                       basis_dtype=jnp.float32,
                       vmem_budget_bytes=48 << 20,
                       vmem_limit_bytes=None):
    B, in_f = x.shape
    out_f, in_f2, coeff = spline_weight.shape
    n_knots = grid.shape[1]
    assert in_f2 == in_f
    assert coeff == grid_size + spline_order
    assert n_knots == grid_size + 2 * spline_order + 1
    assert base_weight.shape == (out_f, in_f)
    assert batch_tile % 8 == 0

    # ---------- one-time parameter prep (plain XLA ops, amortized) ----------
    in_pad = _round_up(in_f, 128)      # lane-dense loads + 128-aligned slab blocks
    out_pad = _round_up(out_f, 128)    # lane-dense (unmasked) output stores
    K = (coeff + 1) * in_pad

    # Fold the standalone spline scaler into the spline weight, flatten the
    # (coeff, in) contraction axes, pad.
    w_spl = jnp.transpose(spline_weight, (2, 1, 0)).astype(jnp.float32)   # (coeff, in, out)
    if spline_scaler is not None:
        w_spl = w_spl * spline_scaler.T[None].astype(jnp.float32)
    w_spl = jnp.pad(w_spl, ((0, 0), (0, in_pad - in_f), (0, out_pad - out_f)))
    w_spl = w_spl.reshape(coeff * in_pad, out_pad)                        # (coeff*in_pad, out_pad)

    w_base = jnp.pad(base_weight.T.astype(jnp.float32),
                     ((0, in_pad - in_f), (0, out_pad - out_f)))          # (in_pad, out_pad)

    # Fused weight: base block on top of the spline blocks -> one contraction.
    w_full = jnp.concatenate([w_base, w_spl], axis=0).astype(compute_dtype)  # (K, out_pad)

    # Knot grid, feature-last; padded features replicate the edge feature's
    # knots so the precomputed reciprocals stay finite (their weights are 0).
    grid_t = jnp.pad(grid.T.astype(jnp.float32),
                     ((0, 0), (0, in_pad - in_f)), mode="edge")           # (n_knots, in_pad)
    inv_l, neg_inv_r = [], []
    for k in range(1, spline_order + 1):
        inv_l.append(1.0 / (grid_t[k:-1] - grid_t[:-(k + 1)]))
        neg_inv_r.append(-1.0 / (grid_t[k + 1:] - grid_t[1:-k]))          # pre-negated
    if inv_l:
        inv_dl = jnp.concatenate(inv_l, axis=0)                           # (n_inv, in_pad)
        neg_inv_dr = jnp.concatenate(neg_inv_r, axis=0)
    else:
        inv_dl = jnp.zeros((1, in_pad), jnp.float32)
        neg_inv_dr = jnp.zeros((1, in_pad), jnp.float32)
    n_inv = inv_dl.shape[0]

    # ---------- batch / output tiling ----------
    eff_bt = min(batch_tile, _round_up(B, 8))
    b_pad = _round_up(B, eff_bt)
    x_p = jnp.pad(x.astype(jnp.float32), ((0, b_pad - B), (0, in_pad - in_f)))

    w_isz = jnp.dtype(compute_dtype).itemsize

    def footprint(t):
        # Rough per-step VMEM footprint for out_tile = t.
        return (2 * eff_bt * in_pad * 4                    # x tile (double-buffered, f32)
                + 2 * (n_knots + 2 * n_inv) * in_pad * 4   # knot tables (double-buffered)
                + 2 * K * t * w_isz                        # fused weight block (double-buffered)
                + 2 * eff_bt * t * 4                       # output tile (double-buffered)
                + eff_bt * K * w_isz                       # basis slab scratch
                + 2 * n_knots * eff_bt * in_pad * 4)       # recursion live temporaries (est.)

    if out_tile is None:
        cands = sorted({out_pad} | {t for t in (512, 384, 256, 128)
                                    if t < out_pad and out_pad % t == 0},
                       reverse=True)
        out_tile = cands[-1]
        for t in cands:
            if footprint(t) <= (vmem_budget_bytes * 3) // 4:
                out_tile = t
                break
    assert out_tile % 128 == 0 and out_pad % out_tile == 0

    if vmem_limit_bytes is None:
        est = footprint(out_tile)
        vmem_limit_bytes = int(min(max(32 << 20, est + (est >> 1) + (2 << 20)),
                                   vmem_budget_bytes))

    grid_dims = (b_pad // eff_bt, out_pad // out_tile)

    kernel = functools.partial(kan_linear_kernel,
                               spline_order=spline_order,
                               in_pad=in_pad,
                               compute_dtype=compute_dtype,
                               basis_dtype=basis_dtype)

    out = pl.pallas_call(
        kernel,
        out_shape=jax.ShapeDtypeStruct((b_pad, out_pad), x.dtype),
        grid_spec=pltpu.PrefetchScalarGridSpec(
            num_scalar_prefetch=0,
            grid=grid_dims,
            in_specs=[
                pl.BlockSpec((eff_bt, in_pad), lambda i, j: (i, 0)),
                pl.BlockSpec((n_knots, in_pad), lambda i, j: (0, 0)),
                pl.BlockSpec((n_inv, in_pad), lambda i, j: (0, 0)),
                pl.BlockSpec((n_inv, in_pad), lambda i, j: (0, 0)),
                pl.BlockSpec((K, out_tile), lambda i, j: (0, j)),
            ],
            out_specs=pl.BlockSpec((eff_bt, out_tile), lambda i, j: (i, j)),
            scratch_shapes=[pltpu.VMEM((eff_bt, K), compute_dtype)],
        ),
        compiler_params=pltpu.CompilerParams(
            # Batch tiles are independent -> "parallel" (megacore / v7x 2 TCs).
            # The out-tile axis must be "arbitrary": the basis slab scratch is
            # built at j == 0 and reused for all later j of the same batch tile.
            dimension_semantics=("parallel", "arbitrary"),
            vmem_limit_bytes=vmem_limit_bytes),
    )(x_p, grid_t, inv_dl, neg_inv_dr, w_full)

    return out[:B, :out_f]


# ----------------------------- reference ------------------------------------
def kan_linear_reference(x, grid, base_weight, spline_weight, spline_scaler,
                         *, spline_order):
    """Pure-JAX reference mirroring the PyTorch forward exactly (f32)."""
    xe = x[:, :, None]                                       # (B, in, 1)
    g = grid[None, :, :]                                     # (1, in, n_knots)
    bases = jnp.logical_and(xe >= g[:, :, :-1], xe < g[:, :, 1:]).astype(x.dtype)
    for k in range(1, spline_order + 1):
        bases = ((xe - g[:, :, :-(k + 1)]) /
                 (g[:, :, k:-1] - g[:, :, :-(k + 1)])) * bases[:, :, :-1] + \
                ((g[:, :, k + 1:] - xe) /
                 (g[:, :, k + 1:] - g[:, :, 1:-k])) * bases[:, :, 1:]
    base_out = jax.nn.gelu(x, approximate=False) @ base_weight.T
    scaled_w = spline_weight * spline_scaler[:, :, None]
    spline_out = bases.reshape(x.shape[0], -1) @ scaled_w.reshape(base_weight.shape[0], -1).T
    return base_out + spline_out


# ----------------------------- test -----------------------------------------
if __name__ == "__main__":
    # Shapes exercise: batch padding (200 rows), lane padding (in 32 -> 128),
    # output padding (192 -> 256) and, with out_tile=128 forced below, the
    # basis-slab reuse across multiple out tiles.
    B, in_f, out_f = 200, 32, 192
    grid_size, spline_order = 3, 3
    coeff = grid_size + spline_order

    key = jax.random.PRNGKey(0)
    k1, k2, k3, k4 = jax.random.split(key, 4)
    x = jax.random.uniform(k1, (B, in_f), jnp.float32, -1.0, 1.0)
    base_weight = jax.random.uniform(k2, (out_f, in_f), jnp.float32, -0.3, 0.3)
    spline_weight = jax.random.uniform(k3, (out_f, in_f, coeff), jnp.float32, -0.1, 0.1)
    spline_scaler = jax.random.uniform(k4, (out_f, in_f), jnp.float32, -0.5, 0.5)

    # Extended uniform knot grid, same construction as the PyTorch buffer.
    grid_range = (-1.0, 1.0)
    h = (grid_range[1] - grid_range[0]) / grid_size
    knots = (jnp.arange(-spline_order, grid_size + spline_order + 1, dtype=jnp.float32)
             * h + grid_range[0])                            # (n_knots,)
    grid = jnp.broadcast_to(knots, (in_f, knots.shape[0]))   # (in, n_knots)

    ref = kan_linear_reference(x, grid, base_weight, spline_weight, spline_scaler,
                               spline_order=spline_order)

    # f32 MXU-operand run with small forced tiles: 2 batch tiles x 2 out tiles,
    # exercising the @pl.when basis-slab cache; tight check of the kernel math.
    out_f32 = kan_linear_forward(x, grid, base_weight, spline_weight, spline_scaler,
                                 grid_size=grid_size, spline_order=spline_order,
                                 batch_tile=128, out_tile=128,
                                 compute_dtype=jnp.float32)
    out_f32 = jax.block_until_ready(out_f32)
    err_f32 = float(jnp.max(jnp.abs(out_f32 - ref)))
    assert err_f32 < 1e-4, f"f32 kernel mismatch vs reference, max abs err = {err_f32}"

    # Default fast path: bf16 MXU operands, f32 basis recursion & accumulation,
    # auto tile selection (single out tile here).  Loosened tolerance.
    # TODO(synk): on v6e/v7x, basis_dtype=jnp.bfloat16 halves the VPU cycles of
    # the recursion; keep f32 on v5e (no bf16 VPU) and re-validate error bounds.
    out_bf16 = kan_linear_forward(x, grid, base_weight, spline_weight, spline_scaler,
                                  grid_size=grid_size, spline_order=spline_order)
    out_bf16 = jax.block_until_ready(out_bf16)
    err_bf16 = float(jnp.max(jnp.abs(out_bf16 - ref)))
    assert err_bf16 < 5e-2, f"bf16 kernel mismatch vs reference, max abs err = {err_bf16}"

    print("KERNEL_OK")
</pallas_src>

<mosaic_0001>
module attributes {stable_mosaic.version = 11 : i64} {
  func.func @kan_linear_kernel(%arg0: i32, %arg1: i32, %arg2: memref<128x128xf32, #tpu.memory_space<vmem>>, %arg3: memref<10x128xf32, #tpu.memory_space<vmem>>, %arg4: memref<21x128xf32, #tpu.memory_space<vmem>>, %arg5: memref<21x128xf32, #tpu.memory_space<vmem>>, %arg6: memref<896x128xf32, #tpu.memory_space<vmem>>, %arg7: memref<128x128xf32, #tpu.memory_space<vmem>>, %arg8: memref<128x896xf32, #tpu.memory_space<vmem>>) attributes {dimension_semantics = [#tpu.dimension_semantics<parallel>, #tpu.dimension_semantics<arbitrary>], iteration_bounds = array<i64: 2, 2>, scalar_prefetch = 0 : i64, scratch_operands = 1 : i64, tpu.core_type = #tpu.core_type<tc>, window_params = [{transform_indices = @transform_0, window_bounds = array<i64: 128, 128>}, {pipeline_mode = #tpu.pipeline_mode<synchronous>, transform_indices = @transform_1, window_bounds = array<i64: 10, 128>}, {pipeline_mode = #tpu.pipeline_mode<synchronous>, transform_indices = @transform_2, window_bounds = array<i64: 21, 128>}, {pipeline_mode = #tpu.pipeline_mode<synchronous>, transform_indices = @transform_3, window_bounds = array<i64: 21, 128>}, {transform_indices = @transform_4, window_bounds = array<i64: 896, 128>}, {transform_indices = @transform_5, window_bounds = array<i64: 128, 128>}]} {
    %c0_i32 = arith.constant 0 : i32
    %0 = arith.cmpi eq, %arg1, %c0_i32 : i32
    %1 = arith.extui %0 : i1 to i32
    %c0_i32_0 = arith.constant 0 : i32
    %2 = arith.cmpi ne, %1, %c0_i32_0 : i32
    scf.if %2 {
      %c0_6 = arith.constant 0 : index
      %c0_7 = arith.constant 0 : index
      %7 = vector.load %arg2[%c0_6, %c0_7] : memref<128x128xf32, #tpu.memory_space<vmem>>, vector<128x128xf32>
      %cst_8 = arith.constant 5.000000e-01 : f32
      %8 = vector.broadcast %cst_8 : f32 to vector<128x128xf32>
      %9 = arith.mulf %8, %7 : vector<128x128xf32>
      %cst_9 = arith.constant 0.707106769 : f32
      %10 = vector.broadcast %cst_9 : f32 to vector<128x128xf32>
      %11 = arith.mulf %7, %10 : vector<128x128xf32>
      %cst_10 = arith.constant 0.000000e+00 : f32
      %12 = vector.broadcast %cst_10 : f32 to vector<128x128xf32>
      %13 = arith.cmpf oge, %11, %12 : vector<128x128xf32>
      %cst_11 = arith.constant 1.000000e+00 : f32
      %cst_12 = arith.constant -1.000000e+00 : f32
      %14 = vector.broadcast %cst_11 : f32 to vector<128x128xf32>
      %15 = vector.broadcast %cst_12 : f32 to vector<128x128xf32>
      %16 = arith.select %13, %14, %15 : vector<128x128xi1>, vector<128x128xf32>
      %17 = math.absf %11 : vector<128x128xf32>
      %cst_13 = arith.constant 0.327591091 : f32
      %18 = vector.broadcast %cst_13 : f32 to vector<128x128xf32>
      %19 = arith.mulf %18, %17 : vector<128x128xf32>
      %cst_14 = arith.constant 1.000000e+00 : f32
      %20 = vector.broadcast %cst_14 : f32 to vector<128x128xf32>
      %21 = arith.addf %20, %19 : vector<128x128xf32>
      %cst_15 = arith.constant 1.000000e+00 : f32
      %22 = vector.broadcast %cst_15 : f32 to vector<128x128xf32>
      %23 = arith.divf %22, %21 : vector<128x128xf32>
      %cst_16 = arith.constant 1.06140542 : f32
      %24 = vector.broadcast %cst_16 : f32 to vector<128x128xf32>
      %25 = arith.mulf %24, %23 : vector<128x128xf32>
      %cst_17 = arith.constant -1.45315206 : f32
      %26 = vector.broadcast %cst_17 : f32 to vector<128x128xf32>
      %27 = arith.addf %25, %26 : vector<128x128xf32>
      %28 = arith.mulf %27, %23 : vector<128x128xf32>
      %cst_18 = arith.constant 1.42141378 : f32
      %29 = vector.broadcast %cst_18 : f32 to vector<128x128xf32>
      %30 = arith.addf %28, %29 : vector<128x128xf32>
      %31 = arith.mulf %30, %23 : vector<128x128xf32>
      %cst_19 = arith.constant -0.284496725 : f32
      %32 = vector.broadcast %cst_19 : f32 to vector<128x128xf32>
      %33 = arith.addf %31, %32 : vector<128x128xf32>
      %34 = arith.mulf %33, %23 : vector<128x128xf32>
      %cst_20 = arith.constant 0.254829586 : f32
      %35 = vector.broadcast %cst_20 : f32 to vector<128x128xf32>
      %36 = arith.addf %34, %35 : vector<128x128xf32>
      %37 = arith.mulf %36, %23 : vector<128x128xf32>
      %cst_21 = arith.constant 0.000000e+00 : f32
      %38 = vector.broadcast %cst_21 : f32 to vector<128x128xf32>
      %39 = arith.subf %38, %17 : vector<128x128xf32>
      %40 = arith.mulf %39, %17 : vector<128x128xf32>
      %41 = math.exp %40 : vector<128x128xf32>
      %42 = arith.mulf %37, %41 : vector<128x128xf32>
      %cst_22 = arith.constant 1.000000e+00 : f32
      %43 = vector.broadcast %cst_22 : f32 to vector<128x128xf32>
      %44 = arith.subf %43, %42 : vector<128x128xf32>
      %45 = arith.mulf %16, %44 : vector<128x128xf32>
      %cst_23 = arith.constant 1.000000e+00 : f32
      %46 = vector.broadcast %cst_23 : f32 to vector<128x128xf32>
      %47 = arith.addf %46, %45 : vector<128x128xf32>
      %48 = arith.mulf %9, %47 : vector<128x128xf32>
      %c0_24 = arith.constant 0 : index
      %c0_25 = arith.constant 0 : index
      %49 = vector.load %arg8[%c0_24, %c0_25] : memref<128x896xf32, #tpu.memory_space<vmem>>, vector<128x128xf32>
      tpu.vector_store %arg8[%c0_24, %c0_25], %48 {strides = array<i32>} : memref<128x896xf32, #tpu.memory_space<vmem>>, vector<128x128xf32>,
      %c0_26 = arith.constant 0 : index
      %c0_27 = arith.constant 0 : index
      %50 = vector.load %arg3[%c0_26, %c0_27] : memref<10x128xf32, #tpu.memory_space<vmem>>, vector<10x128xf32>
      %c0_28 = arith.constant 0 : index
      %c0_29 = arith.constant 0 : index
      %51 = vector.load %arg4[%c0_28, %c0_29] : memref<21x128xf32, #tpu.memory_space<vmem>>, vector<21x128xf32>
      %c0_30 = arith.constant 0 : index
      %c0_31 = arith.constant 0 : index
      %52 = vector.load %arg5[%c0_30, %c0_31] : memref<21x128xf32, #tpu.memory_space<vmem>>, vector<21x128xf32>
      %53 = vector.extract_strided_slice %50 {offsets = [0, 0], sizes = [1, 128], strides = [1, 1]} : vector<10x128xf32> to vector<1x128xf32>
      %54 = vector.broadcast %53 : vector<1x128xf32> to vector<128x128xf32>
      %55 = arith.subf %7, %54 : vector<128x128xf32>
      %56 = vector.extract_strided_slice %50 {offsets = [1, 0], sizes = [1, 128], strides = [1, 1]} : vector<10x128xf32> to vector<1x128xf32>
      %57 = vector.broadcast %56 : vector<1x128xf32> to vector<128x128xf32>
      %58 = arith.subf %7, %57 : vector<128x128xf32>
      %59 = vector.extract_strided_slice %50 {offsets = [2, 0], sizes = [1, 128], strides = [1, 1]} : vector<10x128xf32> to vector<1x128xf32>
      %60 = vector.broadcast %59 : vector<1x128xf32> to vector<128x128xf32>
      %61 = arith.subf %7, %60 : vector<128x128xf32>
      %62 = vector.extract_strided_slice %50 {offsets = [3, 0], sizes = [1, 128], strides = [1, 1]} : vector<10x128xf32> to vector<1x128xf32>
      %63 = vector.broadcast %62 : vector<1x128xf32> to vector<128x128xf32>
      %64 = arith.subf %7, %63 : vector<128x128xf32>
      %65 = vector.extract_strided_slice %50 {offsets = [4, 0], sizes = [1, 128], strides = [1, 1]} : vector<10x128xf32> to vector<1x128xf32>
      %66 = vector.broadcast %65 : vector<1x128xf32> to vector<128x128xf32>
      %67 = arith.subf %7, %66 : vector<128x128xf32>
      %68 = vector.extract_strided_slice %50 {offsets = [5, 0], sizes = [1, 128], strides = [1, 1]} : vector<10x128xf32> to vector<1x128xf32>
      %69 = vector.broadcast %68 : vector<1x128xf32> to vector<128x128xf32>
      %70 = arith.subf %7, %69 : vector<128x128xf32>
      %71 = vector.extract_strided_slice %50 {offsets = [6, 0], sizes = [1, 128], strides = [1, 1]} : vector<10x128xf32> to vector<1x128xf32>
      %72 = vector.broadcast %71 : vector<1x128xf32> to vector<128x128xf32>
      %73 = arith.subf %7, %72 : vector<128x128xf32>
      %74 = vector.extract_strided_slice %50 {offsets = [7, 0], sizes = [1, 128], strides = [1, 1]} : vector<10x128xf32> to vector<1x128xf32>
      %75 = vector.broadcast %74 : vector<1x128xf32> to vector<128x128xf32>
      %76 = arith.subf %7, %75 : vector<128x128xf32>
      %77 = vector.extract_strided_slice %50 {offsets = [8, 0], sizes = [1, 128], strides = [1, 1]} : vector<10x128xf32> to vector<1x128xf32>
      %78 = vector.broadcast %77 : vector<1x128xf32> to vector<128x128xf32>
      %79 = arith.subf %7, %78 : vector<128x128xf32>
      %80 = vector.extract_strided_slice %50 {offsets = [9, 0], sizes = [1, 128], strides = [1, 1]} : vector<10x128xf32> to vector<1x128xf32>
      %81 = vector.broadcast %80 : vector<1x128xf32> to vector<128x128xf32>
      %82 = arith.subf %7, %81 : vector<128x128xf32>
      %83 = vector.extract_strided_slice %50 {offsets = [0, 0], sizes = [1, 128], strides = [1, 1]} : vector<10x128xf32> to vector<1x128xf32>
      %84 = vector.broadcast %83 : vector<1x128xf32> to vector<128x128xf32>
      %85 = arith.cmpf oge, %7, %84 : vector<128x128xf32>
      %86 = vector.extract_strided_slice %50 {offsets = [1, 0], sizes = [1, 128], strides = [1, 1]} : vector<10x128xf32> to vector<1x128xf32>
      %87 = vector.broadcast %86 : vector<1x128xf32> to vector<128x128xf32>
      %88 = arith.cmpf olt, %7, %87 : vector<128x128xf32>
      %89 = arith.andi %85, %88 : vector<128x128xi1>
      %90 = arith.extui %89 : vector<128x128xi1> to vector<128x128xi32>
      %91 = arith.sitofp %90 : vector<128x128xi32> to vector<128x128xf32>
      %92 = vector.extract_strided_slice %50 {offsets = [1, 0], sizes = [1, 128], strides = [1, 1]} : vector<10x128xf32> to vector<1x128xf32>
      %93 = vector.broadcast %92 : vector<1x128xf32> to vector<128x128xf32>
      %94 = arith.cmpf oge, %7, %93 : vector<128x128xf32>
      %95 = vector.extract_strided_slice %50 {offsets = [2, 0], sizes = [1, 128], strides = [1, 1]} : vector<10x128xf32> to vector<1x128xf32>
      %96 = vector.broadcast %95 : vector<1x128xf32> to vector<128x128xf32>
      %97 = arith.cmpf olt, %7, %96 : vector<128x128xf32>
      %98 = arith.andi %94, %97 : vector<128x128xi1>
      %99 = arith.extui %98 : vector<128x128xi1> to vector<128x128xi32>
      %100 = arith.sitofp %99 : vector<128x128xi32> to vector<128x128xf32>
      %101 = vector.extract_strided_slice %50 {offsets = [2, 0], sizes = [1, 128], strides = [1, 1]} : vector<10x128xf32> to vector<1x128xf32>
      %102 = vector.broadcast %101 : vector<1x128xf32> to vector<128x128xf32>
      %103 = arith.cmpf oge, %7, %102 : vector<128x128xf32>
      %104 = vector.extract_strided_slice %50 {offsets = [3, 0], sizes = [1, 128], strides = [1, 1]} : vector<10x128xf32> to vector<1x128xf32>
      %105 = vector.broadcast %104 : vector<1x128xf32> to vector<128x128xf32>
      %106 = arith.cmpf olt, %7, %105 : vector<128x128xf32>
      %107 = arith.andi %103, %106 : vector<128x128xi1>
      %108 = arith.extui %107 : vector<128x128xi1> to vector<128x128xi32>
      %109 = arith.sitofp %108 : vector<128x128xi32> to vector<128x128xf32>
      %110 = vector.extract_strided_slice %50 {offsets = [3, 0], sizes = [1, 128], strides = [1, 1]} : vector<10x128xf32> to vector<1x128xf32>
      %111 = vector.broadcast %110 : vector<1x128xf32> to vector<128x128xf32>
      %112 = arith.cmpf oge, %7, %111 : vector<128x128xf32>
      %113 = vector.extract_strided_slice %50 {offsets = [4, 0], sizes = [1, 128], strides = [1, 1]} : vector<10x128xf32> to vector<1x128xf32>
      %114 = vector.broadcast %113 : vector<1x128xf32> to vector<128x128xf32>
      %115 = arith.cmpf olt, %7, %114 : vector<128x128xf32>
      %116 = arith.andi %112, %115 : vector<128x128xi1>
      %117 = arith.extui %116 : vector<128x128xi1> to vector<128x128xi32>
      %118 = arith.sitofp %117 : vector<128x128xi32> to vector<128x128xf32>
      %119 = vector.extract_strided_slice %50 {offsets = [4, 0], sizes = [1, 128], strides = [1, 1]} : vector<10x128xf32> to vector<1x128xf32>
      %120 = vector.broadcast %119 : vector<1x128xf32> to vector<128x128xf32>
      %121 = arith.cmpf oge, %7, %120 : vector<128x128xf32>
      %122 = vector.extract_strided_slice %50 {offsets = [5, 0], sizes = [1, 128], strides = [1, 1]} : vector<10x128xf32> to vector<1x128xf32>
      %123 = vector.broadcast %122 : vector<1x128xf32> to vector<128x128xf32>
      %124 = arith.cmpf olt, %7, %123 : vector<128x128xf32>
      %125 = arith.andi %121, %124 : vector<128x128xi1>
      %126 = arith.extui %125 : vector<128x128xi1> to vector<128x128xi32>
      %127 = arith.sitofp %126 : vector<128x128xi32> to vector<128x128xf32>
      %128 = vector.extract_strided_slice %50 {offsets = [5, 0], sizes = [1, 128], strides = [1, 1]} : vector<10x128xf32> to vector<1x128xf32>
      %129 = vector.broadcast %128 : vector<1x128xf32> to vector<128x128xf32>
      %130 = arith.cmpf oge, %7, %129 : vector<128x128xf32>
      %131 = vector.extract_strided_slice %50 {offsets = [6, 0], sizes = [1, 128], strides = [1, 1]} : vector<10x128xf32> to vector<1x128xf32>
      %132 = vector.broadcast %131 : vector<1x128xf32> to vector<128x128xf32>
      %133 = arith.cmpf olt, %7, %132 : vector<128x128xf32>
      %134 = arith.andi %130, %133 : vector<128x128xi1>
      %135 = arith.extui %134 : vector<128x128xi1> to vector<128x128xi32>
      %136 = arith.sitofp %135 : vector<128x128xi32> to vector<128x128xf32>
      %137 = vector.extract_strided_slice %50 {offsets = [6, 0], sizes = [1, 128], strides = [1, 1]} : vector<10x128xf32> to vector<1x128xf32>
      %138 = vector.broadcast %137 : vector<1x128xf32> to vector<128x128xf32>
      %139 = arith.cmpf oge, %7, %138 : vector<128x128xf32>
      %140 = vector.extract_strided_slice %50 {offsets = [7, 0], sizes = [1, 128], strides = [1, 1]} : vector<10x128xf32> to vector<1x128xf32>
      %141 = vector.broadcast %140 : vector<1x128xf32> to vector<128x128xf32>
      %142 = arith.cmpf olt, %7, %141 : vector<128x128xf32>
      %143 = arith.andi %139, %142 : vector<128x128xi1>
      %144 = arith.extui %143 : vector<128x128xi1> to vector<128x128xi32>
      %145 = arith.sitofp %144 : vector<128x128xi32> to vector<128x128xf32>
      %146 = vector.extract_strided_slice %50 {offsets = [7, 0], sizes = [1, 128], strides = [1, 1]} : vector<10x128xf32> to vector<1x128xf32>
      %147 = vector.broadcast %146 : vector<1x128xf32> to vector<128x128xf32>
      %148 = arith.cmpf oge, %7, %147 : vector<128x128xf32>
      %149 = vector.extract_strided_slice %50 {offsets = [8, 0], sizes = [1, 128], strides = [1, 1]} : vector<10x128xf32> to vector<1x128xf32>
      %150 = vector.broadcast %149 : vector<1x128xf32> to vector<128x128xf32>
      %151 = arith.cmpf olt, %7, %150 : vector<128x128xf32>
      %152 = arith.andi %148, %151 : vector<128x128xi1>
      %153 = arith.extui %152 : vector<128x128xi1> to vector<128x128xi32>
      %154 = arith.sitofp %153 : vector<128x128xi32> to vector<128x128xf32>
      %155 = vector.extract_strided_slice %50 {offsets = [8, 0], sizes = [1, 128], strides = [1, 1]} : vector<10x128xf32> to vector<1x128xf32>
      %156 = vector.broadcast %155 : vector<1x128xf32> to vector<128x128xf32>
      %157 = arith.cmpf oge, %7, %156 : vector<128x128xf32>
      %158 = vector.extract_strided_slice %50 {offsets = [9, 0], sizes = [1, 128], strides = [1, 1]} : vector<10x128xf32> to vector<1x128xf32>
      %159 = vector.broadcast %158 : vector<1x128xf32> to vector<128x128xf32>
      %160 = arith.cmpf olt, %7, %159 : vector<128x128xf32>
      %161 = arith.andi %157, %160 : vector<128x128xi1>
      %162 = arith.extui %161 : vector<128x128xi1> to vector<128x128xi32>
      %163 = arith.sitofp %162 : vector<128x128xi32> to vector<128x128xf32>
      %164 = vector.extract_strided_slice %51 {offsets = [0, 0], sizes = [1, 128], strides = [1, 1]} : vector<21x128xf32> to vector<1x128xf32>
      %165 = vector.broadcast %164 : vector<1x128xf32> to vector<128x128xf32>
      %166 = arith.mulf %55, %165 : vector<128x128xf32>
      %167 = arith.mulf %166, %91 : vector<128x128xf32>
      %168 = vector.extract_strided_slice %52 {offsets = [0, 0], sizes = [1, 128], strides = [1, 1]} : vector<21x128xf32> to vector<1x128xf32>
      %169 = vector.broadcast %168 : vector<1x128xf32> to vector<128x128xf32>
      %170 = arith.mulf %61, %169 : vector<128x128xf32>
      %171 = arith.mulf %170, %100 : vector<128x128xf32>
      %172 = arith.addf %167, %171 : vector<128x128xf32>
      %173 = vector.extract_strided_slice %51 {offsets = [1, 0], sizes = [1, 128], strides = [1, 1]} : vector<21x128xf32> to vector<1x128xf32>
      %174 = vector.broadcast %173 : vector<1x128xf32> to vector<128x128xf32>
      %175 = arith.mulf %58, %174 : vector<128x128xf32>
      %176 = arith.mulf %175, %100 : vector<128x128xf32>
      %177 = vector.extract_strided_slice %52 {offsets = [1, 0], sizes = [1, 128], strides = [1, 1]} : vector<21x128xf32> to vector<1x128xf32>
      %178 = vector.broadcast %177 : vector<1x128xf32> to vector<128x128xf32>
      %179 = arith.mulf %64, %178 : vector<128x128xf32>
      %180 = arith.mulf %179, %109 : vector<128x128xf32>
      %181 = arith.addf %176, %180 : vector<128x128xf32>
      %182 = vector.extract_strided_slice %51 {offsets = [2, 0], sizes = [1, 128], strides = [1, 1]} : vector<21x128xf32> to vector<1x128xf32>
      %183 = vector.broadcast %182 : vector<1x128xf32> to vector<128x128xf32>
      %184 = arith.mulf %61, %183 : vector<128x128xf32>
      %185 = arith.mulf %184, %109 : vector<128x128xf32>
      %186 = vector.extract_strided_slice %52 {offsets = [2, 0], sizes = [1, 128], strides = [1, 1]} : vector<21x128xf32> to vector<1x128xf32>
      %187 = vector.broadcast %186 : vector<1x128xf32> to vector<128x128xf32>
      %188 = arith.mulf %67, %187 : vector<128x128xf32>
      %189 = arith.mulf %188, %118 : vector<128x128xf32>
      %190 = arith.addf %185, %189 : vector<128x128xf32>
      %191 = vector.extract_strided_slice %51 {offsets = [3, 0], sizes = [1, 128], strides = [1, 1]} : vector<21x128xf32> to vector<1x128xf32>
      %192 = vector.broadcast %191 : vector<1x128xf32> to vector<128x128xf32>
      %193 = arith.mulf %64, %192 : vector<128x128xf32>
      %194 = arith.mulf %193, %118 : vector<128x128xf32>
      %195 = vector.extract_strided_slice %52 {offsets = [3, 0], sizes = [1, 128], strides = [1, 1]} : vector<21x128xf32> to vector<1x128xf32>
      %196 = vector.broadcast %195 : vector<1x128xf32> to vector<128x128xf32>
      %197 = arith.mulf %70, %196 : vector<128x128xf32>
      %198 = arith.mulf %197, %127 : vector<128x128xf32>
      %199 = arith.addf %194, %198 : vector<128x128xf32>
      %200 = vector.extract_strided_slice %51 {offsets = [4, 0], sizes = [1, 128], strides = [1, 1]} : vector<21x128xf32> to vector<1x128xf32>
      %201 = vector.broadcast %200 : vector<1x128xf32> to vector<128x128xf32>
      %202 = arith.mulf %67, %201 : vector<128x128xf32>
      %203 = arith.mulf %202, %127 : vector<128x128xf32>
      %204 = vector.extract_strided_slice %52 {offsets = [4, 0], sizes = [1, 128], strides = [1, 1]} : vector<21x128xf32> to vector<1x128xf32>
      %205 = vector.broadcast %204 : vector<1x128xf32> to vector<128x128xf32>
      %206 = arith.mulf %73, %205 : vector<128x128xf32>
      %207 = arith.mulf %206, %136 : vector<128x128xf32>
      %208 = arith.addf %203, %207 : vector<128x128xf32>
      %209 = vector.extract_strided_slice %51 {offsets = [5, 0], sizes = [1, 128], strides = [1, 1]} : vector<21x128xf32> to vector<1x128xf32>
      %210 = vector.broadcast %209 : vector<1x128xf32> to vector<128x128xf32>
      %211 = arith.mulf %70, %210 : vector<128x128xf32>
      %212 = arith.mulf %211, %136 : vector<128x128xf32>
      %213 = vector.extract_strided_slice %52 {offsets = [5, 0], sizes = [1, 128], strides = [1, 1]} : vector<21x128xf32> to vector<1x128xf32>
      %214 = vector.broadcast %213 : vector<1x128xf32> to vector<128x128xf32>
      %215 = arith.mulf %76, %214 : vector<128x128xf32>
      %216 = arith.mulf %215, %145 : vector<128x128xf32>
      %217 = arith.addf %212, %216 : vector<128x128xf32>
      %218 = vector.extract_strided_slice %51 {offsets = [6, 0], sizes = [1, 128], strides = [1, 1]} : vector<21x128xf32> to vector<1x128xf32>
      %219 = vector.broadcast %218 : vector<1x128xf32> to vector<128x128xf32>
      %220 = arith.mulf %73, %219 : vector<128x128xf32>
      %221 = arith.mulf %220, %145 : vector<128x128xf32>
      %222 = vector.extract_strided_slice %52 {offsets = [6, 0], sizes = [1, 128], strides = [1, 1]} : vector<21x128xf32> to vector<1x128xf32>
      %223 = vector.broadcast %222 : vector<1x128xf32> to vector<128x128xf32>
      %224 = arith.mulf %79, %223 : vector<128x128xf32>
      %225 = arith.mulf %224, %154 : vector<128x128xf32>
      %226 = arith.addf %221, %225 : vector<128x128xf32>
      %227 = vector.extract_strided_slice %51 {offsets = [7, 0], sizes = [1, 128], strides = [1, 1]} : vector<21x128xf32> to vector<1x128xf32>
      %228 = vector.broadcast %227 : vector<1x128xf32> to vector<128x128xf32>
      %229 = arith.mulf %76, %228 : vector<128x128xf32>
      %230 = arith.mulf %229, %154 : vector<128x128xf32>
      %231 = vector.extract_strided_slice %52 {offsets = [7, 0], sizes = [1, 128], strides = [1, 1]} : vector<21x128xf32> to vector<1x128xf32>
      %232 = vector.broadcast %231 : vector<1x128xf32> to vector<128x128xf32>
      %233 = arith.mulf %82, %232 : vector<128x128xf32>
      %234 = arith.mulf %233, %163 : vector<128x128xf32>
      %235 = arith.addf %230, %234 : vector<128x128xf32>
      %236 = vector.extract_strided_slice %51 {offsets = [8, 0], sizes = [1, 128], strides = [1, 1]} : vector<21x128xf32> to vector<1x128xf32>
      %237 = vector.broadcast %236 : vector<1x128xf32> to vector<128x128xf32>
      %238 = arith.mulf %55, %237 : vector<128x128xf32>
      %239 = arith.mulf %238, %172 : vector<128x128xf32>
      %240 = vector.extract_strided_slice %52 {offsets = [8, 0], sizes = [1, 128], strides = [1, 1]} : vector<21x128xf32> to vector<1x128xf32>
      %241 = vector.broadcast %240 : vector<1x128xf32> to vector<128x128xf32>
      %242 = arith.mulf %64, %241 : vector<128x128xf32>
      %243 = arith.mulf %242, %181 : vector<128x128xf32>
      %244 = arith.addf %239, %243 : vector<128x128xf32>
      %245 = vector.extract_strided_slice %51 {offsets = [9, 0], sizes = [1, 128], strides = [1, 1]} : vector<21x128xf32> to vector<1x128xf32>
      %246 = vector.broadcast %245 : vector<1x128xf32> to vector<128x128xf32>
      %247 = arith.mulf %58, %246 : vector<128x128xf32>
      %248 = arith.mulf %247, %181 : vector<128x128xf32>
      %249 = vector.extract_strided_slice %52 {offsets = [9, 0], sizes = [1, 128], strides = [1, 1]} : vector<21x128xf32> to vector<1x128xf32>
      %250 = vector.broadcast %249 : vector<1x128xf32> to vector<128x128xf32>
      %251 = arith.mulf %67, %250 : vector<128x128xf32>
      %252 = arith.mulf %251, %190 : vector<128x128xf32>
      %253 = arith.addf %248, %252 : vector<128x128xf32>
      %254 = vector.extract_strided_slice %51 {offsets = [10, 0], sizes = [1, 128], strides = [1, 1]} : vector<21x128xf32> to vector<1x128xf32>
      %255 = vector.broadcast %254 : vector<1x128xf32> to vector<128x128xf32>
      %256 = arith.mulf %61, %255 : vector<128x128xf32>
      %257 = arith.mulf %256, %190 : vector<128x128xf32>
      %258 = vector.extract_strided_slice %52 {offsets = [10, 0], sizes = [1, 128], strides = [1, 1]} : vector<21x128xf32> to vector<1x128xf32>
      %259 = vector.broadcast %258 : vector<1x128xf32> to vector<128x128xf32>
      %260 = arith.mulf %70, %259 : vector<128x128xf32>
      %261 = arith.mulf %260, %199 : vector<128x128xf32>
      %262 = arith.addf %257, %261 : vector<128x128xf32>
      %263 = vector.extract_strided_slice %51 {offsets = [11, 0], sizes = [1, 128], strides = [1, 1]} : vector<21x128xf32> to vector<1x128xf32>
      %264 = vector.broadcast %263 : vector<1x128xf32> to vector<128x128xf32>
      %265 = arith.mulf %64, %264 : vector<128x128xf32>
      %266 = arith.mulf %265, %199 : vector<128x128xf32>
      %267 = vector.extract_strided_slice %52 {offsets = [11, 0], sizes = [1, 128], strides = [1, 1]} : vector<21x128xf32> to vector<1x128xf32>
      %268 = vector.broadcast %267 : vector<1x128xf32> to vector<128x128xf32>
      %269 = arith.mulf %73, %268 : vector<128x128xf32>
      %270 = arith.mulf %269, %208 : vector<128x128xf32>
      %271 = arith.addf %266, %270 : vector<128x128xf32>
      %272 = vector.extract_strided_slice %51 {offsets = [12, 0], sizes = [1, 128], strides = [1, 1]} : vector<21x128xf32> to vector<1x128xf32>
      %273 = vector.broadcast %272 : vector<1x128xf32> to vector<128x128xf32>
      %274 = arith.mulf %67, %273 : vector<128x128xf32>
      %275 = arith.mulf %274, %208 : vector<128x128xf32>
      %276 = vector.extract_strided_slice %52 {offsets = [12, 0], sizes = [1, 128], strides = [1, 1]} : vector<21x128xf32> to vector<1x128xf32>
      %277 = vector.broadcast %276 : vector<1x128xf32> to vector<128x128xf32>
      %278 = arith.mulf %76, %277 : vector<128x128xf32>
      %279 = arith.mulf %278, %217 : vector<128x128xf32>
      %280 = arith.addf %275, %279 : vector<128x128xf32>
      %281 = vector.extract_strided_slice %51 {offsets = [13, 0], sizes = [1, 128], strides = [1, 1]} : vector<21x128xf32> to vector<1x128xf32>
      %282 = vector.broadcast %281 : vector<1x128xf32> to vector<128x128xf32>
      %283 = arith.mulf %70, %282 : vector<128x128xf32>
      %284 = arith.mulf %283, %217 : vector<128x128xf32>
      %285 = vector.extract_strided_slice %52 {offsets = [13, 0], sizes = [1, 128], strides = [1, 1]} : vector<21x128xf32> to vector<1x128xf32>
      %286 = vector.broadcast %285 : vector<1x128xf32> to vector<128x128xf32>
      %287 = arith.mulf %79, %286 : vector<128x128xf32>
      %288 = arith.mulf %287, %226 : vector<128x128xf32>
      %289 = arith.addf %284, %288 : vector<128x128xf32>
      %290 = vector.extract_strided_slice %51 {offsets = [14, 0], sizes = [1, 128], strides = [1, 1]} : vector<21x128xf32> to vector<1x128xf32>
      %291 = vector.broadcast %290 : vector<1x128xf32> to vector<128x128xf32>
      %292 = arith.mulf %73, %291 : vector<128x128xf32>
      %293 = arith.mulf %292, %226 : vector<128x128xf32>
      %294 = vector.extract_strided_slice %52 {offsets = [14, 0], sizes = [1, 128], strides = [1, 1]} : vector<21x128xf32> to vector<1x128xf32>
      %295 = vector.broadcast %294 : vector<1x128xf32> to vector<128x128xf32>
      %296 = arith.mulf %82, %295 : vector<128x128xf32>
      %297 = arith.mulf %296, %235 : vector<128x128xf32>
      %298 = arith.addf %293, %297 : vector<128x128xf32>
      %299 = vector.extract_strided_slice %51 {offsets = [15, 0], sizes = [1, 128], strides = [1, 1]} : vector<21x128xf32> to vector<1x128xf32>
      %300 = vector.broadcast %299 : vector<1x128xf32> to vector<128x128xf32>
      %301 = arith.mulf %55, %300 : vector<128x128xf32>
      %302 = arith.mulf %301, %244 : vector<128x128xf32>
      %303 = vector.extract_strided_slice %52 {offsets = [15, 0], sizes = [1, 128], strides = [1, 1]} : vector<21x128xf32> to vector<1x128xf32>
      %304 = vector.broadcast %303 : vector<1x128xf32> to vector<128x128xf32>
      %305 = arith.mulf %67, %304 : vector<128x128xf32>
      %306 = arith.mulf %305, %253 : vector<128x128xf32>
      %307 = arith.addf %302, %306 : vector<128x128xf32>
      %308 = vector.extract_strided_slice %51 {offsets = [16, 0], sizes = [1, 128], strides = [1, 1]} : vector<21x128xf32> to vector<1x128xf32>
      %309 = vector.broadcast %308 : vector<1x128xf32> to vector<128x128xf32>
      %310 = arith.mulf %58, %309 : vector<128x128xf32>
      %311 = arith.mulf %310, %253 : vector<128x128xf32>
      %312 = vector.extract_strided_slice %52 {offsets = [16, 0], sizes = [1, 128], strides = [1, 1]} : vector<21x128xf32> to vector<1x128xf32>
      %313 = vector.broadcast %312 : vector<1x128xf32> to vector<128x128xf32>
      %314 = arith.mulf %70, %313 : vector<128x128xf32>
      %315 = arith.mulf %314, %262 : vector<128x128xf32>
      %316 = arith.addf %311, %315 : vector<128x128xf32>
      %317 = vector.extract_strided_slice %51 {offsets = [17, 0], sizes = [1, 128], strides = [1, 1]} : vector<21x128xf32> to vector<1x128xf32>
      %318 = vector.broadcast %317 : vector<1x128xf32> to vector<128x128xf32>
      %319 = arith.mulf %61, %318 : vector<128x128xf32>
      %320 = arith.mulf %319, %262 : vector<128x128xf32>
      %321 = vector.extract_strided_slice %52 {offsets = [17, 0], sizes = [1, 128], strides = [1, 1]} : vector<21x128xf32> to vector<1x128xf32>
      %322 = vector.broadcast %321 : vector<1x128xf32> to vector<128x128xf32>
      %323 = arith.mulf %73, %322 : vector<128x128xf32>
      %324 = arith.mulf %323, %271 : vector<128x128xf32>
      %325 = arith.addf %320, %324 : vector<128x128xf32>
      %326 = vector.extract_strided_slice %51 {offsets = [18, 0], sizes = [1, 128], strides = [1, 1]} : vector<21x128xf32> to vector<1x128xf32>
      %327 = vector.broadcast %326 : vector<1x128xf32> to vector<128x128xf32>
      %328 = arith.mulf %64, %327 : vector<128x128xf32>
      %329 = arith.mulf %328, %271 : vector<128x128xf32>
      %330 = vector.extract_strided_slice %52 {offsets = [18, 0], sizes = [1, 128], strides = [1, 1]} : vector<21x128xf32> to vector<1x128xf32>
      %331 = vector.broadcast %330 : vector<1x128xf32> to vector<128x128xf32>
      %332 = arith.mulf %76, %331 : vector<128x128xf32>
      %333 = arith.mulf %332, %280 : vector<128x128xf32>
      %334 = arith.addf %329, %333 : vector<128x128xf32>
      %335 = vector.extract_strided_slice %51 {offsets = [19, 0], sizes = [1, 128], strides = [1, 1]} : vector<21x128xf32> to vector<1x128xf32>
      %336 = vector.broadcast %335 : vector<1x128xf32> to vector<128x128xf32>
      %337 = arith.mulf %67, %336 : vector<128x128xf32>
      %338 = arith.mulf %337, %280 : vector<128x128xf32>
      %339 = vector.extract_strided_slice %52 {offsets = [19, 0], sizes = [1, 128], strides = [1, 1]} : vector<21x128xf32> to vector<1x128xf32>
      %340 = vector.broadcast %339 : vector<1x128xf32> to vector<128x128xf32>
      %341 = arith.mulf %79, %340 : vector<128x128xf32>
      %342 = arith.mulf %341, %289 : vector<128x128xf32>
      %343 = arith.addf %338, %342 : vector<128x128xf32>
      %344 = vector.extract_strided_slice %51 {offsets = [20, 0], sizes = [1, 128], strides = [1, 1]} : vector<21x128xf32> to vector<1x128xf32>
      %345 = vector.broadcast %344 : vector<1x128xf32> to vector<128x128xf32>
      %346 = arith.mulf %70, %345 : vector<128x128xf32>
      %347 = arith.mulf %346, %289 : vector<128x128xf32>
      %348 = vector.extract_strided_slice %52 {offsets = [20, 0], sizes = [1, 128], strides = [1, 1]} : vector<21x128xf32> to vector<1x128xf32>
      %349 = vector.broadcast %348 : vector<1x128xf32> to vector<128x128xf32>
      %350 = arith.mulf %82, %349 : vector<128x128xf32>
      %351 = arith.mulf %350, %298 : vector<128x128xf32>
      %352 = arith.addf %347, %351 : vector<128x128xf32>
      %c0_32 = arith.constant 0 : index
      %c128 = arith.constant 128 : index
      %353 = vector.load %arg8[%c0_32, %c128] : memref<128x896xf32, #tpu.memory_space<vmem>>, vector<128x128xf32>
      tpu.vector_store %arg8[%c0_32, %c128], %307 {strides = array<i32>} : memref<128x896xf32, #tpu.memory_space<vmem>>, vector<128x128xf32>,
      %c0_33 = arith.constant 0 : index
      %c256 = arith.constant 256 : index
      %354 = vector.load %arg8[%c0_33, %c256] : memref<128x896xf32, #tpu.memory_space<vmem>>, vector<128x128xf32>
      tpu.vector_store %arg8[%c0_33, %c256], %316 {strides = array<i32>} : memref<128x896xf32, #tpu.memory_space<vmem>>, vector<128x128xf32>,
      %c0_34 = arith.constant 0 : index
      %c384 = arith.constant 384 : index
      %355 = vector.load %arg8[%c0_34, %c384] : memref<128x896xf32, #tpu.memory_space<vmem>>, vector<128x128xf32>
      tpu.vector_store %arg8[%c0_34, %c384], %325 {strides = array<i32>} : memref<128x896xf32, #tpu.memory_space<vmem>>, vector<128x128xf32>,
      %c0_35 = arith.constant 0 : index
      %c512 = arith.constant 512 : index
      %356 = vector.load %arg8[%c0_35, %c512] : memref<128x896xf32, #tpu.memory_space<vmem>>, vector<128x128xf32>
      tpu.vector_store %arg8[%c0_35, %c512], %334 {strides = array<i32>} : memref<128x896xf32, #tpu.memory_space<vmem>>, vector<128x128xf32>,
      %c0_36 = arith.constant 0 : index
      %c640 = arith.constant 640 : index
      %357 = vector.load %arg8[%c0_36, %c640] : memref<128x896xf32, #tpu.memory_space<vmem>>, vector<128x128xf32>
      tpu.vector_store %arg8[%c0_36, %c640], %343 {strides = array<i32>} : memref<128x896xf32, #tpu.memory_space<vmem>>, vector<128x128xf32>,
      %c0_37 = arith.constant 0 : index
      %c768 = arith.constant 768 : index
      %358 = vector.load %arg8[%c0_37, %c768] : memref<128x896xf32, #tpu.memory_space<vmem>>, vector<128x128xf32>
      tpu.vector_store %arg8[%c0_37, %c768], %352 {strides = array<i32>} : memref<128x896xf32, #tpu.memory_space<vmem>>, vector<128x128xf32>,
    } else {
    }
    %c0 = arith.constant 0 : index
    %c0_1 = arith.constant 0 : index
    %3 = vector.load %arg8[%c0, %c0_1] : memref<128x896xf32, #tpu.memory_space<vmem>>, vector<128x896xf32>
    %c0_2 = arith.constant 0 : index
    %c0_3 = arith.constant 0 : index
    %4 = vector.load %arg6[%c0_2, %c0_3] : memref<896x128xf32, #tpu.memory_space<vmem>>, vector<896x128xf32>
    %cst = arith.constant dense<0.000000e+00> : vector<128x128xf32>
    %5 = tpu.matmul %3, %4, %cst {dimension_numbers = #tpu.dot_dimension_numbers<[1], [0], [0], [1], [0, 0, 1, 1], [], []>} : vector<128x896xf32>, vector<896x128xf32>, vector<128x128xf32> -> vector<128x128xf32>
    %c0_4 = arith.constant 0 : index
    %c0_5 = arith.constant 0 : index
    %6 = vector.load %arg7[%c0_4, %c0_5] : memref<128x128xf32, #tpu.memory_space<vmem>>, vector<128x128xf32>
    tpu.vector_store %arg7[%c0_4, %c0_5], %5 {strides = array<i32>} : memref<128x128xf32, #tpu.memory_space<vmem>>, vector<128x128xf32>,
    return
  }
  func.func @transform_0(%arg0: i32, %arg1: i32) -> (i32, i32) {
    %c0_i32 = arith.constant 0 : i32
    %c0_i32_0 = arith.constant 0 : i32
    return %arg0, %c0_i32 : i32, i32
  }
  func.func @transform_1(%arg0: i32, %arg1: i32) -> (i32, i32) {
    %c0_i32 = arith.constant 0 : i32
    %c0_i32_0 = arith.constant 0 : i32
    %c0_i32_1 = arith.constant 0 : i32
    return %c0_i32, %c0_i32_0 : i32, i32
  }
  func.func @transform_2(%arg0: i32, %arg1: i32) -> (i32, i32) {
    %c0_i32 = arith.constant 0 : i32
    %c0_i32_0 = arith.constant 0 : i32
    %c0_i32_1 = arith.constant 0 : i32
    return %c0_i32, %c0_i32_0 : i32, i32
  }
  func.func @transform_3(%arg0: i32, %arg1: i32) -> (i32, i32) {
    %c0_i32 = arith.constant 0 : i32
    %c0_i32_0 = arith.constant 0 : i32
    %c0_i32_1 = arith.constant 0 : i32
    return %c0_i32, %c0_i32_0 : i32, i32
  }
  func.func @transform_4(%arg0: i32, %arg1: i32) -> (i32, i32) {
    %c0_i32 = arith.constant 0 : i32
    %c0_i32_0 = arith.constant 0 : i32
    return %c0_i32, %arg1 : i32, i32
  }
  func.func @transform_5(%arg0: i32, %arg1: i32) -> (i32, i32) {
    %c0_i32 = arith.constant 0 : i32
    return %arg0, %arg1 : i32, i32
  }
}

</mosaic_0001>

<bundles_post_ra>
// kernel: tpu_custom_call.1
= control target key start
LH: loop header
LB: loop body
LE: loop exit
PB: predicated region body
PF: predicated region fallthrough
CT: control target
= control target key end

     0   :  { %s10390_s0 = inlined_call_operand.hbm [shape: f32[256,128], index: 0, kind: input, shape index: {}]   ;;  %s10391_s1 = inlined_call_operand.hbm [shape: f32[10,128], index: 1, kind: input, shape index: {}]   ;;  %s10392_s2 = inlined_call_operand.hbm [shape: f32[21,128], index: 2, kind: input, shape index: {}]   ;;  %s10393_s3 = inlined_call_operand.hbm [shape: f32[21,128], index: 3, kind: input, shape index: {}]   ;;  %s10394_s4 = inlined_call_operand.hbm [shape: f32[896,256], index: 4, kind: input, shape index: {}]   ;;  %s10395_s5 = inlined_call_operand.hbm [shape: f32[256,256], index: 5, kind: output, shape index: {}]  }
   0x1   :  { %10818 = sst [smem:[#allocation164_spill]] %s10391_s1 }
   0x2   :  { %10819 = sst [smem:[#allocation165_spill]] %s10395_s5 }
   0x3   :  { %10 = vsyncpa [#allocation4], 0 }
   0x4   :  { %12 = vsyncpa [#allocation4 + $0x1], 0 }
   0x5   :  { %13 = vsyncpa [#allocation7], 0 }
   0x6   :  { %14 = vsyncpa [#allocation10], 0 }
   0x7   :  { %15 = vsyncpa [#allocation5], 0 }
   0x8   :  { %17 = vsyncpa [#allocation5 + $0x1], 0  ;;  %s5795_s18 = smov 0   ;;  %s5797_s19 = smov 0  }
   0x9   :  { %s5799_s20 = smov 0   ;;  %s5801_s21 = smov 0  }
   0xa   :  { %s5803_s22 = smov 0   ;;  %s5805_s23 = smov 0  }
   0xb   :  { %s5807_s24 = smov 0   ;;  %s5809_s25 = smov 0  }
   0xc   :  { %s5811_s26 = smov 0   ;;  %s5813_s27 = smov 0  }
   0xd   :  { %s5815_s28 = smov 0   ;;  %s5817_s29 = smov 0  }
   0xe   :  { %s5819_s30 = smov 0   ;;  %s5821_s6 = smov 0  }
   0xf LB: > { %10820 = sst [smem:[#allocation18_spill]] %s5697_s18  ;;  %s5862_s7 = sadd.s32 4294967295, %s5749_s6   ;;  %s5749_s6 = sphi %s5821_s6, %s23_s6   ;;  %s5745_s30 = sphi %s5819_s30, %s11584_s30   ;;  %s5741_s29 = sphi %s5817_s29, %s11583_s29   ;;  %s5737_s28 = sphi %s5815_s28, %s11582_s28   ;;  %s5733_s27 = sphi %s5813_s27, %s11581_s27   ;;  %s5729_s26 = sphi %s5811_s26, %s11580_s26   ;;  %s5725_s25 = sphi %s5809_s25, %s11579_s25   ;;  %s5721_s24 = sphi %s5807_s24, %s11572_s24   ;;  %s5717_s23 = sphi %s5805_s23, %s11578_s23   ;;  %s5713_s22 = sphi %s5803_s22, %s11577_s22   ;;  %s5709_s21 = sphi %s5801_s21, %s11570_s21   ;;  %s5705_s20 = sphi %s5799_s20, %s11576_s20   ;;  %s5701_s19 = sphi %s5797_s19, %s11575_s19   ;;  %s5697_s18 = sphi %s5795_s18, %s11569_s18  }
  0x10   : > { %10821 = sst [smem:[#allocation19_spill]] %s5701_s19  ;;  %s4651_s8 = sadd.s32 4294967294, %s5749_s6  }
  0x11   : > { %10822 = sst [smem:[#allocation20_spill]] %s5713_s22  ;;  %p55_p0 = scmp.ne.s32.totalorder %s5725_s25, %s5721_s24 }
  0x12   : > { %10823 = sst [smem:[#allocation21_spill]] %s5725_s25  ;;  %p10416_p1 = scmp.eq.s32.totalorder %s5862_s7, 0 }
  0x13   : > { %10824 = sst [smem:[#allocation22_spill]] %s5733_s27  ;;  %p144_p3 = scmp.ne.s32.totalorder %s5713_s22, %s5709_s21 }
  0x14   : > { %10825 = sst [smem:[#allocation23_spill]] %s5737_s28  ;;  %p5872_p4 = por %p10416_p1, %p55_p0 }
  0x15   : > { %p169_p5 = scmp.ne.s32.totalorder %s5705_s20, %s5701_s19  ;;  %p5880_p6 = por %p144_p3, %p10416_p1 }
  0x16   : > { %s10826_s9 = scalar_select %p5872_p4, 1, 0 }
  0x17   : > { %s10828_s10 = scalar_select %p5880_p6, 1, 0 }
  0x18   : > { %10827 = sst [smem:[#allocation24_spill]] %s10826_s9  ;;  %p170_p7 = scmp.eq.s32.totalorder %s5862_s7, 3 }
  0x19   : > { %10829 = sst [smem:[#allocation25_spill]] %s10828_s10  ;;  %p175_p8 = scmp.ne.s32.totalorder %s5701_s19, %s5697_s18 }
  0x1a   : > { %p176_p9 = scmp.eq.s32.totalorder %s4651_s8, 3  ;;  %p5887_p10 = por %p170_p7, %p169_p5 }
  0x1b   : > { %p4652_p11 = scmp.ge.s32.totalorder %s5749_s6, 1  ;;  %p183_p13 = scmp.lt.s32.totalorder %s5749_s6, 5 }
  0x1c   : > { %s10830_s11 = scalar_select %p5887_p10, 1, 0 }
  0x1d   : > { %p5892_p12 = por %p176_p9, %p175_p8  ;;  %p5897_p0 = pnand %p4652_p11, %p183_p13 }
  0x1e   : > { %10831 = sst [smem:[#allocation26_spill]] %s10830_s11  ;;  %s5751_s14 = smov [#allocation6]  }
  0x1f   : > { %s10832_s12 = scalar_select %p5892_p12, 1, 0 }
  0x20   : > { %s195_s15 = sshll.u32 %s5751_s14, 4  ;;  %p5168_p3 = pneg %p5897_p0  ;;  %s196_s15 = int_to_ptr.vmem [resolvable:$true] %s195_s15 }
  0x21   : > { %10833 = sst [smem:[#allocation27_spill]] %s10832_s12  ;;  %s5470_s17 = scalar_lea.vmem %s196_s15, 256 }
  0x22   : > { %p5905_p5 = pnand %p5168_p3, %p10416_p1  ;;  %p5471_p8 = scmp.ne.s32.totalorder %s196_s15, %s5470_s17 }
  0x23   : > { %p5478_p13 = scmp.lt.s32.totalorder %s196_s15, %s196_s15  ;;  %p5479_p2 = scmp.lt.s32.totalorder %s5470_s17, %s5470_s17 }
  0x24   : > { %p10417_p7 = pneg %p5905_p5 }
  0x25   : > { %p5480_p12 = por %p5479_p2, %p5478_p13 }
  0x26   : > { %p5473_p9 = pnand %p5471_p8, %p10417_p7 }
  0x28   : > { %p5474_p11 = pneg %p5473_p9 }
  0x2a   : > { %p5481_p10 = pnand %p5480_p12, %p5474_p11 }
  0x2c   : > { %5484 = shalt.err (!%p5481_p10)
}
  0x2d   : > { %s10399_s21 = smov 128   ;;  %s10401_s24 = smov 8  }
  0x2e   : > { %s10836_s1 = sld [smem:[#allocation164_spill]]  ;;  %s32_s17 = sadd.s32 1, %s5741_s29 }
  0x2f   : > { %p33_p2 = scmp.ge.s32.totalorder %s32_s17, 2  ;;  %s35_s12 = sadd.s32 1, %s5745_s30 }
  0x30   : > { %s42_s18 = sadd.s32 1, %s5729_s26  ;;  %p49_p10 = scmp.ne.s32.totalorder %s5729_s26, %s5725_s25 }
  0x31   : > { %s11586_s17 = smov (%p33_p2, %s32_s17), 0  ;;  %s11588_s12 = smov (!%p33_p2, %s35_s12), %s5745_s30 }
  0x32   : > { %10837 = sst [smem:[#allocation28_spill]] %s11586_s17  ;;  %p50_p12 = scmp.eq.s32.totalorder %s5749_s6, 0 }
  0x33   : > { %s128_s8 = ssub.s32 %s5741_s29, %s11586_s17  ;;  %p37_p3 = scmp.ge.s32.totalorder %s11588_s12, 2 }
  0x34   : > { %5171 = dma.hbm_to_vmem [thread:$0]  (!%p5905_p5), %s10836_s1, 256, %s196_s15, [#allocation7], %s10399_s21, %s10399_s21, %s10401_s24  }
  0x35   : > { %p129_p8 = scmp.eq.s32.totalorder %s128_s8, 0  ;;  %p5933_p9 = por %p50_p12, %p49_p10 }
  0x36   : > { %s131_s14 = sadd.s32 1, %s5717_s23  ;;  %s11590_s12 = smov (%p37_p3, %s11588_s12), 0 }
  0x37   : > { %10839 = sst [smem:[#allocation29_spill]] %s11590_s12  ;;  %s39_s24 = ssub.s32 %s5745_s30, %s11590_s12 }
  0x38   : > { %s5941_s21 = scalar_select %p129_p8, %s5717_s23, %s131_s14  }
  0x39   : > { %p10841_p11 = scmp.ne.s32.totalorder %s5717_s23, %s5713_s22  ;;  %p40_p2 = scmp.eq.s32.totalorder %s39_s24, 0 }
  0x3a   : > { %10840 = sst [smem:[#allocation30_spill]] %s5941_s21  ;;  %s156_s17 = sor.u32 %s128_s8, %s39_s24 }
  0x3b   : > { %p5948_p13 = por %p10841_p11, %p50_p12  ;;  %p157_p10 = scmp.eq.s32.totalorder %s156_s17, 0 }
  0x3c   : > { %s159_s5 = sadd.s32 1, %s5705_s20  ;;  %p5192_p3 = scmp.lt.s32.totalorder %s5749_s6, 4 }
  0x3d   : > { %s5954_s11 = scalar_select %p40_p2, %s5729_s26, %s42_s18  }
  0x3e   : > { %s5957_s28 = scalar_select %p157_p10, %s5705_s20, %s159_s5  }
  0x3f   : > { %s235_s27 = sand.u32 1, %s5749_s6   ;;  %s237_s14 = sand.u32 1, %s5729_s26  }
  0x40   : > { %s4657_s21 = sshll.u32 %s237_s14, 7  ;;  %s4818_s12 = sshll.u32 %s5745_s30, 11 }
  0x41   : > { %s245_s22 = scalar_lea.hbm %s10390_s0, %s4818_s12  ;;  %s239_s9 = scalar_lea.vmem [#allocation3], %s4657_s21 }
  0x42   : > { %s246_s25 = sshll.u32 %s239_s9, 4  ;;  %p5968_p12 = pnand %p5192_p3, %p5933_p9  ;;  %s247_s25 = int_to_ptr.vmem [resolvable:$true] %s246_s25 }
  0x43   : > { %p5974_p8 = pnand %p5192_p3, %p5948_p13  ;;  %s5978_s18 = scalar_lea.sflag [#allocation4], %s235_s27 }
  0x44   : > { %p5487_p11 = pneg %p5968_p12  ;;  %s5498_s19 = scalar_lea.vmem %s247_s25, 2048 }
  0x45   : > { %p5499_p2 = scmp.ne.s32.totalorder %s247_s25, %s5498_s19  ;;  %s5754_s9 = smov [#allocation3]  }
  0x46   : > { %s5503_s10 = sshll.u32 %s5754_s9, 4  ;;  %s5504_s10 = int_to_ptr.vmem [resolvable:$false] %s5503_s10 }
  0x47   : > { %p5501_p10 = pnand %p5499_p2, %p5487_p11  ;;  %s5505_s12 = scalar_lea.vmem %s5504_s10, 4096 }
  0x48   : > { %p5506_p9 = scmp.lt.s32.totalorder %s247_s25, %s5504_s10  ;;  %p5507_p7 = scmp.lt.s32.totalorder %s5505_s12, %s5498_s19 }
  0x49   : > { %p5502_p1 = pneg %p5501_p10 }
  0x4a   : > { %p5508_p6 = por %p5507_p7, %p5506_p9 }
  0x4c   : > { %p5509_p4 = pnand %p5508_p6, %p5502_p1 }
  0x4e   : > { %5512 = shalt.err (!%p5509_p4)
}
  0x4f   : > { %s10845_s1 = smov 8   ;;  %s10846_s27 = smov 128  }
  0x50   : > { %5181 = dma.hbm_to_vmem [thread:$0]  (!%p5968_p12), %s245_s22, 2048, %s247_s25, %s5978_s18, %s10846_s27, %s10846_s27, %s10845_s1  }
  0x51   : > { %s5755_s21 = smov [#allocation8]   ;;  %p10847_p3 = pneg %p5905_p5 }
  0x52   : > { %s208_s17 = sshll.u32 %s5755_s21, 4  ;;  %s209_s17 = int_to_ptr.vmem [resolvable:$true] %s208_s17 }
  0x53   : > { %s5524_s8 = scalar_lea.vmem %s209_s17, 384  ;;  %p5532_p7 = scmp.lt.s32.totalorder %s209_s17, %s209_s17 }
  0x54   : > { %p5525_p13 = scmp.ne.s32.totalorder %s209_s17, %s5524_s8  ;;  %p5533_p1 = scmp.lt.s32.totalorder %s5524_s8, %s5524_s8 }
  0x56   : > { %p5527_p11 = pnand %p5525_p13, %p10847_p3  ;;  %p5534_p4 = por %p5533_p1, %p5532_p7 }
  0x58   : > { %p5528_p2 = pneg %p5527_p11 }
  0x5a   : > { %p5535_p6 = pnand %p5534_p4, %p5528_p2 }
  0x5c   : > { %5538 = shalt.err (!%p5535_p6)
}
  0x5d   : > { %5174 = dma.hbm_to_vmem [thread:$0]  (!%p5905_p5), %s10392_s2, 384, %s209_s17, [#allocation7], %s10846_s27, %s10846_s27, %s10845_s1  }
  0x5e   : > { %s5756_s15 = smov [#allocation9]   ;;  %s258_s24 = sand.u32 1, %s5717_s23  }
  0x5f   : > { %s221_s14 = sshll.u32 %s5756_s15, 4  ;;  %s5148_s19 = smul.u32 896, %s258_s24  ;;  %s222_s14 = int_to_ptr.vmem [resolvable:$true] %s221_s14 }
  0x60   : > { %s5550_s9 = scalar_lea.vmem %s222_s14, 384  ;;  %p10848_p10 = pmov %p10847_p3 }
  0x61   : > { %p5551_p12 = scmp.ne.s32.totalorder %s222_s14, %s5550_s9  ;;  %p5558_p3 = scmp.lt.s32.totalorder %s222_s14, %s222_s14 }
  0x62   : > { %p5559_p11 = scmp.lt.s32.totalorder %s5550_s9, %s5550_s9 }
  0x63   : > { %p5553_p9 = pnand %p5551_p12, %p10848_p10 }
  0x64   : > { %p5560_p2 = por %p5559_p11, %p5558_p3 }
  0x65   : > { %p5554_p13 = pneg %p5553_p9 }
  0x67   : > { %p5561_p7 = pnand %p5560_p2, %p5554_p13 }
  0x69   : > { %5564 = shalt.err (!%p5561_p7)
}
  0x6a   : > { %5177 = dma.hbm_to_vmem [thread:$0]  (!%p5905_p5), %s10393_s3, 384, %s222_s14, [#allocation10], %s10846_s27, %s10846_s27, %s10845_s1  }
  0x6b   : > { %s4660_s21 = sshll.u32 %s5741_s29, 7  ;;  %s260_s25 = scalar_lea.vmem [#allocation11], %s5148_s19 }
  0x6c   : > { %s265_s22 = scalar_lea.hbm %s10394_s4, %s4660_s21  ;;  %s266_s15 = sshll.u32 %s260_s25, 4  ;;  %s267_s15 = int_to_ptr.vmem [resolvable:$true] %s266_s15 }
  0x6d   : > { %p5567_p1 = pneg %p5974_p8  ;;  %s5578_s16 = scalar_lea.vmem %s267_s15, 14336 }
  0x6e   : > { %p5579_p4 = scmp.ne.s32.totalorder %s267_s15, %s5578_s16  ;;  %s5757_s24 = smov [#allocation11]  }
  0x6f   : > { %s5583_s9 = sshll.u32 %s5757_s24, 4  ;;  %s5584_s9 = int_to_ptr.vmem [resolvable:$false] %s5583_s9 }
  0x70   : > { %p5581_p6 = pnand %p5579_p4, %p5567_p1  ;;  %s5585_s10 = scalar_lea.vmem %s5584_s9, 28672 }
  0x71   : > { %p5586_p10 = scmp.lt.s32.totalorder %s267_s15, %s5584_s9  ;;  %p5587_p5 = scmp.lt.s32.totalorder %s5585_s10, %s5578_s16 }
  0x72   : > { %p5582_p12 = pneg %p5581_p6 }
  0x73   : > { %p5588_p9 = por %p5587_p5, %p5586_p10 }
  0x75   : > { %p5589_p13 = pnand %p5588_p9, %p5582_p12 }
  0x77   : > { %5592 = shalt.err (!%p5589_p13)
}
  0x78   : > { %s5758_s14 = smov 256   ;;  %278 = sbr.rel (%p5897_p0) target bundleno = 1259 (0x4eb), region = 40 }
  0x79   : > { %5184 = dma.hbm_to_vmem [thread:$0]  (!%p5974_p8), %s265_s22, 14336, %s267_s15, %s5978_s18, %s5758_s14, %s10846_s27, %s10845_s1  }
  0x7d   : > { %s10849_s19 = sld [smem:[#allocation21_spill]]  ;;  %s280_s21 = sand.u32 1, %s5862_s7  }
  0x7e   : > { %s10850_s12 = sld [smem:[#allocation24_spill]]  ;;  %s281_s25 = scalar_lea.sflag [#allocation4], %s280_s21 }
  0x83   : > { %s282_s17 = sand.u32 1, %s10849_s19  }
  0x84   : > { %s4662_s8 = sshll.u32 %s282_s17, 7  ;;  %p10851_p3 = scmp.ne.s32.totalorder %s10850_s12, 0 }
  0x85   : > { %s6026_s16 = scalar_lea.vmem [#allocation3], %s4662_s8 }
  0x86   : > { %5676 = dma.done.wait (%p10851_p3), %s281_s25, 2048  }
  0x87   : > { %5678 = vsyncadd (%p10851_p3), %s281_s25, 4294965248  ;;  %p10852_p11 = scmp.eq.s32.totalorder %s5862_s7, 0 }
  0x89   : > { %5680 = dma.done.wait (%p10852_p11), [#allocation7], 640   ;;  %p10853_p8 = pmov %p10852_p11 }
  0x8b   : > { %5682 = vsyncadd (%p10853_p8), [#allocation7], 4294966656  ;;  %p10854_p0 = pmov %p10853_p8 }
  0x8d   : > { %5684 = dma.done.wait (%p10854_p0), [#allocation10], 384   ;;  %p10855_p2 = pmov %p10854_p0 }
  0x8e   : > { %s10856_s13 = sld [smem:[#allocation20_spill]] }
  0x8f   : > { %5686 = vsyncadd (%p10855_p2), [#allocation10], 4294966912  ;;  %s10857_s5 = sld [smem:[#allocation25_spill]] }
  0x94   : > { %s303_s18 = sand.u32 1, %s10856_s13  }
  0x95   : > { %s5149_s1 = smul.u32 896, %s303_s18  ;;  %p10858_p7 = scmp.ne.s32.totalorder %s10857_s5, 0 }
  0x97   : > { %s6041_s27 = scalar_lea.vmem [#allocation11], %s5149_s1 }
  0x98   : > { %5688 = dma.done.wait (%p10858_p7), %s281_s25, 14336  }
  0x99   : > { %5690 = vsyncadd (%p10858_p7), %s281_s25, 4294952960  ;;  %s10859_s22 = sld [smem:[#allocation19_spill]] }
  0x9a   : > { %s10860_s7 = sld [smem:[#allocation22_spill]] }
  0x9f   : > { %s334_s15 = sand.u32 1, %s10859_s22  }
  0xa0   : > { %s4666_s24 = sshll.u32 %s334_s15, 7  ;;  %p4667_p1 = scmp.ne.s32.totalorder %s10860_s7, 0 }
  0xa1   : > { %s6050_s9 = scalar_lea.vmem [#allocation12], %s4666_s24 }
  0xa2   : > { %342 = sbr.rel (%p4667_p1) target bundleno = 883 (0x373), region = 64 }
  0xa7   : > { %v6054_v0 = vld [vmem:[%s6026_s16] sm:$0xff]  ;;  %v344_v1 = vld [vmem:[%s6026_s16 + $0x8] sm:$0xff]  ;;  %v345_v2 = vld [vmem:[%s6026_s16 + $0x10] sm:$0xff]  ;;  %v815_v8 = vlaneseq  ;;  %v5759_v24 = vmov -1.0  }
  0xa8   : > { %v375_v3 = vmul.f32 0.70710677, %v6054_v0  ;;  %v376_v4 = vmul.f32 0.70710677, %v344_v1  ;;  %v377_v5 = vmul.f32 0.70710677, %v345_v2 }
  0xa9   : > { %v6060_v9 = vmul.f32 0.5, %v6054_v0  ;;  %v6062_v10 = vmul.f32 0.5, %v344_v1  ;;  %v346_v12 = vld [vmem:[%s6026_s16 + $0x18] sm:$0xff]  ;;  %v347_v19 = vld [vmem:[%s6026_s16 + $0x20] sm:$0xff]  ;;  %v6070_v26 = vmul.f32 0.5, %v345_v2  ;;  %v348_v35 = vld [vmem:[%s6026_s16 + $0x28] sm:$0xff] }
  0xaa   : > { %v423_v6 = vand.u32 2147483647, %v375_v3  ;;  %v424_v7 = vand.u32 2147483647, %v376_v4  ;;  %vm391_vm0 = vcmp.ge.f32.partialorder %v375_v3, 0.0  ;;  %vm392_vm1 = vcmp.ge.f32.partialorder %v376_v4, 0.0 }
  0xab   : > { %v425_v11 = vand.u32 2147483647, %v377_v5  ;;  %vm393_vm2 = vcmp.ge.f32.partialorder %v377_v5, 0.0  ;;  %v6068_v25 = vsel %vm391_vm0, 1.0, %v5759_v24  ;;  %v378_v28 = vmul.f32 0.70710677, %v346_v12 }
  0xac   : > { %v439_v13 = vmul.f32 0.3275911, %v423_v6  ;;  %v647_v14 = vsub.f32 0.0, %v423_v6  ;;  %v440_v15 = vmul.f32 0.3275911, %v424_v7  ;;  %v648_v16 = vsub.f32 0.0, %v424_v7 }
  0xad   : > { %v441_v17 = vmul.f32 0.3275911, %v425_v11  ;;  %v649_v18 = vsub.f32 0.0, %v425_v11  ;;  %v379_v31 = vmul.f32 0.70710677, %v347_v19  ;;  %v6074_v32 = vsel %vm392_vm1, 1.0, %v5759_v24 }
  0xae   : > { %v455_v20 = vadd.f32 1.0, %v439_v13  ;;  %v663_v21 = vmul.f32 %v647_v14, %v423_v6  ;;  %v456_v22 = vadd.f32 1.0, %v440_v15  ;;  %v664_v23 = vmul.f32 %v648_v16, %v424_v7  ;;  %v349_v43 = vld [vmem:[%s6026_s16 + $0x30] sm:$0xff]  ;;  %v350_v55 = vld [vmem:[%s6026_s16 + $0x38] sm:$0xff]  ;;  %v351_v63 = vld [vmem:[%s6026_s16 + $0x40] sm:$0xff] }
  0xaf   : > { %v665_v27 = vmul.f32 %v649_v18, %v425_v11  ;;  %v457_v30 = vadd.f32 1.0, %v441_v17  ;;  %v6078_v33 = vsel %vm393_vm2, 1.0, %v5759_v24  ;;  %v426_v34 = vand.u32 2147483647, %v378_v28 }
  0xb0   : > { %5320 = vrcp.f32 %v455_v20  ;;  %v679_v29 = vmul.f32 1.442695, %v663_v21  ;;  %v681_v36 = vmul.f32 1.442695, %v664_v23  ;;  %v6081_v37 = vmul.f32 0.5, %v346_v12 }
  0xb1   : > { %5322 = vrcp.f32 %v456_v22  ;;  %v6083_v38 = vmul.f32 0.5, %v347_v19  ;;  %v427_v39 = vand.u32 2147483647, %v379_v31  ;;  %v683_v40 = vmul.f32 1.442695, %v665_v27 }
  0xb2   : > { %5324 = vpow2.f32 %v679_v29  ;;  %v442_v41 = vmul.f32 0.3275911, %v426_v34  ;;  %v650_v42 = vsub.f32 0.0, %v426_v34  ;;  %vm394_vm3 = vcmp.ge.f32.partialorder %v378_v28, 0.0 }
  0xb3   : > { %5326 = vrcp.f32 %v457_v30  ;;  %v443_v44 = vmul.f32 0.3275911, %v427_v39  ;;  %v651_v45 = vsub.f32 0.0, %v427_v39  ;;  %vm395_vm4 = vcmp.ge.f32.partialorder %v379_v31, 0.0  ;;  %v352_v30 = vld [vmem:[%s6026_s16 + $0x48] sm:$0xff] }
  0xb4   : > { %v458_v46 = vadd.f32 1.0, %v442_v41  ;;  %v666_v47 = vmul.f32 %v650_v42, %v426_v34  ;;  %v380_v48 = vmul.f32 0.70710677, %v348_v35  ;;  %5328 = vpow2.f32 %v681_v36 }
  0xb5   : > { %v459_v49 = vadd.f32 1.0, %v443_v44  ;;  %v667_v50 = vmul.f32 %v651_v45, %v427_v39  ;;  %v381_v51 = vmul.f32 0.70710677, %v349_v43  ;;  %v6087_v52 = vsel %vm394_vm3, 1.0, %v5759_v24 }
  0xb6   : > { %5330 = vrcp.f32 %v458_v46  ;;  %v685_v53 = vmul.f32 1.442695, %v666_v47  ;;  %v428_v54 = vand.u32 2147483647, %v380_v48  ;;  %v6091_v56 = vsel %vm395_vm4, 1.0, %v5759_v24 }
  0xb7   : > { %5332 = vrcp.f32 %v459_v49  ;;  %v687_v57 = vmul.f32 1.442695, %v667_v50  ;;  %vm396_vm5 = vcmp.ge.f32.partialorder %v380_v48, 0.0  ;;  %v6093_v58 = vmul.f32 0.5, %v348_v35 }
  0xb8   : > { %5334 = vpow2.f32 %v683_v40  ;;  %v444_v59 = vmul.f32 0.3275911, %v428_v54  ;;  %v652_v60 = vsub.f32 0.0, %v428_v54  ;;  %vm397_vm6 = vcmp.ge.f32.partialorder %v381_v51, 0.0 }
  0xb9   : > { %5336 = vpow2.f32 %v685_v53  ;;  %v429_v61 = vand.u32 2147483647, %v381_v51  ;;  %v382_v62 = vmul.f32 0.70710677, %v350_v55  ;;  %v6097_v1 = vsel %vm396_vm5, 1.0, %v5759_v24 }
  0xba   : > { %5338 = vpow2.f32 %v687_v57  ;;  %v460_v2 = vadd.f32 1.0, %v444_v59  ;;  %v6099_v3 = vmul.f32 0.5, %v349_v43  ;;  %v668_v4 = vmul.f32 %v652_v60, %v428_v54 }
  0xbb   : > { %v445_v5 = vmul.f32 0.3275911, %v429_v61  ;;  %v653_v6 = vsub.f32 0.0, %v429_v61  ;;  %v430_v7 = vand.u32 2147483647, %v382_v62  ;;  %v6104_v12 = vsel %vm397_vm6, 1.0, %v5759_v24 }
  0xbc   : > { %5340 = vrcp.f32 %v460_v2  ;;  %vm398_vm7 = vcmp.ge.f32.partialorder %v382_v62, 0.0  ;;  %v383_v13 = vmul.f32 0.70710677, %v351_v63  ;;  %v6110_v20 = vmul.f32 0.5, %v350_v55 }
  0xbd   : > { %v6101_v11 = vpop.eup %5320  ;;  %v461_v16 = vadd.f32 1.0, %v445_v5  ;;  %v669_v17 = vmul.f32 %v653_v6, %v429_v61  ;;  %v446_v18 = vmul.f32 0.3275911, %v430_v7  ;;  %v654_v21 = vsub.f32 0.0, %v430_v7 }
  0xbe   : > { %v6106_v14 = vpop.eup %5322  ;;  %v503_v15 = vmul.f32 1.0614054, %v6101_v11  ;;  %v6112_v22 = vmul.f32 0.5, %v351_v63  ;;  %v689_v28 = vmul.f32 1.442695, %v668_v4  ;;  %v6121_v35 = vsel %vm398_vm7, 1.0, %v5759_v24 }
  0xbf   : > { %v504_v19 = vmul.f32 1.0614054, %v6106_v14  ;;  %v6114_v23 = vpop.eup %5324  ;;  %5342 = vrcp.f32 %v461_v16  ;;  %v462_v29 = vadd.f32 1.0, %v446_v18  ;;  %vm399_vm8 = vcmp.ge.f32.partialorder %v383_v13, 0.0 }
  0xc0   : > { %v519_v27 = vadd.f32 -1.4531521, %v503_v15  ;;  %v6117_v31 = vpop.eup %5326  ;;  %v431_v36 = vand.u32 2147483647, %v383_v13  ;;  %v691_v41 = vmul.f32 1.442695, %v669_v17  ;;  %v670_v42 = vmul.f32 %v654_v21, %v430_v7 }
  0xc1   : > { %v520_v34 = vadd.f32 -1.4531521, %v504_v19  ;;  %v505_v40 = vmul.f32 1.0614054, %v6117_v31  ;;  %v6125_v43 = vpop.eup %5328  ;;  %5344 = vrcp.f32 %v462_v29  ;;  %v6128_v46 = vmul.f32 0.70710677, %v352_v30 }
  0xc2   : > { %v535_v39 = vmul.f32 %v6101_v11, %v519_v27  ;;  %v447_v45 = vmul.f32 0.3275911, %v431_v36  ;;  %5346 = vpow2.f32 %v689_v28  ;;  %v655_v50 = vsub.f32 0.0, %v431_v36 }
  0xc3   : > { %v536_v44 = vmul.f32 %v6106_v14, %v520_v34  ;;  %v6130_v47 = vpop.eup %5330  ;;  %v521_v49 = vadd.f32 -1.4531521, %v505_v40  ;;  %v6137_v55 = vsel %vm399_vm8, 1.0, %v5759_v24  ;;  %v693_v6 = vmul.f32 1.442695, %v670_v42 }
  0xc4   : > { %v551_v48 = vadd.f32 1.4214138, %v535_v39  ;;  %v6132_v51 = vpop.eup %5332  ;;  %v506_v54 = vmul.f32 1.0614054, %v6130_v47  ;;  %v463_v57 = vadd.f32 1.0, %v447_v45  ;;  %v671_v63 = vmul.f32 %v655_v50, %v431_v36 }
  0xc5   : > { %v552_v53 = vadd.f32 1.4214138, %v536_v44  ;;  %v6139_v59 = vpop.eup %5334  ;;  %v537_v61 = vmul.f32 %v6117_v31, %v521_v49  ;;  %v507_v62 = vmul.f32 1.0614054, %v6132_v51  ;;  %v6147_v7 = vmul.f32 0.5, %v352_v30 }
  0xc6   : > { %v567_v60 = vmul.f32 %v6101_v11, %v551_v48  ;;  %v6144_v2 = vpop.eup %5336  ;;  %v522_v5 = vadd.f32 -1.4531521, %v506_v54  ;;  %5348 = vpow2.f32 %v691_v41  ;;  %v695_v21 = vmul.f32 1.442695, %v671_v63 }
  0xc7   : > { %v568_v4 = vmul.f32 %v6106_v14, %v552_v53  ;;  %v6149_v13 = vpop.eup %5338  ;;  %v553_v16 = vadd.f32 1.4214138, %v537_v61  ;;  %v523_v17 = vadd.f32 -1.4531521, %v507_v62  ;;  %v6153_v27 = vand.u32 2147483647, %v6128_v46 }
  0xc8   : > { %v583_v15 = vadd.f32 -0.28449672, %v567_v60  ;;  %v538_v19 = vmul.f32 %v6130_v47, %v522_v5  ;;  %5350 = vrcp.f32 %v463_v57  ;;  %vm400_vm9 = vcmp.ge.f32.partialorder %v6128_v46, 0.0 }
  0xc9   : > { %v584_v18 = vadd.f32 -0.28449672, %v568_v4  ;;  %v6155_v28 = vpop.eup %5340  ;;  %v569_v30 = vmul.f32 %v6117_v31, %v553_v16  ;;  %v539_v34 = vmul.f32 %v6132_v51, %v523_v17  ;;  %5352 = vpow2.f32 %v693_v6 }
  0xca   : > { %v599_v29 = vmul.f32 %v6101_v11, %v583_v15  ;;  %v554_v39 = vadd.f32 1.4214138, %v538_v19  ;;  %v508_v40 = vmul.f32 1.0614054, %v6155_v28  ;;  %5354 = vpow2.f32 %v695_v21 }
  0xcb   : > { %v600_v36 = vmul.f32 %v6106_v14, %v584_v18  ;;  %v585_v42 = vadd.f32 -0.28449672, %v569_v30  ;;  %v555_v44 = vadd.f32 1.4214138, %v539_v34  ;;  %v448_v53 = vmul.f32 0.3275911, %v6153_v27 }
  0xcc   : > { %v615_v41 = vadd.f32 0.2548296, %v599_v29  ;;  %v6162_v45 = vpop.eup %5342  ;;  %v570_v49 = vmul.f32 %v6130_v47, %v554_v39  ;;  %v524_v50 = vadd.f32 -1.4531521, %v508_v40 }
  0xcd   : > { %v616_v48 = vadd.f32 0.2548296, %v600_v36  ;;  %v601_v57 = vmul.f32 %v6117_v31, %v585_v42  ;;  %v571_v60 = vmul.f32 %v6132_v51, %v555_v44  ;;  %v509_v61 = vmul.f32 1.0614054, %v6162_v45 }
  0xce   : > { %v631_v54 = vmul.f32 %v6101_v11, %v615_v41  ;;  %v586_v63 = vadd.f32 -0.28449672, %v570_v49  ;;  %v540_v4 = vmul.f32 %v6155_v28, %v524_v50  ;;  %v464_v5 = vadd.f32 1.0, %v448_v53  ;;  %v6172_v6 = vpop.eup %5344 }
  0xcf   : > { %v632_v62 = vmul.f32 %v6106_v14, %v616_v48  ;;  %v617_v16 = vadd.f32 0.2548296, %v601_v57  ;;  %v587_v17 = vadd.f32 -0.28449672, %v571_v60  ;;  %v525_v18 = vadd.f32 -1.4531521, %v509_v61  ;;  %v5347_v11 = vpop.eup %5346 }
  0xd0   : > { %v711_v15 = vmul.f32 %v6114_v23, %v631_v54  ;;  %v602_v21 = vmul.f32 %v6130_v47, %v586_v63  ;;  %v556_v29 = vadd.f32 1.4214138, %v540_v4  ;;  %v510_v30 = vmul.f32 1.0614054, %v6172_v6 }
  0xd1   : > { %v712_v19 = vmul.f32 %v6125_v43, %v632_v62  ;;  %v633_v34 = vmul.f32 %v6117_v31, %v617_v16  ;;  %v603_v36 = vmul.f32 %v6132_v51, %v587_v17  ;;  %v541_v39 = vmul.f32 %v6162_v45, %v525_v18 }
  0xd2   : > { %v727_v14 = vsub.f32 1.0, %v711_v15  ;;  %v618_v23 = vadd.f32 0.2548296, %v602_v21  ;;  %v572_v41 = vmul.f32 %v6155_v28, %v556_v29  ;;  %v526_v42 = vadd.f32 -1.4531521, %v510_v30 }
  0xd3   : > { %v728_v40 = vsub.f32 1.0, %v712_v19  ;;  %v713_v43 = vmul.f32 %v6139_v59, %v633_v34  ;;  %v619_v48 = vadd.f32 0.2548296, %v603_v36  ;;  %v557_v49 = vadd.f32 1.4214138, %v541_v39  ;;  %v5349_v50 = vpop.eup %5348 }
  0xd4   : > { %v743_v44 = vmul.f32 %v727_v14, %v6068_v25  ;;  %v634_v31 = vmul.f32 %v6130_v47, %v618_v23  ;;  %v588_v54 = vadd.f32 -0.28449672, %v572_v41  ;;  %v542_v57 = vmul.f32 %v6172_v6, %v526_v42 }
  0xd5   : > { %v744_v53 = vmul.f32 %v728_v40, %v6074_v32  ;;  %v729_v61 = vsub.f32 1.0, %v713_v43  ;;  %v635_v62 = vmul.f32 %v6132_v51, %v619_v48  ;;  %v573_v63 = vmul.f32 %v6162_v45, %v557_v49  ;;  %v6190_v25 = vpop.eup %5350  ;;  %v353_v40 = vld [vmem:[%s6026_s16 + $0x50] sm:$0xff] }
  0xd6   : > { %v759_v60 = vadd.f32 1.0, %v743_v44  ;;  %v714_v4 = vmul.f32 %v6144_v2, %v634_v31  ;;  %v604_v32 = vmul.f32 %v6155_v28, %v588_v54  ;;  %v558_v15 = vadd.f32 1.4214138, %v542_v57  ;;  %v5353_v47 = vpop.eup %5352 }
  0xd7   : > { %v760_v59 = vadd.f32 1.0, %v744_v53  ;;  %v745_v17 = vmul.f32 %v729_v61, %v6078_v33  ;;  %v715_v18 = vmul.f32 %v6149_v13, %v635_v62  ;;  %v589_v51 = vadd.f32 -0.28449672, %v573_v63  ;;  %v6197_v19 = vpop.eup %5354  ;;  %v354_v61 = vld [vmem:[%s6026_s16 + $0x58] sm:$0xff] }
  0xd8   : > { %v775_v16 = vmul.f32 %v759_v60, %v6060_v9  ;;  %v730_v29 = vsub.f32 1.0, %v714_v4  ;;  %v620_v30 = vadd.f32 0.2548296, %v604_v32  ;;  %v574_v2 = vmul.f32 %v6172_v6, %v558_v15 }
  0xd9   : > { %v776_v21 = vmul.f32 %v760_v59, %v6062_v10  ;;  %v761_v14 = vadd.f32 1.0, %v745_v17  ;;  %v731_v34 = vsub.f32 1.0, %v715_v18  ;;  %v605_v36 = vmul.f32 %v6162_v45, %v589_v51 }
  0xda   : > { %791 = vst [vmem:[#allocation2 + $0x178] sm:$0xff] %v775_v16  ;;  %v511_v9 = vmul.f32 1.0614054, %v6190_v25  ;;  %v746_v33 = vmul.f32 %v730_v29, %v6087_v52  ;;  %v636_v13 = vmul.f32 %v6155_v28, %v620_v30  ;;  %v590_v39 = vadd.f32 -0.28449672, %v574_v2 }
  0xdb   : > { %792 = vst [vmem:[#allocation2 + $0x238] sm:$0xff] %v776_v21  ;;  %5356 = vrcp.f32 %v464_v5  ;;  %v777_v10 = vmul.f32 %v761_v14, %v6070_v26  ;;  %v747_v23 = vmul.f32 %v731_v34, %v6091_v56  ;;  %v621_v41 = vadd.f32 0.2548296, %v605_v36 }
  0xdc   : > { %v527_v42 = vadd.f32 -1.4531521, %v511_v9  ;;  %v762_v44 = vadd.f32 1.0, %v746_v33  ;;  %v716_v43 = vmul.f32 %v5347_v11, %v636_v13  ;;  %v606_v48 = vmul.f32 %v6172_v6, %v590_v39  ;;  %v355_v9 = vld [vmem:[%s6026_s16 + $0x60] sm:$0xff] }
  0xdd   : > { %v656_v49 = vsub.f32 0.0, %v6153_v27  ;;  %793 = vst [vmem:[#allocation2 + $0x70] sm:$0xff] %v777_v10  ;;  %v763_v52 = vadd.f32 1.0, %v747_v23  ;;  %v637_v28 = vmul.f32 %v6162_v45, %v621_v41  ;;  %v385_v53 = vmul.f32 0.70710677, %v353_v40 }
  0xde   : > { %v543_v5 = vmul.f32 %v6190_v25, %v527_v42  ;;  %v778_v26 = vmul.f32 %v762_v44, %v6081_v37  ;;  %v732_v31 = vsub.f32 1.0, %v716_v43  ;;  %v622_v56 = vadd.f32 0.2548296, %v606_v48  ;;  %v356_v43 = vld [vmem:[%s6026_s16 + $0x68] sm:$0xff] }
  0xdf   : > { %v672_v54 = vmul.f32 %v656_v49, %v6153_v27  ;;  %v779_v11 = vmul.f32 %v763_v52, %v6083_v38  ;;  %v717_v57 = vmul.f32 %v5349_v50, %v637_v28  ;;  %vm401_vm10 = vcmp.ge.f32.partialorder %v385_v53, 0.0 }
  0xe0   : > { %v559_v60 = vadd.f32 1.4214138, %v543_v5  ;;  %794 = vst [vmem:[#allocation2 + $0x1f8] sm:$0xff] %v778_v26  ;;  %v748_v62 = vmul.f32 %v732_v31, %v6097_v1  ;;  %v638_v45 = vmul.f32 %v6172_v6, %v622_v56  ;;  %v6221_v63 = vsel %vm400_vm9, 1.0, %v5759_v24 }
  0xe1   : > { %v6223_v37 = vmul.f32 0.5, %v353_v40  ;;  %795 = vst [vmem:[#allocation2 + $0x2d0] sm:$0xff] %v779_v11  ;;  %v733_v27 = vsub.f32 1.0, %v717_v57  ;;  %v697_v50 = vmul.f32 1.442695, %v672_v54  ;;  %v6227_v15 = vsel %vm401_vm10, 1.0, %v5759_v24 }
  0xe2   : > { %v575_v38 = vmul.f32 %v6190_v25, %v559_v60  ;;  %v433_v59 = vand.u32 2147483647, %v385_v53  ;;  %v764_v4 = vadd.f32 1.0, %v748_v62  ;;  %v718_v32 = vmul.f32 %v5353_v47, %v638_v45  ;;  %v357_v54 = vld [vmem:[%s6026_s16 + $0x70] sm:$0xff] }
  0xe3   : > { %v386_v1 = vmul.f32 0.70710677, %v354_v61  ;;  %v749_v6 = vmul.f32 %v733_v27, %v6104_v12  ;;  %v6231_v21 = vmul.f32 0.5, %v354_v61  ;;  %v387_v44 = vmul.f32 0.70710677, %v355_v9  ;;  %v358_v27 = vld [vmem:[%s6026_s16 + $0x78] sm:$0xff] }
  0xe4   : > { %v591_v16 = vadd.f32 -0.28449672, %v575_v38  ;;  %v449_v46 = vmul.f32 0.3275911, %v433_v59  ;;  %v657_v17 = vsub.f32 0.0, %v433_v59  ;;  %v780_v18 = vmul.f32 %v764_v4, %v6093_v58 }
  0xe5   : > { %v734_v51 = vsub.f32 1.0, %v718_v32  ;;  %v434_v29 = vand.u32 2147483647, %v386_v1  ;;  %v765_v30 = vadd.f32 1.0, %v749_v6  ;;  %vm402_vm11 = vcmp.ge.f32.partialorder %v386_v1, 0.0 }
  0xe6   : > { %v607_v2 = vmul.f32 %v6190_v25, %v591_v16  ;;  %v465_v47 = vadd.f32 1.0, %v449_v46  ;;  %v673_v14 = vmul.f32 %v657_v17, %v433_v59  ;;  %796 = vst [vmem:[#allocation2 + $0x148] sm:$0xff] %v780_v18  ;;  %v6243_v42 = vsel %vm402_vm11, 1.0, %v5759_v24 }
  0xe7   : > { %v750_v34 = vmul.f32 %v734_v51, %v6121_v35  ;;  %v450_v12 = vmul.f32 0.3275911, %v434_v29  ;;  %v658_v36 = vsub.f32 0.0, %v434_v29  ;;  %v781_v58 = vmul.f32 %v765_v30, %v6099_v3 }
  0xe8   : > { %v6236_v33 = vpop.eup %5356  ;;  %v623_v13 = vadd.f32 0.2548296, %v607_v2  ;;  %5358 = vrcp.f32 %v465_v47  ;;  %v699_v39 = vmul.f32 1.442695, %v673_v14  ;;  %vm403_vm12 = vcmp.ge.f32.partialorder %v387_v44, 0.0 }
  0xe9   : > { %v766_v40 = vadd.f32 1.0, %v750_v34  ;;  %v512_v10 = vmul.f32 1.0614054, %v6236_v33  ;;  %v466_v23 = vadd.f32 1.0, %v450_v12  ;;  %v674_v41 = vmul.f32 %v658_v36, %v434_v29  ;;  %797 = vst [vmem:[#allocation2 + $0x1c0] sm:$0xff] %v781_v58 }
  0xea   : > { %v639_v35 = vmul.f32 %v6190_v25, %v623_v13  ;;  %5360 = vpow2.f32 %v697_v50  ;;  %v435_v28 = vand.u32 2147483647, %v387_v44  ;;  %v6249_v5 = vmul.f32 0.5, %v355_v9 }
  0xeb   : > { %v782_v3 = vmul.f32 %v766_v40, %v6110_v20  ;;  %v528_v48 = vadd.f32 -1.4531521, %v512_v10  ;;  %5362 = vrcp.f32 %v466_v23  ;;  %v701_v49 = vmul.f32 1.442695, %v674_v41 }
  0xec   : > { %v719_v52 = vmul.f32 %v6197_v19, %v639_v35  ;;  %5364 = vpow2.f32 %v699_v39  ;;  %v6251_v53 = vmul.f32 0.5, %v356_v43  ;;  %v388_v26 = vmul.f32 0.70710677, %v356_v43 }
  0xed   : > { %798 = vst [vmem:[#allocation2 + $0x378] sm:$0xff] %v782_v3  ;;  %v544_v25 = vmul.f32 %v6236_v33, %v528_v48  ;;  %5366 = vpow2.f32 %v701_v49  ;;  %v451_v20 = vmul.f32 0.3275911, %v435_v28  ;;  %v659_v56 = vsub.f32 0.0, %v435_v28  ;;  %v6287_v49 = vld [vmem:[#allocation6] sm:$0xff] }
  0xee   : > { %v735_v31 = vsub.f32 1.0, %v719_v52  ;;  %v6255_v19 = vsel %vm403_vm12, 1.0, %v5759_v24  ;;  %v436_v57 = vand.u32 2147483647, %v388_v26  ;;  %v6257_v60 = vmul.f32 0.5, %v357_v54 }
  0xef   : > { %v560_v11 = vadd.f32 1.4214138, %v544_v25  ;;  %v467_v62 = vadd.f32 1.0, %v451_v20  ;;  %v675_v45 = vmul.f32 %v659_v56, %v435_v28  ;;  %vm404_vm13 = vcmp.ge.f32.partialorder %v388_v26, 0.0 }
  0xf0   : > { %v751_v61 = vmul.f32 %v735_v31, %v6137_v55  ;;  %v452_v50 = vmul.f32 0.3275911, %v436_v57  ;;  %v660_v59 = vsub.f32 0.0, %v436_v57  ;;  %v389_v4 = vmul.f32 0.70710677, %v357_v54 }
  0xf1   : > { %v576_v38 = vmul.f32 %v6236_v33, %v560_v11  ;;  %5368 = vrcp.f32 %v467_v62  ;;  %v703_v1 = vmul.f32 1.442695, %v675_v45  ;;  %v6262_v6 = vmul.f32 0.5, %v358_v27 }
  0xf2   : > { %v767_v32 = vadd.f32 1.0, %v751_v61  ;;  %v468_v46 = vadd.f32 1.0, %v452_v50  ;;  %v676_v17 = vmul.f32 %v660_v59, %v436_v57  ;;  %v390_v18 = vmul.f32 0.70710677, %v358_v27 }
  0xf3   : > { %v592_v16 = vadd.f32 -0.28449672, %v576_v38  ;;  %v6266_v51 = vsel %vm404_vm13, 1.0, %v5759_v24  ;;  %vm405_vm14 = vcmp.ge.f32.partialorder %v389_v4, 0.0  ;;  %v437_v29 = vand.u32 2147483647, %v389_v4 }
  0xf4   : > { %v783_v55 = vmul.f32 %v767_v32, %v6112_v22  ;;  %5370 = vrcp.f32 %v468_v46  ;;  %v705_v47 = vmul.f32 1.442695, %v676_v17  ;;  %vm406_vm15 = vcmp.ge.f32.partialorder %v390_v18, 0.0 }
  0xf5   : > { %v6268_v30 = vpop.eup %5358  ;;  %v608_v2 = vmul.f32 %v6236_v33, %v592_v16  ;;  %5372 = vpow2.f32 %v703_v1  ;;  %v453_v34 = vmul.f32 0.3275911, %v437_v29  ;;  %v661_v12 = vsub.f32 0.0, %v437_v29 }
  0xf6   : > { %799 = vst [vmem:[#allocation2 + $0x48] sm:$0xff] %v783_v55  ;;  %v513_v14 = vmul.f32 1.0614054, %v6268_v30  ;;  %v6273_v9 = vsel %vm405_vm14, 1.0, %v5759_v24  ;;  %v438_v58 = vand.u32 2147483647, %v390_v18 }
  0xf7   : > { %v5361_v36 = vpop.eup %5360  ;;  %v624_v22 = vadd.f32 0.2548296, %v608_v2  ;;  %v6276_v13 = vshrl.u32 %v815_v8, 7  ;;  %v469_v10 = vadd.f32 1.0, %v453_v34  ;;  %v677_v23 = vmul.f32 %v661_v12, %v437_v29 }
  0xf8   : > { %v6278_v39 = vpop.eup %5362  ;;  %v529_v40 = vadd.f32 -1.4531521, %v513_v14  ;;  %v6281_v41 = vsel %vm406_vm15, 1.0, %v5759_v24  ;;  %v454_v3 = vmul.f32 0.3275911, %v438_v58  ;;  %v662_v48 = vsub.f32 0.0, %v438_v58 }
  0xf9   : > { %v6283_v35 = vpop.eup %5364  ;;  %v640_v44 = vmul.f32 %v6236_v33, %v624_v22  ;;  %v514_v43 = vmul.f32 1.0614054, %v6278_v39  ;;  %5374 = vrcp.f32 %v469_v10  ;;  %v707_v52 = vmul.f32 1.442695, %v677_v23 }
  0xfa   : > { %v545_v8 = vmul.f32 %v6268_v30, %v529_v40  ;;  %v6291_v28 = vsub.s32 0, %v6276_v13  ;;  %v6293_v25 = vpop.eup %5366  ;;  %v470_v31 = vadd.f32 1.0, %v454_v3  ;;  %v678_v20 = vmul.f32 %v662_v48, %v438_v58 }
  0xfb   : > { %v720_v24 = vmul.f32 %v5361_v36, %v640_v44  ;;  %v530_v26 = vadd.f32 -1.4531521, %v514_v43  ;;  %5376 = vpow2.f32 %v705_v47  ;;  %v6300_v54 = vsub.s32 1, %v6276_v13  ;;  %v808_v44 = vld [vmem:[#allocation6 + $0x8] sm:$0x3] }
  0xfc   : > { %v561_v33 = vadd.f32 1.4214138, %v545_v8  ;;  %v6297_v56 = vrot.slane %v6287_v49, %v6291_v28  ;;  %5378 = vrcp.f32 %v470_v31  ;;  %v709_v61 = vmul.f32 1.442695, %v678_v20 }
  0xfd   : > { %v736_v11 = vsub.f32 1.0, %v720_v24  ;;  %v546_v57 = vmul.f32 %v6278_v39, %v530_v26  ;;  %5380 = vpow2.f32 %v707_v52  ;;  %v6306_v45 = vrot.slane %v6287_v49, %v6300_v54 }
  0xfe   : > { %v577_v62 = vmul.f32 %v6268_v30, %v561_v33  ;;  %v6309_v27 = vsub.s32 2, %v6276_v13  ;;  %v6311_v38 = vpop.eup %5368  ;;  %v6316_v4 = vsub.f32 %v6054_v0, %v6297_v56  ;;  %v6319_v32 = vsub.s32 3, %v6276_v13 }
  0xff   : > { %v752_v50 = vmul.f32 %v736_v11, %v6221_v63  ;;  %v562_v59 = vadd.f32 1.4214138, %v546_v57  ;;  %v515_v16 = vmul.f32 1.0614054, %v6311_v38  ;;  %5382 = vpow2.f32 %v709_v61 }
 0x100   : > { %10861 = vst [vmem:[#allocation31_spill] sm:$0xff] %v6309_v27  ;;  %10862 = vst [vmem:[#allocation32_spill] sm:$0xff] %v6319_v32  ;;  %v593_v1 = vadd.f32 -0.28449672, %v577_v62  ;;  %v6324_v46 = vrot.slane %v6287_v49, %v6309_v27  ;;  %v6329_v63 = vrot.slane %v6287_v49, %v6319_v32  ;;  %v6332_v55 = vsub.s32 4, %v6276_v13 }
 0x101   : > { %v768_v17 = vadd.f32 1.0, %v752_v50  ;;  %v578_v18 = vmul.f32 %v6278_v39, %v562_v59  ;;  %v6334_v29 = vpop.eup %5370  ;;  %v531_v47 = vadd.f32 -1.4531521, %v515_v16  ;;  %v6339_v14 = vsub.f32 %v6054_v0, %v6306_v45 }
 0x102   : > { %10863 = vst [vmem:[#allocation33_spill] sm:$0xff] %v6332_v55  ;;  %v609_v2 = vmul.f32 %v6268_v30, %v593_v1  ;;  %v6342_v34 = vsub.s32 5, %v6276_v13  ;;  %v6344_v12 = vpop.eup %5372  ;;  %v516_v58 = vmul.f32 1.0614054, %v6334_v29  ;;  %v6350_v40 = vsub.f32 %v6054_v0, %v6324_v46 }
 0x103   : > { %v784_v36 = vmul.f32 %v768_v17, %v6147_v7  ;;  %v594_v22 = vadd.f32 -0.28449672, %v578_v18  ;;  %v547_v23 = vmul.f32 %v6311_v38, %v531_v47  ;;  %v6355_v43 = vsub.f32 %v6054_v0, %v6329_v63 }
 0x104   : > { %10864 = vst [vmem:[#allocation34_spill] sm:$0xff] %v6342_v34  ;;  %10865 = vst [vmem:[#allocation35_spill] sm:$0xff] %v6350_v40  ;;  %v625_v10 = vadd.f32 0.2548296, %v609_v2  ;;  %v6359_v3 = vrot.slane %v6287_v49, %v6332_v55  ;;  %v532_v48 = vadd.f32 -1.4531521, %v516_v58  ;;  %v6375_v20 = vrot.slane %v6287_v49, %v6342_v34 }
 0x105   : > { %800 = vst [vmem:[#allocation2 + $0x80] sm:$0xff] %v784_v36  ;;  %v610_v7 = vmul.f32 %v6278_v39, %v594_v22  ;;  %v6363_v8 = vsub.s32 6, %v6276_v13  ;;  %v6366_v52 = vsub.s32 7, %v6276_v13  ;;  %v563_v26 = vadd.f32 1.4214138, %v547_v23 }
 0x106   : > { %v641_v24 = vmul.f32 %v6268_v30, %v625_v10  ;;  %v6371_v31 = vsub.f32 %v6054_v0, %v6359_v3  ;;  %v6377_v33 = vpop.eup %5374  ;;  %v548_v57 = vmul.f32 %v6334_v29, %v532_v48  ;;  %v6385_v30 = vrot.slane %v808_v44, %v6291_v28 }
 0x107   : > { %10866 = vst [vmem:[#allocation36_spill] sm:$0xff] %v6363_v8  ;;  %10867 = vst [vmem:[#allocation37_spill] sm:$0xff] %v6366_v52  ;;  %v626_v11 = vadd.f32 0.2548296, %v610_v7  ;;  %v6382_v13 = vrot.slane %v6287_v49, %v6363_v8  ;;  %v579_v62 = vmul.f32 %v6311_v38, %v563_v26  ;;  %v517_v50 = vmul.f32 1.0614054, %v6377_v33 }
 0x108   : > { %10868 = vst [vmem:[#allocation38_spill] sm:$0xff] %v6371_v31  ;;  %10870 = vst [vmem:[#allocation40_spill] sm:$0xff] %v6385_v30  ;;  %v721_v61 = vmul.f32 %v6283_v35, %v641_v24  ;;  %v6392_v59 = vrot.slane %v6287_v49, %v6366_v52  ;;  %v5377_v1 = vpop.eup %5376  ;;  %v564_v17 = vadd.f32 1.4214138, %v548_v57  ;;  %vm1015_vm0 = vcmp.ge.f32.partialorder %v6054_v0, %v6297_v56 }
 0x109   : > { %10869 = vst [vmem:[#allocation39_spill] sm:$0xff] %v6382_v13  ;;  %v642_v16 = vmul.f32 %v6278_v39, %v626_v11  ;;  %vm1031_vm1 = vcmp.lt.f32.partialorder %v6054_v0, %v6306_v45  ;;  %v6399_v18 = vpop.eup %5378  ;;  %v595_v2 = vadd.f32 -0.28449672, %v579_v62  ;;  %v533_v47 = vadd.f32 -1.4531521, %v517_v50 }
 0x10a   : > { %10871 = vst [vmem:[#allocation41_spill] sm:$0xff] %v6392_v59  ;;  %v737_v35 = vsub.f32 1.0, %v721_v61  ;;  %vm1047_vm2 = vmand %vm1015_vm0, %vm1031_vm1  ;;  %vm1095_vm3 = vcmp.ge.f32.partialorder %v6054_v0, %v6306_v45  ;;  %v6403_v49 = vpop.eup %5380  ;;  %v580_v36 = vmul.f32 %v6334_v29, %v564_v17  ;;  %v518_v22 = vmul.f32 1.0614054, %v6399_v18  ;;  %v809_v17 = vld [vmem:[#allocation8] sm:$0xff] }
 0x10b   : > { %v722_v39 = vmul.f32 %v6293_v25, %v642_v16  ;;  %v10428_v58 = vmov 0.0   ;;  %v611_v44 = vmul.f32 %v6311_v38, %v595_v2  ;;  %v549_v7 = vmul.f32 %v6377_v33, %v533_v47 }
 0x10c   : > { %v4668_v10 = vsel %vm1047_vm2, 1.0, %v10428_v58  ;;  %v753_v23 = vmul.f32 %v737_v35, %v6227_v15  ;;  %vm1111_vm4 = vcmp.lt.f32.partialorder %v6054_v0, %v6324_v46  ;;  %v6414_v48 = vpop.eup %5382  ;;  %v596_v25 = vadd.f32 -0.28449672, %v580_v36 }
 0x10d   : > { %v738_v24 = vsub.f32 1.0, %v722_v39  ;;  %v534_v26 = vadd.f32 -1.4531521, %v518_v22  ;;  %vm1127_vm5 = vmand %vm1095_vm3, %vm1111_vm4  ;;  %vm1175_vm6 = vcmp.ge.f32.partialorder %v6054_v0, %v6324_v46  ;;  %v627_v11 = vadd.f32 0.2548296, %v611_v44  ;;  %v812_v39 = vld [vmem:[#allocation9] sm:$0xff] }
 0x10e   : > { %v769_v15 = vadd.f32 1.0, %v753_v23  ;;  %v565_v57 = vadd.f32 1.4214138, %v549_v7  ;;  %v4684_v61 = vsel %vm1127_vm5, 1.0, %v10428_v58  ;;  %v612_v50 = vmul.f32 %v6334_v29, %v596_v25 }
 0x10f   : > { %v754_v62 = vmul.f32 %v738_v24, %v6243_v42  ;;  %v550_v16 = vmul.f32 %v6399_v18, %v534_v26  ;;  %vm1191_vm7 = vcmp.lt.f32.partialorder %v6054_v0, %v6329_v63  ;;  %v643_v2 = vmul.f32 %v6311_v38, %v627_v11 }
 0x110   : > { %v785_v35 = vmul.f32 %v769_v15, %v6223_v37  ;;  %v581_v47 = vmul.f32 %v6377_v33, %v565_v57  ;;  %vm1207_vm8 = vmand %vm1175_vm6, %vm1191_vm7  ;;  %vm1255_vm9 = vcmp.ge.f32.partialorder %v6054_v0, %v6329_v63  ;;  %v628_v36 = vadd.f32 0.2548296, %v612_v50 }
 0x111   : > { %v770_v42 = vadd.f32 1.0, %v754_v62  ;;  %v566_v22 = vadd.f32 1.4214138, %v550_v16  ;;  %v4700_v23 = vsel %vm1207_vm8, 1.0, %v10428_v58  ;;  %v723_v44 = vmul.f32 %v6344_v12, %v643_v2 }
 0x112   : > { %801 = vst [vmem:[#allocation2 + $0x78] sm:$0xff] %v785_v35  ;;  %v597_v7 = vadd.f32 -0.28449672, %v581_v47  ;;  %vm1271_vm10 = vcmp.lt.f32.partialorder %v6054_v0, %v6359_v3  ;;  %v6437_v37 = vrot.slane %v809_v17, %v6291_v28  ;;  %v644_v24 = vmul.f32 %v6334_v29, %v628_v36 }
 0x113   : > { %v786_v38 = vmul.f32 %v770_v42, %v6231_v21  ;;  %v582_v25 = vmul.f32 %v6399_v18, %v566_v22  ;;  %vm1287_vm11 = vmand %vm1255_vm9, %vm1271_vm10  ;;  %v6443_v26 = vrot.slane %v812_v39, %v6291_v28  ;;  %v739_v15 = vsub.f32 1.0, %v723_v44 }
 0x114   : > { %v613_v12 = vmul.f32 %v6377_v33, %v597_v7  ;;  %v6447_v11 = vsel %vm1287_vm11, 1.0, %v10428_v58  ;;  %v1739_v0 = vmul.f32 %v6437_v37, %v6316_v4  ;;  %v724_v57 = vmul.f32 %v5377_v1, %v644_v24  ;;  %v810_v7 = vld [vmem:[#allocation8 + $0x8] sm:$0xff] }
 0x115   : > { %802 = vst [vmem:[#allocation2 + $0xd8] sm:$0xff] %v786_v38  ;;  %v598_v21 = vadd.f32 -0.28449672, %v582_v25  ;;  %v1775_v29 = vmul.f32 %v6443_v26, %v6350_v40  ;;  %v6454_v62 = vrot.slane %v809_v17, %v6300_v54  ;;  %v755_v50 = vmul.f32 %v739_v15, %v6255_v19  ;;  %v813_v25 = vld [vmem:[#allocation9 + $0x8] sm:$0xff] }
 0x116   : > { %v629_v16 = vadd.f32 0.2548296, %v613_v12  ;;  %v1755_v35 = vmul.f32 %v4668_v10, %v1739_v0  ;;  %v6458_v2 = vrot.slane %v812_v39, %v6300_v54  ;;  %v740_v47 = vsub.f32 1.0, %v724_v57 }
 0x117   : > { %v614_v42 = vmul.f32 %v6399_v18, %v598_v21  ;;  %v1791_v36 = vmul.f32 %v4684_v61, %v1775_v29  ;;  %v1827_v1 = vmul.f32 %v6454_v62, %v6339_v14  ;;  %v771_v22 = vadd.f32 1.0, %v755_v50 }
 0x118   : > { %v645_v44 = vmul.f32 %v6377_v33, %v629_v16  ;;  %v1863_v38 = vmul.f32 %v6458_v2, %v6355_v43  ;;  %v6467_v19 = vrot.slane %v809_v17, %v6309_v27  ;;  %v756_v10 = vmul.f32 %v740_v47, %v6266_v51 }
 0x119   : > { %v630_v24 = vadd.f32 0.2548296, %v614_v42  ;;  %v1807_v15 = vadd.f32 %v1791_v36, %v1755_v35  ;;  %v1843_v12 = vmul.f32 %v4684_v61, %v1827_v1  ;;  %v787_v0 = vmul.f32 %v771_v22, %v6249_v5 }
 0x11a   : > { %v725_v57 = vmul.f32 %v6403_v49, %v645_v44  ;;  %v1879_v21 = vmul.f32 %v4700_v23, %v1863_v38  ;;  %v1915_v33 = vmul.f32 %v6467_v19, %v6350_v40  ;;  %v772_v29 = vadd.f32 1.0, %v756_v10 }
 0x11b   : > { %v646_v50 = vmul.f32 %v6399_v18, %v630_v24  ;;  %v6476_v17 = vrot.slane %v812_v39, %v6309_v27  ;;  %v6479_v51 = vrot.slane %v810_v7, %v6291_v28  ;;  %803 = vst [vmem:[#allocation2 + $0x208] sm:$0xff] %v787_v0  ;;  %v6482_v5 = vrot.slane %v813_v25, %v6291_v28 }
 0x11c   : > { %v741_v16 = vsub.f32 1.0, %v725_v57  ;;  %v1895_v61 = vadd.f32 %v1879_v21, %v1843_v12  ;;  %v1931_v35 = vmul.f32 %v4700_v23, %v1915_v33  ;;  %v788_v49 = vmul.f32 %v772_v29, %v6251_v53  ;;  %v5384_v29 = vld [vmem:[%s6026_s16 + $0x8] sm:$0xff] }
 0x11d   : > { %v726_v47 = vmul.f32 %v6414_v48, %v646_v50  ;;  %v1951_v18 = vmul.f32 %v6476_v17, %v6371_v31  ;;  %v2443_v39 = vmul.f32 %v6479_v51, %v6316_v4  ;;  %v2479_v36 = vmul.f32 %v6482_v5, %v6355_v43 }
 0x11e   : > { %v757_v42 = vmul.f32 %v741_v16, %v6273_v9  ;;  %v6494_v23 = vrot.slane %v810_v7, %v6300_v54  ;;  %v6497_v1 = vrot.slane %v813_v25, %v6300_v54  ;;  %804 = vst [vmem:[#allocation2 + $0x10] sm:$0xff] %v788_v49  ;;  %v6501_v44 = vrot.slane %v810_v7, %v6366_v52 }
 0x11f   : > { %v742_v53 = vsub.f32 1.0, %v726_v47  ;;  %v1967_v48 = vmul.f32 %v6447_v11, %v1951_v18  ;;  %v2459_v22 = vmul.f32 %v2443_v39, %v1807_v15  ;;  %v2495_v9 = vmul.f32 %v2479_v36, %v1895_v61 }
 0x120   : > { %v773_v38 = vadd.f32 1.0, %v757_v42  ;;  %v2531_v10 = vmul.f32 %v6494_v23, %v6339_v14  ;;  %v2567_v24 = vmul.f32 %v6497_v1, %v6371_v31  ;;  %v3059_v57 = vmul.f32 %v6501_v44, %v6316_v4 }
 0x121   : > { %v758_v12 = vmul.f32 %v742_v53, %v6281_v41  ;;  %v6508_v0 = vadd.f32 %v1967_v48, %v1931_v35  ;;  %v6513_v15 = vrot.slane %v813_v25, %v6366_v52  ;;  %v2511_v21 = vadd.f32 %v2495_v9, %v2459_v22 }
 0x122   : > { %v789_v7 = vmul.f32 %v773_v38, %v6257_v60  ;;  %v2547_v33 = vmul.f32 %v2531_v10, %v1895_v61  ;;  %v820_v50 = vsub.f32 %v5384_v29, %v6297_v56  ;;  %v6522_v35 = vsub.f32 %v5384_v29, %v6306_v45 }
 0x123   : > { %v774_v16 = vadd.f32 1.0, %v758_v12  ;;  %v2583_v49 = vmul.f32 %v2567_v24, %v6508_v0  ;;  %v3095_v41 = vmul.f32 %v6513_v15, %v6371_v31  ;;  %v3075_v4 = vmul.f32 %v3059_v57, %v2511_v21 }
 0x124   : > { %805 = vst [vmem:[#allocation2 + $0x268] sm:$0xff] %v789_v7  ;;  %v6525_v25 = vsub.f32 %v5384_v29, %v6324_v46  ;;  %v6528_v60 = vsub.f32 %v5384_v29, %v6329_v63  ;;  %v6531_v61 = vsub.f32 %v5384_v29, %v6359_v3  ;;  %vm1016_vm12 = vcmp.ge.f32.partialorder %v5384_v29, %v6297_v56 }
 0x125   : > { %v790_v47 = vmul.f32 %v774_v16, %v6262_v6  ;;  %v6534_v18 = vadd.f32 %v2583_v49, %v2547_v33  ;;  %vm1032_vm13 = vcmp.lt.f32.partialorder %v5384_v29, %v6306_v45  ;;  %vm1096_vm15 = vcmp.ge.f32.partialorder %v5384_v29, %v6306_v45 }
 0x126   : > { %10872 = vst [vmem:[#allocation42_spill] sm:$0xff] %v6525_v25  ;;  %10873 = vst [vmem:[#allocation43_spill] sm:$0xff] %v6528_v60  ;;  %vm1112_vm0 = vcmp.lt.f32.partialorder %v5384_v29, %v6324_v46  ;;  %vm1176_vm1 = vcmp.ge.f32.partialorder %v5384_v29, %v6324_v46  ;;  %vm1192_vm2 = vcmp.lt.f32.partialorder %v5384_v29, %v6329_v63 }
 0x127   : > { %10874 = vst [vmem:[#allocation44_spill] sm:$0xff] %v6531_v61  ;;  %vm1048_vm14 = vmand %vm1016_vm12, %vm1032_vm13  ;;  %v3111_v39 = vmul.f32 %v3095_v41, %v6534_v18  ;;  %vm1256_vm4 = vcmp.ge.f32.partialorder %v5384_v29, %v6329_v63  ;;  %vm1272_vm5 = vcmp.lt.f32.partialorder %v5384_v29, %v6359_v3  ;;  %v1740_v36 = vmul.f32 %v6437_v37, %v820_v50 }
 0x128   : > { %806 = vst [vmem:[#allocation2 + $0x290] sm:$0xff] %v790_v47  ;;  %v4669_v6 = vsel %vm1048_vm14, 1.0, %v10428_v58  ;;  %vm1128_vm3 = vmand %vm1096_vm15, %vm1112_vm0  ;;  %v1776_v53 = vmul.f32 %v6443_v26, %v6525_v25  ;;  %v1828_v48 = vmul.f32 %v6454_v62, %v6522_v35  ;;  %v1864_v9 = vmul.f32 %v6458_v2, %v6528_v60 }
 0x129   : > { %v4685_v42 = vsel %vm1128_vm3, 1.0, %v10428_v58  ;;  %vm1208_vm6 = vmand %vm1176_vm1, %vm1192_vm2  ;;  %v3127_v22 = vadd.f32 %v3111_v39, %v3075_v4  ;;  %v1916_v10 = vmul.f32 %v6467_v19, %v6525_v25  ;;  %v1756_v12 = vmul.f32 %v4669_v6, %v1740_v36 }
 0x12a   : > { %v4701_v38 = vsel %vm1208_vm6, 1.0, %v10428_v58  ;;  %vm1288_vm7 = vmand %vm1256_vm4, %vm1272_vm5  ;;  %v1792_v57 = vmul.f32 %v4685_v42, %v1776_v53  ;;  %v1844_v7 = vmul.f32 %v4685_v42, %v1828_v48  ;;  %v1952_v29 = vmul.f32 %v6476_v17, %v6531_v61  ;;  %v5385_v48 = vld [vmem:[%s6026_s16 + $0x10] sm:$0xff] }
 0x12b   : > { %v6558_v24 = vsel %vm1288_vm7, 1.0, %v10428_v58  ;;  %3583 = vst [vmem:[#allocation2 + $0x118] sm:$0xff] %v3127_v22  ;;  %v1880_v21 = vmul.f32 %v4701_v38, %v1864_v9  ;;  %v1932_v33 = vmul.f32 %v4701_v38, %v1916_v10  ;;  %v2444_v16 = vmul.f32 %v6479_v51, %v820_v50 }
 0x12c   : > { %v1808_v49 = vadd.f32 %v1792_v57, %v1756_v12  ;;  %v2480_v41 = vmul.f32 %v6482_v5, %v6528_v60  ;;  %v2532_v4 = vmul.f32 %v6494_v23, %v6522_v35  ;;  %v2568_v47 = vmul.f32 %v6497_v1, %v6531_v61 }
 0x12d   : > { %v1896_v39 = vadd.f32 %v1880_v21, %v1844_v7  ;;  %v1968_v6 = vmul.f32 %v6558_v24, %v1952_v29  ;;  %v3060_v42 = vmul.f32 %v6501_v44, %v820_v50  ;;  %v3096_v36 = vmul.f32 %v6513_v15, %v6531_v61 }
 0x12e   : > { %v2460_v53 = vmul.f32 %v2444_v16, %v1808_v49  ;;  %v821_v22 = vsub.f32 %v5385_v48, %v6297_v56  ;;  %v6576_v38 = vsub.f32 %v5385_v48, %v6306_v45  ;;  %v6579_v9 = vsub.f32 %v5385_v48, %v6324_v46 }
 0x12f   : > { %v6581_v10 = vadd.f32 %v1968_v6, %v1932_v33  ;;  %v2496_v12 = vmul.f32 %v2480_v41, %v1896_v39  ;;  %v2548_v57 = vmul.f32 %v2532_v4, %v1896_v39  ;;  %v6584_v7 = vsub.f32 %v5385_v48, %v6329_v63 }
 0x130   : > { %10875 = vst [vmem:[#allocation45_spill] sm:$0xff] %v6576_v38  ;;  %10876 = vst [vmem:[#allocation46_spill] sm:$0xff] %v6579_v9  ;;  %v6587_v50 = vsub.f32 %v5385_v48, %v6359_v3  ;;  %vm1017_vm8 = vcmp.ge.f32.partialorder %v5385_v48, %v6297_v56  ;;  %vm1033_vm9 = vcmp.lt.f32.partialorder %v5385_v48, %v6306_v45 }
 0x131   : > { %10877 = vst [vmem:[#allocation47_spill] sm:$0xff] %v6584_v7  ;;  %vm1097_vm10 = vcmp.ge.f32.partialorder %v5385_v48, %v6306_v45  ;;  %v2512_v21 = vadd.f32 %v2496_v12, %v2460_v53  ;;  %v2584_v29 = vmul.f32 %v2568_v47, %v6581_v10  ;;  %vm1049_vm11 = vmand %vm1017_vm8, %vm1033_vm9  ;;  %vm1113_vm12 = vcmp.lt.f32.partialorder %v5385_v48, %v6324_v46 }
 0x132   : > { %10878 = vst [vmem:[#allocation48_spill] sm:$0xff] %v6587_v50  ;;  %vm1177_vm13 = vcmp.ge.f32.partialorder %v5385_v48, %v6324_v46  ;;  %v4670_v33 = vsel %vm1049_vm11, 1.0, %v10428_v58  ;;  %vm1129_vm14 = vmand %vm1097_vm10, %vm1113_vm12  ;;  %vm1193_vm15 = vcmp.lt.f32.partialorder %v5385_v48, %v6329_v63  ;;  %vm1257_vm0 = vcmp.ge.f32.partialorder %v5385_v48, %v6329_v63 }
 0x133   : > { %vm1273_vm1 = vcmp.lt.f32.partialorder %v5385_v48, %v6359_v3  ;;  %v6599_v16 = vadd.f32 %v2584_v29, %v2548_v57  ;;  %v3076_v49 = vmul.f32 %v3060_v42, %v2512_v21  ;;  %v4686_v41 = vsel %vm1129_vm14, 1.0, %v10428_v58  ;;  %vm1209_vm2 = vmand %vm1177_vm13, %vm1193_vm15 }
 0x134   : > { %v1741_v4 = vmul.f32 %v6437_v37, %v821_v22  ;;  %v4702_v47 = vsel %vm1209_vm2, 1.0, %v10428_v58  ;;  %vm1289_vm3 = vmand %vm1257_vm0, %vm1273_vm1  ;;  %v1777_v39 = vmul.f32 %v6443_v26, %v6579_v9  ;;  %v1829_v6 = vmul.f32 %v6454_v62, %v6576_v38 }
 0x135   : > { %v1865_v53 = vmul.f32 %v6458_v2, %v6584_v7  ;;  %v3112_v48 = vmul.f32 %v3096_v36, %v6599_v16  ;;  %v6612_v42 = vsel %vm1289_vm3, 1.0, %v10428_v58  ;;  %v1917_v57 = vmul.f32 %v6467_v19, %v6579_v9 }
 0x136   : > { %10879 = vst [vmem:[#allocation49_spill] sm:$0xff] %v6612_v42  ;;  %v1757_v12 = vmul.f32 %v4670_v33, %v1741_v4  ;;  %v1793_v21 = vmul.f32 %v4686_v41, %v1777_v39  ;;  %v1845_v29 = vmul.f32 %v4686_v41, %v1829_v6  ;;  %v1953_v8 = vmul.f32 %v6476_v17, %v6587_v50 }
 0x137   : > { %v1881_v52 = vmul.f32 %v4702_v47, %v1865_v53  ;;  %v3128_v30 = vadd.f32 %v3112_v48, %v3076_v49  ;;  %v1933_v34 = vmul.f32 %v4702_v47, %v1917_v57  ;;  %v2445_v59 = vmul.f32 %v6479_v51, %v821_v22  ;;  %v5386_v47 = vld [vmem:[%s6026_s16 + $0x18] sm:$0xff] }
 0x138   : > { %v2481_v36 = vmul.f32 %v6482_v5, %v6584_v7  ;;  %v1809_v58 = vadd.f32 %v1793_v21, %v1757_v12  ;;  %v1969_v33 = vmul.f32 %v6612_v42, %v1953_v8  ;;  %v2533_v4 = vmul.f32 %v6494_v23, %v6576_v38 }
 0x139   : > { %v1897_v61 = vadd.f32 %v1881_v52, %v1845_v29  ;;  %3584 = vst [vmem:[#allocation2 + $0x180] sm:$0xff] %v3128_v30  ;;  %v2569_v41 = vmul.f32 %v6497_v1, %v6587_v50  ;;  %v3061_v39 = vmul.f32 %v6501_v44, %v821_v22  ;;  %v3097_v49 = vmul.f32 %v6513_v15, %v6587_v50 }
 0x13a   : > { %v822_v6 = vsub.f32 %v5386_v47, %v6297_v56  ;;  %v6631_v53 = vadd.f32 %v1969_v33, %v1933_v34  ;;  %v2461_v52 = vmul.f32 %v2445_v59, %v1809_v58  ;;  %v6634_v12 = vsub.f32 %v5386_v47, %v6306_v45 }
 0x13b   : > { %v2497_v48 = vmul.f32 %v2481_v36, %v1897_v61  ;;  %v2549_v8 = vmul.f32 %v2533_v4, %v1897_v61  ;;  %v6637_v30 = vsub.f32 %v5386_v47, %v6324_v46  ;;  %v6640_v57 = vsub.f32 %v5386_v47, %v6329_v63 }
 0x13c   : > { %10880 = vst [vmem:[#allocation50_spill] sm:$0xff] %v6631_v53  ;;  %10881 = vst [vmem:[#allocation51_spill] sm:$0xff] %v6634_v12  ;;  %v6643_v22 = vsub.f32 %v5386_v47, %v6359_v3  ;;  %v2585_v29 = vmul.f32 %v2569_v41, %v6631_v53  ;;  %vm1018_vm4 = vcmp.ge.f32.partialorder %v5386_v47, %v6297_v56  ;;  %v10886_v58 = vmov 0.0  }
 0x13d   : > { %10882 = vst [vmem:[#allocation52_spill] sm:$0xff] %v6637_v30  ;;  %10883 = vst [vmem:[#allocation53_spill] sm:$0xff] %v6640_v57  ;;  %v2513_v21 = vadd.f32 %v2497_v48, %v2461_v52  ;;  %vm1034_vm5 = vcmp.lt.f32.partialorder %v5386_v47, %v6306_v45  ;;  %vm1098_vm7 = vcmp.ge.f32.partialorder %v5386_v47, %v6306_v45 }
 0x13e   : > { %10884 = vst [vmem:[#allocation54_spill] sm:$0xff] %v6643_v22  ;;  %vm1050_vm6 = vmand %vm1018_vm4, %vm1034_vm5  ;;  %vm1114_vm8 = vcmp.lt.f32.partialorder %v5386_v47, %v6324_v46  ;;  %vm1178_vm9 = vcmp.ge.f32.partialorder %v5386_v47, %v6324_v46  ;;  %vm1194_vm10 = vcmp.lt.f32.partialorder %v5386_v47, %v6329_v63  ;;  %v6652_v34 = vadd.f32 %v2585_v29, %v2549_v8 }
 0x13f   : > { %v3077_v59 = vmul.f32 %v3061_v39, %v2513_v21  ;;  %v4671_v61 = vsel %vm1050_vm6, 1.0, %v10886_v58  ;;  %vm1130_vm11 = vmand %vm1098_vm7, %vm1114_vm8  ;;  %vm1258_vm12 = vcmp.ge.f32.partialorder %v5386_v47, %v6329_v63  ;;  %vm1274_vm14 = vcmp.lt.f32.partialorder %v5386_v47, %v6359_v3 }
 0x140   : > { %10885 = vst [vmem:[#allocation55_spill] sm:$0xff] %v6652_v34  ;;  %v4687_v36 = vsel %vm1130_vm11, 1.0, %v10886_v58  ;;  %vm1210_vm13 = vmand %vm1178_vm9, %vm1194_vm10  ;;  %v1742_v33 = vmul.f32 %v6437_v37, %v822_v6  ;;  %v1778_v4 = vmul.f32 %v6443_v26, %v6637_v30  ;;  %v3113_v41 = vmul.f32 %v3097_v49, %v6652_v34 }
 0x141   : > { %v4703_v52 = vsel %vm1210_vm13, 1.0, %v10886_v58  ;;  %vm1290_vm15 = vmand %vm1258_vm12, %vm1274_vm14  ;;  %v1830_v39 = vmul.f32 %v6454_v62, %v6634_v12  ;;  %v1866_v48 = vmul.f32 %v6458_v2, %v6640_v57  ;;  %v1918_v29 = vmul.f32 %v6467_v19, %v6637_v30 }
 0x142   : > { %v6668_v8 = vsel %vm1290_vm15, 1.0, %v10886_v58  ;;  %v1758_v47 = vmul.f32 %v4671_v61, %v1742_v33  ;;  %v1794_v21 = vmul.f32 %v4687_v36, %v1778_v4  ;;  %v3129_v50 = vadd.f32 %v3113_v41, %v3077_v59 }
 0x143   : > { %10887 = vst [vmem:[#allocation56_spill] sm:$0xff] %v6668_v8  ;;  %v1846_v49 = vmul.f32 %v4687_v36, %v1830_v39  ;;  %v1882_v31 = vmul.f32 %v4703_v52, %v1866_v48  ;;  %v1954_v55 = vmul.f32 %v6476_v17, %v6643_v22  ;;  %v1934_v34 = vmul.f32 %v4703_v52, %v1918_v29  ;;  %v5387_v39 = vld [vmem:[%s6026_s16 + $0x20] sm:$0xff] }
 0x144   : > { %v1810_v13 = vadd.f32 %v1794_v21, %v1758_v47  ;;  %v2446_v53 = vmul.f32 %v6479_v51, %v822_v6  ;;  %v2482_v42 = vmul.f32 %v6482_v5, %v6640_v57  ;;  %3585 = vst [vmem:[#allocation2 + $0x258] sm:$0xff] %v3129_v50  ;;  %v2534_v59 = vmul.f32 %v6494_v23, %v6634_v12 }
 0x145   : > { %v1898_v61 = vadd.f32 %v1882_v31, %v1846_v49  ;;  %v1970_v33 = vmul.f32 %v6668_v8, %v1954_v55  ;;  %v2570_v36 = vmul.f32 %v6497_v1, %v6643_v22  ;;  %v3062_v41 = vmul.f32 %v6501_v44, %v822_v6 }
 0x146   : > { %v2462_v4 = vmul.f32 %v2446_v53, %v1810_v13  ;;  %v3098_v52 = vmul.f32 %v6513_v15, %v6643_v22  ;;  %v823_v48 = vsub.f32 %v5387_v39, %v6297_v56  ;;  %v6690_v55 = vsub.f32 %v5387_v39, %v6306_v45 }
 0x147   : > { %v6687_v47 = vadd.f32 %v1970_v33, %v1934_v34  ;;  %v2498_v31 = vmul.f32 %v2482_v42, %v1898_v61  ;;  %v2550_v50 = vmul.f32 %v2534_v59, %v1898_v61  ;;  %v6693_v21 = vsub.f32 %v5387_v39, %v6324_v46 }
 0x148   : > { %10889 = vst [vmem:[#allocation58_spill] sm:$0xff] %v6690_v55  ;;  %v6696_v13 = vsub.f32 %v5387_v39, %v6329_v63  ;;  %v6699_v6 = vsub.f32 %v5387_v39, %v6359_v3  ;;  %vm1019_vm0 = vcmp.ge.f32.partialorder %v5387_v39, %v6297_v56  ;;  %vm1035_vm1 = vcmp.lt.f32.partialorder %v5387_v39, %v6306_v45 }
 0x149   : > { %10888 = vst [vmem:[#allocation57_spill] sm:$0xff] %v6687_v47  ;;  %10890 = vst [vmem:[#allocation59_spill] sm:$0xff] %v6693_v21  ;;  %v2514_v53 = vadd.f32 %v2498_v31, %v2462_v4  ;;  %v2586_v34 = vmul.f32 %v2570_v36, %v6687_v47  ;;  %vm1099_vm2 = vcmp.ge.f32.partialorder %v5387_v39, %v6306_v45 }
 0x14a   : > { %10891 = vst [vmem:[#allocation60_spill] sm:$0xff] %v6696_v13  ;;  %10892 = vst [vmem:[#allocation61_spill] sm:$0xff] %v6699_v6  ;;  %vm1115_vm4 = vcmp.lt.f32.partialorder %v5387_v39, %v6324_v46  ;;  %vm1179_vm5 = vcmp.ge.f32.partialorder %v5387_v39, %v6324_v46  ;;  %vm1195_vm6 = vcmp.lt.f32.partialorder %v5387_v39, %v6329_v63 }
 0x14b   : > { %vm1051_vm3 = vmand %vm1019_vm0, %vm1035_vm1  ;;  %vm1259_vm7 = vcmp.ge.f32.partialorder %v5387_v39, %v6329_v63  ;;  %v6709_v42 = vadd.f32 %v2586_v34, %v2550_v50  ;;  %v3078_v29 = vmul.f32 %v3062_v41, %v2514_v53  ;;  %vm1275_vm9 = vcmp.lt.f32.partialorder %v5387_v39, %v6359_v3 }
 0x14c   : > { %v4672_v49 = vsel %vm1051_vm3, 1.0, %v10886_v58  ;;  %vm1131_vm8 = vmand %vm1099_vm2, %vm1115_vm4  ;;  %v1743_v33 = vmul.f32 %v6437_v37, %v823_v48  ;;  %v1779_v59 = vmul.f32 %v6443_v26, %v6693_v21  ;;  %v1831_v36 = vmul.f32 %v6454_v62, %v6690_v55 }
 0x14d   : > { %10893 = vst [vmem:[#allocation62_spill] sm:$0xff] %v6709_v42  ;;  %v4688_v61 = vsel %vm1131_vm8, 1.0, %v10886_v58  ;;  %vm1211_vm10 = vmand %vm1179_vm5, %vm1195_vm6  ;;  %v3114_v4 = vmul.f32 %v3098_v52, %v6709_v42  ;;  %v1867_v31 = vmul.f32 %v6458_v2, %v6696_v13  ;;  %v1919_v39 = vmul.f32 %v6467_v19, %v6693_v21 }
 0x14e   : > { %v4704_v41 = vsel %vm1211_vm10, 1.0, %v10886_v58  ;;  %vm1291_vm11 = vmand %vm1259_vm7, %vm1275_vm9  ;;  %v1759_v53 = vmul.f32 %v4672_v49, %v1743_v33  ;;  %v1795_v34 = vmul.f32 %v4688_v61, %v1779_v59  ;;  %v1847_v22 = vmul.f32 %v4688_v61, %v1831_v36 }
 0x14f   : > { %v6726_v50 = vsel %vm1291_vm11, 1.0, %v10886_v58  ;;  %v3130_v47 = vadd.f32 %v3114_v4, %v3078_v29  ;;  %v1883_v8 = vmul.f32 %v4704_v41, %v1867_v31  ;;  %v1935_v12 = vmul.f32 %v4704_v41, %v1919_v39  ;;  %v5388_v4 = vld [vmem:[%s6026_s16 + $0x28] sm:$0xff] }
 0x150   : > { %10894 = vst [vmem:[#allocation63_spill] sm:$0xff] %v6726_v50  ;;  %v1955_v52 = vmul.f32 %v6476_v17, %v6699_v6  ;;  %v1811_v42 = vadd.f32 %v1795_v34, %v1759_v53  ;;  %v2447_v30 = vmul.f32 %v6479_v51, %v823_v48  ;;  %v2483_v57 = vmul.f32 %v6482_v5, %v6696_v13 }
 0x151   : > { %v2535_v21 = vmul.f32 %v6494_v23, %v6690_v55  ;;  %3586 = vst [vmem:[#allocation2 + $0xc0] sm:$0xff] %v3130_v47  ;;  %v1899_v49 = vadd.f32 %v1883_v8, %v1847_v22  ;;  %v2571_v29 = vmul.f32 %v6497_v1, %v6699_v6  ;;  %v3063_v33 = vmul.f32 %v6501_v44, %v823_v48 }
 0x152   : > { %v1971_v61 = vmul.f32 %v6726_v50, %v1955_v52  ;;  %v2463_v59 = vmul.f32 %v2447_v30, %v1811_v42  ;;  %v3099_v36 = vmul.f32 %v6513_v15, %v6699_v6  ;;  %v824_v41 = vsub.f32 %v5388_v4, %v6297_v56 }
 0x153   : > { %v6744_v31 = vsub.f32 %v5388_v4, %v6306_v45  ;;  %v2499_v22 = vmul.f32 %v2483_v57, %v1899_v49  ;;  %v2551_v8 = vmul.f32 %v2535_v21, %v1899_v49  ;;  %v6749_v47 = vsub.f32 %v5388_v4, %v6324_v46 }
 0x154   : > { %v6746_v39 = vadd.f32 %v1971_v61, %v1935_v12  ;;  %v6752_v53 = vsub.f32 %v5388_v4, %v6329_v63  ;;  %v6755_v30 = vsub.f32 %v5388_v4, %v6359_v3  ;;  %vm1020_vm12 = vcmp.ge.f32.partialorder %v5388_v4, %v6297_v56 }
 0x155   : > { %10895 = vst [vmem:[#allocation64_spill] sm:$0xff] %v6744_v31  ;;  %10897 = vst [vmem:[#allocation66_spill] sm:$0xff] %v6749_v47  ;;  %vm1036_vm13 = vcmp.lt.f32.partialorder %v5388_v4, %v6306_v45  ;;  %v2515_v48 = vadd.f32 %v2499_v22, %v2463_v59  ;;  %vm1100_vm15 = vcmp.ge.f32.partialorder %v5388_v4, %v6306_v45 }
 0x156   : > { %10896 = vst [vmem:[#allocation65_spill] sm:$0xff] %v6746_v39  ;;  %10898 = vst [vmem:[#allocation67_spill] sm:$0xff] %v6752_v53  ;;  %v2587_v42 = vmul.f32 %v2571_v29, %v6746_v39  ;;  %vm1116_vm0 = vcmp.lt.f32.partialorder %v5388_v4, %v6324_v46  ;;  %vm1180_vm2 = vcmp.ge.f32.partialorder %v5388_v4, %v6324_v46 }
 0x157   : > { %10899 = vst [vmem:[#allocation68_spill] sm:$0xff] %v6755_v30  ;;  %vm1052_vm14 = vmand %vm1020_vm12, %vm1036_vm13  ;;  %vm1196_vm3 = vcmp.lt.f32.partialorder %v5388_v4, %v6329_v63  ;;  %vm1260_vm4 = vcmp.ge.f32.partialorder %v5388_v4, %v6329_v63  ;;  %v3079_v21 = vmul.f32 %v3063_v33, %v2515_v48  ;;  %vm1276_vm6 = vcmp.lt.f32.partialorder %v5388_v4, %v6359_v3 }
 0x158   : > { %v4673_v12 = vsel %vm1052_vm14, 1.0, %v10886_v58  ;;  %vm1132_vm1 = vmand %vm1100_vm15, %vm1116_vm0  ;;  %v6766_v57 = vadd.f32 %v2587_v42, %v2551_v8  ;;  %v1744_v49 = vmul.f32 %v6437_v37, %v824_v41  ;;  %v1780_v61 = vmul.f32 %v6443_v26, %v6749_v47 }
 0x159   : > { %v4689_v34 = vsel %vm1132_vm1, 1.0, %v10886_v58  ;;  %vm1212_vm5 = vmand %vm1180_vm2, %vm1196_vm3  ;;  %v1832_v29 = vmul.f32 %v6454_v62, %v6744_v31  ;;  %v1868_v22 = vmul.f32 %v6458_v2, %v6752_v53  ;;  %v1920_v4 = vmul.f32 %v6467_v19, %v6749_v47 }
 0x15a   : > { %10900 = vst [vmem:[#allocation69_spill] sm:$0xff] %v6766_v57  ;;  %v4705_v52 = vsel %vm1212_vm5, 1.0, %v10886_v58  ;;  %vm1292_vm7 = vmand %vm1260_vm4, %vm1276_vm6  ;;  %v3115_v59 = vmul.f32 %v3099_v36, %v6766_v57  ;;  %v1760_v8 = vmul.f32 %v4673_v12, %v1744_v49  ;;  %v1796_v48 = vmul.f32 %v4689_v34, %v1780_v61 }
 0x15b   : > { %v6778_v33 = vsel %vm1292_vm7, 1.0, %v10886_v58  ;;  %v1848_v42 = vmul.f32 %v4689_v34, %v1832_v29  ;;  %v1956_v6 = vmul.f32 %v6476_v17, %v6755_v30  ;;  %v1884_v55 = vmul.f32 %v4705_v52, %v1868_v22 }
 0x15c   : > { %10901 = vst [vmem:[#allocation70_spill] sm:$0xff] %v6778_v33  ;;  %v3131_v39 = vadd.f32 %v3115_v59, %v3079_v21  ;;  %v1936_v50 = vmul.f32 %v4705_v52, %v1920_v4  ;;  %v2448_v36 = vmul.f32 %v6479_v51, %v824_v41  ;;  %v1812_v57 = vadd.f32 %v1796_v48, %v1760_v8 }
 0x15d   : > { %v1972_v13 = vmul.f32 %v6778_v33, %v1956_v6  ;;  %v2484_v38 = vmul.f32 %v6482_v5, %v6752_v53  ;;  %v2536_v12 = vmul.f32 %v6494_v23, %v6744_v31  ;;  %v1900_v34 = vadd.f32 %v1884_v55, %v1848_v42  ;;  %v5389_v6 = vld [vmem:[%s6026_s16 + $0x30] sm:$0xff] }
 0x15e   : > { %3587 = vst [vmem:[#allocation2 + $0x130] sm:$0xff] %v3131_v39  ;;  %v2572_v49 = vmul.f32 %v6497_v1, %v6755_v30  ;;  %v3064_v21 = vmul.f32 %v6501_v44, %v824_v41  ;;  %v3100_v52 = vmul.f32 %v6513_v15, %v6755_v30  ;;  %v2464_v29 = vmul.f32 %v2448_v36, %v1812_v57 }
 0x15f   : > { %v6797_v61 = vadd.f32 %v1972_v13, %v1936_v50  ;;  %v825_v59 = vsub.f32 %v5389_v6, %v6297_v56  ;;  %v6802_v22 = vsub.f32 %v5389_v6, %v6306_v45  ;;  %v2500_v4 = vmul.f32 %v2484_v38, %v1900_v34 }
 0x160   : > { %v2552_v39 = vmul.f32 %v2536_v12, %v1900_v34  ;;  %v6805_v55 = vsub.f32 %v5389_v6, %v6324_v46  ;;  %v6808_v8 = vsub.f32 %v5389_v6, %v6329_v63  ;;  %v6812_v13 = vsub.f32 %v5389_v6, %v6359_v3 }
 0x161   : > { %10902 = vst [vmem:[#allocation71_spill] sm:$0xff] %v6797_v61  ;;  %10903 = vst [vmem:[#allocation72_spill] sm:$0xff] %v6802_v22  ;;  %v2588_v41 = vmul.f32 %v2572_v49, %v6797_v61  ;;  %vm1021_vm8 = vcmp.ge.f32.partialorder %v5389_v6, %v6297_v56  ;;  %vm1037_vm9 = vcmp.lt.f32.partialorder %v5389_v6, %v6306_v45 }
 0x162   : > { %10904 = vst [vmem:[#allocation73_spill] sm:$0xff] %v6805_v55  ;;  %10905 = vst [vmem:[#allocation74_spill] sm:$0xff] %v6808_v8  ;;  %v2516_v50 = vadd.f32 %v2500_v4, %v2464_v29  ;;  %vm1101_vm11 = vcmp.ge.f32.partialorder %v5389_v6, %v6306_v45  ;;  %vm1117_vm12 = vcmp.lt.f32.partialorder %v5389_v6, %v6324_v46 }
 0x163   : > { %10906 = vst [vmem:[#allocation75_spill] sm:$0xff] %v6812_v13  ;;  %vm1053_vm10 = vmand %vm1021_vm8, %vm1037_vm9  ;;  %vm1181_vm13 = vcmp.ge.f32.partialorder %v5389_v6, %v6324_v46  ;;  %v6819_v38 = vadd.f32 %v2588_v41, %v2552_v39  ;;  %vm1197_vm15 = vcmp.lt.f32.partialorder %v5389_v6, %v6329_v63  ;;  %vm1261_vm0 = vcmp.ge.f32.partialorder %v5389_v6, %v6329_v63 }
 0x164   : > { %v4674_v57 = vsel %vm1053_vm10, 1.0, %v10886_v58  ;;  %vm1133_vm14 = vmand %vm1101_vm11, %vm1117_vm12  ;;  %v3080_v48 = vmul.f32 %v3064_v21, %v2516_v50  ;;  %vm1277_vm2 = vcmp.lt.f32.partialorder %v5389_v6, %v6359_v3  ;;  %v1745_v36 = vmul.f32 %v6437_v37, %v825_v59 }
 0x165   : > { %10907 = vst [vmem:[#allocation76_spill] sm:$0xff] %v6819_v38  ;;  %v4690_v42 = vsel %vm1133_vm14, 1.0, %v10886_v58  ;;  %vm1213_vm1 = vmand %vm1181_vm13, %vm1197_vm15  ;;  %v3116_v12 = vmul.f32 %v3100_v52, %v6819_v38  ;;  %v1781_v49 = vmul.f32 %v6443_v26, %v6805_v55  ;;  %v1833_v29 = vmul.f32 %v6454_v62, %v6802_v22 }
 0x166   : > { %v4706_v34 = vsel %vm1213_vm1, 1.0, %v10886_v58  ;;  %vm1293_vm3 = vmand %vm1261_vm0, %vm1277_vm2  ;;  %v1761_v4 = vmul.f32 %v4674_v57, %v1745_v36  ;;  %v1869_v6 = vmul.f32 %v6458_v2, %v6808_v8  ;;  %v1921_v39 = vmul.f32 %v6467_v19, %v6805_v55 }
 0x167   : > { %v6834_v21 = vsel %vm1293_vm3, 1.0, %v10886_v58  ;;  %v3132_v52 = vadd.f32 %v3116_v12, %v3080_v48  ;;  %v1797_v41 = vmul.f32 %v4690_v42, %v1781_v49  ;;  %v1849_v50 = vmul.f32 %v4690_v42, %v1833_v29  ;;  %v5390_v29 = vld [vmem:[%s6026_s16 + $0x38] sm:$0xff] }
 0x168   : > { %10908 = vst [vmem:[#allocation77_spill] sm:$0xff] %v6834_v21  ;;  %v1957_v30 = vmul.f32 %v6476_v17, %v6812_v13  ;;  %v1885_v38 = vmul.f32 %v4706_v34, %v1869_v6  ;;  %v1937_v61 = vmul.f32 %v4706_v34, %v1921_v39  ;;  %v2449_v33 = vmul.f32 %v6479_v51, %v825_v59 }
 0x169   : > { %v2485_v57 = vmul.f32 %v6482_v5, %v6808_v8  ;;  %3588 = vst [vmem:[#allocation2 + $0x278] sm:$0xff] %v3132_v52  ;;  %v1813_v36 = vadd.f32 %v1797_v41, %v1761_v4  ;;  %v2537_v48 = vmul.f32 %v6494_v23, %v6802_v22  ;;  %v2573_v42 = vmul.f32 %v6497_v1, %v6812_v13 }
 0x16a   : > { %v1973_v31 = vmul.f32 %v6834_v21, %v1957_v30  ;;  %v1901_v12 = vadd.f32 %v1885_v38, %v1849_v50  ;;  %v3065_v49 = vmul.f32 %v6501_v44, %v825_v59  ;;  %v3101_v34 = vmul.f32 %v6513_v15, %v6812_v13 }
 0x16b   : > { %v826_v6 = vsub.f32 %v5390_v29, %v6297_v56  ;;  %v2465_v4 = vmul.f32 %v2449_v33, %v1813_v36  ;;  %v6858_v30 = vsub.f32 %v5390_v29, %v6306_v45  ;;  %v6861_v52 = vsub.f32 %v5390_v29, %v6324_v46 }
 0x16c   : > { %v6855_v39 = vadd.f32 %v1973_v31, %v1937_v61  ;;  %v2501_v41 = vmul.f32 %v2485_v57, %v1901_v12  ;;  %v2553_v21 = vmul.f32 %v2537_v48, %v1901_v12  ;;  %v6864_v38 = vsub.f32 %v5390_v29, %v6329_v63 }
 0x16d   : > { %10910 = vst [vmem:[#allocation79_spill] sm:$0xff] %v6858_v30  ;;  %10911 = vst [vmem:[#allocation80_spill] sm:$0xff] %v6861_v52  ;;  %v6867_v59 = vsub.f32 %v5390_v29, %v6359_v3  ;;  %vm1022_vm4 = vcmp.ge.f32.partialorder %v5390_v29, %v6297_v56  ;;  %vm1038_vm5 = vcmp.lt.f32.partialorder %v5390_v29, %v6306_v45 }
 0x16e   : > { %10909 = vst [vmem:[#allocation78_spill] sm:$0xff] %v6855_v39  ;;  %10912 = vst [vmem:[#allocation81_spill] sm:$0xff] %v6864_v38  ;;  %v2589_v50 = vmul.f32 %v2573_v42, %v6855_v39  ;;  %vm1102_vm6 = vcmp.ge.f32.partialorder %v5390_v29, %v6306_v45  ;;  %v2517_v31 = vadd.f32 %v2501_v41, %v2465_v4 }
 0x16f   : > { %10913 = vst [vmem:[#allocation82_spill] sm:$0xff] %v6867_v59  ;;  %vm1054_vm7 = vmand %vm1022_vm4, %vm1038_vm5  ;;  %vm1118_vm8 = vcmp.lt.f32.partialorder %v5390_v29, %v6324_v46  ;;  %vm1182_vm9 = vcmp.ge.f32.partialorder %v5390_v29, %v6324_v46  ;;  %vm1198_vm10 = vcmp.lt.f32.partialorder %v5390_v29, %v6329_v63  ;;  %vm1262_vm12 = vcmp.ge.f32.partialorder %v5390_v29, %v6329_v63 }
 0x170   : > { %v6876_v33 = vadd.f32 %v2589_v50, %v2553_v21  ;;  %v4675_v61 = vsel %vm1054_vm7, 1.0, %v10886_v58  ;;  %vm1134_vm11 = vmand %vm1102_vm6, %vm1118_vm8  ;;  %vm1278_vm13 = vcmp.lt.f32.partialorder %v5390_v29, %v6359_v3  ;;  %v3081_v57 = vmul.f32 %v3065_v49, %v2517_v31 }
 0x171   : > { %v4691_v36 = vsel %vm1134_vm11, 1.0, %v10886_v58  ;;  %vm1214_vm14 = vmand %vm1182_vm9, %vm1198_vm10  ;;  %v1746_v48 = vmul.f32 %v6437_v37, %v826_v6  ;;  %v1782_v42 = vmul.f32 %v6443_v26, %v6861_v52  ;;  %v1834_v4 = vmul.f32 %v6454_v62, %v6858_v30 }
 0x172   : > { %10914 = vst [vmem:[#allocation83_spill] sm:$0xff] %v6876_v33  ;;  %v3117_v12 = vmul.f32 %v3101_v34, %v6876_v33  ;;  %v4707_v21 = vsel %vm1214_vm14, 1.0, %v10886_v58  ;;  %vm1294_vm15 = vmand %vm1262_vm12, %vm1278_vm13  ;;  %v1870_v29 = vmul.f32 %v6458_v2, %v6864_v38  ;;  %v1922_v31 = vmul.f32 %v6467_v19, %v6861_v52 }
 0x173   : > { %v6892_v49 = vsel %vm1294_vm15, 1.0, %v10886_v58  ;;  %v1762_v41 = vmul.f32 %v4675_v61, %v1746_v48  ;;  %v1798_v50 = vmul.f32 %v4691_v36, %v1782_v42  ;;  %v1850_v34 = vmul.f32 %v4691_v36, %v1834_v4  ;;  %v5391_v4 = vld [vmem:[%s6026_s16 + $0x40] sm:$0xff] }
 0x174   : > { %10915 = vst [vmem:[#allocation84_spill] sm:$0xff] %v6892_v49  ;;  %v3133_v13 = vadd.f32 %v3117_v12, %v3081_v57  ;;  %v1886_v33 = vmul.f32 %v4707_v21, %v1870_v29  ;;  %v1958_v39 = vmul.f32 %v6476_v17, %v6867_v59  ;;  %v1938_v55 = vmul.f32 %v4707_v21, %v1922_v31 }
 0x175   : > { %v1814_v22 = vadd.f32 %v1798_v50, %v1762_v41  ;;  %v2450_v8 = vmul.f32 %v6479_v51, %v826_v6  ;;  %v2486_v47 = vmul.f32 %v6482_v5, %v6864_v38  ;;  %v2538_v57 = vmul.f32 %v6494_v23, %v6858_v30 }
 0x176   : > { %3589 = vst [vmem:[#allocation2 + $0x2c8] sm:$0xff] %v3133_v13  ;;  %v1902_v61 = vadd.f32 %v1886_v33, %v1850_v34  ;;  %v1974_v48 = vmul.f32 %v6892_v49, %v1958_v39  ;;  %v2574_v36 = vmul.f32 %v6497_v1, %v6867_v59  ;;  %v3066_v12 = vmul.f32 %v6501_v44, %v826_v6 }
 0x177   : > { %v2466_v42 = vmul.f32 %v2450_v8, %v1814_v22  ;;  %v3102_v21 = vmul.f32 %v6513_v15, %v6867_v59  ;;  %v827_v29 = vsub.f32 %v5391_v4, %v6297_v56  ;;  %v6914_v39 = vsub.f32 %v5391_v4, %v6306_v45 }
 0x178   : > { %v6911_v41 = vadd.f32 %v1974_v48, %v1938_v55  ;;  %v2502_v13 = vmul.f32 %v2486_v47, %v1902_v61  ;;  %v2554_v33 = vmul.f32 %v2538_v57, %v1902_v61  ;;  %v6917_v50 = vsub.f32 %v5391_v4, %v6324_v46 }
 0x179   : > { %10917 = vst [vmem:[#allocation86_spill] sm:$0xff] %v6914_v39  ;;  %v6920_v22 = vsub.f32 %v5391_v4, %v6329_v63  ;;  %v6923_v8 = vsub.f32 %v5391_v4, %v6359_v3  ;;  %vm1023_vm0 = vcmp.ge.f32.partialorder %v5391_v4, %v6297_v56  ;;  %vm1039_vm1 = vcmp.lt.f32.partialorder %v5391_v4, %v6306_v45 }
 0x17a   : > { %10916 = vst [vmem:[#allocation85_spill] sm:$0xff] %v6911_v41  ;;  %10918 = vst [vmem:[#allocation87_spill] sm:$0xff] %v6917_v50  ;;  %v2518_v6 = vadd.f32 %v2502_v13, %v2466_v42  ;;  %v2590_v55 = vmul.f32 %v2574_v36, %v6911_v41  ;;  %vm1103_vm2 = vcmp.ge.f32.partialorder %v5391_v4, %v6306_v45 }
 0x17b   : > { %10919 = vst [vmem:[#allocation88_spill] sm:$0xff] %v6920_v22  ;;  %10920 = vst [vmem:[#allocation89_spill] sm:$0xff] %v6923_v8  ;;  %vm1119_vm4 = vcmp.lt.f32.partialorder %v5391_v4, %v6324_v46  ;;  %vm1183_vm5 = vcmp.ge.f32.partialorder %v5391_v4, %v6324_v46  ;;  %vm1199_vm6 = vcmp.lt.f32.partialorder %v5391_v4, %v6329_v63 }
 0x17c   : > { %vm1055_vm3 = vmand %vm1023_vm0, %vm1039_vm1  ;;  %vm1263_vm7 = vcmp.ge.f32.partialorder %v5391_v4, %v6329_v63  ;;  %v6933_v47 = vadd.f32 %v2590_v55, %v2554_v33  ;;  %v3082_v31 = vmul.f32 %v3066_v12, %v2518_v6  ;;  %vm1279_vm9 = vcmp.lt.f32.partialorder %v5391_v4, %v6359_v3 }
 0x17d   : > { %v4676_v34 = vsel %vm1055_vm3, 1.0, %v10886_v58  ;;  %vm1135_vm8 = vmand %vm1103_vm2, %vm1119_vm4  ;;  %v1747_v48 = vmul.f32 %v6437_v37, %v827_v29  ;;  %v1783_v57 = vmul.f32 %v6443_v26, %v6917_v50  ;;  %v1835_v36 = vmul.f32 %v6454_v62, %v6914_v39 }
 0x17e   : > { %10921 = vst [vmem:[#allocation90_spill] sm:$0xff] %v6933_v47  ;;  %v4692_v61 = vsel %vm1135_vm8, 1.0, %v10886_v58  ;;  %vm1215_vm10 = vmand %vm1183_vm5, %vm1199_vm6  ;;  %v3118_v42 = vmul.f32 %v3102_v21, %v6933_v47  ;;  %v1871_v13 = vmul.f32 %v6458_v2, %v6920_v22  ;;  %v1923_v4 = vmul.f32 %v6467_v19, %v6917_v50 }
 0x17f   : > { %v4708_v12 = vsel %vm1215_vm10, 1.0, %v10886_v58  ;;  %vm1295_vm11 = vmand %vm1263_vm7, %vm1279_vm9  ;;  %v1763_v6 = vmul.f32 %v4676_v34, %v1747_v48  ;;  %v1799_v55 = vmul.f32 %v4692_v61, %v1783_v57  ;;  %v1851_v59 = vmul.f32 %v4692_v61, %v1835_v36 }
 0x180   : > { %v6950_v33 = vsel %vm1295_vm11, 1.0, %v10886_v58  ;;  %v3134_v41 = vadd.f32 %v3118_v42, %v3082_v31  ;;  %v1887_v30 = vmul.f32 %v4708_v12, %v1871_v13  ;;  %v1939_v49 = vmul.f32 %v4708_v12, %v1923_v4  ;;  %v5392_v42 = vld [vmem:[%s6026_s16 + $0x48] sm:$0xff] }
 0x181   : > { %10922 = vst [vmem:[#allocation91_spill] sm:$0xff] %v6950_v33  ;;  %v1959_v21 = vmul.f32 %v6476_v17, %v6923_v8  ;;  %v1815_v47 = vadd.f32 %v1799_v55, %v1763_v6  ;;  %v2451_v52 = vmul.f32 %v6479_v51, %v827_v29  ;;  %v2487_v38 = vmul.f32 %v6482_v5, %v6920_v22 }
 0x182   : > { %v2539_v50 = vmul.f32 %v6494_v23, %v6914_v39  ;;  %3590 = vst [vmem:[#allocation2 + $0x368] sm:$0xff] %v3134_v41  ;;  %v1903_v34 = vadd.f32 %v1887_v30, %v1851_v59  ;;  %v2575_v31 = vmul.f32 %v6497_v1, %v6923_v8  ;;  %v3067_v48 = vmul.f32 %v6501_v44, %v827_v29 }
 0x183   : > { %v1975_v61 = vmul.f32 %v6950_v33, %v1959_v21  ;;  %v2467_v57 = vmul.f32 %v2451_v52, %v1815_v47  ;;  %v3103_v36 = vmul.f32 %v6513_v15, %v6923_v8  ;;  %v828_v12 = vsub.f32 %v5392_v42, %v6297_v56 }
 0x184   : > { %v6968_v13 = vsub.f32 %v5392_v42, %v6306_v45  ;;  %v2503_v30 = vmul.f32 %v2487_v38, %v1903_v34  ;;  %v2555_v59 = vmul.f32 %v2539_v50, %v1903_v34  ;;  %v6973_v41 = vsub.f32 %v5392_v42, %v6324_v46 }
 0x185   : > { %v6970_v4 = vadd.f32 %v1975_v61, %v1939_v49  ;;  %v6976_v6 = vsub.f32 %v5392_v42, %v6329_v63  ;;  %v6979_v52 = vsub.f32 %v5392_v42, %v6359_v3  ;;  %vm1024_vm12 = vcmp.ge.f32.partialorder %v5392_v42, %v6297_v56 }
 0x186   : > { %10923 = vst [vmem:[#allocation92_spill] sm:$0xff] %v6968_v13  ;;  %10925 = vst [vmem:[#allocation94_spill] sm:$0xff] %v6973_v41  ;;  %vm1040_vm13 = vcmp.lt.f32.partialorder %v5392_v42, %v6306_v45  ;;  %v2519_v29 = vadd.f32 %v2503_v30, %v2467_v57  ;;  %vm1104_vm15 = vcmp.ge.f32.partialorder %v5392_v42, %v6306_v45 }
 0x187   : > { %10924 = vst [vmem:[#allocation93_spill] sm:$0xff] %v6970_v4  ;;  %10926 = vst [vmem:[#allocation95_spill] sm:$0xff] %v6976_v6  ;;  %v2591_v47 = vmul.f32 %v2575_v31, %v6970_v4  ;;  %vm1120_vm0 = vcmp.lt.f32.partialorder %v5392_v42, %v6324_v46  ;;  %vm1184_vm2 = vcmp.ge.f32.partialorder %v5392_v42, %v6324_v46 }
 0x188   : > { %10927 = vst [vmem:[#allocation96_spill] sm:$0xff] %v6979_v52  ;;  %vm1056_vm14 = vmand %vm1024_vm12, %vm1040_vm13  ;;  %vm1200_vm3 = vcmp.lt.f32.partialorder %v5392_v42, %v6329_v63  ;;  %vm1264_vm4 = vcmp.ge.f32.partialorder %v5392_v42, %v6329_v63  ;;  %v3083_v50 = vmul.f32 %v3067_v48, %v2519_v29  ;;  %vm1280_vm6 = vcmp.lt.f32.partialorder %v5392_v42, %v6359_v3 }
 0x189   : > { %v4677_v38 = vsel %vm1056_vm14, 1.0, %v10886_v58  ;;  %vm1136_vm1 = vmand %vm1104_vm15, %vm1120_vm0  ;;  %v6990_v49 = vadd.f32 %v2591_v47, %v2555_v59  ;;  %v1748_v34 = vmul.f32 %v6437_v37, %v828_v12  ;;  %v1784_v61 = vmul.f32 %v6443_v26, %v6973_v41 }
 0x18a   : > { %v4693_v55 = vsel %vm1136_vm1, 1.0, %v10886_v58  ;;  %vm1216_vm5 = vmand %vm1184_vm2, %vm1200_vm3  ;;  %v1836_v31 = vmul.f32 %v6454_v62, %v6968_v13  ;;  %v1872_v30 = vmul.f32 %v6458_v2, %v6976_v6  ;;  %v1924_v42 = vmul.f32 %v6467_v19, %v6973_v41 }
 0x18b   : > { %10928 = vst [vmem:[#allocation97_spill] sm:$0xff] %v6990_v49  ;;  %v4709_v21 = vsel %vm1216_vm5, 1.0, %v10886_v58  ;;  %vm1296_vm7 = vmand %vm1264_vm4, %vm1280_vm6  ;;  %v3119_v57 = vmul.f32 %v3103_v36, %v6990_v49  ;;  %v1764_v59 = vmul.f32 %v4677_v38, %v1748_v34  ;;  %v1800_v29 = vmul.f32 %v4693_v55, %v1784_v61 }
 0x18c   : > { %v7002_v48 = vsel %vm1296_vm7, 1.0, %v10886_v58  ;;  %v1852_v47 = vmul.f32 %v4693_v55, %v1836_v31  ;;  %v1960_v8 = vmul.f32 %v6476_v17, %v6979_v52  ;;  %v1888_v33 = vmul.f32 %v4709_v21, %v1872_v30 }
 0x18d   : > { %10929 = vst [vmem:[#allocation98_spill] sm:$0xff] %v7002_v48  ;;  %v3135_v4 = vadd.f32 %v3119_v57, %v3083_v50  ;;  %v1940_v39 = vmul.f32 %v4709_v21, %v1924_v42  ;;  %v2452_v36 = vmul.f32 %v6479_v51, %v828_v12  ;;  %v1816_v49 = vadd.f32 %v1800_v29, %v1764_v59 }
 0x18e   : > { %v1976_v22 = vmul.f32 %v7002_v48, %v1960_v8  ;;  %v2488_v53 = vmul.f32 %v6482_v5, %v6976_v6  ;;  %v2540_v38 = vmul.f32 %v6494_v23, %v6968_v13  ;;  %v1904_v55 = vadd.f32 %v1888_v33, %v1852_v47  ;;  %v5393_v8 = vld [vmem:[%s6026_s16 + $0x50] sm:$0xff] }
 0x18f   : > { %3591 = vst [vmem:[#allocation2 + $0x260] sm:$0xff] %v3135_v4  ;;  %v2576_v34 = vmul.f32 %v6497_v1, %v6979_v52  ;;  %v3068_v50 = vmul.f32 %v6501_v44, %v828_v12  ;;  %v3104_v21 = vmul.f32 %v6513_v15, %v6979_v52  ;;  %v2468_v31 = vmul.f32 %v2452_v36, %v1816_v49 }
 0x190   : > { %v7021_v61 = vadd.f32 %v1976_v22, %v1940_v39  ;;  %v829_v57 = vsub.f32 %v5393_v8, %v6297_v56  ;;  %v7026_v30 = vsub.f32 %v5393_v8, %v6306_v45  ;;  %v2504_v42 = vmul.f32 %v2488_v53, %v1904_v55 }
 0x191   : > { %v2556_v4 = vmul.f32 %v2540_v38, %v1904_v55  ;;  %v7029_v33 = vsub.f32 %v5393_v8, %v6324_v46  ;;  %v7032_v59 = vsub.f32 %v5393_v8, %v6329_v63  ;;  %v7036_v39 = vsub.f32 %v5393_v8, %v6359_v3 }
 0x192   : > { %10930 = vst [vmem:[#allocation99_spill] sm:$0xff] %v7021_v61  ;;  %10931 = vst [vmem:[#allocation100_spill] sm:$0xff] %v7026_v30  ;;  %v2592_v12 = vmul.f32 %v2576_v34, %v7021_v61  ;;  %vm1025_vm8 = vcmp.ge.f32.partialorder %v5393_v8, %v6297_v56  ;;  %vm1041_vm9 = vcmp.lt.f32.partialorder %v5393_v8, %v6306_v45 }
 0x193   : > { %10932 = vst [vmem:[#allocation101_spill] sm:$0xff] %v7029_v33  ;;  %10933 = vst [vmem:[#allocation102_spill] sm:$0xff] %v7032_v59  ;;  %v2520_v22 = vadd.f32 %v2504_v42, %v2468_v31  ;;  %vm1105_vm11 = vcmp.ge.f32.partialorder %v5393_v8, %v6306_v45  ;;  %vm1121_vm12 = vcmp.lt.f32.partialorder %v5393_v8, %v6324_v46 }
 0x194   : > { %10934 = vst [vmem:[#allocation103_spill] sm:$0xff] %v7036_v39  ;;  %vm1057_vm10 = vmand %vm1025_vm8, %vm1041_vm9  ;;  %vm1185_vm13 = vcmp.ge.f32.partialorder %v5393_v8, %v6324_v46  ;;  %v7043_v53 = vadd.f32 %v2592_v12, %v2556_v4  ;;  %vm1201_vm15 = vcmp.lt.f32.partialorder %v5393_v8, %v6329_v63  ;;  %vm1265_vm0 = vcmp.ge.f32.partialorder %v5393_v8, %v6329_v63 }
 0x195   : > { %v4678_v49 = vsel %vm1057_vm10, 1.0, %v10886_v58  ;;  %vm1137_vm14 = vmand %vm1105_vm11, %vm1121_vm12  ;;  %v3084_v29 = vmul.f32 %v3068_v50, %v2520_v22  ;;  %vm1281_vm2 = vcmp.lt.f32.partialorder %v5393_v8, %v6359_v3  ;;  %v1749_v36 = vmul.f32 %v6437_v37, %v829_v57 }
 0x196   : > { %10935 = vst [vmem:[#allocation104_spill] sm:$0xff] %v7043_v53  ;;  %v4694_v47 = vsel %vm1137_vm14, 1.0, %v10886_v58  ;;  %vm1217_vm1 = vmand %vm1185_vm13, %vm1201_vm15  ;;  %v3120_v38 = vmul.f32 %v3104_v21, %v7043_v53  ;;  %v1785_v34 = vmul.f32 %v6443_v26, %v7029_v33  ;;  %v1837_v31 = vmul.f32 %v6454_v62, %v7026_v30 }
 0x197   : > { %v4710_v55 = vsel %vm1217_vm1, 1.0, %v10886_v58  ;;  %vm1297_vm3 = vmand %vm1265_vm0, %vm1281_vm2  ;;  %v1765_v42 = vmul.f32 %v4678_v49, %v1749_v36  ;;  %v1873_v8 = vmul.f32 %v6458_v2, %v7032_v59  ;;  %v1925_v4 = vmul.f32 %v6467_v19, %v7029_v33 }
 0x198   : > { %v7058_v50 = vsel %vm1297_vm3, 1.0, %v10886_v58  ;;  %v3136_v21 = vadd.f32 %v3120_v38, %v3084_v29  ;;  %v1801_v12 = vmul.f32 %v4694_v47, %v1785_v34  ;;  %v1853_v22 = vmul.f32 %v4694_v47, %v1837_v31  ;;  %v7078_v31 = vld [vmem:[%s6026_s16 + $0x58] sm:$0xff] }
 0x199   : > { %10936 = vst [vmem:[#allocation105_spill] sm:$0xff] %v7058_v50  ;;  %v1961_v52 = vmul.f32 %v6476_v17, %v7036_v39  ;;  %v1889_v53 = vmul.f32 %v4710_v55, %v1873_v8  ;;  %v1941_v61 = vmul.f32 %v4710_v55, %v1925_v4  ;;  %v2453_v48 = vmul.f32 %v6479_v51, %v829_v57 }
 0x19a   : > { %v2489_v49 = vmul.f32 %v6482_v5, %v7032_v59  ;;  %3592 = vst [vmem:[#allocation2 + $0xf0] sm:$0xff] %v3136_v21  ;;  %v1817_v36 = vadd.f32 %v1801_v12, %v1765_v42  ;;  %v2541_v29 = vmul.f32 %v6494_v23, %v7026_v30  ;;  %v2577_v47 = vmul.f32 %v6497_v1, %v7036_v39 }
 0x19b   : > { %v1977_v13 = vmul.f32 %v7058_v50, %v1961_v52  ;;  %v1905_v38 = vadd.f32 %v1889_v53, %v1853_v22  ;;  %v3069_v34 = vmul.f32 %v6501_v44, %v829_v57  ;;  %v3105_v55 = vmul.f32 %v6513_v15, %v7036_v39  ;;  %10937 = vst [vmem:[#allocation106_spill] sm:$0xff] %v7078_v31 }
 0x19c   : > { %v830_v8 = vsub.f32 %v7078_v31, %v6297_v56  ;;  %v2469_v52 = vmul.f32 %v2453_v48, %v1817_v36  ;;  %v7086_v4 = vsub.f32 %v7078_v31, %v6306_v45  ;;  %v7090_v53 = vsub.f32 %v7078_v31, %v6324_v46 }
 0x19d   : > { %v7082_v42 = vadd.f32 %v1977_v13, %v1941_v61  ;;  %v2505_v57 = vmul.f32 %v2489_v49, %v1905_v38  ;;  %v2557_v21 = vmul.f32 %v2541_v29, %v1905_v38  ;;  %v7094_v12 = vsub.f32 %v7078_v31, %v6329_v63 }
 0x19e   : > { %10939 = vst [vmem:[#allocation108_spill] sm:$0xff] %v7086_v4  ;;  %10940 = vst [vmem:[#allocation109_spill] sm:$0xff] %v7090_v53  ;;  %v7098_v22 = vsub.f32 %v7078_v31, %v6359_v3  ;;  %vm1026_vm4 = vcmp.ge.f32.partialorder %v7078_v31, %v6297_v56  ;;  %vm1042_vm5 = vcmp.lt.f32.partialorder %v7078_v31, %v6306_v45 }
 0x19f   : > { %10938 = vst [vmem:[#allocation107_spill] sm:$0xff] %v7082_v42  ;;  %10941 = vst [vmem:[#allocation110_spill] sm:$0xff] %v7094_v12  ;;  %v2593_v13 = vmul.f32 %v2577_v47, %v7082_v42  ;;  %vm1106_vm6 = vcmp.ge.f32.partialorder %v7078_v31, %v6306_v45  ;;  %v2521_v48 = vadd.f32 %v2505_v57, %v2469_v52 }
 0x1a0   : > { %10942 = vst [vmem:[#allocation111_spill] sm:$0xff] %v7098_v22  ;;  %vm1058_vm7 = vmand %vm1026_vm4, %vm1042_vm5  ;;  %vm1122_vm8 = vcmp.lt.f32.partialorder %v7078_v31, %v6324_v46  ;;  %vm1186_vm9 = vcmp.ge.f32.partialorder %v7078_v31, %v6324_v46  ;;  %vm1202_vm10 = vcmp.lt.f32.partialorder %v7078_v31, %v6329_v63  ;;  %vm1266_vm12 = vcmp.ge.f32.partialorder %v7078_v31, %v6329_v63 }
 0x1a1   : > { %v7113_v61 = vadd.f32 %v2593_v13, %v2557_v21  ;;  %v4679_v49 = vsel %vm1058_vm7, 1.0, %v10886_v58  ;;  %vm1138_vm11 = vmand %vm1106_vm6, %vm1122_vm8  ;;  %vm1282_vm13 = vcmp.lt.f32.partialorder %v7078_v31, %v6359_v3  ;;  %v3085_v36 = vmul.f32 %v3069_v34, %v2521_v48 }
 0x1a2   : > { %v4695_v29 = vsel %vm1138_vm11, 1.0, %v10886_v58  ;;  %vm1218_vm14 = vmand %vm1186_vm9, %vm1202_vm10  ;;  %v1750_v47 = vmul.f32 %v6437_v37, %v830_v8  ;;  %v1786_v38 = vmul.f32 %v6443_v26, %v7090_v53  ;;  %v1838_v21 = vmul.f32 %v6454_v62, %v7086_v4 }
 0x1a3   : > { %10943 = vst [vmem:[#allocation112_spill] sm:$0xff] %v7113_v61  ;;  %v3121_v52 = vmul.f32 %v3105_v55, %v7113_v61  ;;  %v4711_v57 = vsel %vm1218_vm14, 1.0, %v10886_v58  ;;  %vm1298_vm15 = vmand %vm1266_vm12, %vm1282_vm13  ;;  %v1874_v13 = vmul.f32 %v6458_v2, %v7094_v12  ;;  %v1926_v31 = vmul.f32 %v6467_v19, %v7090_v53 }
 0x1a4   : > { %v7131_v34 = vsel %vm1298_vm15, 1.0, %v10886_v58  ;;  %v1766_v48 = vmul.f32 %v4679_v49, %v1750_v47  ;;  %v1802_v39 = vmul.f32 %v4695_v29, %v1786_v38  ;;  %v1854_v55 = vmul.f32 %v4695_v29, %v1838_v21 }
 0x1a5   : > { %10944 = vst [vmem:[#allocation113_spill] sm:$0xff] %v7131_v34  ;;  %v3137_v42 = vadd.f32 %v3121_v52, %v3085_v36  ;;  %v1890_v61 = vmul.f32 %v4711_v57, %v1874_v13  ;;  %v1962_v50 = vmul.f32 %v6476_v17, %v7098_v22  ;;  %v1942_v33 = vmul.f32 %v4711_v57, %v1926_v31  ;;  %v7149_v31 = vld [vmem:[%s6026_s16 + $0x60] sm:$0xff] }
 0x1a6   : > { %v1818_v30 = vadd.f32 %v1802_v39, %v1766_v48  ;;  %v2454_v59 = vmul.f32 %v6479_v51, %v830_v8  ;;  %v2490_v41 = vmul.f32 %v6482_v5, %v7094_v12  ;;  %v2542_v36 = vmul.f32 %v6494_v23, %v7086_v4  ;;  %10945 = vst [vmem:[#allocation114_spill] sm:$0xff] %v7149_v31 }
 0x1a7   : > { %3593 = vst [vmem:[#allocation2 + $0xf8] sm:$0xff] %v3137_v42  ;;  %v1906_v49 = vadd.f32 %v1890_v61, %v1854_v55  ;;  %v1978_v47 = vmul.f32 %v7131_v34, %v1962_v50  ;;  %v2578_v29 = vmul.f32 %v6497_v1, %v7098_v22  ;;  %v3070_v52 = vmul.f32 %v6501_v44, %v830_v8 }
 0x1a8   : > { %v2470_v38 = vmul.f32 %v2454_v59, %v1818_v30  ;;  %v3106_v39 = vmul.f32 %v6513_v15, %v7098_v22  ;;  %v831_v42 = vsub.f32 %v7149_v31, %v6297_v56  ;;  %v7157_v21 = vsub.f32 %v7149_v31, %v6306_v45 }
 0x1a9   : > { %v7153_v61 = vadd.f32 %v1978_v47, %v1942_v33  ;;  %v2506_v50 = vmul.f32 %v2490_v41, %v1906_v49  ;;  %v2558_v57 = vmul.f32 %v2542_v36, %v1906_v49  ;;  %v7161_v30 = vsub.f32 %v7149_v31, %v6324_v46 }
 0x1aa   : > { %10947 = vst [vmem:[#allocation116_spill] sm:$0xff] %v7157_v21  ;;  %v7165_v59 = vsub.f32 %v7149_v31, %v6329_v63  ;;  %v7169_v8 = vsub.f32 %v7149_v31, %v6359_v3  ;;  %vm1027_vm0 = vcmp.ge.f32.partialorder %v7149_v31, %v6297_v56  ;;  %vm1043_vm1 = vcmp.lt.f32.partialorder %v7149_v31, %v6306_v45 }
 0x1ab   : > { %10946 = vst [vmem:[#allocation115_spill] sm:$0xff] %v7153_v61  ;;  %10948 = vst [vmem:[#allocation117_spill] sm:$0xff] %v7161_v30  ;;  %v2522_v41 = vadd.f32 %v2506_v50, %v2470_v38  ;;  %v2594_v33 = vmul.f32 %v2578_v29, %v7153_v61  ;;  %vm1107_vm2 = vcmp.ge.f32.partialorder %v7149_v31, %v6306_v45 }
 0x1ac   : > { %10949 = vst [vmem:[#allocation118_spill] sm:$0xff] %v7165_v59  ;;  %10950 = vst [vmem:[#allocation119_spill] sm:$0xff] %v7169_v8  ;;  %vm1123_vm4 = vcmp.lt.f32.partialorder %v7149_v31, %v6324_v46  ;;  %vm1187_vm5 = vcmp.ge.f32.partialorder %v7149_v31, %v6324_v46  ;;  %vm1203_vm6 = vcmp.lt.f32.partialorder %v7149_v31, %v6329_v63 }
 0x1ad   : > { %vm1059_vm3 = vmand %vm1027_vm0, %vm1043_vm1  ;;  %vm1267_vm7 = vcmp.ge.f32.partialorder %v7149_v31, %v6329_v63  ;;  %v7186_v13 = vadd.f32 %v2594_v33, %v2558_v57  ;;  %v3086_v48 = vmul.f32 %v3070_v52, %v2522_v41  ;;  %vm1283_vm9 = vcmp.lt.f32.partialorder %v7149_v31, %v6359_v3 }
 0x1ae   : > { %v4680_v55 = vsel %vm1059_vm3, 1.0, %v10886_v58  ;;  %vm1139_vm8 = vmand %vm1107_vm2, %vm1123_vm4  ;;  %v1751_v47 = vmul.f32 %v6437_v37, %v831_v42  ;;  %v1787_v36 = vmul.f32 %v6443_v26, %v7161_v30  ;;  %v1839_v29 = vmul.f32 %v6454_v62, %v7157_v21 }
 0x1af   : > { %10951 = vst [vmem:[#allocation120_spill] sm:$0xff] %v7186_v13  ;;  %v4696_v49 = vsel %vm1139_vm8, 1.0, %v10886_v58  ;;  %vm1219_vm10 = vmand %vm1187_vm5, %vm1203_vm6  ;;  %v3122_v38 = vmul.f32 %v3106_v39, %v7186_v13  ;;  %v1875_v50 = vmul.f32 %v6458_v2, %v7165_v59  ;;  %v1927_v57 = vmul.f32 %v6467_v19, %v7161_v30 }
 0x1b0   : > { %v4712_v52 = vsel %vm1219_vm10, 1.0, %v10886_v58  ;;  %vm1299_vm11 = vmand %vm1267_vm7, %vm1283_vm9  ;;  %v1767_v33 = vmul.f32 %v4680_v55, %v1751_v47  ;;  %v1803_v22 = vmul.f32 %v4696_v49, %v1787_v36  ;;  %v1855_v31 = vmul.f32 %v4696_v49, %v1839_v29  ;;  %v7220_v29 = vld [vmem:[%s6026_s16 + $0x68] sm:$0xff] }
 0x1b1   : > { %v7204_v41 = vsel %vm1299_vm11, 1.0, %v10886_v58  ;;  %v3138_v61 = vadd.f32 %v3122_v38, %v3086_v48  ;;  %v1891_v4 = vmul.f32 %v4712_v52, %v1875_v50  ;;  %v1943_v34 = vmul.f32 %v4712_v52, %v1927_v57  ;;  %10953 = vst [vmem:[#allocation122_spill] sm:$0xff] %v7220_v29 }
 0x1b2   : > { %10952 = vst [vmem:[#allocation121_spill] sm:$0xff] %v7204_v41  ;;  %v1963_v39 = vmul.f32 %v6476_v17, %v7169_v8  ;;  %v1819_v13 = vadd.f32 %v1803_v22, %v1767_v33  ;;  %v2455_v53 = vmul.f32 %v6479_v51, %v831_v42  ;;  %v2491_v12 = vmul.f32 %v6482_v5, %v7165_v59 }
 0x1b3   : > { %v2543_v30 = vmul.f32 %v6494_v23, %v7157_v21  ;;  %3594 = vst [vmem:[#allocation2 + $0x2c0] sm:$0xff] %v3138_v61  ;;  %v1907_v55 = vadd.f32 %v1891_v4, %v1855_v31  ;;  %v2579_v48 = vmul.f32 %v6497_v1, %v7169_v8  ;;  %v3071_v47 = vmul.f32 %v6501_v44, %v831_v42 }
 0x1b4   : > { %v1979_v49 = vmul.f32 %v7204_v41, %v1963_v39  ;;  %v2471_v36 = vmul.f32 %v2455_v53, %v1819_v13  ;;  %v3107_v22 = vmul.f32 %v6513_v15, %v7169_v8  ;;  %v832_v38 = vsub.f32 %v7220_v29, %v6297_v56 }
 0x1b5   : > { %v7226_v61 = vsub.f32 %v7220_v29, %v6306_v45  ;;  %v2507_v31 = vmul.f32 %v2491_v12, %v1907_v55  ;;  %v2559_v52 = vmul.f32 %v2543_v30, %v1907_v55  ;;  %v7232_v42 = vsub.f32 %v7220_v29, %v6324_v46 }
 0x1b6   : > { %v7228_v4 = vadd.f32 %v1979_v49, %v1943_v34  ;;  %v7236_v53 = vsub.f32 %v7220_v29, %v6329_v63  ;;  %v7240_v13 = vsub.f32 %v7220_v29, %v6359_v3  ;;  %vm1028_vm12 = vcmp.ge.f32.partialorder %v7220_v29, %v6297_v56 }
 0x1b7   : > { %10954 = vst [vmem:[#allocation123_spill] sm:$0xff] %v7226_v61  ;;  %10956 = vst [vmem:[#allocation125_spill] sm:$0xff] %v7232_v42  ;;  %vm1044_vm13 = vcmp.lt.f32.partialorder %v7220_v29, %v6306_v45  ;;  %v2523_v12 = vadd.f32 %v2507_v31, %v2471_v36  ;;  %vm1108_vm15 = vcmp.ge.f32.partialorder %v7220_v29, %v6306_v45 }
 0x1b8   : > { %10955 = vst [vmem:[#allocation124_spill] sm:$0xff] %v7228_v4  ;;  %10957 = vst [vmem:[#allocation126_spill] sm:$0xff] %v7236_v53  ;;  %v2595_v34 = vmul.f32 %v2579_v48, %v7228_v4  ;;  %vm1124_vm0 = vcmp.lt.f32.partialorder %v7220_v29, %v6324_v46  ;;  %vm1188_vm2 = vcmp.ge.f32.partialorder %v7220_v29, %v6324_v46 }
 0x1b9   : > { %10958 = vst [vmem:[#allocation127_spill] sm:$0xff] %v7240_v13  ;;  %vm1060_vm14 = vmand %vm1028_vm12, %vm1044_vm13  ;;  %vm1204_vm3 = vcmp.lt.f32.partialorder %v7220_v29, %v6329_v63  ;;  %vm1268_vm4 = vcmp.ge.f32.partialorder %v7220_v29, %v6329_v63  ;;  %v3087_v57 = vmul.f32 %v3071_v47, %v2523_v12  ;;  %vm1284_vm6 = vcmp.lt.f32.partialorder %v7220_v29, %v6359_v3 }
 0x1ba   : > { %v4681_v30 = vsel %vm1060_vm14, 1.0, %v10886_v58  ;;  %vm1140_vm1 = vmand %vm1108_vm15, %vm1124_vm0  ;;  %v7258_v50 = vadd.f32 %v2595_v34, %v2559_v52  ;;  %v1752_v55 = vmul.f32 %v6437_v37, %v832_v38  ;;  %v1788_v49 = vmul.f32 %v6443_v26, %v7232_v42 }
 0x1bb   : > { %v4697_v33 = vsel %vm1140_vm1, 1.0, %v10886_v58  ;;  %vm1220_vm5 = vmand %vm1188_vm2, %vm1204_vm3  ;;  %v1840_v48 = vmul.f32 %v6454_v62, %v7226_v61  ;;  %v1876_v31 = vmul.f32 %v6458_v2, %v7236_v53  ;;  %v1928_v52 = vmul.f32 %v6467_v19, %v7232_v42 }
 0x1bc   : > { %10959 = vst [vmem:[#allocation128_spill] sm:$0xff] %v7258_v50  ;;  %v4713_v39 = vsel %vm1220_vm5, 1.0, %v10886_v58  ;;  %vm1300_vm7 = vmand %vm1268_vm4, %vm1284_vm6  ;;  %v3123_v36 = vmul.f32 %v3107_v22, %v7258_v50  ;;  %v1768_v12 = vmul.f32 %v4681_v30, %v1752_v55  ;;  %v1804_v34 = vmul.f32 %v4697_v33, %v1788_v49 }
 0x1bd   : > { %v7271_v47 = vsel %vm1300_vm7, 1.0, %v10886_v58  ;;  %v1856_v8 = vmul.f32 %v4697_v33, %v1840_v48  ;;  %v1964_v29 = vmul.f32 %v6476_v17, %v7240_v13  ;;  %v1892_v41 = vmul.f32 %v4713_v39, %v1876_v31 }
 0x1be   : > { %10960 = vst [vmem:[#allocation129_spill] sm:$0xff] %v7271_v47  ;;  %v3139_v4 = vadd.f32 %v3123_v36, %v3087_v57  ;;  %v1944_v21 = vmul.f32 %v4713_v39, %v1928_v52  ;;  %v2456_v22 = vmul.f32 %v6479_v51, %v832_v38  ;;  %v1820_v50 = vadd.f32 %v1804_v34, %v1768_v12 }
 0x1bf   : > { %v1980_v59 = vmul.f32 %v7271_v47, %v1964_v29  ;;  %v2492_v6 = vmul.f32 %v6482_v5, %v7236_v53  ;;  %v2544_v30 = vmul.f32 %v6494_v23, %v7226_v61  ;;  %v1908_v33 = vadd.f32 %v1892_v41, %v1856_v8  ;;  %v7293_v29 = vld [vmem:[%s6026_s16 + $0x70] sm:$0xff] }
 0x1c0   : > { %3595 = vst [vmem:[#allocation2 + $0x2a8] sm:$0xff] %v3139_v4  ;;  %v2580_v55 = vmul.f32 %v6497_v1, %v7240_v13  ;;  %v3072_v57 = vmul.f32 %v6501_v44, %v832_v38  ;;  %v3108_v39 = vmul.f32 %v6513_v15, %v7240_v13  ;;  %v2472_v48 = vmul.f32 %v2456_v22, %v1820_v50 }
 0x1c1   : > { %v7290_v49 = vadd.f32 %v1980_v59, %v1944_v21  ;;  %10962 = vst [vmem:[#allocation131_spill] sm:$0xff] %v7293_v29  ;;  %v833_v36 = vsub.f32 %v7293_v29, %v6297_v56  ;;  %v7299_v4 = vsub.f32 %v7293_v29, %v6306_v45  ;;  %v2508_v8 = vmul.f32 %v2492_v6, %v1908_v33 }
 0x1c2   : > { %v2560_v41 = vmul.f32 %v2544_v30, %v1908_v33  ;;  %v7303_v38 = vsub.f32 %v7293_v29, %v6324_v46  ;;  %v7307_v21 = vsub.f32 %v7293_v29, %v6329_v63  ;;  %v7312_v50 = vsub.f32 %v7293_v29, %v6359_v3 }
 0x1c3   : > { %10961 = vst [vmem:[#allocation130_spill] sm:$0xff] %v7290_v49  ;;  %v2596_v59 = vmul.f32 %v2580_v55, %v7290_v49  ;;  %vm1029_vm8 = vcmp.ge.f32.partialorder %v7293_v29, %v6297_v56  ;;  %vm1045_vm9 = vcmp.lt.f32.partialorder %v7293_v29, %v6306_v45  ;;  %v2524_v6 = vadd.f32 %v2508_v8, %v2472_v48 }
 0x1c4   : > { %10963 = vst [vmem:[#allocation132_spill] sm:$0xff] %v7307_v21  ;;  %10964 = vst [vmem:[#allocation133_spill] sm:$0xff] %v7312_v50  ;;  %vm1109_vm11 = vcmp.ge.f32.partialorder %v7293_v29, %v6306_v45  ;;  %vm1125_vm12 = vcmp.lt.f32.partialorder %v7293_v29, %v6324_v46  ;;  %vm1189_vm13 = vcmp.ge.f32.partialorder %v7293_v29, %v6324_v46 }
 0x1c5   : > { %vm1061_vm10 = vmand %vm1029_vm8, %vm1045_vm9  ;;  %v7324_v31 = vadd.f32 %v2596_v59, %v2560_v41  ;;  %vm1205_vm15 = vcmp.lt.f32.partialorder %v7293_v29, %v6329_v63  ;;  %vm1269_vm0 = vcmp.ge.f32.partialorder %v7293_v29, %v6329_v63  ;;  %v3088_v12 = vmul.f32 %v3072_v57, %v2524_v6 }
 0x1c6   : > { %v4682_v52 = vsel %vm1061_vm10, 1.0, %v10886_v58  ;;  %vm1141_vm14 = vmand %vm1109_vm11, %vm1125_vm12  ;;  %vm1285_vm2 = vcmp.lt.f32.partialorder %v7293_v29, %v6359_v3  ;;  %v1753_v22 = vmul.f32 %v6437_v37, %v833_v36  ;;  %v1789_v55 = vmul.f32 %v6443_v26, %v7303_v38 }
 0x1c7   : > { %10965 = vst [vmem:[#allocation134_spill] sm:$0xff] %v7324_v31  ;;  %v4698_v34 = vsel %vm1141_vm14, 1.0, %v10886_v58  ;;  %vm1221_vm1 = vmand %vm1189_vm13, %vm1205_vm15  ;;  %v3124_v30 = vmul.f32 %v3108_v39, %v7324_v31  ;;  %v1841_v48 = vmul.f32 %v6454_v62, %v7299_v4  ;;  %v1877_v41 = vmul.f32 %v6458_v2, %v7307_v21 }
 0x1c8   : > { %v4714_v33 = vsel %vm1221_vm1, 1.0, %v10886_v58  ;;  %vm1301_vm3 = vmand %vm1269_vm0, %vm1285_vm2  ;;  %v1769_v8 = vmul.f32 %v4682_v52, %v1753_v22  ;;  %v1929_v59 = vmul.f32 %v6467_v19, %v7303_v38  ;;  %v1805_v6 = vmul.f32 %v4698_v34, %v1789_v55 }
 0x1c9   : > { %v7342_v57 = vsel %vm1301_vm3, 1.0, %v10886_v58  ;;  %v3140_v39 = vadd.f32 %v3124_v30, %v3088_v12  ;;  %v1857_v13 = vmul.f32 %v4698_v34, %v1841_v48  ;;  %v1965_v29 = vmul.f32 %v6476_v17, %v7312_v50  ;;  %v7362_v48 = vld [vmem:[%s6026_s16 + $0x78] sm:$0xff] }
 0x1ca   : > { %v1893_v31 = vmul.f32 %v4714_v33, %v1877_v41  ;;  %v1945_v49 = vmul.f32 %v4714_v33, %v1929_v59  ;;  %v2457_v47 = vmul.f32 %v6479_v51, %v833_v36  ;;  %v2493_v52 = vmul.f32 %v6482_v5, %v7307_v21 }
 0x1cb   : > { %3596 = vst [vmem:[#allocation2 + $0x160] sm:$0xff] %v3140_v39  ;;  %v1821_v22 = vadd.f32 %v1805_v6, %v1769_v8  ;;  %v1981_v61 = vmul.f32 %v7342_v57, %v1965_v29  ;;  %v2545_v12 = vmul.f32 %v6494_v23, %v7299_v4  ;;  %v2581_v34 = vmul.f32 %v6497_v1, %v7312_v50 }
 0x1cc   : > { %v1909_v30 = vadd.f32 %v1893_v31, %v1857_v13  ;;  %v3073_v55 = vmul.f32 %v6501_v44, %v833_v36  ;;  %v3109_v33 = vmul.f32 %v6513_v15, %v7312_v50  ;;  %v834_v41 = vsub.f32 %v7362_v48, %v6297_v56 }
 0x1cd   : > { %v7366_v8 = vadd.f32 %v1981_v61, %v1945_v49  ;;  %v2473_v29 = vmul.f32 %v2457_v47, %v1821_v22  ;;  %v7370_v59 = vsub.f32 %v7362_v48, %v6306_v45  ;;  %v7374_v13 = vsub.f32 %v7362_v48, %v6324_v46 }
 0x1ce   : > { %v2509_v36 = vmul.f32 %v2493_v52, %v1909_v30  ;;  %v2561_v31 = vmul.f32 %v2545_v12, %v1909_v30  ;;  %v7378_v39 = vsub.f32 %v7362_v48, %v6329_v63  ;;  %v7382_v6 = vsub.f32 %v7362_v48, %v6359_v3 }
 0x1cf   : > { %v2597_v61 = vmul.f32 %v2581_v34, %v7366_v8  ;;  %vm1030_vm4 = vcmp.ge.f32.partialorder %v7362_v48, %v6297_v56  ;;  %vm1046_vm5 = vcmp.lt.f32.partialorder %v7362_v48, %v6306_v45  ;;  %vm1110_vm6 = vcmp.ge.f32.partialorder %v7362_v48, %v6306_v45 }
 0x1d0   : > { %10966 = vst [vmem:[#allocation135_spill] sm:$0xff] %v7382_v6  ;;  %v2525_v47 = vadd.f32 %v2509_v36, %v2473_v29  ;;  %vm1062_vm7 = vmand %vm1030_vm4, %vm1046_vm5  ;;  %vm1126_vm8 = vcmp.lt.f32.partialorder %v7362_v48, %v6324_v46  ;;  %vm1190_vm9 = vcmp.ge.f32.partialorder %v7362_v48, %v6324_v46  ;;  %vm1206_vm10 = vcmp.lt.f32.partialorder %v7362_v48, %v6329_v63 }
 0x1d1   : > { %v7397_v49 = vadd.f32 %v2597_v61, %v2561_v31  ;;  %v4683_v56 = vsel %vm1062_vm7, 1.0, %v10886_v58  ;;  %vm1142_vm11 = vmand %vm1110_vm6, %vm1126_vm8  ;;  %vm1270_vm12 = vcmp.ge.f32.partialorder %v7362_v48, %v6329_v63  ;;  %vm1286_vm13 = vcmp.lt.f32.partialorder %v7362_v48, %v6359_v3 }
 0x1d2   : > { %v3089_v45 = vmul.f32 %v3073_v55, %v2525_v47  ;;  %v4699_v52 = vsel %vm1142_vm11, 1.0, %v10886_v58  ;;  %vm1222_vm14 = vmand %vm1190_vm9, %vm1206_vm10  ;;  %v1754_v46 = vmul.f32 %v6437_v37, %v834_v41  ;;  %v1790_v22 = vmul.f32 %v6443_v26, %v7374_v13 }
 0x1d3   : > { %v3125_v12 = vmul.f32 %v3109_v33, %v7397_v49  ;;  %v4715_v34 = vsel %vm1222_vm14, 1.0, %v10886_v58  ;;  %vm1302_vm15 = vmand %vm1270_vm12, %vm1286_vm13  ;;  %v1842_v63 = vmul.f32 %v6454_v62, %v7370_v59  ;;  %v1878_v30 = vmul.f32 %v6458_v2, %v7378_v39 }
 0x1d4   : > { %v7415_v55 = vsel %vm1302_vm15, 1.0, %v10886_v58  ;;  %v1770_v29 = vmul.f32 %v4683_v56, %v1754_v46  ;;  %v1806_v36 = vmul.f32 %v4699_v52, %v1790_v22  ;;  %v1930_v37 = vmul.f32 %v6467_v19, %v7374_v13 }
 0x1d5   : > { %v3141_v26 = vadd.f32 %v3125_v12, %v3089_v45  ;;  %v1858_v31 = vmul.f32 %v4699_v52, %v1842_v63  ;;  %v1894_v33 = vmul.f32 %v4715_v34, %v1878_v30  ;;  %v1966_v61 = vmul.f32 %v6476_v17, %v7382_v6  ;;  %v7435_v12 = vld [vmem:[%s6026_s16] sm:$0xff] }
 0x1d6   : > { %v1822_v47 = vadd.f32 %v1806_v36, %v1770_v29  ;;  %v1946_v62 = vmul.f32 %v4715_v34, %v1930_v37  ;;  %v2458_v50 = vmul.f32 %v6479_v51, %v834_v41  ;;  %v2494_v2 = vmul.f32 %v6482_v5, %v7378_v39  ;;  %v7432_v51 = vld [vmem:[#allocation8 + $0x10] sm:$0x1f]  ;;  %v7466_v37 = vld [vmem:[#allocation9 + $0x10] sm:$0x1f] }
 0x1d7   : > { %3597 = vst [vmem:[#allocation2 + $0x2f0] sm:$0xff] %v3141_v26  ;;  %v1910_v56 = vadd.f32 %v1894_v33, %v1858_v31  ;;  %v1982_v46 = vmul.f32 %v7415_v55, %v1966_v61  ;;  %v2546_v19 = vmul.f32 %v6494_v23, %v7370_v59  ;;  %v2582_v45 = vmul.f32 %v6497_v1, %v7382_v6  ;;  %v7447_v1 = vld [vmem:[#allocation8] sm:$0xff] }
 0x1d8   : > { %v2474_v52 = vmul.f32 %v2458_v50, %v1822_v47  ;;  %v3074_v17 = vmul.f32 %v6501_v44, %v834_v41  ;;  %v3110_v22 = vmul.f32 %v6513_v15, %v7382_v6  ;;  %v7439_v5 = vsub.f32 %v7435_v12, %v6375_v20  ;;  %v7453_v15 = vld [vmem:[#allocation9] sm:$0xff]  ;;  %v7459_v41 = vld [vmem:[#allocation8 + $0x8] sm:$0xff]  ;;  %v7468_v26 = vld [vmem:[#allocation9 + $0x8] sm:$0xff] }
 0x1d9   : > { %v7441_v34 = vadd.f32 %v1982_v46, %v1946_v62  ;;  %v2510_v23 = vmul.f32 %v2494_v2, %v1910_v56  ;;  %v2562_v63 = vmul.f32 %v2546_v19, %v1910_v56  ;;  %vm1335_vm0 = vcmp.ge.f32.partialorder %v7435_v12, %v6359_v3  ;;  %v5404_v56 = vld [vmem:[#allocation6 + $0x8] sm:$0x3] }
 0x1da   : > { %10967 = vst [vmem:[#allocation136_spill] sm:$0xff] %v7439_v5  ;;  %vm1351_vm1 = vcmp.lt.f32.partialorder %v7435_v12, %v6375_v20  ;;  %v7451_v44 = vrot.slane %v7447_v1, %v6319_v32  ;;  %v7457_v50 = vrot.slane %v7453_v15, %v6319_v32  ;;  %v7463_v30 = vrot.slane %v7459_v41, %v6309_v27 }
 0x1db   : > { %v2526_v29 = vadd.f32 %v2510_v23, %v2474_v52  ;;  %v2598_v36 = vmul.f32 %v2582_v45, %v7441_v34  ;;  %vm1367_vm2 = vmand %vm1335_vm0, %vm1351_vm1  ;;  %v7472_v31 = vrot.slane %v7468_v26, %v6309_v27  ;;  %v7476_v33 = vrot.slane %v7432_v51, %v6291_v28 }
 0x1dc   : > { %v7479_v61 = vsel %vm1367_vm2, 1.0, %v10886_v58  ;;  %v2003_v47 = vmul.f32 %v7451_v44, %v6355_v43  ;;  %v2039_v62 = vmul.f32 %v7457_v50, %v7439_v5  ;;  %v2619_v2 = vmul.f32 %v7463_v30, %v6350_v40 }
 0x1dd   : > { %v7488_v46 = vrot.slane %v5404_v56, %v6300_v54  ;;  %v7490_v19 = vadd.f32 %v2598_v36, %v2562_v63  ;;  %v3090_v45 = vmul.f32 %v3074_v17, %v2526_v29  ;;  %v3147_v52 = vmul.f32 %v7476_v33, %v6339_v14  ;;  %v7505_v36 = vld [vmem:[%s6026_s16 + $0x8] sm:$0xff] }
 0x1de   : > { %v2019_v23 = vmul.f32 %v6447_v11, %v2003_v47  ;;  %v2055_v27 = vmul.f32 %v7479_v61, %v2039_v62  ;;  %v2655_v6 = vmul.f32 %v7472_v31, %v7439_v5  ;;  %v7500_v40 = vrot.slane %v7466_v37, %v6291_v28 }
 0x1df   : > { %10968 = vst [vmem:[#allocation137_spill] sm:$0xff] %v7488_v46  ;;  %v3126_v56 = vmul.f32 %v3110_v22, %v7490_v19  ;;  %v2635_v63 = vmul.f32 %v2619_v2, %v6508_v0  ;;  %v7509_v14 = vsub.f32 %v7505_v36, %v6375_v20  ;;  %vm1336_vm3 = vcmp.ge.f32.partialorder %v7505_v36, %v6359_v3 }
 0x1e0   : > { %v7513_v11 = vadd.f32 %v2055_v27, %v2019_v23  ;;  %v3163_v17 = vmul.f32 %v3147_v52, %v6534_v18  ;;  %vm1352_vm4 = vcmp.lt.f32.partialorder %v7505_v36, %v6375_v20  ;;  %v2004_v28 = vmul.f32 %v7451_v44, %v6528_v60 }
 0x1e1   : > { %10969 = vst [vmem:[#allocation138_spill] sm:$0xff] %v7509_v14  ;;  %v3142_v0 = vadd.f32 %v3126_v56, %v3090_v45  ;;  %v3183_v22 = vmul.f32 %v7500_v40, %v7439_v5  ;;  %vm1368_vm5 = vmand %vm1336_vm3, %vm1352_vm4  ;;  %v2040_v29 = vmul.f32 %v7457_v50, %v7509_v14  ;;  %v2620_v27 = vmul.f32 %v7463_v30, %v6525_v25  ;;  %v7538_v56 = vld [vmem:[%s6026_s16 + $0x10] sm:$0xff]  ;;  %v10978_v25 = vld [vmem:[#allocation55_spill] sm:$0xff] }
 0x1e2   : > { %v2671_v18 = vmul.f32 %v2655_v6, %v7513_v11  ;;  %v7528_v47 = vsel %vm1368_vm5, 1.0, %v10886_v58  ;;  %v2020_v62 = vmul.f32 %v6558_v24, %v2004_v28  ;;  %v3148_v2 = vmul.f32 %v7476_v33, %v6522_v35  ;;  %10971 = vst [vmem:[#allocation140_spill] sm:$0xff] %v7538_v56 }
 0x1e3   : > { %10970 = vst [vmem:[#allocation139_spill] sm:$0xff] %v7528_v47  ;;  %3598 = vst [vmem:[#allocation2 + $0x188] sm:$0xff] %v3142_v0  ;;  %v2056_v45 = vmul.f32 %v7528_v47, %v2040_v29  ;;  %v2636_v52 = vmul.f32 %v2620_v27, %v6581_v10  ;;  %v2656_v23 = vmul.f32 %v7472_v31, %v7509_v14  ;;  %v10977_v47 = vld [vmem:[#allocation50_spill] sm:$0xff] }
 0x1e4   : > { %v7542_v6 = vsub.f32 %v7538_v56, %v6375_v20  ;;  %v7544_v46 = vadd.f32 %v2671_v18, %v2635_v63  ;;  %v3184_v24 = vmul.f32 %v7500_v40, %v7509_v14  ;;  %vm1337_vm6 = vcmp.ge.f32.partialorder %v7538_v56, %v6359_v3  ;;  %v10975_v18 = vld [vmem:[#allocation45_spill] sm:$0xff] }
 0x1e5   : > { %vm1353_vm7 = vcmp.lt.f32.partialorder %v7538_v56, %v6375_v20  ;;  %v7552_v35 = vadd.f32 %v2056_v45, %v2020_v62  ;;  %v2005_v10 = vmul.f32 %v7451_v44, %v6584_v7  ;;  %v2621_v28 = vmul.f32 %v7463_v30, %v6579_v9  ;;  %v10976_v14 = vld [vmem:[#allocation49_spill] sm:$0xff] }
 0x1e6   : > { %10972 = vst [vmem:[#allocation141_spill] sm:$0xff] %v7542_v6  ;;  %vm1369_vm8 = vmand %vm1337_vm6, %vm1353_vm7  ;;  %v2041_v63 = vmul.f32 %v7457_v50, %v7542_v6  ;;  %v3199_v0 = vmul.f32 %v3183_v22, %v7544_v46  ;;  %v3164_v29 = vmul.f32 %v3148_v2, %v6599_v16  ;;  %v3149_v62 = vmul.f32 %v7476_v33, %v10975_v18  ;;  %v7575_v2 = vld [vmem:[%s6026_s16 + $0x18] sm:$0xff] }
 0x1e7   : > { %10973 = vst [vmem:[#allocation142_spill] sm:$0xff] %v7552_v35  ;;  %v7563_v27 = vsel %vm1369_vm8, 1.0, %v10886_v58  ;;  %v2672_v45 = vmul.f32 %v2656_v23, %v7552_v35  ;;  %v2021_v5 = vmul.f32 %v10976_v14, %v2005_v10  ;;  %v2657_v56 = vmul.f32 %v7472_v31, %v7542_v6  ;;  %10979 = vst [vmem:[#allocation45_spill] sm:$0xff] %v7575_v2  ;;  %v10983_v14 = vld [vmem:[#allocation53_spill] sm:$0xff] }
 0x1e8   : > { %10974 = vst [vmem:[#allocation143_spill] sm:$0xff] %v7563_v27  ;;  %v2057_v7 = vmul.f32 %v7563_v27, %v2041_v63  ;;  %v3215_v9 = vadd.f32 %v3199_v0, %v3163_v17  ;;  %v2637_v22 = vmul.f32 %v2621_v28, %v10977_v47  ;;  %v3165_v16 = vmul.f32 %v3149_v62, %v10978_v25  ;;  %v10986_v63 = vld [vmem:[#allocation51_spill] sm:$0xff]  ;;  %v10987_v0 = vld [vmem:[#allocation56_spill] sm:$0xff] }
 0x1e9   : > { %v7579_v60 = vsub.f32 %v7575_v2, %v6375_v20  ;;  %v7581_v18 = vadd.f32 %v2672_v45, %v2636_v52  ;;  %vm1338_vm9 = vcmp.ge.f32.partialorder %v7575_v2, %v6359_v3  ;;  %vm1354_vm10 = vcmp.lt.f32.partialorder %v7575_v2, %v6375_v20 }
 0x1ea   : > { %v7583_v23 = vadd.f32 %v2057_v7, %v2021_v5  ;;  %3599 = vst [vmem:[#allocation2 + $0x270] sm:$0xff] %v3215_v9  ;;  %v3185_v25 = vmul.f32 %v7500_v40, %v7542_v6  ;;  %vm1370_vm11 = vmand %vm1338_vm9, %vm1354_vm10  ;;  %v2006_v17 = vmul.f32 %v7451_v44, %v10983_v14  ;;  %v10984_v7 = vld [vmem:[#allocation52_spill] sm:$0xff]  ;;  %v3150_v28 = vmul.f32 %v7476_v33, %v10986_v63  ;;  %v10988_v6 = vld [vmem:[#allocation57_spill] sm:$0xff] }
 0x1eb   : > { %10980 = vst [vmem:[#allocation49_spill] sm:$0xff] %v7579_v60  ;;  %10981 = vst [vmem:[#allocation50_spill] sm:$0xff] %v7581_v18  ;;  %v2042_v47 = vmul.f32 %v7457_v50, %v7579_v60  ;;  %v2622_v5 = vmul.f32 %v7463_v30, %v10984_v7  ;;  %v3200_v52 = vmul.f32 %v3184_v24, %v7581_v18  ;;  %v7600_v9 = vsel %vm1370_vm11, 1.0, %v10886_v58  ;;  %v7614_v24 = vld [vmem:[%s6026_s16 + $0x20] sm:$0xff] }
 0x1ec   : > { %10982 = vst [vmem:[#allocation55_spill] sm:$0xff] %v7583_v23  ;;  %v2673_v10 = vmul.f32 %v2657_v56, %v7583_v23  ;;  %10985 = vst [vmem:[#allocation144_spill] sm:$0xff] %v7600_v9  ;;  %v2022_v62 = vmul.f32 %v10987_v0, %v2006_v17  ;;  %v2658_v2 = vmul.f32 %v7472_v31, %v7579_v60 }
 0x1ed   : > { %v2058_v45 = vmul.f32 %v7600_v9, %v2042_v47  ;;  %v2638_v14 = vmul.f32 %v2622_v5, %v10988_v6  ;;  %v3216_v7 = vadd.f32 %v3200_v52, %v3164_v29  ;;  %v3186_v56 = vmul.f32 %v7500_v40, %v7579_v60  ;;  %10990 = vst [vmem:[#allocation56_spill] sm:$0xff] %v7614_v24  ;;  %v10993_v6 = vld [vmem:[#allocation60_spill] sm:$0xff]  ;;  %v10994_v47 = vld [vmem:[#allocation62_spill] sm:$0xff]  ;;  %v10997_v60 = vld [vmem:[#allocation63_spill] sm:$0xff] }
 0x1ee   : > { %v7609_v27 = vadd.f32 %v2673_v10, %v2637_v22  ;;  %v7618_v63 = vsub.f32 %v7614_v24, %v6375_v20  ;;  %vm1339_vm12 = vcmp.ge.f32.partialorder %v7614_v24, %v6359_v3  ;;  %vm1355_vm13 = vcmp.lt.f32.partialorder %v7614_v24, %v6375_v20  ;;  %v10995_v10 = vld [vmem:[#allocation59_spill] sm:$0xff] }
 0x1ef   : > { %v7620_v17 = vadd.f32 %v2058_v45, %v2022_v62  ;;  %v2007_v29 = vmul.f32 %v7451_v44, %v10993_v6  ;;  %3600 = vst [vmem:[#allocation2 + $0xd0] sm:$0xff] %v3216_v7  ;;  %v3166_v5 = vmul.f32 %v3150_v28, %v10994_v47  ;;  %vm1371_vm14 = vmand %vm1339_vm12, %vm1355_vm13  ;;  %v2623_v0 = vmul.f32 %v7463_v30, %v10995_v10  ;;  %v10998_v7 = vld [vmem:[#allocation58_spill] sm:$0xff]  ;;  %v10999_v47 = vld [vmem:[#allocation65_spill] sm:$0xff] }
 0x1f0   : > { %10989 = vst [vmem:[#allocation51_spill] sm:$0xff] %v7609_v27  ;;  %10991 = vst [vmem:[#allocation57_spill] sm:$0xff] %v7618_v63  ;;  %v3201_v22 = vmul.f32 %v3185_v25, %v7609_v27  ;;  %v2043_v52 = vmul.f32 %v7457_v50, %v7618_v63  ;;  %v7636_v45 = vsel %vm1371_vm14, 1.0, %v10886_v58  ;;  %v3151_v24 = vmul.f32 %v7476_v33, %v10998_v7  ;;  %v7650_v10 = vld [vmem:[%s6026_s16 + $0x28] sm:$0xff] }
 0x1f1   : > { %10992 = vst [vmem:[#allocation145_spill] sm:$0xff] %v7620_v17  ;;  %v2674_v62 = vmul.f32 %v2658_v2, %v7620_v17  ;;  %10996 = vst [vmem:[#allocation62_spill] sm:$0xff] %v7636_v45  ;;  %v2023_v6 = vmul.f32 %v10997_v60, %v2007_v29  ;;  %v2639_v9 = vmul.f32 %v2623_v0, %v10999_v47 }
 0x1f2   : > { %v3217_v25 = vadd.f32 %v3201_v22, %v3165_v16  ;;  %v2059_v28 = vmul.f32 %v7636_v45, %v2043_v52  ;;  %v2659_v27 = vmul.f32 %v7472_v31, %v7618_v63  ;;  %v3187_v2 = vmul.f32 %v7500_v40, %v7618_v63  ;;  %11001 = vst [vmem:[#allocation58_spill] sm:$0xff] %v7650_v10  ;;  %v11005_v22 = vld [vmem:[#allocation66_spill] sm:$0xff] }
 0x1f3   : > { %v7645_v23 = vadd.f32 %v2674_v62, %v2638_v14  ;;  %v7654_v60 = vsub.f32 %v7650_v10, %v6375_v20  ;;  %vm1340_vm15 = vcmp.ge.f32.partialorder %v7650_v10, %v6359_v3  ;;  %vm1356_vm0 = vcmp.lt.f32.partialorder %v7650_v10, %v6375_v20  ;;  %v11004_v14 = vld [vmem:[#allocation67_spill] sm:$0xff]  ;;  %v11006_v62 = vld [vmem:[#allocation69_spill] sm:$0xff] }
 0x1f4   : > { %3601 = vst [vmem:[#allocation2 + $0x190] sm:$0xff] %v3217_v25  ;;  %v7658_v16 = vadd.f32 %v2059_v28, %v2023_v6  ;;  %v2008_v29 = vmul.f32 %v7451_v44, %v11004_v14  ;;  %v2624_v52 = vmul.f32 %v7463_v30, %v11005_v22  ;;  %v3167_v7 = vmul.f32 %v3151_v24, %v11006_v62  ;;  %vm1372_vm1 = vmand %vm1340_vm15, %vm1356_vm0  ;;  %v11007_v6 = vld [vmem:[#allocation64_spill] sm:$0xff]  ;;  %v11009_v14 = vld [vmem:[#allocation70_spill] sm:$0xff] }
 0x1f5   : > { %11000 = vst [vmem:[#allocation63_spill] sm:$0xff] %v7645_v23  ;;  %11002 = vst [vmem:[#allocation65_spill] sm:$0xff] %v7654_v60  ;;  %v3202_v0 = vmul.f32 %v3186_v56, %v7645_v23  ;;  %v2044_v25 = vmul.f32 %v7457_v50, %v7654_v60  ;;  %v3152_v28 = vmul.f32 %v7476_v33, %v11007_v6  ;;  %v7674_v63 = vsel %vm1372_vm1, 1.0, %v10886_v58  ;;  %v11010_v62 = vld [vmem:[#allocation71_spill] sm:$0xff]  ;;  %v11011_v23 = vld [vmem:[#allocation76_spill] sm:$0xff] }
 0x1f6   : > { %11003 = vst [vmem:[#allocation146_spill] sm:$0xff] %v7658_v16  ;;  %v2675_v47 = vmul.f32 %v2659_v27, %v7658_v16  ;;  %11008 = vst [vmem:[#allocation69_spill] sm:$0xff] %v7674_v63  ;;  %v2024_v10 = vmul.f32 %v11009_v14, %v2008_v29  ;;  %v2660_v22 = vmul.f32 %v7472_v31, %v7654_v60  ;;  %v7685_v6 = vld [vmem:[%s6026_s16 + $0x30] sm:$0xff]  ;;  %v11017_v14 = vld [vmem:[#allocation73_spill] sm:$0xff] }
 0x1f7   : > { %v3218_v56 = vadd.f32 %v3202_v0, %v3166_v5  ;;  %v2060_v24 = vmul.f32 %v7674_v63, %v2044_v25  ;;  %v2640_v45 = vmul.f32 %v2624_v52, %v11010_v62  ;;  %v3168_v17 = vmul.f32 %v3152_v28, %v11011_v23  ;;  %11013 = vst [vmem:[#allocation70_spill] sm:$0xff] %v7685_v6  ;;  %v11016_v23 = vld [vmem:[#allocation74_spill] sm:$0xff]  ;;  %v11018_v52 = vld [vmem:[#allocation72_spill] sm:$0xff]  ;;  %v11022_v63 = vld [vmem:[#allocation83_spill] sm:$0xff] }
 0x1f8   : > { %v7682_v18 = vadd.f32 %v2675_v47, %v2639_v9  ;;  %v7689_v27 = vsub.f32 %v7685_v6, %v6375_v20  ;;  %vm1341_vm2 = vcmp.ge.f32.partialorder %v7685_v6, %v6359_v3  ;;  %vm1357_vm3 = vcmp.lt.f32.partialorder %v7685_v6, %v6375_v20 }
 0x1f9   : > { %3602 = vst [vmem:[#allocation2 + $0x320] sm:$0xff] %v3218_v56  ;;  %v7695_v5 = vadd.f32 %v2060_v24, %v2024_v10  ;;  %vm1373_vm4 = vmand %vm1341_vm2, %vm1357_vm3  ;;  %v2009_v9 = vmul.f32 %v7451_v44, %v11016_v23  ;;  %v2625_v29 = vmul.f32 %v7463_v30, %v11017_v14  ;;  %v3153_v0 = vmul.f32 %v7476_v33, %v11018_v52  ;;  %v11020_v24 = vld [vmem:[#allocation77_spill] sm:$0xff]  ;;  %v11021_v23 = vld [vmem:[#allocation78_spill] sm:$0xff] }
 0x1fa   : > { %11012 = vst [vmem:[#allocation64_spill] sm:$0xff] %v7682_v18  ;;  %11014 = vst [vmem:[#allocation71_spill] sm:$0xff] %v7689_v27  ;;  %v3203_v25 = vmul.f32 %v3187_v2, %v7682_v18  ;;  %v3188_v28 = vmul.f32 %v7500_v40, %v7654_v60  ;;  %v7707_v47 = vsel %vm1373_vm4, 1.0, %v10886_v58  ;;  %v2045_v10 = vmul.f32 %v7457_v50, %v7689_v27  ;;  %v7719_v18 = vld [vmem:[%s6026_s16 + $0x38] sm:$0xff] }
 0x1fb   : > { %11015 = vst [vmem:[#allocation76_spill] sm:$0xff] %v7695_v5  ;;  %11019 = vst [vmem:[#allocation72_spill] sm:$0xff] %v7707_v47  ;;  %v2676_v56 = vmul.f32 %v2660_v22, %v7695_v5  ;;  %v2025_v62 = vmul.f32 %v11020_v24, %v2009_v9  ;;  %v2641_v14 = vmul.f32 %v2625_v29, %v11021_v23  ;;  %v11026_v22 = vld [vmem:[#allocation81_spill] sm:$0xff]  ;;  %v11028_v9 = vld [vmem:[#allocation80_spill] sm:$0xff] }
 0x1fc   : > { %v2661_v52 = vmul.f32 %v7472_v31, %v7689_v27  ;;  %v3219_v6 = vadd.f32 %v3203_v25, %v3167_v7  ;;  %v2061_v2 = vmul.f32 %v7707_v47, %v2045_v10  ;;  %v3169_v60 = vmul.f32 %v3153_v0, %v11022_v63  ;;  %11023 = vst [vmem:[#allocation77_spill] sm:$0xff] %v7719_v18  ;;  %v11030_v10 = vld [vmem:[#allocation84_spill] sm:$0xff]  ;;  %v7756_v47 = vld [vmem:[%s6026_s16 + $0x40] sm:$0xff] }
 0x1fd   : > { %v7723_v16 = vsub.f32 %v7719_v18, %v6375_v20  ;;  %v7725_v35 = vadd.f32 %v2676_v56, %v2640_v45  ;;  %vm1342_vm5 = vcmp.ge.f32.partialorder %v7719_v18, %v6359_v3  ;;  %vm1358_vm6 = vcmp.lt.f32.partialorder %v7719_v18, %v6375_v20  ;;  %v11031_v56 = vld [vmem:[#allocation79_spill] sm:$0xff]  ;;  %11033 = vst [vmem:[#allocation84_spill] sm:$0xff] %v7756_v47 }
 0x1fe   : > { %v2010_v7 = vmul.f32 %v7451_v44, %v11026_v22  ;;  %3603 = vst [vmem:[#allocation2 + $0xb0] sm:$0xff] %v3219_v6  ;;  %v7733_v63 = vadd.f32 %v2061_v2, %v2025_v62  ;;  %v3189_v23 = vmul.f32 %v7500_v40, %v7689_v27  ;;  %vm1374_vm7 = vmand %vm1342_vm5, %vm1358_vm6  ;;  %v2626_v29 = vmul.f32 %v7463_v30, %v11028_v9  ;;  %v11032_v27 = vld [vmem:[#allocation85_spill] sm:$0xff] }
 0x1ff   : > { %11024 = vst [vmem:[#allocation78_spill] sm:$0xff] %v7723_v16  ;;  %11025 = vst [vmem:[#allocation83_spill] sm:$0xff] %v7725_v35  ;;  %v2046_v45 = vmul.f32 %v7457_v50, %v7723_v16  ;;  %v3204_v0 = vmul.f32 %v3188_v28, %v7725_v35  ;;  %v7743_v25 = vsel %vm1374_vm7, 1.0, %v10886_v58  ;;  %v3154_v24 = vmul.f32 %v7476_v33, %v11031_v56  ;;  %v11039_v56 = vld [vmem:[#allocation87_spill] sm:$0xff] }
 0x200   : > { %11027 = vst [vmem:[#allocation147_spill] sm:$0xff] %v7733_v63  ;;  %11029 = vst [vmem:[#allocation148_spill] sm:$0xff] %v7743_v25  ;;  %v2026_v6 = vmul.f32 %v11030_v10, %v2010_v7  ;;  %v2677_v62 = vmul.f32 %v2661_v52, %v7733_v63  ;;  %v2642_v22 = vmul.f32 %v2626_v29, %v11032_v27  ;;  %v11038_v29 = vld [vmem:[#allocation90_spill] sm:$0xff] }
 0x201   : > { %v2062_v2 = vmul.f32 %v7743_v25, %v2046_v45  ;;  %v2662_v18 = vmul.f32 %v7472_v31, %v7723_v16  ;;  %v3220_v9 = vadd.f32 %v3204_v0, %v3168_v17  ;;  %v3190_v28 = vmul.f32 %v7500_v40, %v7723_v16  ;;  %v11037_v17 = vld [vmem:[#allocation88_spill] sm:$0xff] }
 0x202   : > { %v7760_v7 = vsub.f32 %v7756_v47, %v6375_v20  ;;  %vm1343_vm8 = vcmp.ge.f32.partialorder %v7756_v47, %v6359_v3  ;;  %v7764_v52 = vadd.f32 %v2677_v62, %v2641_v14  ;;  %vm1359_vm9 = vcmp.lt.f32.partialorder %v7756_v47, %v6375_v20  ;;  %v11040_v62 = vld [vmem:[#allocation86_spill] sm:$0xff] }
 0x203   : > { %v7766_v45 = vadd.f32 %v2062_v2, %v2026_v6  ;;  %v2011_v27 = vmul.f32 %v7451_v44, %v11037_v17  ;;  %3604 = vst [vmem:[#allocation2 + $0xe8] sm:$0xff] %v3220_v9  ;;  %v3170_v0 = vmul.f32 %v3154_v24, %v11038_v29  ;;  %vm1375_vm10 = vmand %vm1343_vm8, %vm1359_vm9  ;;  %v2627_v14 = vmul.f32 %v7463_v30, %v11039_v56  ;;  %v11042_v9 = vld [vmem:[#allocation91_spill] sm:$0xff]  ;;  %v11043_v29 = vld [vmem:[#allocation93_spill] sm:$0xff] }
 0x204   : > { %11034 = vst [vmem:[#allocation79_spill] sm:$0xff] %v7760_v7  ;;  %11035 = vst [vmem:[#allocation85_spill] sm:$0xff] %v7764_v52  ;;  %v2047_v10 = vmul.f32 %v7457_v50, %v7760_v7  ;;  %v3155_v6 = vmul.f32 %v7476_v33, %v11040_v62  ;;  %v3205_v2 = vmul.f32 %v3189_v23, %v7764_v52  ;;  %v7782_v17 = vsel %vm1375_vm10, 1.0, %v10886_v58  ;;  %v11044_v56 = vld [vmem:[#allocation97_spill] sm:$0xff]  ;;  %v7793_v23 = vld [vmem:[%s6026_s16 + $0x48] sm:$0xff] }
 0x205   : > { %11036 = vst [vmem:[#allocation149_spill] sm:$0xff] %v7766_v45  ;;  %v2678_v16 = vmul.f32 %v2662_v18, %v7766_v45  ;;  %11041 = vst [vmem:[#allocation90_spill] sm:$0xff] %v7782_v17  ;;  %v2027_v47 = vmul.f32 %v11042_v9, %v2011_v27  ;;  %v2643_v25 = vmul.f32 %v2627_v14, %v11043_v29  ;;  %v11053_v29 = vld [vmem:[#allocation98_spill] sm:$0xff] }
 0x206   : > { %v2063_v24 = vmul.f32 %v7782_v17, %v2047_v10  ;;  %v2663_v63 = vmul.f32 %v7472_v31, %v7760_v7  ;;  %v3171_v35 = vmul.f32 %v3155_v6, %v11044_v56  ;;  %v3221_v5 = vadd.f32 %v3205_v2, %v3169_v60  ;;  %11046 = vst [vmem:[#allocation91_spill] sm:$0xff] %v7793_v23  ;;  %v11049_v10 = vld [vmem:[#allocation95_spill] sm:$0xff]  ;;  %v11050_v60 = vld [vmem:[#allocation94_spill] sm:$0xff]  ;;  %v11051_v6 = vld [vmem:[#allocation92_spill] sm:$0xff] }
 0x207   : > { %v7790_v62 = vadd.f32 %v2678_v16, %v2642_v22  ;;  %v7797_v18 = vsub.f32 %v7793_v23, %v6375_v20  ;;  %vm1344_vm11 = vcmp.ge.f32.partialorder %v7793_v23, %v6359_v3  ;;  %vm1360_vm12 = vcmp.lt.f32.partialorder %v7793_v23, %v6375_v20  ;;  %v11055_v17 = vld [vmem:[#allocation104_spill] sm:$0xff] }
 0x208   : > { %v7801_v27 = vadd.f32 %v2063_v24, %v2027_v47  ;;  %v2012_v56 = vmul.f32 %v7451_v44, %v11049_v10  ;;  %v2628_v16 = vmul.f32 %v7463_v30, %v11050_v60  ;;  %3605 = vst [vmem:[#allocation2 + $0x110] sm:$0xff] %v3221_v5  ;;  %v3191_v14 = vmul.f32 %v7500_v40, %v7760_v7  ;;  %vm1376_vm13 = vmand %vm1344_vm11, %vm1360_vm12  ;;  %v11054_v10 = vld [vmem:[#allocation99_spill] sm:$0xff] }
 0x209   : > { %11045 = vst [vmem:[#allocation86_spill] sm:$0xff] %v7790_v62  ;;  %11047 = vst [vmem:[#allocation93_spill] sm:$0xff] %v7797_v18  ;;  %v3206_v22 = vmul.f32 %v3190_v28, %v7790_v62  ;;  %v2048_v47 = vmul.f32 %v7457_v50, %v7797_v18  ;;  %v3156_v2 = vmul.f32 %v7476_v33, %v11051_v6  ;;  %v7818_v24 = vsel %vm1376_vm13, 1.0, %v10886_v58  ;;  %v7829_v6 = vld [vmem:[%s6026_s16 + $0x50] sm:$0xff] }
 0x20a   : > { %11048 = vst [vmem:[#allocation97_spill] sm:$0xff] %v7801_v27  ;;  %v2679_v9 = vmul.f32 %v2663_v63, %v7801_v27  ;;  %11052 = vst [vmem:[#allocation92_spill] sm:$0xff] %v7818_v24  ;;  %v2028_v60 = vmul.f32 %v11053_v29, %v2012_v56  ;;  %v2664_v5 = vmul.f32 %v7472_v31, %v7797_v18  ;;  %v11064_v29 = vld [vmem:[#allocation105_spill] sm:$0xff] }
 0x20b   : > { %v3222_v28 = vadd.f32 %v3206_v22, %v3170_v0  ;;  %v2064_v7 = vmul.f32 %v7818_v24, %v2048_v47  ;;  %v2644_v23 = vmul.f32 %v2628_v16, %v11054_v10  ;;  %v3172_v62 = vmul.f32 %v3156_v2, %v11055_v17  ;;  %11057 = vst [vmem:[#allocation99_spill] sm:$0xff] %v7829_v6  ;;  %v11060_v10 = vld [vmem:[#allocation102_spill] sm:$0xff]  ;;  %v11061_v17 = vld [vmem:[#allocation101_spill] sm:$0xff]  ;;  %v11062_v16 = vld [vmem:[#allocation100_spill] sm:$0xff] }
 0x20c   : > { %v7826_v45 = vadd.f32 %v2679_v9, %v2643_v25  ;;  %v7833_v63 = vsub.f32 %v7829_v6, %v6375_v20  ;;  %vm1345_vm14 = vcmp.ge.f32.partialorder %v7829_v6, %v6359_v3  ;;  %vm1361_vm15 = vcmp.lt.f32.partialorder %v7829_v6, %v6375_v20  ;;  %v11066_v24 = vld [vmem:[#allocation112_spill] sm:$0xff] }
 0x20d   : > { %3606 = vst [vmem:[#allocation2 + $0x318] sm:$0xff] %v3222_v28  ;;  %v7839_v0 = vadd.f32 %v2064_v7, %v2028_v60  ;;  %vm1377_vm0 = vmand %vm1345_vm14, %vm1361_vm15  ;;  %v2013_v25 = vmul.f32 %v7451_v44, %v11060_v10  ;;  %v2629_v56 = vmul.f32 %v7463_v30, %v11061_v17  ;;  %v3157_v22 = vmul.f32 %v7476_v33, %v11062_v16  ;;  %v11065_v10 = vld [vmem:[#allocation107_spill] sm:$0xff] }
 0x20e   : > { %11056 = vst [vmem:[#allocation98_spill] sm:$0xff] %v7826_v45  ;;  %11058 = vst [vmem:[#allocation104_spill] sm:$0xff] %v7833_v63  ;;  %v3207_v47 = vmul.f32 %v3191_v14, %v7826_v45  ;;  %v3192_v2 = vmul.f32 %v7500_v40, %v7797_v18  ;;  %v7851_v9 = vsel %vm1377_vm0, 1.0, %v10886_v58  ;;  %v2049_v7 = vmul.f32 %v7457_v50, %v7833_v63  ;;  %v11067_v45 = vld [vmem:[#allocation106_spill] sm:$0xff] }
 0x20f   : > { %11059 = vst [vmem:[#allocation150_spill] sm:$0xff] %v7839_v0  ;;  %11063 = vst [vmem:[#allocation100_spill] sm:$0xff] %v7851_v9  ;;  %v2680_v60 = vmul.f32 %v2664_v5, %v7839_v0  ;;  %v2029_v28 = vmul.f32 %v11064_v29, %v2013_v25  ;;  %v2645_v17 = vmul.f32 %v2629_v56, %v11065_v10  ;;  %v11070_v5 = vld [vmem:[#allocation110_spill] sm:$0xff]  ;;  %v11072_v25 = vld [vmem:[#allocation109_spill] sm:$0xff] }
 0x210   : > { %v2665_v16 = vmul.f32 %v7472_v31, %v7833_v63  ;;  %v3223_v6 = vadd.f32 %v3207_v47, %v3171_v35  ;;  %v2065_v14 = vmul.f32 %v7851_v9, %v2049_v7  ;;  %v3173_v18 = vmul.f32 %v3157_v22, %v11066_v24  ;;  %v11074_v47 = vld [vmem:[#allocation113_spill] sm:$0xff]  ;;  %v11077_v9 = vld [vmem:[#allocation114_spill] sm:$0xff] }
 0x211   : > { %v7864_v27 = vsub.f32 %v11067_v45, %v6375_v20  ;;  %v7866_v52 = vadd.f32 %v2680_v60, %v2644_v23  ;;  %vm1346_vm1 = vcmp.ge.f32.partialorder %v11067_v45, %v6359_v3  ;;  %vm1362_vm2 = vcmp.lt.f32.partialorder %v11067_v45, %v6375_v20 }
 0x212   : > { %v2014_v10 = vmul.f32 %v7451_v44, %v11070_v5  ;;  %3607 = vst [vmem:[#allocation2 + $0x360] sm:$0xff] %v3223_v6  ;;  %v7874_v35 = vadd.f32 %v2065_v14, %v2029_v28  ;;  %v3193_v24 = vmul.f32 %v7500_v40, %v7833_v63  ;;  %vm1378_vm3 = vmand %vm1346_vm1, %vm1362_vm2  ;;  %v2630_v56 = vmul.f32 %v7463_v30, %v11072_v25  ;;  %v11075_v6 = vld [vmem:[#allocation108_spill] sm:$0xff]  ;;  %v11076_v14 = vld [vmem:[#allocation115_spill] sm:$0xff] }
 0x213   : > { %11068 = vst [vmem:[#allocation105_spill] sm:$0xff] %v7864_v27  ;;  %11069 = vst [vmem:[#allocation107_spill] sm:$0xff] %v7866_v52  ;;  %v2050_v23 = vmul.f32 %v7457_v50, %v7864_v27  ;;  %v3208_v22 = vmul.f32 %v3192_v2, %v7866_v52  ;;  %v7884_v45 = vsel %vm1378_vm3, 1.0, %v10886_v58  ;;  %v3158_v60 = vmul.f32 %v7476_v33, %v11075_v6  ;;  %v11081_v6 = vld [vmem:[#allocation117_spill] sm:$0xff] }
 0x214   : > { %11071 = vst [vmem:[#allocation112_spill] sm:$0xff] %v7874_v35  ;;  %11073 = vst [vmem:[#allocation106_spill] sm:$0xff] %v7884_v45  ;;  %v2030_v7 = vmul.f32 %v11074_v47, %v2014_v10  ;;  %v2681_v29 = vmul.f32 %v2665_v16, %v7874_v35  ;;  %v2646_v63 = vmul.f32 %v2630_v56, %v11076_v14  ;;  %v11080_v56 = vld [vmem:[#allocation120_spill] sm:$0xff] }
 0x215   : > { %v2066_v28 = vmul.f32 %v7884_v45, %v2050_v23  ;;  %v2666_v5 = vmul.f32 %v7472_v31, %v7864_v27  ;;  %v3224_v25 = vadd.f32 %v3208_v22, %v3172_v62  ;;  %v3194_v2 = vmul.f32 %v7500_v40, %v7864_v27  ;;  %v11079_v23 = vld [vmem:[#allocation118_spill] sm:$0xff] }
 0x216   : > { %v7898_v52 = vsub.f32 %v11077_v9, %v6375_v20  ;;  %vm1347_vm4 = vcmp.ge.f32.partialorder %v11077_v9, %v6359_v3  ;;  %v7902_v10 = vadd.f32 %v2681_v29, %v2645_v17  ;;  %vm1363_vm5 = vcmp.lt.f32.partialorder %v11077_v9, %v6375_v20  ;;  %v11082_v17 = vld [vmem:[#allocation116_spill] sm:$0xff] }
 0x217   : > { %v7904_v16 = vadd.f32 %v2066_v28, %v2030_v7  ;;  %v2015_v62 = vmul.f32 %v7451_v44, %v11079_v23  ;;  %3608 = vst [vmem:[#allocation2 + $0x338] sm:$0xff] %v3224_v25  ;;  %v3174_v22 = vmul.f32 %v3158_v60, %v11080_v56  ;;  %vm1379_vm6 = vmand %vm1347_vm4, %vm1363_vm5  ;;  %v2631_v14 = vmul.f32 %v7463_v30, %v11081_v6  ;;  %v11084_v25 = vld [vmem:[#allocation121_spill] sm:$0xff]  ;;  %v11085_v56 = vld [vmem:[#allocation124_spill] sm:$0xff] }
 0x218   : > { %11078 = vst [vmem:[#allocation113_spill] sm:$0xff] %v7898_v52  ;;  %v2051_v47 = vmul.f32 %v7457_v50, %v7898_v52  ;;  %v3159_v7 = vmul.f32 %v7476_v33, %v11082_v17  ;;  %v3209_v29 = vmul.f32 %v3193_v24, %v7902_v10  ;;  %v7920_v28 = vsel %vm1379_vm6, 1.0, %v10886_v58  ;;  %v11086_v6 = vld [vmem:[#allocation128_spill] sm:$0xff]  ;;  %v11087_v24 = vld [vmem:[#allocation122_spill] sm:$0xff] }
 0x219   : > { %v2682_v9 = vmul.f32 %v2666_v5, %v7904_v16  ;;  %11083 = vst [vmem:[#allocation108_spill] sm:$0xff] %v7920_v28  ;;  %v2031_v27 = vmul.f32 %v11084_v25, %v2015_v62  ;;  %v2647_v23 = vmul.f32 %v2631_v14, %v11085_v56  ;;  %v2667_v45 = vmul.f32 %v7472_v31, %v7898_v52  ;;  %v11089_v14 = vld [vmem:[#allocation123_spill] sm:$0xff]  ;;  %v11090_v25 = vld [vmem:[#allocation129_spill] sm:$0xff] }
 0x21a   : > { %v2067_v60 = vmul.f32 %v7920_v28, %v2051_v47  ;;  %v3175_v35 = vmul.f32 %v3159_v7, %v11086_v6  ;;  %v3225_v0 = vadd.f32 %v3209_v29, %v3173_v18  ;;  %v7932_v5 = vsub.f32 %v11087_v24, %v6375_v20 }
 0x21b   : > { %v7928_v17 = vadd.f32 %v2682_v9, %v2646_v63  ;;  %vm1348_vm7 = vcmp.ge.f32.partialorder %v11087_v24, %v6359_v3  ;;  %vm1364_vm8 = vcmp.lt.f32.partialorder %v11087_v24, %v6375_v20  ;;  %v2016_v47 = vmul.f32 %v7451_v44, %v7236_v53  ;;  %v11091_v24 = vld [vmem:[#allocation130_spill] sm:$0xff] }
 0x21c   : > { %11088 = vst [vmem:[#allocation115_spill] sm:$0xff] %v7932_v5  ;;  %v7936_v62 = vadd.f32 %v2067_v60, %v2031_v27  ;;  %v2632_v18 = vmul.f32 %v7463_v30, %v7232_v42  ;;  %3609 = vst [vmem:[#allocation2 + $0x298] sm:$0xff] %v3225_v0  ;;  %v3195_v6 = vmul.f32 %v7500_v40, %v7898_v52  ;;  %v11092_v42 = vld [vmem:[#allocation134_spill] sm:$0xff] }
 0x21d   : > { %v3210_v63 = vmul.f32 %v3194_v2, %v7928_v17  ;;  %vm1380_vm9 = vmand %vm1348_vm7, %vm1364_vm8  ;;  %v2052_v27 = vmul.f32 %v7457_v50, %v7932_v5  ;;  %v3160_v7 = vmul.f32 %v7476_v33, %v11089_v14  ;;  %v2032_v60 = vmul.f32 %v11090_v25, %v2016_v47  ;;  %v11093_v14 = vld [vmem:[#allocation131_spill] sm:$0xff] }
 0x21e   : > { %v2683_v29 = vmul.f32 %v2667_v45, %v7936_v62  ;;  %v7953_v9 = vsel %vm1380_vm9, 1.0, %v10886_v58  ;;  %v2668_v0 = vmul.f32 %v7472_v31, %v7932_v5  ;;  %v2648_v52 = vmul.f32 %v2632_v18, %v11091_v24 }
 0x21f   : > { %v3226_v2 = vadd.f32 %v3210_v63, %v3174_v22  ;;  %v2068_v56 = vmul.f32 %v7953_v9, %v2052_v27  ;;  %v3176_v53 = vmul.f32 %v3160_v7, %v11092_v42  ;;  %v7965_v45 = vsub.f32 %v11093_v14, %v6375_v20 }
 0x220   : > { %v7961_v28 = vadd.f32 %v2683_v29, %v2647_v23  ;;  %vm1349_vm10 = vcmp.ge.f32.partialorder %v11093_v14, %v6359_v3  ;;  %vm1365_vm11 = vcmp.lt.f32.partialorder %v11093_v14, %v6375_v20  ;;  %v2017_v47 = vmul.f32 %v7451_v44, %v7307_v21 }
 0x221   : > { %11094 = vst [vmem:[#allocation114_spill] sm:$0xff] %v7965_v45  ;;  %3610 = vst [vmem:[#allocation2 + $0x1d8] sm:$0xff] %v3226_v2  ;;  %v7971_v22 = vadd.f32 %v2068_v56, %v2032_v60  ;;  %v2633_v42 = vmul.f32 %v7463_v30, %v7303_v38  ;;  %v3161_v23 = vmul.f32 %v7476_v33, %v7299_v4 }
 0x222   : > { %vm1381_vm12 = vmand %vm1349_vm10, %vm1365_vm11  ;;  %v3211_v18 = vmul.f32 %v3195_v6, %v7961_v28  ;;  %v3196_v63 = vmul.f32 %v7500_v40, %v7932_v5  ;;  %v2053_v7 = vmul.f32 %v7457_v50, %v7965_v45  ;;  %v2033_v25 = vmul.f32 %v7342_v57, %v2017_v47  ;;  %v11125_v5 = vld [vmem:[#allocation145_spill] sm:$0xff] }
 0x223   : > { %v7983_v27 = vsel %vm1381_vm12, 1.0, %v10886_v58  ;;  %v2684_v29 = vmul.f32 %v2668_v0, %v7971_v22  ;;  %v2649_v60 = vmul.f32 %v2633_v42, %v7366_v8  ;;  %v2669_v4 = vmul.f32 %v7472_v31, %v7965_v45 }
 0x224   : > { %v3227_v2 = vadd.f32 %v3211_v18, %v3175_v35  ;;  %v2069_v6 = vmul.f32 %v7983_v27, %v2053_v7  ;;  %v3177_v56 = vmul.f32 %v3161_v23, %v7397_v49  ;;  %v7996_v24 = vsub.f32 %v7362_v48, %v6375_v20 }
 0x225   : > { %v7998_v14 = vadd.f32 %v2684_v29, %v2648_v52  ;;  %vm1350_vm13 = vcmp.ge.f32.partialorder %v7362_v48, %v6359_v3  ;;  %vm1366_vm14 = vcmp.lt.f32.partialorder %v7362_v48, %v6375_v20  ;;  %v2018_v57 = vmul.f32 %v7451_v44, %v7378_v39 }
 0x226   : > { %11095 = vst [vmem:[#allocation120_spill] sm:$0xff] %v7996_v24  ;;  %3611 = vst [vmem:[#allocation2 + $0x218] sm:$0xff] %v3227_v2  ;;  %v8006_v8 = vadd.f32 %v2069_v6, %v2033_v25  ;;  %v3197_v49 = vmul.f32 %v7500_v40, %v7965_v45  ;;  %v2054_v52 = vmul.f32 %v7457_v50, %v7996_v24 }
 0x227   : > { %vm1382_vm15 = vmand %vm1350_vm13, %vm1366_vm14  ;;  %v2634_v35 = vmul.f32 %v7463_v30, %v7374_v13  ;;  %v3212_v3 = vmul.f32 %v3196_v63, %v7998_v14  ;;  %v2034_v44 = vmul.f32 %v7415_v55, %v2018_v57  ;;  %v2670_v0 = vmul.f32 %v7472_v31, %v7996_v24  ;;  %v11096_v63 = vld [vmem:[#allocation39_spill] sm:$0xff] }
 0x228   : > { %v8016_v48 = vsel %vm1382_vm15, 1.0, %v10886_v58  ;;  %v2685_v47 = vmul.f32 %v2669_v4, %v8006_v8  ;;  %v3162_v50 = vmul.f32 %v7476_v33, %v7370_v59  ;;  %v3198_v18 = vmul.f32 %v7500_v40, %v7996_v24 }
 0x229   : > { %v2070_v42 = vmul.f32 %v8016_v48, %v2054_v52  ;;  %v2650_v23 = vmul.f32 %v2634_v35, %v7441_v34  ;;  %v3228_v30 = vadd.f32 %v3212_v3, %v3176_v53  ;;  %v8030_v7 = vsub.f32 %v7435_v12, %v11096_v63  ;;  %v11098_v34 = vld [vmem:[#allocation33_spill] sm:$0xff] }
 0x22a   : > { %vm1415_vm0 = vcmp.ge.f32.partialorder %v7435_v12, %v6375_v20  ;;  %v8034_v55 = vadd.f32 %v2685_v47, %v2649_v60  ;;  %vm1431_vm1 = vcmp.lt.f32.partialorder %v7435_v12, %v11096_v63  ;;  %v8042_v53 = vrot.slane %v7447_v1, %v11098_v34  ;;  %v11103_v47 = vld [vmem:[#allocation43_spill] sm:$0xff] }
 0x22b   : > { %11097 = vst [vmem:[#allocation116_spill] sm:$0xff] %v8030_v7  ;;  %v8036_v31 = vadd.f32 %v2070_v42, %v2034_v44  ;;  %3612 = vst [vmem:[#allocation2 + $0x1f0] sm:$0xff] %v3228_v30  ;;  %v8046_v40 = vrot.slane %v7453_v15, %v11098_v34  ;;  %v8050_v59 = vrot.slane %v7459_v41, %v6319_v32  ;;  %v11099_v15 = vld [vmem:[#allocation38_spill] sm:$0xff] }
 0x22c   : > { %vm1447_vm2 = vmand %vm1415_vm0, %vm1431_vm1  ;;  %v8054_v33 = vrot.slane %v7468_v26, %v6319_v32  ;;  %v8058_v12 = vrot.slane %v7432_v51, %v6300_v54  ;;  %v3213_v1 = vmul.f32 %v3197_v49, %v8034_v55  ;;  %v2091_v60 = vmul.f32 %v8042_v53, %v11099_v15  ;;  %v11100_v51 = vld [vmem:[#allocation35_spill] sm:$0xff] }
 0x22d   : > { %v2686_v29 = vmul.f32 %v2670_v0, %v8036_v31  ;;  %v8063_v25 = vsel %vm1447_vm2, 1.0, %v10886_v58  ;;  %v3178_v41 = vmul.f32 %v3162_v50, %v7490_v19  ;;  %v2127_v26 = vmul.f32 %v8046_v40, %v8030_v7  ;;  %v11116_v32 = vld [vmem:[#allocation51_spill] sm:$0xff] }
 0x22e   : > { %v2707_v4 = vmul.f32 %v8050_v59, %v6355_v43  ;;  %v3235_v2 = vmul.f32 %v8058_v12, %v11100_v51  ;;  %v3229_v6 = vadd.f32 %v3213_v1, %v3177_v56  ;;  %v2107_v49 = vmul.f32 %v7479_v61, %v2091_v60  ;;  %v11105_v1 = vld [vmem:[#allocation139_spill] sm:$0xff]  ;;  %v11107_v51 = vld [vmem:[#allocation50_spill] sm:$0xff] }
 0x22f   : > { %v8074_v57 = vadd.f32 %v2686_v29, %v2650_v23  ;;  %v8079_v52 = vrot.slane %v7466_v37, %v6300_v54  ;;  %v2143_v19 = vmul.f32 %v8063_v25, %v2127_v26  ;;  %v2743_v3 = vmul.f32 %v8054_v33, %v8030_v7  ;;  %v11102_v37 = vld [vmem:[#allocation44_spill] sm:$0xff] }
 0x230   : > { %v2723_v35 = vmul.f32 %v2707_v4, %v7513_v11  ;;  %v8087_v44 = vsub.f32 %v7505_v36, %v11096_v63  ;;  %3613 = vst [vmem:[#allocation2 + $0x140] sm:$0xff] %v3229_v6  ;;  %v3251_v61 = vmul.f32 %v3235_v2, %v7544_v46  ;;  %vm1416_vm3 = vcmp.ge.f32.partialorder %v7505_v36, %v6375_v20  ;;  %v11108_v6 = vld [vmem:[#allocation140_spill] sm:$0xff] }
 0x231   : > { %v3214_v56 = vmul.f32 %v3198_v18, %v8074_v57  ;;  %vm1432_vm4 = vcmp.lt.f32.partialorder %v7505_v36, %v11096_v63  ;;  %v8095_v54 = vadd.f32 %v2143_v19, %v2107_v49  ;;  %v2092_v11 = vmul.f32 %v8042_v53, %v11102_v37  ;;  %v11104_v36 = vld [vmem:[#allocation42_spill] sm:$0xff] }
 0x232   : > { %11101 = vst [vmem:[#allocation121_spill] sm:$0xff] %v8087_v44  ;;  %vm1448_vm5 = vmand %vm1416_vm3, %vm1432_vm4  ;;  %v2128_v0 = vmul.f32 %v8046_v40, %v8087_v44  ;;  %v2708_v42 = vmul.f32 %v8050_v59, %v11103_v47  ;;  %v3271_v46 = vmul.f32 %v8079_v52, %v8030_v7  ;;  %v3236_v30 = vmul.f32 %v8058_v12, %v11104_v36 }
 0x233   : > { %v3230_v23 = vadd.f32 %v3214_v56, %v3178_v41  ;;  %v8106_v50 = vsel %vm1448_vm5, 1.0, %v10886_v58  ;;  %v2759_v18 = vmul.f32 %v2743_v3, %v8095_v54  ;;  %v2108_v29 = vmul.f32 %v11105_v1, %v2092_v11  ;;  %v11106_v41 = vld [vmem:[#allocation142_spill] sm:$0xff]  ;;  %v11110_v56 = vld [vmem:[#allocation48_spill] sm:$0xff] }
 0x234   : > { %v2144_v60 = vmul.f32 %v8106_v50, %v2128_v0  ;;  %v2744_v26 = vmul.f32 %v8054_v33, %v8087_v44  ;;  %v2724_v4 = vmul.f32 %v2708_v42, %v11106_v41  ;;  %v3252_v2 = vmul.f32 %v3236_v30, %v11107_v51 }
 0x235   : > { %3614 = vst [vmem:[#allocation2 + $0xa0] sm:$0xff] %v3230_v23  ;;  %v8119_v49 = vsub.f32 %v11108_v6, %v11096_v63  ;;  %vm1417_vm6 = vcmp.ge.f32.partialorder %v11108_v6, %v6375_v20  ;;  %v8123_v19 = vadd.f32 %v2759_v18, %v2723_v35  ;;  %vm1433_vm7 = vcmp.lt.f32.partialorder %v11108_v6, %v11096_v63  ;;  %v11111_v23 = vld [vmem:[#allocation47_spill] sm:$0xff]  ;;  %v11112_v35 = vld [vmem:[#allocation46_spill] sm:$0xff] }
 0x236   : > { %v8125_v3 = vadd.f32 %v2144_v60, %v2108_v29  ;;  %v2093_v11 = vmul.f32 %v8042_v53, %v11110_v56  ;;  %v3272_v0 = vmul.f32 %v8079_v52, %v8087_v44  ;;  %vm1449_vm8 = vmand %vm1417_vm6, %vm1433_vm7  ;;  %v2709_v36 = vmul.f32 %v8050_v59, %v11111_v23  ;;  %v11114_v60 = vld [vmem:[#allocation143_spill] sm:$0xff] }
 0x237   : > { %11109 = vst [vmem:[#allocation124_spill] sm:$0xff] %v8119_v49  ;;  %v2129_v42 = vmul.f32 %v8046_v40, %v8119_v49  ;;  %v3237_v30 = vmul.f32 %v8058_v12, %v11112_v35  ;;  %v3287_v18 = vmul.f32 %v3271_v46, %v8123_v19  ;;  %v8142_v29 = vsel %vm1449_vm8, 1.0, %v10886_v58  ;;  %v11115_v6 = vld [vmem:[#allocation55_spill] sm:$0xff]  ;;  %v11117_v46 = vld [vmem:[#allocation45_spill] sm:$0xff] }
 0x238   : > { %v2760_v1 = vmul.f32 %v2744_v26, %v8125_v3  ;;  %11113 = vst [vmem:[#allocation128_spill] sm:$0xff] %v8142_v29  ;;  %v2109_v41 = vmul.f32 %v11114_v60, %v2093_v11  ;;  %v2725_v44 = vmul.f32 %v2709_v36, %v11115_v6  ;;  %v2745_v7 = vmul.f32 %v8054_v33, %v8119_v49  ;;  %v11121_v60 = vld [vmem:[#allocation53_spill] sm:$0xff]  ;;  %v11124_v6 = vld [vmem:[#allocation144_spill] sm:$0xff] }
 0x239   : > { %v2145_v51 = vmul.f32 %v8142_v29, %v2129_v42  ;;  %v3253_v24 = vmul.f32 %v3237_v30, %v11116_v32  ;;  %v3303_v45 = vadd.f32 %v3287_v18, %v3251_v61  ;;  %v8154_v26 = vsub.f32 %v11117_v46, %v11096_v63  ;;  %v11120_v42 = vld [vmem:[#allocation54_spill] sm:$0xff]  ;;  %v11122_v18 = vld [vmem:[#allocation52_spill] sm:$0xff] }
 0x23a   : > { %v8150_v35 = vadd.f32 %v2760_v1, %v2724_v4  ;;  %vm1418_vm9 = vcmp.ge.f32.partialorder %v11117_v46, %v6375_v20  ;;  %vm1434_vm10 = vcmp.lt.f32.partialorder %v11117_v46, %v11096_v63  ;;  %v2094_v36 = vmul.f32 %v8042_v53, %v11120_v42  ;;  %v11126_v42 = vld [vmem:[#allocation63_spill] sm:$0xff] }
 0x23b   : > { %11118 = vst [vmem:[#allocation122_spill] sm:$0xff] %v8154_v26  ;;  %v8158_v11 = vadd.f32 %v2145_v51, %v2109_v41  ;;  %v2710_v32 = vmul.f32 %v8050_v59, %v11121_v60  ;;  %3615 = vst [vmem:[#allocation2 + $0x1b0] sm:$0xff] %v3303_v45  ;;  %v3273_v4 = vmul.f32 %v8079_v52, %v8119_v49 }
 0x23c   : > { %v3288_v61 = vmul.f32 %v3272_v0, %v8150_v35  ;;  %vm1450_vm11 = vmand %vm1418_vm9, %vm1434_vm10  ;;  %v2130_v30 = vmul.f32 %v8046_v40, %v8154_v26  ;;  %v3238_v1 = vmul.f32 %v8058_v12, %v11122_v18  ;;  %v2110_v46 = vmul.f32 %v11124_v6, %v2094_v36  ;;  %v11128_v18 = vld [vmem:[#allocation56_spill] sm:$0xff]  ;;  %v11131_v36 = vld [vmem:[#allocation61_spill] sm:$0xff] }
 0x23d   : > { %11119 = vst [vmem:[#allocation123_spill] sm:$0xff] %v8158_v11  ;;  %v2761_v41 = vmul.f32 %v2745_v7, %v8158_v11  ;;  %v8175_v51 = vsel %vm1450_vm11, 1.0, %v10886_v58  ;;  %v2746_v45 = vmul.f32 %v8054_v33, %v8154_v26  ;;  %v2726_v60 = vmul.f32 %v2710_v32, %v11125_v5  ;;  %v11133_v32 = vld [vmem:[#allocation59_spill] sm:$0xff] }
 0x23e   : > { %11123 = vst [vmem:[#allocation129_spill] sm:$0xff] %v8175_v51  ;;  %v3304_v0 = vadd.f32 %v3288_v61, %v3252_v2  ;;  %v2146_v49 = vmul.f32 %v8175_v51, %v2130_v30  ;;  %v3254_v29 = vmul.f32 %v3238_v1, %v11126_v42  ;;  %v8187_v7 = vsub.f32 %v11128_v18, %v11096_v63  ;;  %v11132_v42 = vld [vmem:[#allocation60_spill] sm:$0xff] }
 0x23f   : > { %v8183_v23 = vadd.f32 %v2761_v41, %v2725_v44  ;;  %vm1419_vm12 = vcmp.ge.f32.partialorder %v11128_v18, %v6375_v20  ;;  %vm1435_vm13 = vcmp.lt.f32.partialorder %v11128_v18, %v11096_v63  ;;  %v2095_v5 = vmul.f32 %v8042_v53, %v11131_v36  ;;  %v11136_v18 = vld [vmem:[#allocation146_spill] sm:$0xff]  ;;  %v11137_v51 = vld [vmem:[#allocation64_spill] sm:$0xff] }
 0x240   : > { %11129 = vst [vmem:[#allocation134_spill] sm:$0xff] %v8187_v7  ;;  %3616 = vst [vmem:[#allocation2 + $0x138] sm:$0xff] %v3304_v0  ;;  %v8193_v2 = vadd.f32 %v2146_v49, %v2110_v46  ;;  %v2711_v44 = vmul.f32 %v8050_v59, %v11132_v42  ;;  %v3239_v61 = vmul.f32 %v8058_v12, %v11133_v32  ;;  %v11135_v46 = vld [vmem:[#allocation62_spill] sm:$0xff] }
 0x241   : > { %11127 = vst [vmem:[#allocation130_spill] sm:$0xff] %v8183_v23  ;;  %vm1451_vm14 = vmand %vm1419_vm12, %vm1435_vm13  ;;  %v3289_v30 = vmul.f32 %v3273_v4, %v8183_v23  ;;  %v3274_v1 = vmul.f32 %v8079_v52, %v8154_v26  ;;  %v2131_v49 = vmul.f32 %v8046_v40, %v8187_v7  ;;  %v2111_v0 = vmul.f32 %v11135_v46, %v2095_v5  ;;  %v11138_v23 = vld [vmem:[#allocation58_spill] sm:$0xff] }
 0x242   : > { %11130 = vst [vmem:[#allocation131_spill] sm:$0xff] %v8193_v2  ;;  %v8205_v41 = vsel %vm1451_vm14, 1.0, %v10886_v58  ;;  %v2762_v6 = vmul.f32 %v2746_v45, %v8193_v2  ;;  %v2727_v42 = vmul.f32 %v2711_v44, %v11136_v18  ;;  %v2747_v32 = vmul.f32 %v8054_v33, %v8187_v7  ;;  %v11141_v45 = vld [vmem:[#allocation68_spill] sm:$0xff]  ;;  %v11143_v44 = vld [vmem:[#allocation67_spill] sm:$0xff] }
 0x243   : > { %11134 = vst [vmem:[#allocation39_spill] sm:$0xff] %v8205_v41  ;;  %v3305_v36 = vadd.f32 %v3289_v30, %v3253_v24  ;;  %v2147_v4 = vmul.f32 %v8205_v41, %v2131_v49  ;;  %v3255_v26 = vmul.f32 %v3239_v61, %v11137_v51  ;;  %v8218_v11 = vsub.f32 %v11138_v23, %v11096_v63  ;;  %v11145_v49 = vld [vmem:[#allocation69_spill] sm:$0xff]  ;;  %v11148_v41 = vld [vmem:[#allocation70_spill] sm:$0xff] }
 0x244   : > { %v8220_v56 = vadd.f32 %v2762_v6, %v2726_v60  ;;  %vm1420_vm15 = vcmp.ge.f32.partialorder %v11138_v23, %v6375_v20  ;;  %vm1436_vm0 = vcmp.lt.f32.partialorder %v11138_v23, %v11096_v63  ;;  %v2096_v5 = vmul.f32 %v8042_v53, %v11141_v45 }
 0x245   : > { %11139 = vst [vmem:[#allocation38_spill] sm:$0xff] %v8218_v11  ;;  %3617 = vst [vmem:[#allocation2 + $0x358] sm:$0xff] %v3305_v36  ;;  %v8228_v24 = vadd.f32 %v2147_v4, %v2111_v0  ;;  %v3275_v51 = vmul.f32 %v8079_v52, %v8187_v7  ;;  %v2132_v60 = vmul.f32 %v8046_v40, %v8218_v11  ;;  %v11146_v36 = vld [vmem:[#allocation66_spill] sm:$0xff]  ;;  %v11147_v4 = vld [vmem:[#allocation76_spill] sm:$0xff] }
 0x246   : > { %11140 = vst [vmem:[#allocation35_spill] sm:$0xff] %v8220_v56  ;;  %vm1452_vm1 = vmand %vm1420_vm15, %vm1436_vm0  ;;  %v2712_v61 = vmul.f32 %v8050_v59, %v11143_v44  ;;  %v3290_v30 = vmul.f32 %v3274_v1, %v8220_v56  ;;  %v2112_v6 = vmul.f32 %v11145_v49, %v2096_v5  ;;  %v3240_v46 = vmul.f32 %v8058_v12, %v11146_v36  ;;  %v11154_v36 = vld [vmem:[#allocation74_spill] sm:$0xff] }
 0x247   : > { %11142 = vst [vmem:[#allocation43_spill] sm:$0xff] %v8228_v24  ;;  %v8238_v23 = vsel %vm1452_vm1, 1.0, %v10886_v58  ;;  %v2763_v0 = vmul.f32 %v2747_v32, %v8228_v24  ;;  %v2748_v45 = vmul.f32 %v8054_v33, %v8218_v11  ;;  %v3276_v1 = vmul.f32 %v8079_v52, %v8218_v11 }
 0x248   : > { %11144 = vst [vmem:[#allocation42_spill] sm:$0xff] %v8238_v23  ;;  %v2148_v18 = vmul.f32 %v8238_v23, %v2132_v60  ;;  %v2728_v7 = vmul.f32 %v2712_v61, %v11147_v4  ;;  %v3306_v44 = vadd.f32 %v3290_v30, %v3254_v29  ;;  %v8252_v56 = vsub.f32 %v11148_v41, %v11096_v63  ;;  %v11152_v60 = vld [vmem:[#allocation75_spill] sm:$0xff] }
 0x249   : > { %vm1421_vm2 = vcmp.ge.f32.partialorder %v11148_v41, %v6375_v20  ;;  %v8256_v5 = vadd.f32 %v2763_v0, %v2727_v42  ;;  %vm1437_vm3 = vcmp.lt.f32.partialorder %v11148_v41, %v11096_v63  ;;  %v2097_v29 = vmul.f32 %v8042_v53, %v11152_v60  ;;  %v11153_v61 = vld [vmem:[#allocation83_spill] sm:$0xff]  ;;  %v11155_v42 = vld [vmem:[#allocation73_spill] sm:$0xff] }
 0x24a   : > { %11149 = vst [vmem:[#allocation139_spill] sm:$0xff] %v8252_v56  ;;  %v8258_v32 = vadd.f32 %v2148_v18, %v2112_v6  ;;  %3618 = vst [vmem:[#allocation2 + $0x20] sm:$0xff] %v3306_v44  ;;  %v3256_v30 = vmul.f32 %v3240_v46, %v11153_v61  ;;  %v2133_v49 = vmul.f32 %v8046_v40, %v8252_v56  ;;  %v11157_v44 = vld [vmem:[#allocation72_spill] sm:$0xff]  ;;  %v11158_v61 = vld [vmem:[#allocation147_spill] sm:$0xff] }
 0x24b   : > { %11150 = vst [vmem:[#allocation142_spill] sm:$0xff] %v8256_v5  ;;  %vm1453_vm4 = vmand %vm1421_vm2, %vm1437_vm3  ;;  %v2713_v4 = vmul.f32 %v8050_v59, %v11154_v36  ;;  %v3241_v6 = vmul.f32 %v8058_v12, %v11155_v42  ;;  %v3291_v0 = vmul.f32 %v3275_v51, %v8256_v5  ;;  %v2113_v11 = vmul.f32 %v11157_v44, %v2097_v29  ;;  %v11159_v36 = vld [vmem:[#allocation85_spill] sm:$0xff] }
 0x24c   : > { %11151 = vst [vmem:[#allocation50_spill] sm:$0xff] %v8258_v32  ;;  %v2764_v41 = vmul.f32 %v2748_v45, %v8258_v32  ;;  %v8274_v18 = vsel %vm1453_vm4, 1.0, %v10886_v58  ;;  %v2749_v23 = vmul.f32 %v8054_v33, %v8252_v56  ;;  %v11161_v51 = vld [vmem:[#allocation77_spill] sm:$0xff] }
 0x24d   : > { %11156 = vst [vmem:[#allocation140_spill] sm:$0xff] %v8274_v18  ;;  %v2149_v46 = vmul.f32 %v8274_v18, %v2133_v49  ;;  %v2729_v60 = vmul.f32 %v2713_v4, %v11158_v61  ;;  %v3257_v24 = vmul.f32 %v3241_v6, %v11159_v36  ;;  %v3307_v2 = vadd.f32 %v3291_v0, %v3255_v26  ;;  %v11164_v49 = vld [vmem:[#allocation82_spill] sm:$0xff]  ;;  %v11165_v44 = vld [vmem:[#allocation81_spill] sm:$0xff]  ;;  %v11166_v6 = vld [vmem:[#allocation80_spill] sm:$0xff] }
 0x24e   : > { %v8282_v42 = vadd.f32 %v2764_v41, %v2728_v7  ;;  %v8286_v45 = vsub.f32 %v11161_v51, %v11096_v63  ;;  %vm1422_vm5 = vcmp.ge.f32.partialorder %v11161_v51, %v6375_v20  ;;  %vm1438_vm6 = vcmp.lt.f32.partialorder %v11161_v51, %v11096_v63  ;;  %v11168_v61 = vld [vmem:[#allocation148_spill] sm:$0xff]  ;;  %v11170_v18 = vld [vmem:[#allocation86_spill] sm:$0xff] }
 0x24f   : > { %v8290_v29 = vadd.f32 %v2149_v46, %v2113_v11  ;;  %v2098_v4 = vmul.f32 %v8042_v53, %v11164_v49  ;;  %v2714_v26 = vmul.f32 %v8050_v59, %v11165_v44  ;;  %3619 = vst [vmem:[#allocation2 + $0x300] sm:$0xff] %v3307_v2  ;;  %v3277_v36 = vmul.f32 %v8079_v52, %v8252_v56  ;;  %vm1454_vm7 = vmand %vm1422_vm5, %vm1438_vm6  ;;  %v11169_v44 = vld [vmem:[#allocation149_spill] sm:$0xff] }
 0x250   : > { %11160 = vst [vmem:[#allocation46_spill] sm:$0xff] %v8282_v42  ;;  %11162 = vst [vmem:[#allocation143_spill] sm:$0xff] %v8286_v45  ;;  %v3292_v7 = vmul.f32 %v3276_v1, %v8282_v42  ;;  %v2134_v11 = vmul.f32 %v8046_v40, %v8286_v45  ;;  %v3242_v0 = vmul.f32 %v8058_v12, %v11166_v6  ;;  %v8307_v46 = vsel %vm1454_vm7, 1.0, %v10886_v58  ;;  %v11172_v6 = vld [vmem:[#allocation84_spill] sm:$0xff] }
 0x251   : > { %11163 = vst [vmem:[#allocation55_spill] sm:$0xff] %v8290_v29  ;;  %v2765_v41 = vmul.f32 %v2749_v23, %v8290_v29  ;;  %11167 = vst [vmem:[#allocation51_spill] sm:$0xff] %v8307_v46  ;;  %v2114_v51 = vmul.f32 %v11168_v61, %v2098_v4  ;;  %v2750_v2 = vmul.f32 %v8054_v33, %v8286_v45  ;;  %v11174_v4 = vld [vmem:[#allocation89_spill] sm:$0xff] }
 0x252   : > { %v3308_v1 = vadd.f32 %v3292_v7, %v3256_v30  ;;  %v2150_v56 = vmul.f32 %v8307_v46, %v2134_v11  ;;  %v2730_v49 = vmul.f32 %v2714_v26, %v11169_v44  ;;  %v3258_v42 = vmul.f32 %v3242_v0, %v11170_v18  ;;  %v11175_v18 = vld [vmem:[#allocation88_spill] sm:$0xff]  ;;  %v11176_v26 = vld [vmem:[#allocation87_spill] sm:$0xff]  ;;  %v11180_v46 = vld [vmem:[#allocation98_spill] sm:$0xff] }
 0x253   : > { %v8315_v32 = vadd.f32 %v2765_v41, %v2729_v60  ;;  %v8319_v23 = vsub.f32 %v11172_v6, %v11096_v63  ;;  %vm1423_vm8 = vcmp.ge.f32.partialorder %v11172_v6, %v6375_v20  ;;  %vm1439_vm9 = vcmp.lt.f32.partialorder %v11172_v6, %v11096_v63  ;;  %v11179_v6 = vld [vmem:[#allocation97_spill] sm:$0xff] }
 0x254   : > { %3620 = vst [vmem:[#allocation2 + $0x58] sm:$0xff] %v3308_v1  ;;  %v8325_v30 = vadd.f32 %v2150_v56, %v2114_v51  ;;  %vm1455_vm10 = vmand %vm1423_vm8, %vm1439_vm9  ;;  %v2099_v44 = vmul.f32 %v8042_v53, %v11174_v4  ;;  %v2715_v60 = vmul.f32 %v8050_v59, %v11175_v18  ;;  %v3243_v7 = vmul.f32 %v8058_v12, %v11176_v26  ;;  %v11178_v51 = vld [vmem:[#allocation90_spill] sm:$0xff] }
 0x255   : > { %11171 = vst [vmem:[#allocation45_spill] sm:$0xff] %v8315_v32  ;;  %11173 = vst [vmem:[#allocation52_spill] sm:$0xff] %v8319_v23  ;;  %v3293_v11 = vmul.f32 %v3277_v36, %v8315_v32  ;;  %v3278_v0 = vmul.f32 %v8079_v52, %v8286_v45  ;;  %v8337_v41 = vsel %vm1455_vm10, 1.0, %v10886_v58  ;;  %v2135_v56 = vmul.f32 %v8046_v40, %v8319_v23  ;;  %v11181_v32 = vld [vmem:[#allocation91_spill] sm:$0xff] }
 0x256   : > { %11177 = vst [vmem:[#allocation144_spill] sm:$0xff] %v8337_v41  ;;  %v2766_v61 = vmul.f32 %v2750_v2, %v8325_v30  ;;  %v2115_v1 = vmul.f32 %v11178_v51, %v2099_v44  ;;  %v2731_v18 = vmul.f32 %v2715_v60, %v11179_v6  ;;  %v2751_v26 = vmul.f32 %v8054_v33, %v8319_v23  ;;  %v11184_v2 = vld [vmem:[#allocation96_spill] sm:$0xff]  ;;  %v11186_v60 = vld [vmem:[#allocation95_spill] sm:$0xff] }
 0x257   : > { %v3309_v4 = vadd.f32 %v3293_v11, %v3257_v24  ;;  %v2151_v36 = vmul.f32 %v8337_v41, %v2135_v56  ;;  %v3259_v45 = vmul.f32 %v3243_v7, %v11180_v46  ;;  %v8350_v29 = vsub.f32 %v11181_v32, %v11096_v63  ;;  %v11188_v56 = vld [vmem:[#allocation92_spill] sm:$0xff]  ;;  %v11191_v41 = vld [vmem:[#allocation99_spill] sm:$0xff] }
 0x258   : > { %v8352_v5 = vadd.f32 %v2766_v61, %v2730_v49  ;;  %vm1424_vm11 = vcmp.ge.f32.partialorder %v11181_v32, %v6375_v20  ;;  %vm1440_vm12 = vcmp.lt.f32.partialorder %v11181_v32, %v11096_v63  ;;  %v2100_v44 = vmul.f32 %v8042_v53, %v11184_v2 }
 0x259   : > { %11182 = vst [vmem:[#allocation145_spill] sm:$0xff] %v8350_v29  ;;  %3621 = vst [vmem:[#allocation2 + $0x370] sm:$0xff] %v3309_v4  ;;  %v8360_v24 = vadd.f32 %v2151_v36, %v2115_v1  ;;  %v3279_v46 = vmul.f32 %v8079_v52, %v8319_v23  ;;  %v2136_v49 = vmul.f32 %v8046_v40, %v8350_v29  ;;  %v11189_v4 = vld [vmem:[#allocation94_spill] sm:$0xff] }
 0x25a   : > { %11183 = vst [vmem:[#allocation63_spill] sm:$0xff] %v8352_v5  ;;  %vm1456_vm13 = vmand %vm1424_vm11, %vm1440_vm12  ;;  %v2716_v7 = vmul.f32 %v8050_v59, %v11186_v60  ;;  %v3294_v11 = vmul.f32 %v3278_v0, %v8352_v5  ;;  %v2116_v61 = vmul.f32 %v11188_v56, %v2100_v44  ;;  %v3244_v51 = vmul.f32 %v8058_v12, %v11189_v4  ;;  %v11190_v36 = vld [vmem:[#allocation150_spill] sm:$0xff] }
 0x25b   : > { %11185 = vst [vmem:[#allocation56_spill] sm:$0xff] %v8360_v24  ;;  %v8370_v32 = vsel %vm1456_vm13, 1.0, %v10886_v58  ;;  %v2767_v1 = vmul.f32 %v2751_v26, %v8360_v24  ;;  %v2752_v2 = vmul.f32 %v8054_v33, %v8350_v29  ;;  %v3280_v0 = vmul.f32 %v8079_v52, %v8350_v29  ;;  %v11195_v4 = vld [vmem:[#allocation102_spill] sm:$0xff] }
 0x25c   : > { %11187 = vst [vmem:[#allocation59_spill] sm:$0xff] %v8370_v32  ;;  %v2152_v6 = vmul.f32 %v8370_v32, %v2136_v49  ;;  %v2732_v23 = vmul.f32 %v2716_v7, %v11190_v36  ;;  %v3310_v60 = vadd.f32 %v3294_v11, %v3258_v42  ;;  %v8384_v5 = vsub.f32 %v11191_v41, %v11096_v63  ;;  %v11193_v49 = vld [vmem:[#allocation103_spill] sm:$0xff] }
 0x25d   : > { %vm1425_vm14 = vcmp.ge.f32.partialorder %v11191_v41, %v6375_v20  ;;  %v8388_v44 = vadd.f32 %v2767_v1, %v2731_v18  ;;  %vm1441_vm15 = vcmp.lt.f32.partialorder %v11191_v41, %v11096_v63  ;;  %v2101_v42 = vmul.f32 %v8042_v53, %v11193_v49  ;;  %v11194_v7 = vld [vmem:[#allocation107_spill] sm:$0xff]  ;;  %v11196_v1 = vld [vmem:[#allocation101_spill] sm:$0xff] }
 0x25e   : > { %11192 = vst [vmem:[#allocation62_spill] sm:$0xff] %v8384_v5  ;;  %v8390_v26 = vadd.f32 %v2152_v6, %v2116_v61  ;;  %3622 = vst [vmem:[#allocation2 + $0x2f8] sm:$0xff] %v3310_v60  ;;  %v3260_v11 = vmul.f32 %v3244_v51, %v11194_v7  ;;  %v2137_v56 = vmul.f32 %v8046_v40, %v8384_v5  ;;  %v11198_v60 = vld [vmem:[#allocation100_spill] sm:$0xff] }
 0x25f   : > { %vm1457_vm0 = vmand %vm1425_vm14, %vm1441_vm15  ;;  %v2717_v18 = vmul.f32 %v8050_v59, %v11195_v4  ;;  %v3245_v61 = vmul.f32 %v8058_v12, %v11196_v1  ;;  %v3295_v6 = vmul.f32 %v3279_v46, %v8388_v44  ;;  %v2117_v29 = vmul.f32 %v11198_v60, %v2101_v42  ;;  %v11199_v7 = vld [vmem:[#allocation112_spill] sm:$0xff]  ;;  %v8417_v46 = vld [vmem:[%s6026_s16 + $0x58] sm:$0xff] }
 0x260   : > { %v2768_v41 = vmul.f32 %v2752_v2, %v8390_v26  ;;  %v8406_v36 = vsel %vm1457_vm0, 1.0, %v10886_v58  ;;  %v2753_v32 = vmul.f32 %v8054_v33, %v8384_v5  ;;  %11200 = vst [vmem:[#allocation64_spill] sm:$0xff] %v8417_v46  ;;  %v8421_v2 = vsub.f32 %v8417_v46, %v11096_v63 }
 0x261   : > { %11197 = vst [vmem:[#allocation146_spill] sm:$0xff] %v8406_v36  ;;  %v2153_v51 = vmul.f32 %v8406_v36, %v2137_v56  ;;  %v2733_v49 = vmul.f32 %v2717_v18, %v11199_v7  ;;  %v3261_v4 = vmul.f32 %v3245_v61, %v7902_v10  ;;  %v3311_v24 = vadd.f32 %v3295_v6, %v3259_v45  ;;  %v11202_v56 = vld [vmem:[#allocation111_spill] sm:$0xff]  ;;  %v11203_v45 = vld [vmem:[#allocation110_spill] sm:$0xff]  ;;  %v11204_v6 = vld [vmem:[#allocation109_spill] sm:$0xff] }
 0x262   : > { %v8414_v1 = vadd.f32 %v2768_v41, %v2732_v23  ;;  %11201 = vst [vmem:[#allocation58_spill] sm:$0xff] %v8421_v2  ;;  %vm1426_vm1 = vcmp.ge.f32.partialorder %v8417_v46, %v6375_v20  ;;  %vm1442_vm2 = vcmp.lt.f32.partialorder %v8417_v46, %v11096_v63  ;;  %v2102_v10 = vmul.f32 %v8042_v53, %v11202_v56  ;;  %v11206_v7 = vld [vmem:[#allocation106_spill] sm:$0xff] }
 0x263   : > { %v8425_v42 = vadd.f32 %v2153_v51, %v2117_v29  ;;  %v2718_v23 = vmul.f32 %v8050_v59, %v11203_v45  ;;  %3623 = vst [vmem:[#allocation2 + $0x330] sm:$0xff] %v3311_v24  ;;  %v3281_v61 = vmul.f32 %v8079_v52, %v8384_v5  ;;  %vm1458_vm3 = vmand %vm1426_vm1, %vm1442_vm2  ;;  %v2138_v29 = vmul.f32 %v8046_v40, %v8421_v2 }
 0x264   : > { %v3296_v18 = vmul.f32 %v3280_v0, %v8414_v1  ;;  %v3246_v41 = vmul.f32 %v8058_v12, %v11204_v6  ;;  %v8442_v51 = vsel %vm1458_vm3, 1.0, %v10886_v58  ;;  %v2118_v45 = vmul.f32 %v11206_v7, %v2102_v10  ;;  %v8453_v6 = vld [vmem:[%s6026_s16 + $0x60] sm:$0xff]  ;;  %v11213_v7 = vld [vmem:[#allocation108_spill] sm:$0xff] }
 0x265   : > { %v2769_v60 = vmul.f32 %v2753_v32, %v8425_v42  ;;  %11205 = vst [vmem:[#allocation69_spill] sm:$0xff] %v8442_v51  ;;  %v2754_v24 = vmul.f32 %v8054_v33, %v8421_v2  ;;  %v2154_v5 = vmul.f32 %v8442_v51, %v2138_v29  ;;  %v2734_v56 = vmul.f32 %v2718_v23, %v7904_v16  ;;  %v11210_v16 = vld [vmem:[#allocation119_spill] sm:$0xff]  ;;  %v11212_v23 = vld [vmem:[#allocation117_spill] sm:$0xff] }
 0x266   : > { %v3312_v0 = vadd.f32 %v3296_v18, %v3260_v11  ;;  %v3262_v46 = vmul.f32 %v3246_v41, %v7928_v17  ;;  %11208 = vst [vmem:[#allocation76_spill] sm:$0xff] %v8453_v6  ;;  %v8457_v32 = vsub.f32 %v8453_v6, %v11096_v63  ;;  %vm1427_vm4 = vcmp.ge.f32.partialorder %v8453_v6, %v6375_v20 }
 0x267   : > { %v8450_v36 = vadd.f32 %v2769_v60, %v2733_v49  ;;  %vm1443_vm5 = vcmp.lt.f32.partialorder %v8453_v6, %v11096_v63  ;;  %v8463_v11 = vadd.f32 %v2154_v5, %v2118_v45  ;;  %v2103_v17 = vmul.f32 %v8042_v53, %v11210_v16  ;;  %v11211_v49 = vld [vmem:[#allocation118_spill] sm:$0xff]  ;;  %v8487_v6 = vld [vmem:[%s6026_s16 + $0x68] sm:$0xff] }
 0x268   : > { %11209 = vst [vmem:[#allocation70_spill] sm:$0xff] %v8457_v32  ;;  %3624 = vst [vmem:[#allocation2 + $0x350] sm:$0xff] %v3312_v0  ;;  %v2719_v10 = vmul.f32 %v8050_v59, %v11211_v49  ;;  %v3247_v18 = vmul.f32 %v8058_v12, %v11212_v23  ;;  %v3282_v41 = vmul.f32 %v8079_v52, %v8421_v2 }
 0x269   : > { %11207 = vst [vmem:[#allocation66_spill] sm:$0xff] %v8450_v36  ;;  %vm1459_vm6 = vmand %vm1427_vm4, %vm1443_vm5  ;;  %v3297_v29 = vmul.f32 %v3281_v61, %v8450_v36  ;;  %v2139_v5 = vmul.f32 %v8046_v40, %v8457_v32  ;;  %v2770_v45 = vmul.f32 %v2754_v24, %v8463_v11  ;;  %v2119_v0 = vmul.f32 %v11213_v7, %v2103_v17  ;;  %v11216_v17 = vld [vmem:[#allocation126_spill] sm:$0xff] }
 0x26a   : > { %v8475_v60 = vsel %vm1459_vm6, 1.0, %v10886_v58  ;;  %v2735_v49 = vmul.f32 %v2719_v10, %v7936_v62  ;;  %v2755_v23 = vmul.f32 %v8054_v33, %v8457_v32  ;;  %v3263_v2 = vmul.f32 %v3247_v18, %v7961_v28  ;;  %v11215_v62 = vld [vmem:[#allocation127_spill] sm:$0xff] }
 0x26b   : > { %v3313_v16 = vadd.f32 %v3297_v29, %v3261_v4  ;;  %v2155_v61 = vmul.f32 %v8475_v60, %v2139_v5  ;;  %v8491_v51 = vsub.f32 %v8487_v6, %v11096_v63  ;;  %v8493_v36 = vadd.f32 %v2770_v45, %v2734_v56  ;;  %v11217_v5 = vld [vmem:[#allocation125_spill] sm:$0xff] }
 0x26c   : > { %vm1428_vm7 = vcmp.ge.f32.partialorder %v8487_v6, %v6375_v20  ;;  %vm1444_vm8 = vcmp.lt.f32.partialorder %v8487_v6, %v11096_v63  ;;  %v2104_v4 = vmul.f32 %v8042_v53, %v11215_v62  ;;  %v3283_v24 = vmul.f32 %v8079_v52, %v8457_v32  ;;  %v8524_v62 = vld [vmem:[%s6026_s16 + $0x70] sm:$0xff] }
 0x26d   : > { %11214 = vst [vmem:[#allocation83_spill] sm:$0xff] %v8491_v51  ;;  %3625 = vst [vmem:[#allocation2 + $0x210] sm:$0xff] %v3313_v16  ;;  %v8501_v28 = vadd.f32 %v2155_v61, %v2119_v0  ;;  %v2140_v56 = vmul.f32 %v8046_v40, %v8491_v51  ;;  %v2720_v10 = vmul.f32 %v8050_v59, %v11216_v17 }
 0x26e   : > { %vm1460_vm9 = vmand %vm1428_vm7, %vm1444_vm8  ;;  %v3298_v18 = vmul.f32 %v3282_v41, %v8493_v36  ;;  %v2120_v16 = vmul.f32 %v7953_v9, %v2104_v4  ;;  %v3248_v45 = vmul.f32 %v8058_v12, %v11217_v5  ;;  %v2756_v32 = vmul.f32 %v8054_v33, %v8491_v51 }
 0x26f   : > { %v8511_v29 = vsel %vm1460_vm9, 1.0, %v10886_v58  ;;  %v2771_v7 = vmul.f32 %v2755_v23, %v8501_v28  ;;  %v2736_v61 = vmul.f32 %v2720_v10, %v7971_v22  ;;  %v3284_v41 = vmul.f32 %v8079_v52, %v8491_v51  ;;  %v11219_v22 = vld [vmem:[#allocation133_spill] sm:$0xff] }
 0x270   : > { %v2156_v0 = vmul.f32 %v8511_v29, %v2140_v56  ;;  %v3314_v17 = vadd.f32 %v3298_v18, %v3262_v46  ;;  %v8528_v9 = vsub.f32 %v8524_v62, %v11096_v63  ;;  %vm1429_vm10 = vcmp.ge.f32.partialorder %v8524_v62, %v6375_v20 }
 0x271   : > { %v8532_v23 = vadd.f32 %v2771_v7, %v2735_v49  ;;  %vm1445_vm11 = vcmp.lt.f32.partialorder %v8524_v62, %v11096_v63  ;;  %v2105_v46 = vmul.f32 %v8042_v53, %v11219_v22  ;;  %v3264_v56 = vmul.f32 %v3248_v45, %v7998_v14 }
 0x272   : > { %11218 = vst [vmem:[#allocation73_spill] sm:$0xff] %v8528_v9  ;;  %v8534_v4 = vadd.f32 %v2156_v0, %v2120_v16  ;;  %3626 = vst [vmem:[#allocation2 + $0x158] sm:$0xff] %v3314_v17  ;;  %v2141_v10 = vmul.f32 %v8046_v40, %v8528_v9  ;;  %v2721_v49 = vmul.f32 %v8050_v59, %v7307_v21 }
 0x273   : > { %vm1461_vm12 = vmand %vm1429_vm10, %vm1445_vm11  ;;  %v3249_v18 = vmul.f32 %v8058_v12, %v7303_v38  ;;  %v3299_v16 = vmul.f32 %v3283_v24, %v8532_v23  ;;  %v2121_v17 = vmul.f32 %v7983_v27, %v2105_v46  ;;  %v2757_v0 = vmul.f32 %v8054_v33, %v8528_v9  ;;  %v8561_v24 = vld [vmem:[%s6026_s16 + $0x78] sm:$0xff] }
 0x274   : > { %v2772_v5 = vmul.f32 %v2756_v32, %v8534_v4  ;;  %v8550_v7 = vsel %vm1461_vm12, 1.0, %v10886_v58  ;;  %v2737_v45 = vmul.f32 %v2721_v49, %v8006_v8  ;;  %v8565_v32 = vsub.f32 %v8561_v24, %v11096_v63  ;;  %v11221_v8 = vld [vmem:[#allocation135_spill] sm:$0xff] }
 0x275   : > { %v2157_v14 = vmul.f32 %v8550_v7, %v2141_v10  ;;  %v3265_v51 = vmul.f32 %v3249_v18, %v8034_v55  ;;  %v3315_v21 = vadd.f32 %v3299_v16, %v3263_v2  ;;  %vm1430_vm13 = vcmp.ge.f32.partialorder %v8561_v24, %v6375_v20 }
 0x276   : > { %v8558_v38 = vadd.f32 %v2772_v5, %v2736_v61  ;;  %11220 = vst [vmem:[#allocation72_spill] sm:$0xff] %v8565_v32  ;;  %vm1446_vm14 = vcmp.lt.f32.partialorder %v8561_v24, %v11096_v63  ;;  %v2106_v55 = vmul.f32 %v8042_v53, %v11221_v8  ;;  %v2722_v2 = vmul.f32 %v8050_v59, %v7378_v39 }
 0x277   : > { %v8569_v27 = vadd.f32 %v2157_v14, %v2121_v17  ;;  %3627 = vst [vmem:[#allocation2 + $0x198] sm:$0xff] %v3315_v21  ;;  %v3285_v46 = vmul.f32 %v8079_v52, %v8528_v9  ;;  %vm1462_vm15 = vmand %vm1430_vm13, %vm1446_vm14  ;;  %v2142_v20 = vmul.f32 %v8046_v40, %v8565_v32  ;;  %v2758_v10 = vmul.f32 %v8054_v33, %v8565_v32  ;;  %v8598_v33 = vld [vmem:[%s6026_s16] sm:$0xff]  ;;  %v11222_v17 = vld [vmem:[#allocation41_spill] sm:$0xff] }
 0x278   : > { %v3300_v61 = vmul.f32 %v3284_v41, %v8558_v38  ;;  %v8586_v53 = vsel %vm1462_vm15, 1.0, %v10886_v58  ;;  %v2122_v59 = vmul.f32 %v8016_v48, %v2106_v55  ;;  %v3250_v21 = vmul.f32 %v8058_v12, %v7374_v13  ;;  %v8610_v48 = vld [vmem:[#allocation8] sm:$0xff] }
 0x279   : > { %v2773_v49 = vmul.f32 %v2757_v0, %v8569_v27  ;;  %v2158_v18 = vmul.f32 %v8586_v53, %v2142_v20  ;;  %v2738_v16 = vmul.f32 %v2722_v2, %v8036_v31  ;;  %v3286_v40 = vmul.f32 %v8079_v52, %v8565_v32  ;;  %11224 = vst [vmem:[#allocation85_spill] sm:$0xff] %v8610_v48  ;;  %v11225_v31 = vld [vmem:[#allocation34_spill] sm:$0xff]  ;;  %v8616_v52 = vld [vmem:[#allocation9] sm:$0xff]  ;;  %v11231_v32 = vld [vmem:[#allocation136_spill] sm:$0xff] }
 0x27a   : > { %v3316_v41 = vadd.f32 %v3300_v61, %v3264_v56  ;;  %v8602_v14 = vsub.f32 %v8598_v33, %v11222_v17  ;;  %vm1495_vm0 = vcmp.ge.f32.partialorder %v8598_v33, %v11096_v63  ;;  %vm1511_vm1 = vcmp.lt.f32.partialorder %v8598_v33, %v11222_v17  ;;  %11226 = vst [vmem:[#allocation77_spill] sm:$0xff] %v8616_v52  ;;  %v8632_v61 = vld [vmem:[#allocation9 + $0x8] sm:$0xff] }
 0x27b   : > { %v8595_v5 = vadd.f32 %v2773_v49, %v2737_v45  ;;  %v8608_v13 = vadd.f32 %v2158_v18, %v2122_v59  ;;  %vm1527_vm2 = vmand %vm1495_vm0, %vm1511_vm1  ;;  %v8614_v12 = vrot.slane %v8610_v48, %v11225_v31  ;;  %v8620_v56 = vrot.slane %v8616_v52, %v11225_v31  ;;  %v8622_v45 = vld [vmem:[#allocation8 + $0x8] sm:$0xff]  ;;  %11228 = vst [vmem:[#allocation148_spill] sm:$0xff] %v8632_v61  ;;  %v8638_v49 = vld [vmem:[#allocation8 + $0x10] sm:$0x1f] }
 0x27c   : > { %11223 = vst [vmem:[#allocation147_spill] sm:$0xff] %v8602_v14  ;;  %3628 = vst [vmem:[#allocation2 + $0x1e8] sm:$0xff] %v3316_v41  ;;  %v8626_v0 = vrot.slane %v8622_v45, %v11098_v34  ;;  %v8630_v2 = vsel %vm1527_vm2, 1.0, %v10886_v58  ;;  %v8636_v20 = vrot.slane %v8632_v61, %v11098_v34  ;;  %v11230_v59 = vld [vmem:[#allocation31_spill] sm:$0xff]  ;;  %v3266_v61 = vmul.f32 %v3250_v21, %v8074_v57 }
 0x27d   : > { %11227 = vst [vmem:[#allocation80_spill] sm:$0xff] %v8622_v45  ;;  %v3301_v55 = vmul.f32 %v3285_v46, %v8595_v5  ;;  %11229 = vst [vmem:[#allocation149_spill] sm:$0xff] %v8638_v49  ;;  %v8642_v41 = vrot.slane %v8638_v49, %v11230_v59  ;;  %v2774_v18 = vmul.f32 %v2758_v10, %v8608_v13  ;;  %v8654_v49 = vld [vmem:[#allocation9 + $0x10] sm:$0x1f]  ;;  %v8669_v21 = vld [vmem:[%s6026_s16 + $0x8] sm:$0xff] }
 0x27e   : > { %v2179_v46 = vmul.f32 %v8614_v12, %v11231_v32  ;;  %v2215_v9 = vmul.f32 %v8620_v56, %v8602_v14  ;;  %v2795_v45 = vmul.f32 %v8626_v0, %v11099_v15  ;;  %v8658_v10 = vrot.slane %v8654_v49, %v11230_v59  ;;  %11232 = vst [vmem:[#allocation86_spill] sm:$0xff] %v8669_v21 }
 0x27f   : > { %v3317_v34 = vadd.f32 %v3301_v55, %v3265_v51  ;;  %v3323_v31 = vmul.f32 %v8642_v41, %v6355_v43  ;;  %v8660_v52 = vadd.f32 %v2774_v18, %v2738_v16  ;;  %v2831_v51 = vmul.f32 %v8636_v20, %v8602_v14 }
 0x280   : > { %v2195_v32 = vmul.f32 %v8063_v25, %v2179_v46  ;;  %v2231_v48 = vmul.f32 %v8630_v2, %v2215_v9  ;;  %v2811_v57 = vmul.f32 %v2795_v45, %v8095_v54  ;;  %v8673_v55 = vsub.f32 %v8669_v21, %v11222_v17 }
 0x281   : > { %3629 = vst [vmem:[#allocation2 + $0x2e0] sm:$0xff] %v3317_v34  ;;  %v3339_v43 = vmul.f32 %v3323_v31, %v8123_v19  ;;  %vm1496_vm3 = vcmp.ge.f32.partialorder %v8669_v21, %v11096_v63  ;;  %v3302_v25 = vmul.f32 %v3286_v40, %v8660_v52  ;;  %vm1512_vm4 = vcmp.lt.f32.partialorder %v8669_v21, %v11222_v17  ;;  %v11235_v34 = vld [vmem:[#allocation138_spill] sm:$0xff] }
 0x282   : > { %11233 = vst [vmem:[#allocation84_spill] sm:$0xff] %v8673_v55  ;;  %v8678_v9 = vadd.f32 %v2231_v48, %v2195_v32  ;;  %v2180_v54 = vmul.f32 %v8614_v12, %v11235_v34  ;;  %v3359_v19 = vmul.f32 %v8658_v10, %v8602_v14  ;;  %vm1528_vm5 = vmand %vm1496_vm3, %vm1512_vm4  ;;  %v2216_v16 = vmul.f32 %v8620_v56, %v8673_v55 }
 0x283   : > { %v2796_v31 = vmul.f32 %v8626_v0, %v11102_v37  ;;  %v3324_v32 = vmul.f32 %v8642_v41, %v11103_v47  ;;  %v3318_v40 = vadd.f32 %v3302_v25, %v3266_v61  ;;  %v8694_v45 = vsel %vm1528_vm5, 1.0, %v10886_v58  ;;  %v8705_v47 = vld [vmem:[%s6026_s16 + $0x10] sm:$0xff]  ;;  %v11243_v25 = vld [vmem:[#allocation47_spill] sm:$0xff] }
 0x284   : > { %11234 = vst [vmem:[#allocation87_spill] sm:$0xff] %v8678_v9  ;;  %v2847_v48 = vmul.f32 %v2831_v51, %v8678_v9  ;;  %11236 = vst [vmem:[#allocation90_spill] sm:$0xff] %v8694_v45  ;;  %v2196_v59 = vmul.f32 %v8106_v50, %v2180_v54  ;;  %v2232_v18 = vmul.f32 %v8694_v45, %v2216_v16  ;;  %v11242_v51 = vld [vmem:[#allocation48_spill] sm:$0xff]  ;;  %v11247_v45 = vld [vmem:[#allocation130_spill] sm:$0xff] }
 0x285   : > { %v2812_v46 = vmul.f32 %v2796_v31, %v8125_v3  ;;  %v2832_v14 = vmul.f32 %v8636_v20, %v8673_v55  ;;  %v3340_v37 = vmul.f32 %v3324_v32, %v8150_v35  ;;  %3630 = vst [vmem:[#allocation2 + $0x280] sm:$0xff] %v3318_v40  ;;  %11238 = vst [vmem:[#allocation98_spill] sm:$0xff] %v8705_v47  ;;  %v11241_v3 = vld [vmem:[#allocation141_spill] sm:$0xff] }
 0x286   : > { %v8702_v34 = vadd.f32 %v2847_v48, %v2811_v57  ;;  %v8709_v61 = vsub.f32 %v8705_v47, %v11222_v17  ;;  %vm1497_vm6 = vcmp.ge.f32.partialorder %v8705_v47, %v11096_v63  ;;  %vm1513_vm7 = vcmp.lt.f32.partialorder %v8705_v47, %v11222_v17 }
 0x287   : > { %v8715_v50 = vadd.f32 %v2232_v18, %v2196_v59  ;;  %vm1529_vm8 = vmand %vm1497_vm6, %vm1513_vm7  ;;  %v2181_v35 = vmul.f32 %v8614_v12, %v11241_v3  ;;  %v2797_v57 = vmul.f32 %v8626_v0, %v11242_v51  ;;  %v3325_v54 = vmul.f32 %v8642_v41, %v11243_v25  ;;  %v11245_v59 = vld [vmem:[#allocation128_spill] sm:$0xff]  ;;  %v11246_v3 = vld [vmem:[#allocation123_spill] sm:$0xff] }
 0x288   : > { %11237 = vst [vmem:[#allocation97_spill] sm:$0xff] %v8702_v34  ;;  %11239 = vst [vmem:[#allocation91_spill] sm:$0xff] %v8709_v61  ;;  %v3375_v16 = vmul.f32 %v3359_v19, %v8702_v34  ;;  %v3360_v31 = vmul.f32 %v8658_v10, %v8673_v55  ;;  %v8727_v32 = vsel %vm1529_vm8, 1.0, %v10886_v58  ;;  %v2217_v40 = vmul.f32 %v8620_v56, %v8709_v61  ;;  %v8739_v34 = vld [vmem:[%s6026_s16 + $0x18] sm:$0xff] }
 0x289   : > { %11240 = vst [vmem:[#allocation92_spill] sm:$0xff] %v8715_v50  ;;  %11244 = vst [vmem:[#allocation94_spill] sm:$0xff] %v8727_v32  ;;  %v2848_v48 = vmul.f32 %v2832_v14, %v8715_v50  ;;  %v2197_v18 = vmul.f32 %v11245_v59, %v2181_v35  ;;  %v2813_v51 = vmul.f32 %v2797_v57, %v11246_v3  ;;  %v11251_v14 = vld [vmem:[#allocation49_spill] sm:$0xff]  ;;  %v11253_v35 = vld [vmem:[#allocation54_spill] sm:$0xff] }
 0x28a   : > { %v2833_v25 = vmul.f32 %v8636_v20, %v8709_v61  ;;  %v3391_v47 = vadd.f32 %v3375_v16, %v3339_v43  ;;  %v2233_v19 = vmul.f32 %v8727_v32, %v2217_v40  ;;  %v3341_v55 = vmul.f32 %v3325_v54, %v11247_v45  ;;  %11248 = vst [vmem:[#allocation150_spill] sm:$0xff] %v8739_v34  ;;  %v11255_v40 = vld [vmem:[#allocation129_spill] sm:$0xff]  ;;  %v8776_v32 = vld [vmem:[%s6026_s16 + $0x20] sm:$0xff] }
 0x28b   : > { %v8743_v21 = vsub.f32 %v8739_v34, %v11222_v17  ;;  %v8745_v9 = vadd.f32 %v2848_v48, %v2812_v46  ;;  %vm1498_vm9 = vcmp.ge.f32.partialorder %v8739_v34, %v11096_v63  ;;  %vm1514_vm10 = vcmp.lt.f32.partialorder %v8739_v34, %v11222_v17  ;;  %v11256_v48 = vld [vmem:[#allocation53_spill] sm:$0xff]  ;;  %11258 = vst [vmem:[#allocation112_spill] sm:$0xff] %v8776_v32 }
 0x28c   : > { %v2182_v43 = vmul.f32 %v8614_v12, %v11251_v14  ;;  %3631 = vst [vmem:[#allocation2 + $0xc8] sm:$0xff] %v3391_v47  ;;  %v8753_v45 = vadd.f32 %v2233_v19, %v2197_v18  ;;  %v3361_v3 = vmul.f32 %v8658_v10, %v8709_v61  ;;  %vm1530_vm11 = vmand %vm1498_vm9, %vm1514_vm10  ;;  %v2798_v57 = vmul.f32 %v8626_v0, %v11253_v35  ;;  %v11257_v61 = vld [vmem:[#allocation131_spill] sm:$0xff] }
 0x28d   : > { %11249 = vst [vmem:[#allocation99_spill] sm:$0xff] %v8743_v21  ;;  %11250 = vst [vmem:[#allocation107_spill] sm:$0xff] %v8745_v9  ;;  %v2218_v46 = vmul.f32 %v8620_v56, %v8743_v21  ;;  %v3376_v54 = vmul.f32 %v3360_v31, %v8745_v9  ;;  %v8763_v16 = vsel %vm1530_vm11, 1.0, %v10886_v58  ;;  %v3326_v59 = vmul.f32 %v8642_v41, %v11256_v48  ;;  %v11264_v48 = vld [vmem:[#allocation61_spill] sm:$0xff] }
 0x28e   : > { %11252 = vst [vmem:[#allocation101_spill] sm:$0xff] %v8753_v45  ;;  %11254 = vst [vmem:[#allocation100_spill] sm:$0xff] %v8763_v16  ;;  %v2198_v47 = vmul.f32 %v11255_v40, %v2182_v43  ;;  %v2849_v18 = vmul.f32 %v2833_v25, %v8753_v45  ;;  %v2814_v14 = vmul.f32 %v2798_v57, %v11257_v61  ;;  %v11263_v57 = vld [vmem:[#allocation35_spill] sm:$0xff] }
 0x28f   : > { %v2234_v19 = vmul.f32 %v8763_v16, %v2218_v46  ;;  %v2834_v34 = vmul.f32 %v8636_v20, %v8743_v21  ;;  %v3392_v35 = vadd.f32 %v3376_v54, %v3340_v37  ;;  %v3362_v31 = vmul.f32 %v8658_v10, %v8743_v21  ;;  %v11262_v37 = vld [vmem:[#allocation57_spill] sm:$0xff] }
 0x290   : > { %v8780_v43 = vsub.f32 %v8776_v32, %v11222_v17  ;;  %vm1499_vm12 = vcmp.ge.f32.partialorder %v8776_v32, %v11096_v63  ;;  %v8784_v25 = vadd.f32 %v2849_v18, %v2813_v51  ;;  %vm1515_vm13 = vcmp.lt.f32.partialorder %v8776_v32, %v11222_v17  ;;  %v11265_v18 = vld [vmem:[#allocation60_spill] sm:$0xff] }
 0x291   : > { %v8786_v46 = vadd.f32 %v2234_v19, %v2198_v47  ;;  %v2183_v61 = vmul.f32 %v8614_v12, %v11262_v37  ;;  %3632 = vst [vmem:[#allocation2 + $0x340] sm:$0xff] %v3392_v35  ;;  %v3342_v54 = vmul.f32 %v3326_v59, %v11263_v57  ;;  %vm1531_vm14 = vmand %vm1499_vm12, %vm1515_vm13  ;;  %v2799_v51 = vmul.f32 %v8626_v0, %v11264_v48  ;;  %v11267_v35 = vld [vmem:[#allocation39_spill] sm:$0xff]  ;;  %v11269_v48 = vld [vmem:[#allocation142_spill] sm:$0xff] }
 0x292   : > { %11259 = vst [vmem:[#allocation109_spill] sm:$0xff] %v8780_v43  ;;  %11260 = vst [vmem:[#allocation106_spill] sm:$0xff] %v8784_v25  ;;  %v2219_v40 = vmul.f32 %v8620_v56, %v8780_v43  ;;  %v3327_v47 = vmul.f32 %v8642_v41, %v11265_v18  ;;  %v3377_v19 = vmul.f32 %v3361_v3, %v8784_v25  ;;  %v8802_v37 = vsel %vm1531_vm14, 1.0, %v10886_v58  ;;  %v11268_v57 = vld [vmem:[#allocation43_spill] sm:$0xff] }
 0x293   : > { %11261 = vst [vmem:[#allocation117_spill] sm:$0xff] %v8786_v46  ;;  %v2850_v21 = vmul.f32 %v2834_v34, %v8786_v46  ;;  %11266 = vst [vmem:[#allocation108_spill] sm:$0xff] %v8802_v37  ;;  %v2199_v32 = vmul.f32 %v11267_v35, %v2183_v61  ;;  %v2815_v16 = vmul.f32 %v2799_v51, %v11268_v57  ;;  %v8813_v3 = vld [vmem:[%s6026_s16 + $0x28] sm:$0xff]  ;;  %v11278_v57 = vld [vmem:[#allocation42_spill] sm:$0xff] }
 0x294   : > { %v2235_v59 = vmul.f32 %v8802_v37, %v2219_v40  ;;  %v2835_v45 = vmul.f32 %v8636_v20, %v8780_v43  ;;  %v3343_v9 = vmul.f32 %v3327_v47, %v11269_v48  ;;  %v3393_v50 = vadd.f32 %v3377_v19, %v3341_v55  ;;  %11271 = vst [vmem:[#allocation133_spill] sm:$0xff] %v8813_v3  ;;  %v11274_v40 = vld [vmem:[#allocation65_spill] sm:$0xff]  ;;  %v11275_v55 = vld [vmem:[#allocation68_spill] sm:$0xff]  ;;  %v11276_v47 = vld [vmem:[#allocation67_spill] sm:$0xff] }
 0x295   : > { %v8810_v18 = vadd.f32 %v2850_v21, %v2814_v14  ;;  %v8817_v34 = vsub.f32 %v8813_v3, %v11222_v17  ;;  %vm1500_vm15 = vcmp.ge.f32.partialorder %v8813_v3, %v11096_v63  ;;  %vm1516_vm0 = vcmp.lt.f32.partialorder %v8813_v3, %v11222_v17  ;;  %v11280_v37 = vld [vmem:[#allocation46_spill] sm:$0xff] }
 0x296   : > { %v8821_v61 = vadd.f32 %v2235_v59, %v2199_v32  ;;  %v2184_v48 = vmul.f32 %v8614_v12, %v11274_v40  ;;  %v2800_v21 = vmul.f32 %v8626_v0, %v11275_v55  ;;  %3633 = vst [vmem:[#allocation2 + $0x120] sm:$0xff] %v3393_v50  ;;  %v3363_v51 = vmul.f32 %v8658_v10, %v8780_v43  ;;  %vm1532_vm1 = vmand %vm1500_vm15, %vm1516_vm0  ;;  %v11279_v40 = vld [vmem:[#allocation50_spill] sm:$0xff] }
 0x297   : > { %11270 = vst [vmem:[#allocation125_spill] sm:$0xff] %v8810_v18  ;;  %11272 = vst [vmem:[#allocation135_spill] sm:$0xff] %v8817_v34  ;;  %v3378_v14 = vmul.f32 %v3362_v31, %v8810_v18  ;;  %v2220_v32 = vmul.f32 %v8620_v56, %v8817_v34  ;;  %v3328_v19 = vmul.f32 %v8642_v41, %v11276_v47  ;;  %v8838_v59 = vsel %vm1532_vm1, 1.0, %v10886_v58  ;;  %v8849_v47 = vld [vmem:[%s6026_s16 + $0x30] sm:$0xff] }
 0x298   : > { %11273 = vst [vmem:[#allocation41_spill] sm:$0xff] %v8821_v61  ;;  %v2851_v35 = vmul.f32 %v2835_v45, %v8821_v61  ;;  %11277 = vst [vmem:[#allocation31_spill] sm:$0xff] %v8838_v59  ;;  %v2200_v55 = vmul.f32 %v11278_v57, %v2184_v48  ;;  %v2836_v50 = vmul.f32 %v8636_v20, %v8817_v34  ;;  %v11288_v57 = vld [vmem:[#allocation140_spill] sm:$0xff] }
 0x299   : > { %v3394_v31 = vadd.f32 %v3378_v14, %v3342_v54  ;;  %v2236_v43 = vmul.f32 %v8838_v59, %v2220_v32  ;;  %v2816_v3 = vmul.f32 %v2800_v21, %v11279_v40  ;;  %v3344_v18 = vmul.f32 %v3328_v19, %v11280_v37  ;;  %11282 = vst [vmem:[#allocation128_spill] sm:$0xff] %v8849_v47  ;;  %v11284_v37 = vld [vmem:[#allocation71_spill] sm:$0xff]  ;;  %v11286_v21 = vld [vmem:[#allocation74_spill] sm:$0xff]  ;;  %v11290_v59 = vld [vmem:[#allocation45_spill] sm:$0xff] }
 0x29a   : > { %v8846_v46 = vadd.f32 %v2851_v35, %v2815_v16  ;;  %v8853_v45 = vsub.f32 %v8849_v47, %v11222_v17  ;;  %vm1501_vm2 = vcmp.ge.f32.partialorder %v8849_v47, %v11096_v63  ;;  %vm1517_vm3 = vcmp.lt.f32.partialorder %v8849_v47, %v11222_v17  ;;  %v11285_v40 = vld [vmem:[#allocation75_spill] sm:$0xff] }
 0x29b   : > { %3634 = vst [vmem:[#allocation2 + $0x200] sm:$0xff] %v3394_v31  ;;  %v8859_v54 = vadd.f32 %v2236_v43, %v2200_v55  ;;  %vm1533_vm4 = vmand %vm1501_vm2, %vm1517_vm3  ;;  %v2185_v16 = vmul.f32 %v8614_v12, %v11284_v37  ;;  %v2801_v48 = vmul.f32 %v8626_v0, %v11285_v40  ;;  %v3329_v14 = vmul.f32 %v8642_v41, %v11286_v21  ;;  %v11289_v37 = vld [vmem:[#allocation55_spill] sm:$0xff] }
 0x29c   : > { %11281 = vst [vmem:[#allocation47_spill] sm:$0xff] %v8846_v46  ;;  %11283 = vst [vmem:[#allocation123_spill] sm:$0xff] %v8853_v45  ;;  %v3379_v32 = vmul.f32 %v3363_v51, %v8846_v46  ;;  %v3364_v19 = vmul.f32 %v8658_v10, %v8817_v34  ;;  %v8871_v35 = vsel %vm1533_vm4, 1.0, %v10886_v58  ;;  %v2221_v43 = vmul.f32 %v8620_v56, %v8853_v45  ;;  %v8883_v46 = vld [vmem:[%s6026_s16 + $0x38] sm:$0xff] }
 0x29d   : > { %11287 = vst [vmem:[#allocation130_spill] sm:$0xff] %v8871_v35  ;;  %v2852_v55 = vmul.f32 %v2836_v50, %v8859_v54  ;;  %v2201_v31 = vmul.f32 %v11288_v57, %v2185_v16  ;;  %v2817_v40 = vmul.f32 %v2801_v48, %v11289_v37  ;;  %v2837_v21 = vmul.f32 %v8636_v20, %v8853_v45  ;;  %v11293_v50 = vld [vmem:[#allocation78_spill] sm:$0xff] }
 0x29e   : > { %v3395_v47 = vadd.f32 %v3379_v32, %v3343_v9  ;;  %v2237_v51 = vmul.f32 %v8871_v35, %v2221_v43  ;;  %v3345_v34 = vmul.f32 %v3329_v14, %v11290_v59  ;;  %11291 = vst [vmem:[#allocation129_spill] sm:$0xff] %v8883_v46  ;;  %v8887_v61 = vsub.f32 %v8883_v46, %v11222_v17  ;;  %v11295_v16 = vld [vmem:[#allocation82_spill] sm:$0xff]  ;;  %v11297_v43 = vld [vmem:[#allocation51_spill] sm:$0xff] }
 0x29f   : > { %v8889_v25 = vadd.f32 %v2852_v55, %v2816_v3  ;;  %vm1502_vm5 = vcmp.ge.f32.partialorder %v8883_v46, %v11096_v63  ;;  %vm1518_vm6 = vcmp.lt.f32.partialorder %v8883_v46, %v11222_v17  ;;  %v2186_v9 = vmul.f32 %v8614_v12, %v11293_v50  ;;  %v11298_v55 = vld [vmem:[#allocation81_spill] sm:$0xff]  ;;  %v8920_v46 = vld [vmem:[%s6026_s16 + $0x40] sm:$0xff] }
 0x2a0   : > { %11292 = vst [vmem:[#allocation53_spill] sm:$0xff] %v8887_v61  ;;  %3635 = vst [vmem:[#allocation2 + $0x1b8] sm:$0xff] %v3395_v47  ;;  %v8897_v59 = vadd.f32 %v2237_v51, %v2201_v31  ;;  %v3365_v37 = vmul.f32 %v8658_v10, %v8853_v45  ;;  %v2222_v3 = vmul.f32 %v8620_v56, %v8887_v61 }
 0x2a1   : > { %vm1534_vm7 = vmand %vm1502_vm5, %vm1518_vm6  ;;  %v2802_v48 = vmul.f32 %v8626_v0, %v11295_v16  ;;  %v3380_v14 = vmul.f32 %v3364_v19, %v8889_v25  ;;  %v2202_v47 = vmul.f32 %v11297_v43, %v2186_v9  ;;  %v3330_v57 = vmul.f32 %v8642_v41, %v11298_v55  ;;  %11299 = vst [vmem:[#allocation60_spill] sm:$0xff] %v8920_v46  ;;  %v11303_v55 = vld [vmem:[#allocation89_spill] sm:$0xff] }
 0x2a2   : > { %11294 = vst [vmem:[#allocation131_spill] sm:$0xff] %v8897_v59  ;;  %v8907_v32 = vsel %vm1534_vm7, 1.0, %v10886_v58  ;;  %v2853_v31 = vmul.f32 %v2837_v21, %v8897_v59  ;;  %v2838_v50 = vmul.f32 %v8636_v20, %v8887_v61  ;;  %v3366_v19 = vmul.f32 %v8658_v10, %v8887_v61 }
 0x2a3   : > { %11296 = vst [vmem:[#allocation35_spill] sm:$0xff] %v8907_v32  ;;  %v2238_v51 = vmul.f32 %v8907_v32, %v2222_v3  ;;  %v2818_v45 = vmul.f32 %v2802_v48, %v8325_v30  ;;  %v3396_v16 = vadd.f32 %v3380_v14, %v3344_v18  ;;  %v8924_v9 = vsub.f32 %v8920_v46, %v11222_v17  ;;  %v11301_v30 = vld [vmem:[#allocation79_spill] sm:$0xff] }
 0x2a4   : > { %vm1503_vm8 = vcmp.ge.f32.partialorder %v8920_v46, %v11096_v63  ;;  %v8928_v21 = vadd.f32 %v2853_v31, %v2817_v40  ;;  %vm1519_vm9 = vcmp.lt.f32.partialorder %v8920_v46, %v11222_v17  ;;  %v2187_v18 = vmul.f32 %v8614_v12, %v11301_v30  ;;  %v11302_v48 = vld [vmem:[#allocation63_spill] sm:$0xff]  ;;  %v11304_v31 = vld [vmem:[#allocation88_spill] sm:$0xff] }
 0x2a5   : > { %11300 = vst [vmem:[#allocation39_spill] sm:$0xff] %v8924_v9  ;;  %v8930_v3 = vadd.f32 %v2238_v51, %v2202_v47  ;;  %3636 = vst [vmem:[#allocation2 + $0x170] sm:$0xff] %v3396_v16  ;;  %v3346_v14 = vmul.f32 %v3330_v57, %v11302_v48  ;;  %v2223_v43 = vmul.f32 %v8620_v56, %v8924_v9  ;;  %v11306_v16 = vld [vmem:[#allocation144_spill] sm:$0xff] }
 0x2a6   : > { %vm1535_vm10 = vmand %vm1503_vm8, %vm1519_vm9  ;;  %v2803_v40 = vmul.f32 %v8626_v0, %v11303_v55  ;;  %v3331_v47 = vmul.f32 %v8642_v41, %v11304_v31  ;;  %v3381_v51 = vmul.f32 %v3365_v37, %v8928_v21  ;;  %v2203_v46 = vmul.f32 %v11306_v16, %v2187_v18  ;;  %v11307_v48 = vld [vmem:[#allocation56_spill] sm:$0xff]  ;;  %v8957_v37 = vld [vmem:[%s6026_s16 + $0x48] sm:$0xff] }
 0x2a7   : > { %v2854_v61 = vmul.f32 %v2838_v50, %v8930_v3  ;;  %v8946_v30 = vsel %vm1535_vm10, 1.0, %v10886_v58  ;;  %v2839_v59 = vmul.f32 %v8636_v20, %v8924_v9  ;;  %11308 = vst [vmem:[#allocation142_spill] sm:$0xff] %v8957_v37  ;;  %v8961_v50 = vsub.f32 %v8957_v37, %v11222_v17 }
 0x2a8   : > { %11305 = vst [vmem:[#allocation43_spill] sm:$0xff] %v8946_v30  ;;  %v2239_v57 = vmul.f32 %v8946_v30, %v2223_v43  ;;  %v2819_v32 = vmul.f32 %v2803_v40, %v11307_v48  ;;  %v3347_v55 = vmul.f32 %v3331_v47, %v8388_v44  ;;  %v3397_v35 = vadd.f32 %v3381_v51, %v3345_v34  ;;  %v11311_v43 = vld [vmem:[#allocation93_spill] sm:$0xff]  ;;  %v11312_v34 = vld [vmem:[#allocation96_spill] sm:$0xff]  ;;  %v11313_v47 = vld [vmem:[#allocation95_spill] sm:$0xff] }
 0x2a9   : > { %v8954_v31 = vadd.f32 %v2854_v61, %v2818_v45  ;;  %11309 = vst [vmem:[#allocation67_spill] sm:$0xff] %v8961_v50  ;;  %vm1504_vm11 = vcmp.ge.f32.partialorder %v8957_v37, %v11096_v63  ;;  %vm1520_vm12 = vcmp.lt.f32.partialorder %v8957_v37, %v11222_v17  ;;  %v2188_v44 = vmul.f32 %v8614_v12, %v11311_v43  ;;  %v11315_v48 = vld [vmem:[#allocation59_spill] sm:$0xff] }
 0x2aa   : > { %v8965_v18 = vadd.f32 %v2239_v57, %v2203_v46  ;;  %v2804_v61 = vmul.f32 %v8626_v0, %v11312_v34  ;;  %3637 = vst [vmem:[#allocation2 + $0x1c8] sm:$0xff] %v3397_v35  ;;  %v3367_v40 = vmul.f32 %v8658_v10, %v8924_v9  ;;  %vm1536_vm13 = vmand %vm1504_vm11, %vm1520_vm12  ;;  %v2224_v46 = vmul.f32 %v8620_v56, %v8961_v50 }
 0x2ab   : > { %v3382_v45 = vmul.f32 %v3366_v19, %v8954_v31  ;;  %v3332_v51 = vmul.f32 %v8642_v41, %v11313_v47  ;;  %v8982_v57 = vsel %vm1536_vm13, 1.0, %v10886_v58  ;;  %v2204_v34 = vmul.f32 %v11315_v48, %v2188_v44  ;;  %v8993_v47 = vld [vmem:[%s6026_s16 + $0x50] sm:$0xff]  ;;  %v11323_v48 = vld [vmem:[#allocation146_spill] sm:$0xff] }
 0x2ac   : > { %11310 = vst [vmem:[#allocation42_spill] sm:$0xff] %v8965_v18  ;;  %v2855_v16 = vmul.f32 %v2839_v59, %v8965_v18  ;;  %11314 = vst [vmem:[#allocation50_spill] sm:$0xff] %v8982_v57  ;;  %v2840_v35 = vmul.f32 %v8636_v20, %v8961_v50  ;;  %v2240_v9 = vmul.f32 %v8982_v57, %v2224_v46  ;;  %v11325_v57 = vld [vmem:[#allocation64_spill] sm:$0xff] }
 0x2ad   : > { %v3398_v19 = vadd.f32 %v3382_v45, %v3346_v14  ;;  %v2820_v43 = vmul.f32 %v2804_v61, %v8390_v26  ;;  %v3348_v37 = vmul.f32 %v3332_v51, %v8414_v1  ;;  %11317 = vst [vmem:[#allocation74_spill] sm:$0xff] %v8993_v47  ;;  %v8997_v59 = vsub.f32 %v8993_v47, %v11222_v17  ;;  %v11319_v26 = vld [vmem:[#allocation104_spill] sm:$0xff]  ;;  %v11321_v61 = vld [vmem:[#allocation102_spill] sm:$0xff] }
 0x2ae   : > { %v8990_v30 = vadd.f32 %v2855_v16, %v2819_v32  ;;  %vm1505_vm14 = vcmp.ge.f32.partialorder %v8993_v47, %v11096_v63  ;;  %vm1521_vm15 = vcmp.lt.f32.partialorder %v8993_v47, %v11222_v17  ;;  %v9003_v14 = vadd.f32 %v2240_v9, %v2204_v34  ;;  %v11320_v32 = vld [vmem:[#allocation103_spill] sm:$0xff]  ;;  %v11324_v47 = vld [vmem:[#allocation66_spill] sm:$0xff] }
 0x2af   : > { %11318 = vst [vmem:[#allocation140_spill] sm:$0xff] %v8997_v59  ;;  %3638 = vst [vmem:[#allocation2 + $0x128] sm:$0xff] %v3398_v19  ;;  %v2189_v1 = vmul.f32 %v8614_v12, %v11319_v26  ;;  %v2805_v44 = vmul.f32 %v8626_v0, %v11320_v32  ;;  %v3333_v45 = vmul.f32 %v8642_v41, %v11321_v61 }
 0x2b0   : > { %11316 = vst [vmem:[#allocation46_spill] sm:$0xff] %v8990_v30  ;;  %vm1537_vm0 = vmand %vm1505_vm14, %vm1521_vm15  ;;  %v3383_v46 = vmul.f32 %v3367_v40, %v8990_v30  ;;  %v3368_v51 = vmul.f32 %v8658_v10, %v8961_v50  ;;  %v2225_v9 = vmul.f32 %v8620_v56, %v8997_v59  ;;  %v2856_v34 = vmul.f32 %v2840_v35, %v9003_v14 }
 0x2b1   : > { %v9015_v16 = vsel %vm1537_vm0, 1.0, %v10886_v58  ;;  %v2205_v19 = vmul.f32 %v11323_v48, %v2189_v1  ;;  %v2821_v32 = vmul.f32 %v2805_v44, %v8425_v42  ;;  %v2841_v61 = vmul.f32 %v8636_v20, %v8997_v59  ;;  %v11327_v42 = vld [vmem:[#allocation105_spill] sm:$0xff]  ;;  %v11328_v1 = vld [vmem:[#allocation111_spill] sm:$0xff] }
 0x2b2   : > { %11322 = vst [vmem:[#allocation55_spill] sm:$0xff] %v9015_v16  ;;  %v3399_v26 = vadd.f32 %v3383_v46, %v3347_v55  ;;  %v2241_v40 = vmul.f32 %v9015_v16, %v2225_v9  ;;  %v3349_v50 = vmul.f32 %v3333_v45, %v11324_v47  ;;  %v9028_v30 = vsub.f32 %v11325_v57, %v11222_v17  ;;  %v11329_v46 = vld [vmem:[#allocation69_spill] sm:$0xff] }
 0x2b3   : > { %v9030_v18 = vadd.f32 %v2856_v34, %v2820_v43  ;;  %vm1506_vm1 = vcmp.ge.f32.partialorder %v11325_v57, %v11096_v63  ;;  %vm1522_vm2 = vcmp.lt.f32.partialorder %v11325_v57, %v11222_v17  ;;  %v2190_v35 = vmul.f32 %v8614_v12, %v11327_v42  ;;  %v11331_v42 = vld [vmem:[#allocation76_spill] sm:$0xff] }
 0x2b4   : > { %11326 = vst [vmem:[#allocation45_spill] sm:$0xff] %v9028_v30  ;;  %3639 = vst [vmem:[#allocation2 + $0x150] sm:$0xff] %v3399_v26  ;;  %v9038_v55 = vadd.f32 %v2241_v40, %v2205_v19  ;;  %v3369_v47 = vmul.f32 %v8658_v10, %v8997_v59  ;;  %v2226_v43 = vmul.f32 %v8620_v56, %v9028_v30  ;;  %v11330_v26 = vld [vmem:[#allocation110_spill] sm:$0xff] }
 0x2b5   : > { %vm1538_vm3 = vmand %vm1506_vm1, %vm1522_vm2  ;;  %v2806_v44 = vmul.f32 %v8626_v0, %v11328_v1  ;;  %v3384_v45 = vmul.f32 %v3368_v51, %v9030_v18  ;;  %v2206_v9 = vmul.f32 %v11329_v46, %v2190_v35  ;;  %v3334_v34 = vmul.f32 %v8642_v41, %v11330_v26 }
 0x2b6   : > { %v9048_v57 = vsel %vm1538_vm3, 1.0, %v10886_v58  ;;  %v2857_v48 = vmul.f32 %v2841_v61, %v9038_v55  ;;  %v2842_v59 = vmul.f32 %v8636_v20, %v9028_v30  ;;  %v3370_v51 = vmul.f32 %v8658_v10, %v9028_v30 }
 0x2b7   : > { %v2242_v19 = vmul.f32 %v9048_v57, %v2226_v43  ;;  %v2822_v40 = vmul.f32 %v2806_v44, %v8463_v11  ;;  %v3400_v1 = vadd.f32 %v3384_v45, %v3348_v37  ;;  %v9062_v16 = vsub.f32 %v11331_v42, %v11222_v17  ;;  %v11333_v11 = vld [vmem:[#allocation113_spill] sm:$0xff]  ;;  %v11334_v45 = vld [vmem:[#allocation119_spill] sm:$0xff] }
 0x2b8   : > { %vm1507_vm4 = vcmp.ge.f32.partialorder %v11331_v42, %v11096_v63  ;;  %v9066_v35 = vadd.f32 %v2857_v48, %v2821_v32  ;;  %vm1523_vm5 = vcmp.lt.f32.partialorder %v11331_v42, %v11222_v17  ;;  %v2191_v37 = vmul.f32 %v8614_v12, %v11333_v11  ;;  %v11335_v32 = vld [vmem:[#allocation118_spill] sm:$0xff] }
 0x2b9   : > { %11332 = vst [vmem:[#allocation51_spill] sm:$0xff] %v9062_v16  ;;  %v9068_v61 = vadd.f32 %v2242_v19, %v2206_v9  ;;  %3640 = vst [vmem:[#allocation2 + $0x90] sm:$0xff] %v3400_v1  ;;  %v3350_v43 = vmul.f32 %v3334_v34, %v8493_v36  ;;  %v2227_v44 = vmul.f32 %v8620_v56, %v9062_v16 }
 0x2ba   : > { %vm1539_vm6 = vmand %vm1507_vm4, %vm1523_vm5  ;;  %v2807_v46 = vmul.f32 %v8626_v0, %v11334_v45  ;;  %v3335_v9 = vmul.f32 %v8642_v41, %v11335_v32  ;;  %v3385_v26 = vmul.f32 %v3369_v47, %v9066_v35  ;;  %v2207_v1 = vmul.f32 %v8475_v60, %v2191_v37  ;;  %v11338_v37 = vld [vmem:[#allocation127_spill] sm:$0xff] }
 0x2bb   : > { %v2858_v42 = vmul.f32 %v2842_v59, %v9068_v61  ;;  %v9084_v48 = vsel %vm1539_vm6, 1.0, %v10886_v58  ;;  %v2843_v19 = vmul.f32 %v8636_v20, %v9062_v16  ;;  %v9096_v59 = vsub.f32 %v8487_v6, %v11222_v17 }
 0x2bc   : > { %v2243_v36 = vmul.f32 %v9084_v48, %v2227_v44  ;;  %v2823_v34 = vmul.f32 %v2807_v46, %v8501_v28  ;;  %v3351_v30 = vmul.f32 %v3335_v9, %v8532_v23  ;;  %v3401_v45 = vadd.f32 %v3385_v26, %v3349_v50  ;;  %v11337_v28 = vld [vmem:[#allocation115_spill] sm:$0xff]  ;;  %v11339_v46 = vld [vmem:[#allocation126_spill] sm:$0xff] }
 0x2bd   : > { %v9092_v32 = vadd.f32 %v2858_v42, %v2822_v40  ;;  %11336 = vst [vmem:[#allocation81_spill] sm:$0xff] %v9096_v59  ;;  %vm1508_vm7 = vcmp.ge.f32.partialorder %v8487_v6, %v11096_v63  ;;  %vm1524_vm8 = vcmp.lt.f32.partialorder %v8487_v6, %v11222_v17  ;;  %v2192_v47 = vmul.f32 %v8614_v12, %v11337_v28 }
 0x2be   : > { %v9100_v60 = vadd.f32 %v2243_v36, %v2207_v1  ;;  %v2808_v23 = vmul.f32 %v8626_v0, %v11338_v37  ;;  %3641 = vst [vmem:[#allocation2 + $0x2b8] sm:$0xff] %v3401_v45  ;;  %v3371_v40 = vmul.f32 %v8658_v10, %v9062_v16  ;;  %vm1540_vm9 = vmand %vm1508_vm7, %vm1524_vm8  ;;  %v2228_v44 = vmul.f32 %v8620_v56, %v9096_v59 }
 0x2bf   : > { %v3386_v50 = vmul.f32 %v3370_v51, %v9092_v32  ;;  %v3336_v9 = vmul.f32 %v8642_v41, %v11339_v46  ;;  %v9117_v26 = vsel %vm1540_vm9, 1.0, %v10886_v58  ;;  %v2208_v42 = vmul.f32 %v8511_v29, %v2192_v47 }
 0x2c0   : > { %v2859_v6 = vmul.f32 %v2843_v19, %v9100_v60  ;;  %v2844_v51 = vmul.f32 %v8636_v20, %v9096_v59  ;;  %v2244_v1 = vmul.f32 %v9117_v26, %v2228_v44  ;;  %v2824_v36 = vmul.f32 %v2808_v23, %v8534_v4 }
 0x2c1   : > { %v3402_v45 = vadd.f32 %v3386_v50, %v3350_v43  ;;  %v3352_v16 = vmul.f32 %v3336_v9, %v8558_v38  ;;  %v9129_v19 = vsub.f32 %v8524_v62, %v11222_v17  ;;  %vm1509_vm10 = vcmp.ge.f32.partialorder %v8524_v62, %v11096_v63  ;;  %v11341_v43 = vld [vmem:[#allocation114_spill] sm:$0xff] }
 0x2c2   : > { %v9125_v37 = vadd.f32 %v2859_v6, %v2823_v34  ;;  %vm1525_vm11 = vcmp.lt.f32.partialorder %v8524_v62, %v11222_v17  ;;  %v9135_v29 = vadd.f32 %v2244_v1, %v2208_v42  ;;  %v2193_v4 = vmul.f32 %v8614_v12, %v11341_v43  ;;  %v11342_v34 = vld [vmem:[#allocation132_spill] sm:$0xff] }
 0x2c3   : > { %11340 = vst [vmem:[#allocation63_spill] sm:$0xff] %v9129_v19  ;;  %3642 = vst [vmem:[#allocation2 + $0x230] sm:$0xff] %v3402_v45  ;;  %v2809_v38 = vmul.f32 %v8626_v0, %v11219_v22  ;;  %v3337_v47 = vmul.f32 %v8642_v41, %v11342_v34  ;;  %v3372_v50 = vmul.f32 %v8658_v10, %v9096_v59 }
 0x2c4   : > { %vm1541_vm12 = vmand %vm1509_vm10, %vm1525_vm11  ;;  %v3387_v23 = vmul.f32 %v3371_v40, %v9125_v37  ;;  %v2229_v44 = vmul.f32 %v8620_v56, %v9129_v19  ;;  %v2860_v46 = vmul.f32 %v2844_v51, %v9135_v29  ;;  %v2209_v9 = vmul.f32 %v8550_v7, %v2193_v4  ;;  %v11344_v7 = vld [vmem:[#allocation120_spill] sm:$0xff] }
 0x2c5   : > { %v9147_v62 = vsel %vm1541_vm12, 1.0, %v10886_v58  ;;  %v2825_v6 = vmul.f32 %v2809_v38, %v8569_v27  ;;  %v2845_v42 = vmul.f32 %v8636_v20, %v9129_v19  ;;  %v3353_v1 = vmul.f32 %v3337_v47, %v8595_v5 }
 0x2c6   : > { %v3403_v45 = vadd.f32 %v3387_v23, %v3351_v30  ;;  %v2245_v40 = vmul.f32 %v9147_v62, %v2229_v44  ;;  %v9160_v34 = vsub.f32 %v8561_v24, %v11222_v17  ;;  %v9162_v59 = vadd.f32 %v2860_v46, %v2824_v36  ;;  %v11345_v44 = vld [vmem:[#allocation40_spill] sm:$0xff] }
 0x2c7   : > { %vm1510_vm13 = vcmp.ge.f32.partialorder %v8561_v24, %v11096_v63  ;;  %vm1526_vm14 = vcmp.lt.f32.partialorder %v8561_v24, %v11222_v17  ;;  %v2194_v27 = vmul.f32 %v8614_v12, %v11344_v7  ;;  %v3373_v5 = vmul.f32 %v8658_v10, %v9129_v19 }
 0x2c8   : > { %11343 = vst [vmem:[#allocation88_spill] sm:$0xff] %v9160_v34  ;;  %3643 = vst [vmem:[#allocation2 + $0x8] sm:$0xff] %v3403_v45  ;;  %v9170_v30 = vadd.f32 %v2245_v40, %v2209_v9  ;;  %v2230_v51 = vmul.f32 %v8620_v56, %v9160_v34  ;;  %v2810_v36 = vmul.f32 %v8626_v0, %v11221_v8  ;;  %v11348_v9 = vld [vmem:[#allocation85_spill] sm:$0xff] }
 0x2c9   : > { %vm1542_vm15 = vmand %vm1510_vm13, %vm1526_vm14  ;;  %v3388_v63 = vmul.f32 %v3372_v50, %v9162_v59  ;;  %v2210_v12 = vmul.f32 %v8586_v53, %v2194_v27  ;;  %v2846_v4 = vmul.f32 %v8636_v20, %v9160_v34  ;;  %v3338_v56 = vmul.f32 %v8642_v41, %v7378_v39  ;;  %v11349_v41 = vld [vmem:[#allocation77_spill] sm:$0xff]  ;;  %v11353_v27 = vld [vmem:[#allocation32_spill] sm:$0xff] }
 0x2ca   : > { %v9180_v24 = vsel %vm1542_vm15, 1.0, %v10886_v58  ;;  %v2861_v38 = vmul.f32 %v2845_v42, %v9170_v30  ;;  %v2826_v23 = vmul.f32 %v2810_v36, %v8608_v13  ;;  %v3374_v50 = vmul.f32 %v8658_v10, %v9160_v34  ;;  %v11347_v13 = vld [vmem:[#allocation36_spill] sm:$0xff] }
 0x2cb   : > { %v2246_v47 = vmul.f32 %v9180_v24, %v2230_v51  ;;  %v3404_v0 = vadd.f32 %v3388_v63, %v3352_v16  ;;  %v979_v46 = vsub.f32 %v8598_v33, %v11345_v44  ;;  %vm1575_vm0 = vcmp.ge.f32.partialorder %v8598_v33, %v11222_v17  ;;  %v11350_v16 = vld [vmem:[#allocation34_spill] sm:$0xff]  ;;  %v11351_v42 = vld [vmem:[#allocation80_spill] sm:$0xff] }
 0x2cc   : > { %v9196_v53 = vadd.f32 %v2861_v38, %v2825_v6  ;;  %vm1591_vm1 = vcmp.lt.f32.partialorder %v8598_v33, %v11345_v44  ;;  %v9204_v39 = vrot.slane %v11348_v9, %v11347_v13  ;;  %v9208_v10 = vrot.slane %v11349_v41, %v11347_v13  ;;  %v11352_v6 = vld [vmem:[#allocation148_spill] sm:$0xff]  ;;  %v11354_v33 = vld [vmem:[#allocation149_spill] sm:$0xff] }
 0x2cd   : > { %v9198_v20 = vadd.f32 %v2246_v47, %v2210_v12  ;;  %3644 = vst [vmem:[#allocation2 + $0x328] sm:$0xff] %v3404_v0  ;;  %vm1607_vm2 = vmand %vm1575_vm0, %vm1591_vm1  ;;  %v9212_v45 = vrot.slane %v11351_v42, %v11350_v16  ;;  %v9216_v40 = vrot.slane %v11352_v6, %v11350_v16  ;;  %v9220_v51 = vrot.slane %v11354_v33, %v11353_v27  ;;  %v11356_v38 = vld [vmem:[#allocation116_spill] sm:$0xff] }
 0x2ce   : > { %v3389_v36 = vmul.f32 %v3373_v5, %v9196_v53  ;;  %v9225_v12 = vsel %vm1607_vm2, 1.0, %v10886_v58  ;;  %v2267_v47 = vmul.f32 %v9204_v39, %v11356_v38  ;;  %v3354_v0 = vmul.f32 %v3338_v56, %v8660_v52  ;;  %v11357_v41 = vld [vmem:[#allocation136_spill] sm:$0xff]  ;;  %v11359_v52 = vld [vmem:[#allocation87_spill] sm:$0xff] }
 0x2cf   : > { %11346 = vst [vmem:[#allocation144_spill] sm:$0xff] %v9198_v20  ;;  %v2862_v63 = vmul.f32 %v2846_v4, %v9198_v20  ;;  %11355 = vst [vmem:[#allocation56_spill] sm:$0xff] %v9225_v12  ;;  %v2303_v9 = vmul.f32 %v9208_v10, %v979_v46  ;;  %v2883_v16 = vmul.f32 %v9212_v45, %v11357_v41  ;;  %v11360_v41 = vld [vmem:[#allocation86_spill] sm:$0xff] }
 0x2d0   : > { %v3411_v42 = vmul.f32 %v9220_v51, %v11099_v15  ;;  %v3405_v6 = vadd.f32 %v3389_v36, %v3353_v1  ;;  %v2283_v4 = vmul.f32 %v8630_v2, %v2267_v47  ;;  %v9240_v33 = vrot.slane %v8654_v49, %v11353_v27  ;;  %v11361_v1 = vld [vmem:[#allocation97_spill] sm:$0xff] }
 0x2d1   : > { %v9235_v5 = vadd.f32 %v2862_v63, %v2826_v23  ;;  %v2319_v34 = vmul.f32 %v9225_v12, %v2303_v9  ;;  %v2899_v56 = vmul.f32 %v2883_v16, %v11359_v52  ;;  %v2919_v19 = vmul.f32 %v9216_v40, %v979_v46  ;;  %v11363_v49 = vld [vmem:[#allocation121_spill] sm:$0xff]  ;;  %v11364_v63 = vld [vmem:[#allocation138_spill] sm:$0xff] }
 0x2d2   : > { %v980_v38 = vsub.f32 %v11360_v41, %v11345_v44  ;;  %3645 = vst [vmem:[#allocation2 + $0x2b0] sm:$0xff] %v3405_v6  ;;  %v3427_v23 = vmul.f32 %v3411_v42, %v11361_v1  ;;  %vm1576_vm3 = vcmp.ge.f32.partialorder %v11360_v41, %v11222_v17  ;;  %vm1592_vm4 = vcmp.lt.f32.partialorder %v11360_v41, %v11345_v44  ;;  %v11366_v42 = vld [vmem:[#allocation44_spill] sm:$0xff]  ;;  %v11367_v6 = vld [vmem:[#allocation90_spill] sm:$0xff] }
 0x2d3   : > { %11358 = vst [vmem:[#allocation95_spill] sm:$0xff] %v9235_v5  ;;  %v3390_v15 = vmul.f32 %v3374_v50, %v9235_v5  ;;  %v9253_v2 = vadd.f32 %v2319_v34, %v2283_v4  ;;  %vm1608_vm5 = vmand %vm1576_vm3, %vm1592_vm4  ;;  %v2268_v27 = vmul.f32 %v9204_v39, %v11363_v49  ;;  %v2884_v47 = vmul.f32 %v9212_v45, %v11364_v63  ;;  %v11368_v49 = vld [vmem:[#allocation92_spill] sm:$0xff]  ;;  %v11378_v5 = vld [vmem:[#allocation106_spill] sm:$0xff] }
 0x2d4   : > { %v2304_v36 = vmul.f32 %v9208_v10, %v980_v38  ;;  %v3447_v9 = vmul.f32 %v9240_v33, %v979_v46  ;;  %v9262_v16 = vsel %vm1608_vm5, 1.0, %v10886_v58  ;;  %v3412_v41 = vmul.f32 %v9220_v51, %v11366_v42  ;;  %v11370_v46 = vld [vmem:[#allocation98_spill] sm:$0xff] }
 0x2d5   : > { %11362 = vst [vmem:[#allocation59_spill] sm:$0xff] %v9253_v2  ;;  %v3406_v50 = vadd.f32 %v3390_v15, %v3354_v0  ;;  %11365 = vst [vmem:[#allocation102_spill] sm:$0xff] %v9262_v16  ;;  %v2935_v34 = vmul.f32 %v2919_v19, %v9253_v2  ;;  %v2284_v4 = vmul.f32 %v11367_v6, %v2268_v27  ;;  %v11369_v0 = vld [vmem:[#allocation107_spill] sm:$0xff]  ;;  %v11372_v27 = vld [vmem:[#allocation124_spill] sm:$0xff] }
 0x2d6   : > { %v2320_v52 = vmul.f32 %v9262_v16, %v2304_v36  ;;  %v2920_v1 = vmul.f32 %v9216_v40, %v980_v38  ;;  %v2900_v63 = vmul.f32 %v2884_v47, %v11368_v49  ;;  %v3428_v15 = vmul.f32 %v3412_v41, %v11369_v0  ;;  %v11374_v6 = vld [vmem:[#allocation48_spill] sm:$0xff]  ;;  %v11376_v0 = vld [vmem:[#allocation94_spill] sm:$0xff] }
 0x2d7   : > { %3646 = vst [vmem:[#allocation2 + $0x2a0] sm:$0xff] %v3406_v50  ;;  %v981_v12 = vsub.f32 %v11370_v46, %v11345_v44  ;;  %vm1577_vm6 = vcmp.ge.f32.partialorder %v11370_v46, %v11222_v17  ;;  %v9276_v42 = vadd.f32 %v2935_v34, %v2899_v56  ;;  %vm1593_vm7 = vcmp.lt.f32.partialorder %v11370_v46, %v11345_v44  ;;  %v11373_v50 = vld [vmem:[#allocation141_spill] sm:$0xff] }
 0x2d8   : > { %v9278_v19 = vadd.f32 %v2320_v52, %v2284_v4  ;;  %v2269_v36 = vmul.f32 %v9204_v39, %v11372_v27  ;;  %v3448_v49 = vmul.f32 %v9240_v33, %v980_v38  ;;  %vm1609_vm8 = vmand %vm1577_vm6, %vm1593_vm7  ;;  %v2885_v41 = vmul.f32 %v9212_v45, %v11373_v50  ;;  %v11377_v27 = vld [vmem:[#allocation101_spill] sm:$0xff] }
 0x2d9   : > { %v2305_v47 = vmul.f32 %v9208_v10, %v981_v12  ;;  %v3413_v56 = vmul.f32 %v9220_v51, %v11374_v6  ;;  %v3463_v34 = vmul.f32 %v3447_v9, %v9276_v42  ;;  %v9293_v52 = vsel %vm1609_vm8, 1.0, %v10886_v58  ;;  %v11380_v9 = vld [vmem:[#allocation150_spill] sm:$0xff] }
 0x2da   : > { %11371 = vst [vmem:[#allocation146_spill] sm:$0xff] %v9278_v19  ;;  %v2936_v4 = vmul.f32 %v2920_v1, %v9278_v19  ;;  %11375 = vst [vmem:[#allocation66_spill] sm:$0xff] %v9293_v52  ;;  %v2285_v46 = vmul.f32 %v11376_v0, %v2269_v36  ;;  %v2901_v16 = vmul.f32 %v2885_v41, %v11377_v27  ;;  %v11382_v36 = vld [vmem:[#allocation122_spill] sm:$0xff] }
 0x2db   : > { %v2321_v38 = vmul.f32 %v9293_v52, %v2305_v47  ;;  %v2921_v2 = vmul.f32 %v9216_v40, %v981_v12  ;;  %v3429_v50 = vmul.f32 %v3413_v56, %v11378_v5  ;;  %v3479_v13 = vadd.f32 %v3463_v34, %v3427_v23  ;;  %v11383_v47 = vld [vmem:[#allocation49_spill] sm:$0xff]  ;;  %v11384_v56 = vld [vmem:[#allocation54_spill] sm:$0xff] }
 0x2dc   : > { %v9300_v20 = vadd.f32 %v2936_v4, %v2900_v63  ;;  %v982_v6 = vsub.f32 %v11380_v9, %v11345_v44  ;;  %vm1578_vm9 = vcmp.ge.f32.partialorder %v11380_v9, %v11222_v17  ;;  %vm1594_vm10 = vcmp.lt.f32.partialorder %v11380_v9, %v11345_v44 }
 0x2dd   : > { %v9306_v1 = vadd.f32 %v2321_v38, %v2285_v46  ;;  %v2270_v27 = vmul.f32 %v9204_v39, %v11382_v36  ;;  %v2886_v5 = vmul.f32 %v9212_v45, %v11383_v47  ;;  %3647 = vst [vmem:[#allocation2 + $0x1d0] sm:$0xff] %v3479_v13  ;;  %v3449_v63 = vmul.f32 %v9240_v33, %v981_v12  ;;  %vm1610_vm11 = vmand %vm1578_vm9, %vm1594_vm10  ;;  %v11386_v46 = vld [vmem:[#allocation100_spill] sm:$0xff]  ;;  %v11387_v47 = vld [vmem:[#allocation117_spill] sm:$0xff] }
 0x2de   : > { %11379 = vst [vmem:[#allocation64_spill] sm:$0xff] %v9300_v20  ;;  %v3464_v23 = vmul.f32 %v3448_v49, %v9300_v20  ;;  %v2306_v41 = vmul.f32 %v9208_v10, %v982_v6  ;;  %v3414_v34 = vmul.f32 %v9220_v51, %v11384_v56  ;;  %v9321_v0 = vsel %vm1610_vm11, 1.0, %v10886_v58  ;;  %v11388_v36 = vld [vmem:[#allocation125_spill] sm:$0xff]  ;;  %v11390_v56 = vld [vmem:[#allocation112_spill] sm:$0xff] }
 0x2df   : > { %11381 = vst [vmem:[#allocation69_spill] sm:$0xff] %v9306_v1  ;;  %v2937_v4 = vmul.f32 %v2921_v2, %v9306_v1  ;;  %11385 = vst [vmem:[#allocation110_spill] sm:$0xff] %v9321_v0  ;;  %v2286_v38 = vmul.f32 %v11386_v46, %v2270_v27  ;;  %v2922_v9 = vmul.f32 %v9216_v40, %v982_v6 }
 0x2e0   : > { %v3480_v13 = vadd.f32 %v3464_v23, %v3428_v15  ;;  %v2322_v49 = vmul.f32 %v9321_v0, %v2306_v41  ;;  %v2902_v12 = vmul.f32 %v2886_v5, %v11387_v47  ;;  %v3430_v52 = vmul.f32 %v3414_v34, %v11388_v36  ;;  %v11391_v15 = vld [vmem:[#allocation134_spill] sm:$0xff]  ;;  %v11392_v47 = vld [vmem:[#allocation57_spill] sm:$0xff]  ;;  %v11396_v0 = vld [vmem:[#allocation47_spill] sm:$0xff] }
 0x2e1   : > { %v9328_v20 = vadd.f32 %v2937_v4, %v2901_v16  ;;  %v983_v19 = vsub.f32 %v11390_v56, %v11345_v44  ;;  %vm1579_vm12 = vcmp.ge.f32.partialorder %v11390_v56, %v11222_v17  ;;  %vm1595_vm13 = vcmp.lt.f32.partialorder %v11390_v56, %v11345_v44  ;;  %v11393_v36 = vld [vmem:[#allocation61_spill] sm:$0xff] }
 0x2e2   : > { %3648 = vst [vmem:[#allocation2 + $0xe0] sm:$0xff] %v3480_v13  ;;  %v9336_v2 = vadd.f32 %v2322_v49, %v2286_v38  ;;  %vm1611_vm14 = vmand %vm1579_vm12, %vm1595_vm13  ;;  %v2271_v27 = vmul.f32 %v9204_v39, %v11391_v15  ;;  %v2887_v16 = vmul.f32 %v9212_v45, %v11392_v47  ;;  %v3415_v5 = vmul.f32 %v9220_v51, %v11393_v36  ;;  %v11394_v38 = vld [vmem:[#allocation108_spill] sm:$0xff]  ;;  %v11395_v49 = vld [vmem:[#allocation41_spill] sm:$0xff] }
 0x2e3   : > { %11389 = vst [vmem:[#allocation76_spill] sm:$0xff] %v9328_v20  ;;  %v3465_v23 = vmul.f32 %v3449_v63, %v9328_v20  ;;  %v3450_v41 = vmul.f32 %v9240_v33, %v982_v6  ;;  %v9347_v34 = vsel %vm1611_vm14, 1.0, %v10886_v58  ;;  %v2307_v4 = vmul.f32 %v9208_v10, %v983_v19  ;;  %v11397_v6 = vld [vmem:[#allocation133_spill] sm:$0xff] }
 0x2e4   : > { %v2938_v46 = vmul.f32 %v2922_v9, %v9336_v2  ;;  %v2287_v13 = vmul.f32 %v11394_v38, %v2271_v27  ;;  %v2903_v56 = vmul.f32 %v2887_v16, %v11395_v49  ;;  %v2923_v47 = vmul.f32 %v9216_v40, %v983_v19  ;;  %v11399_v9 = vld [vmem:[#allocation38_spill] sm:$0xff]  ;;  %v11404_v49 = vld [vmem:[#allocation68_spill] sm:$0xff] }
 0x2e5   : > { %v3481_v15 = vadd.f32 %v3465_v23, %v3429_v50  ;;  %v2323_v36 = vmul.f32 %v9347_v34, %v2307_v4  ;;  %v3431_v63 = vmul.f32 %v3415_v5, %v11396_v0  ;;  %v984_v20 = vsub.f32 %v11397_v6, %v11345_v44  ;;  %v11401_v5 = vld [vmem:[#allocation65_spill] sm:$0xff] }
 0x2e6   : > { %v9358_v1 = vadd.f32 %v2938_v46, %v2902_v12  ;;  %vm1580_vm15 = vcmp.ge.f32.partialorder %v11397_v6, %v11222_v17  ;;  %vm1596_vm0 = vcmp.lt.f32.partialorder %v11397_v6, %v11345_v44  ;;  %v2272_v27 = vmul.f32 %v9204_v39, %v11399_v9  ;;  %v11403_v46 = vld [vmem:[#allocation31_spill] sm:$0xff] }
 0x2e7   : > { %3649 = vst [vmem:[#allocation2 + $0x2d8] sm:$0xff] %v3481_v15  ;;  %v9366_v50 = vadd.f32 %v2323_v36, %v2287_v13  ;;  %v3451_v16 = vmul.f32 %v9240_v33, %v983_v19  ;;  %vm1612_vm1 = vmand %vm1580_vm15, %vm1596_vm0  ;;  %v2308_v0 = vmul.f32 %v9208_v10, %v984_v20  ;;  %v2888_v12 = vmul.f32 %v9212_v45, %v11401_v5 }
 0x2e8   : > { %11398 = vst [vmem:[#allocation118_spill] sm:$0xff] %v9358_v1  ;;  %v3466_v23 = vmul.f32 %v3450_v41, %v9358_v1  ;;  %v9374_v4 = vsel %vm1612_vm1, 1.0, %v10886_v58  ;;  %v2288_v38 = vmul.f32 %v11403_v46, %v2272_v27  ;;  %v3416_v15 = vmul.f32 %v9220_v51, %v11404_v49  ;;  %v11405_v41 = vld [vmem:[#allocation128_spill] sm:$0xff] }
 0x2e9   : > { %11400 = vst [vmem:[#allocation126_spill] sm:$0xff] %v9366_v50  ;;  %11402 = vst [vmem:[#allocation132_spill] sm:$0xff] %v9374_v4  ;;  %v2939_v13 = vmul.f32 %v2923_v47, %v9366_v50  ;;  %v2324_v19 = vmul.f32 %v9374_v4, %v2308_v0  ;;  %v2904_v36 = vmul.f32 %v2888_v12, %v8859_v54  ;;  %v11406_v47 = vld [vmem:[#allocation139_spill] sm:$0xff] }
 0x2ea   : > { %v2924_v6 = vmul.f32 %v9216_v40, %v984_v20  ;;  %v3482_v9 = vadd.f32 %v3466_v23, %v3430_v52  ;;  %v3452_v5 = vmul.f32 %v9240_v33, %v984_v20  ;;  %v985_v1 = vsub.f32 %v11405_v41, %v11345_v44  ;;  %v11407_v0 = vld [vmem:[#allocation71_spill] sm:$0xff] }
 0x2eb   : > { %vm1581_vm2 = vcmp.ge.f32.partialorder %v11405_v41, %v11222_v17  ;;  %v9388_v27 = vadd.f32 %v2939_v13, %v2903_v56  ;;  %v9390_v46 = vadd.f32 %v2324_v19, %v2288_v38  ;;  %vm1597_vm3 = vcmp.lt.f32.partialorder %v11405_v41, %v11345_v44  ;;  %v11408_v23 = vld [vmem:[#allocation75_spill] sm:$0xff]  ;;  %v11410_v19 = vld [vmem:[#allocation130_spill] sm:$0xff] }
 0x2ec   : > { %v2273_v54 = vmul.f32 %v9204_v39, %v11406_v47  ;;  %3650 = vst [vmem:[#allocation2 + $0x348] sm:$0xff] %v3482_v9  ;;  %v3432_v52 = vmul.f32 %v3416_v15, %v8889_v25  ;;  %vm1613_vm4 = vmand %vm1581_vm2, %vm1597_vm3  ;;  %v2309_v20 = vmul.f32 %v9208_v10, %v985_v1  ;;  %v2889_v12 = vmul.f32 %v9212_v45, %v11407_v0  ;;  %v11411_v15 = vld [vmem:[#allocation131_spill] sm:$0xff] }
 0x2ed   : > { %v3417_v56 = vmul.f32 %v9220_v51, %v11408_v23  ;;  %v3467_v38 = vmul.f32 %v3451_v16, %v9388_v27  ;;  %v2940_v49 = vmul.f32 %v2924_v6, %v9390_v46  ;;  %v9405_v13 = vsel %vm1613_vm4, 1.0, %v10886_v58  ;;  %v11412_v16 = vld [vmem:[#allocation129_spill] sm:$0xff] }
 0x2ee   : > { %11409 = vst [vmem:[#allocation40_spill] sm:$0xff] %v9405_v13  ;;  %v2289_v9 = vmul.f32 %v11410_v19, %v2273_v54  ;;  %v2325_v25 = vmul.f32 %v9405_v13, %v2309_v20  ;;  %v2905_v41 = vmul.f32 %v2889_v12, %v11411_v15  ;;  %v2925_v47 = vmul.f32 %v9216_v40, %v985_v1  ;;  %v11414_v54 = vld [vmem:[#allocation143_spill] sm:$0xff]  ;;  %v11415_v12 = vld [vmem:[#allocation78_spill] sm:$0xff] }
 0x2ef   : > { %v3433_v0 = vmul.f32 %v3417_v56, %v8928_v21  ;;  %v3483_v4 = vadd.f32 %v3467_v38, %v3431_v63  ;;  %v9412_v50 = vadd.f32 %v2940_v49, %v2904_v36  ;;  %v986_v23 = vsub.f32 %v11412_v16, %v11345_v44  ;;  %v11416_v38 = vld [vmem:[#allocation82_spill] sm:$0xff] }
 0x2f0   : > { %vm1582_vm5 = vcmp.ge.f32.partialorder %v11412_v16, %v11222_v17  ;;  %v9418_v6 = vadd.f32 %v2325_v25, %v2289_v9  ;;  %vm1598_vm6 = vcmp.lt.f32.partialorder %v11412_v16, %v11345_v44  ;;  %v2274_v20 = vmul.f32 %v9204_v39, %v11414_v54  ;;  %v11418_v25 = vld [vmem:[#allocation35_spill] sm:$0xff] }
 0x2f1   : > { %v2890_v21 = vmul.f32 %v9212_v45, %v11415_v12  ;;  %3651 = vst [vmem:[#allocation2 + $0x50] sm:$0xff] %v3483_v4  ;;  %v3468_v63 = vmul.f32 %v3452_v5, %v9412_v50  ;;  %v3453_v36 = vmul.f32 %v9240_v33, %v985_v1  ;;  %vm1614_vm7 = vmand %vm1582_vm5, %vm1598_vm6  ;;  %v2310_v56 = vmul.f32 %v9208_v10, %v986_v23 }
 0x2f2   : > { %11413 = vst [vmem:[#allocation85_spill] sm:$0xff] %v9418_v6  ;;  %v3418_v49 = vmul.f32 %v9220_v51, %v11416_v38  ;;  %v2941_v19 = vmul.f32 %v2925_v47, %v9418_v6  ;;  %v9433_v9 = vsel %vm1614_vm7, 1.0, %v10886_v58  ;;  %v2290_v15 = vmul.f32 %v11418_v25, %v2274_v20  ;;  %v11420_v38 = vld [vmem:[#allocation60_spill] sm:$0xff]  ;;  %v11422_v20 = vld [vmem:[#allocation79_spill] sm:$0xff] }
 0x2f3   : > { %11417 = vst [vmem:[#allocation77_spill] sm:$0xff] %v9433_v9  ;;  %v2926_v16 = vmul.f32 %v9216_v40, %v986_v23  ;;  %v3484_v4 = vadd.f32 %v3468_v63, %v3432_v52  ;;  %v2326_v5 = vmul.f32 %v9433_v9, %v2310_v56  ;;  %v2906_v1 = vmul.f32 %v2890_v21, %v8930_v3  ;;  %v11421_v52 = vld [vmem:[#allocation52_spill] sm:$0xff]  ;;  %v11426_v9 = vld [vmem:[#allocation46_spill] sm:$0xff] }
 0x2f4   : > { %v3434_v12 = vmul.f32 %v3418_v49, %v8954_v31  ;;  %v9440_v54 = vadd.f32 %v2941_v19, %v2905_v41  ;;  %v987_v13 = vsub.f32 %v11420_v38, %v11345_v44  ;;  %vm1583_vm8 = vcmp.ge.f32.partialorder %v11420_v38, %v11222_v17  ;;  %v11423_v41 = vld [vmem:[#allocation89_spill] sm:$0xff] }
 0x2f5   : > { %vm1599_vm9 = vcmp.lt.f32.partialorder %v11420_v38, %v11345_v44  ;;  %3652 = vst [vmem:[#allocation2 + $0x1a8] sm:$0xff] %v3484_v4  ;;  %v9448_v47 = vadd.f32 %v2326_v5, %v2290_v15  ;;  %v2275_v3 = vmul.f32 %v9204_v39, %v11421_v52  ;;  %v2891_v31 = vmul.f32 %v9212_v45, %v11422_v20  ;;  %v11424_v15 = vld [vmem:[#allocation43_spill] sm:$0xff]  ;;  %v11425_v5 = vld [vmem:[#allocation42_spill] sm:$0xff] }
 0x2f6   : > { %11419 = vst [vmem:[#allocation34_spill] sm:$0xff] %v9440_v54  ;;  %vm1615_vm10 = vmand %vm1583_vm8, %vm1599_vm9  ;;  %v3419_v21 = vmul.f32 %v9220_v51, %v11423_v41  ;;  %v3469_v63 = vmul.f32 %v3453_v36, %v9440_v54  ;;  %v3454_v56 = vmul.f32 %v9240_v33, %v986_v23  ;;  %v2311_v19 = vmul.f32 %v9208_v10, %v987_v13  ;;  %v11427_v23 = vld [vmem:[#allocation142_spill] sm:$0xff] }
 0x2f7   : > { %v9459_v49 = vsel %vm1615_vm10, 1.0, %v10886_v58  ;;  %v2942_v25 = vmul.f32 %v2926_v16, %v9448_v47  ;;  %v2291_v4 = vmul.f32 %v11424_v15, %v2275_v3  ;;  %v2907_v38 = vmul.f32 %v2891_v31, %v11425_v5  ;;  %v11429_v16 = vld [vmem:[#allocation145_spill] sm:$0xff]  ;;  %v11433_v5 = vld [vmem:[#allocation96_spill] sm:$0xff] }
 0x2f8   : > { %v2927_v20 = vmul.f32 %v9216_v40, %v987_v13  ;;  %v3485_v52 = vadd.f32 %v3469_v63, %v3433_v0  ;;  %v2327_v41 = vmul.f32 %v9459_v49, %v2311_v19  ;;  %v3435_v36 = vmul.f32 %v3419_v21, %v11426_v9  ;;  %v11430_v21 = vld [vmem:[#allocation93_spill] sm:$0xff] }
 0x2f9   : > { %v988_v54 = vsub.f32 %v11427_v23, %v11345_v44  ;;  %v9470_v6 = vadd.f32 %v2942_v25, %v2906_v1  ;;  %vm1584_vm11 = vcmp.ge.f32.partialorder %v11427_v23, %v11222_v17  ;;  %vm1600_vm12 = vcmp.lt.f32.partialorder %v11427_v23, %v11345_v44  ;;  %v11432_v25 = vld [vmem:[#allocation50_spill] sm:$0xff] }
 0x2fa   : > { %v2276_v3 = vmul.f32 %v9204_v39, %v11429_v16  ;;  %3653 = vst [vmem:[#allocation2 + $0x220] sm:$0xff] %v3485_v52  ;;  %v9478_v0 = vadd.f32 %v2327_v41, %v2291_v4  ;;  %v3455_v31 = vmul.f32 %v9240_v33, %v987_v13  ;;  %vm1616_vm13 = vmand %vm1584_vm11, %vm1600_vm12  ;;  %v2892_v1 = vmul.f32 %v9212_v45, %v11430_v21 }
 0x2fb   : > { %11428 = vst [vmem:[#allocation80_spill] sm:$0xff] %v9470_v6  ;;  %v2312_v9 = vmul.f32 %v9208_v10, %v988_v54  ;;  %v3470_v63 = vmul.f32 %v3454_v56, %v9470_v6  ;;  %v9486_v19 = vsel %vm1616_vm13, 1.0, %v10886_v58  ;;  %v3420_v52 = vmul.f32 %v9220_v51, %v11433_v5  ;;  %v11434_v56 = vld [vmem:[#allocation74_spill] sm:$0xff] }
 0x2fc   : > { %11431 = vst [vmem:[#allocation148_spill] sm:$0xff] %v9486_v19  ;;  %v2292_v15 = vmul.f32 %v11432_v25, %v2276_v3  ;;  %v2943_v4 = vmul.f32 %v2927_v20, %v9478_v0  ;;  %v2908_v41 = vmul.f32 %v2892_v1, %v9003_v14  ;;  %v2928_v23 = vmul.f32 %v9216_v40, %v988_v54  ;;  %v11435_v20 = vld [vmem:[#allocation62_spill] sm:$0xff] }
 0x2fd   : > { %v2328_v13 = vmul.f32 %v9486_v19, %v2312_v9  ;;  %v3486_v16 = vadd.f32 %v3470_v63, %v3434_v12  ;;  %v3456_v21 = vmul.f32 %v9240_v33, %v988_v54  ;;  %v989_v6 = vsub.f32 %v11434_v56, %v11345_v44  ;;  %v11436_v9 = vld [vmem:[#allocation104_spill] sm:$0xff] }
 0x2fe   : > { %vm1585_vm14 = vcmp.ge.f32.partialorder %v11434_v56, %v11222_v17  ;;  %v9500_v3 = vadd.f32 %v2943_v4, %v2907_v38  ;;  %vm1601_vm15 = vcmp.lt.f32.partialorder %v11434_v56, %v11345_v44  ;;  %v2277_v14 = vmul.f32 %v9204_v39, %v11435_v20  ;;  %v11437_v38 = vld [vmem:[#allocation103_spill] sm:$0xff] }
 0x2ff   : > { %v9502_v25 = vadd.f32 %v2328_v13, %v2292_v15  ;;  %3654 = vst [vmem:[#allocation2 + $0x310] sm:$0xff] %v3486_v16  ;;  %v3436_v54 = vmul.f32 %v3420_v52, %v9030_v18  ;;  %vm1617_vm0 = vmand %vm1585_vm14, %vm1601_vm15  ;;  %v2313_v12 = vmul.f32 %v9208_v10, %v989_v6  ;;  %v2893_v1 = vmul.f32 %v9212_v45, %v11436_v9  ;;  %v11438_v16 = vld [vmem:[#allocation55_spill] sm:$0xff] }
 0x300   : > { %v3421_v63 = vmul.f32 %v9220_v51, %v11437_v38  ;;  %v3471_v15 = vmul.f32 %v3455_v31, %v9500_v3  ;;  %v9517_v4 = vsel %vm1617_vm0, 1.0, %v10886_v58  ;;  %v2293_v13 = vmul.f32 %v11438_v16, %v2277_v14  ;;  %v9527_v38 = vld [vmem:[%s6026_s16 + $0x58] sm:$0xff] }
 0x301   : > { %v2944_v5 = vmul.f32 %v2928_v23, %v9502_v25  ;;  %v2329_v18 = vmul.f32 %v9517_v4, %v2313_v12  ;;  %v2909_v52 = vmul.f32 %v2893_v1, %v9038_v55  ;;  %v2929_v56 = vmul.f32 %v9216_v40, %v989_v6  ;;  %11439 = vst [vmem:[#allocation32_spill] sm:$0xff] %v9527_v38  ;;  %v11440_v55 = vld [vmem:[#allocation58_spill] sm:$0xff] }
 0x302   : > { %v3437_v9 = vmul.f32 %v3421_v63, %v9066_v35  ;;  %v3487_v20 = vadd.f32 %v3471_v15, %v3435_v36  ;;  %v990_v31 = vsub.f32 %v9527_v38, %v11345_v44  ;;  %vm1586_vm1 = vcmp.ge.f32.partialorder %v9527_v38, %v11222_v17  ;;  %v11441_v35 = vld [vmem:[#allocation105_spill] sm:$0xff]  ;;  %v11442_v63 = vld [vmem:[#allocation111_spill] sm:$0xff] }
 0x303   : > { %v9524_v19 = vadd.f32 %v2944_v5, %v2908_v41  ;;  %v9533_v23 = vadd.f32 %v2329_v18, %v2293_v13  ;;  %vm1602_vm2 = vcmp.lt.f32.partialorder %v9527_v38, %v11345_v44  ;;  %v2278_v14 = vmul.f32 %v9204_v39, %v11440_v55  ;;  %v9558_v38 = vld [vmem:[%s6026_s16 + $0x60] sm:$0xff] }
 0x304   : > { %v2894_v36 = vmul.f32 %v9212_v45, %v11441_v35  ;;  %3655 = vst [vmem:[#allocation2 + $0x228] sm:$0xff] %v3487_v20  ;;  %v3457_v12 = vmul.f32 %v9240_v33, %v989_v6  ;;  %vm1618_vm3 = vmand %vm1586_vm1, %vm1602_vm2  ;;  %v2314_v1 = vmul.f32 %v9208_v10, %v990_v31  ;;  %v3422_v15 = vmul.f32 %v9220_v51, %v11442_v63 }
 0x305   : > { %v3472_v41 = vmul.f32 %v3456_v21, %v9524_v19  ;;  %v2945_v5 = vmul.f32 %v2929_v56, %v9533_v23  ;;  %v9548_v16 = vsel %vm1618_vm3, 1.0, %v10886_v58  ;;  %v2294_v13 = vmul.f32 %v9048_v57, %v2278_v14 }
 0x306   : > { %v2930_v18 = vmul.f32 %v9216_v40, %v990_v31  ;;  %v2330_v21 = vmul.f32 %v9548_v16, %v2314_v1  ;;  %v2910_v6 = vmul.f32 %v2894_v36, %v9068_v61  ;;  %v3438_v35 = vmul.f32 %v3422_v15, %v9092_v32  ;;  %v11443_v61 = vld [vmem:[#allocation70_spill] sm:$0xff] }
 0x307   : > { %v3488_v20 = vadd.f32 %v3472_v41, %v3436_v54  ;;  %v9555_v55 = vadd.f32 %v2945_v5, %v2909_v52  ;;  %v991_v56 = vsub.f32 %v9558_v38, %v11345_v44  ;;  %vm1587_vm4 = vcmp.ge.f32.partialorder %v9558_v38, %v11222_v17  ;;  %v11444_v52 = vld [vmem:[#allocation119_spill] sm:$0xff] }
 0x308   : > { %vm1603_vm5 = vcmp.lt.f32.partialorder %v9558_v38, %v11345_v44  ;;  %v9566_v57 = vadd.f32 %v2330_v21, %v2294_v13  ;;  %v2279_v32 = vmul.f32 %v9204_v39, %v11443_v61  ;;  %v2895_v54 = vmul.f32 %v9212_v45, %v11333_v11  ;;  %v9587_v11 = vld [vmem:[%s6026_s16 + $0x68] sm:$0xff] }
 0x309   : > { %3656 = vst [vmem:[#allocation2 + $0x2e8] sm:$0xff] %v3488_v20  ;;  %vm1619_vm6 = vmand %vm1587_vm4, %vm1603_vm5  ;;  %v3423_v14 = vmul.f32 %v9220_v51, %v11444_v52  ;;  %v3473_v36 = vmul.f32 %v3457_v12, %v9555_v55  ;;  %v3458_v41 = vmul.f32 %v9240_v33, %v990_v31  ;;  %v2315_v63 = vmul.f32 %v9208_v10, %v991_v56 }
 0x30a   : > { %v9577_v1 = vsel %vm1619_vm6, 1.0, %v10886_v58  ;;  %v2946_v15 = vmul.f32 %v2930_v18, %v9566_v57  ;;  %v2295_v5 = vmul.f32 %v9084_v48, %v2279_v32  ;;  %v2911_v13 = vmul.f32 %v2895_v54, %v9100_v60  ;;  %v11445_v48 = vld [vmem:[#allocation83_spill] sm:$0xff] }
 0x30b   : > { %v2931_v20 = vmul.f32 %v9216_v40, %v991_v56  ;;  %v3489_v21 = vadd.f32 %v3473_v36, %v3437_v9  ;;  %v2331_v52 = vmul.f32 %v9577_v1, %v2315_v63  ;;  %v3439_v12 = vmul.f32 %v3423_v14, %v9125_v37  ;;  %v11446_v36 = vld [vmem:[#allocation127_spill] sm:$0xff] }
 0x30c   : > { %v992_v31 = vsub.f32 %v9587_v11, %v11345_v44  ;;  %v9591_v61 = vadd.f32 %v2946_v15, %v2910_v6  ;;  %vm1588_vm7 = vcmp.ge.f32.partialorder %v9587_v11, %v11222_v17  ;;  %vm1604_vm8 = vcmp.lt.f32.partialorder %v9587_v11, %v11345_v44 }
 0x30d   : > { %v2280_v60 = vmul.f32 %v9204_v39, %v11445_v48  ;;  %3657 = vst [vmem:[#allocation2 + $0x60] sm:$0xff] %v3489_v21  ;;  %v9599_v9 = vadd.f32 %v2331_v52, %v2295_v5  ;;  %v3459_v37 = vmul.f32 %v9240_v33, %v991_v56  ;;  %vm1620_vm9 = vmand %vm1588_vm7, %vm1604_vm8  ;;  %v2896_v6 = vmul.f32 %v9212_v45, %v11337_v28 }
 0x30e   : > { %v2316_v18 = vmul.f32 %v9208_v10, %v992_v31  ;;  %v3474_v32 = vmul.f32 %v3458_v41, %v9591_v61  ;;  %v9607_v54 = vsel %vm1620_vm9, 1.0, %v10886_v58  ;;  %v3424_v63 = vmul.f32 %v9220_v51, %v11446_v36  ;;  %v9618_v41 = vld [vmem:[%s6026_s16 + $0x70] sm:$0xff] }
 0x30f   : > { %v2296_v14 = vmul.f32 %v9117_v26, %v2280_v60  ;;  %v2947_v15 = vmul.f32 %v2931_v20, %v9599_v9  ;;  %v2912_v5 = vmul.f32 %v2896_v6, %v9135_v29  ;;  %v2932_v21 = vmul.f32 %v9216_v40, %v992_v31  ;;  %v11447_v29 = vld [vmem:[#allocation73_spill] sm:$0xff] }
 0x310   : > { %v2332_v56 = vmul.f32 %v9607_v54, %v2316_v18  ;;  %v3490_v52 = vadd.f32 %v3474_v32, %v3438_v35  ;;  %v3460_v28 = vmul.f32 %v9240_v33, %v992_v31  ;;  %v993_v48 = vsub.f32 %v9618_v41, %v11345_v44 }
 0x311   : > { %vm1589_vm10 = vcmp.ge.f32.partialorder %v9618_v41, %v11222_v17  ;;  %v9624_v26 = vadd.f32 %v2947_v15, %v2911_v13  ;;  %vm1605_vm11 = vcmp.lt.f32.partialorder %v9618_v41, %v11345_v44  ;;  %v2281_v35 = vmul.f32 %v9204_v39, %v11447_v29 }
 0x312   : > { %v9626_v20 = vadd.f32 %v2332_v56, %v2296_v14  ;;  %3658 = vst [vmem:[#allocation2 + $0x248] sm:$0xff] %v3490_v52  ;;  %v3440_v31 = vmul.f32 %v3424_v63, %v9162_v59  ;;  %vm1621_vm12 = vmand %vm1589_vm10, %vm1605_vm11  ;;  %v2317_v60 = vmul.f32 %v9208_v10, %v993_v48  ;;  %v2897_v18 = vmul.f32 %v9212_v45, %v11341_v43 }
 0x313   : > { %v3425_v13 = vmul.f32 %v9220_v51, %v11219_v22  ;;  %v3475_v6 = vmul.f32 %v3459_v37, %v9624_v26  ;;  %v9641_v14 = vsel %vm1621_vm12, 1.0, %v10886_v58  ;;  %v2297_v36 = vmul.f32 %v9147_v62, %v2281_v35  ;;  %v9651_v22 = vld [vmem:[%s6026_s16 + $0x78] sm:$0xff] }
 0x314   : > { %v2948_v32 = vmul.f32 %v2932_v21, %v9626_v20  ;;  %v2333_v59 = vmul.f32 %v9641_v14, %v2317_v60  ;;  %v2913_v63 = vmul.f32 %v2897_v18, %v9170_v30  ;;  %v2933_v15 = vmul.f32 %v9216_v40, %v993_v48  ;;  %11448 = vst [vmem:[#allocation149_spill] sm:$0xff] %v9651_v22  ;;  %v11450_v30 = vld [vmem:[#allocation72_spill] sm:$0xff] }
 0x315   : > { %v3441_v56 = vmul.f32 %v3425_v13, %v9196_v53  ;;  %v3491_v52 = vadd.f32 %v3475_v6, %v3439_v12  ;;  %v994_v37 = vsub.f32 %v9651_v22, %v11345_v44  ;;  %vm1590_vm13 = vcmp.ge.f32.partialorder %v9651_v22, %v11222_v17  ;;  %v11452_v6 = vld [vmem:[#allocation144_spill] sm:$0xff] }
 0x316   : > { %v9648_v43 = vadd.f32 %v2948_v32, %v2912_v5  ;;  %v9657_v62 = vadd.f32 %v2333_v59, %v2297_v36  ;;  %vm1606_vm14 = vcmp.lt.f32.partialorder %v9651_v22, %v11345_v44  ;;  %v2282_v21 = vmul.f32 %v9204_v39, %v11450_v30  ;;  %v11454_v36 = vld [vmem:[#allocation137_spill] sm:$0xff]  ;;  %v5450_v22 = vld [vmem:[%s6026_s16 + $0x10] sm:$0xff] }
 0x317   : > { %v2898_v53 = vmul.f32 %v9212_v45, %v11344_v7  ;;  %3659 = vst [vmem:[#allocation2 + $0x28] sm:$0xff] %v3491_v52  ;;  %v3461_v5 = vmul.f32 %v9240_v33, %v993_v48  ;;  %vm1622_vm15 = vmand %vm1590_vm13, %vm1606_vm14  ;;  %v2318_v17 = vmul.f32 %v9208_v10, %v994_v37  ;;  %v2934_v35 = vmul.f32 %v9216_v40, %v994_v37  ;;  %v5442_v40 = vld [vmem:[%s6026_s16] sm:$0xff]  ;;  %v11457_v52 = vld [vmem:[#allocation36_spill] sm:$0xff] }
 0x318   : > { %11449 = vst [vmem:[#allocation87_spill] sm:$0xff] %v9657_v62  ;;  %v3476_v12 = vmul.f32 %v3460_v28, %v9648_v43  ;;  %v2949_v60 = vmul.f32 %v2933_v15, %v9657_v62  ;;  %v9671_v18 = vsel %vm1622_vm15, 1.0, %v10886_v58  ;;  %v2298_v39 = vmul.f32 %v9180_v24, %v2282_v21  ;;  %v5444_v15 = vld [vmem:[#allocation9] sm:$0xff]  ;;  %v11465_v62 = vld [vmem:[#allocation136_spill] sm:$0xff] }
 0x319   : > { %11451 = vst [vmem:[#allocation86_spill] sm:$0xff] %v9671_v18  ;;  %v3426_v45 = vmul.f32 %v9220_v51, %v11221_v8  ;;  %v2334_v28 = vmul.f32 %v9671_v18, %v2318_v17  ;;  %v2914_v48 = vmul.f32 %v2898_v53, %v11452_v6  ;;  %v3462_v32 = vmul.f32 %v9240_v33, %v994_v37  ;;  %v5443_v8 = vld [vmem:[#allocation8] sm:$0xff]  ;;  %v11456_v51 = vld [vmem:[#allocation37_spill] sm:$0xff]  ;;  %v11459_v6 = vld [vmem:[#allocation147_spill] sm:$0xff] }
 0x31a   : > { %v3492_v13 = vadd.f32 %v3476_v12, %v3440_v31  ;;  %v9679_v10 = vadd.f32 %v2949_v60, %v2913_v63  ;;  %v999_v59 = vsub.f32 %v5442_v40, %v11454_v36  ;;  %vm1655_vm0 = vcmp.ge.f32.partialorder %v5442_v40, %v11345_v44  ;;  %v5445_v63 = vld [vmem:[#allocation8 + $0x8] sm:$0xff]  ;;  %v5446_v12 = vld [vmem:[#allocation9 + $0x8] sm:$0xff]  ;;  %v5447_v60 = vld [vmem:[#allocation8 + $0x10] sm:$0x1f] }
 0x31b   : > { %vm1671_vm1 = vcmp.lt.f32.partialorder %v5442_v40, %v11454_v36  ;;  %v9685_v24 = vadd.f32 %v2334_v28, %v2298_v39  ;;  %v9688_v31 = vrot.slane %v5443_v8, %v11456_v51  ;;  %v9691_v33 = vrot.slane %v5444_v15, %v11456_v51  ;;  %v11458_v39 = vld [vmem:[#allocation33_spill] sm:$0xff]  ;;  %v11460_v51 = vld [vmem:[#allocation116_spill] sm:$0xff] }
 0x31c   : > { %11453 = vst [vmem:[#allocation97_spill] sm:$0xff] %v9679_v10  ;;  %3660 = vst [vmem:[#allocation2 + $0x30] sm:$0xff] %v3492_v13  ;;  %v9694_v37 = vrot.slane %v5445_v63, %v11457_v52  ;;  %v3477_v21 = vmul.f32 %v3461_v5, %v9679_v10  ;;  %v9699_v17 = vrot.slane %v5446_v12, %v11457_v52  ;;  %v11461_v63 = vld [vmem:[#allocation95_spill] sm:$0xff]  ;;  %v5448_v52 = vld [vmem:[#allocation9 + $0x10] sm:$0x1f] }
 0x31d   : > { %11455 = vst [vmem:[#allocation44_spill] sm:$0xff] %v9685_v24  ;;  %vm1687_vm2 = vmand %vm1655_vm0, %vm1671_vm1  ;;  %v9702_v13 = vrot.slane %v5447_v60, %v11458_v39  ;;  %v2950_v28 = vmul.f32 %v2934_v35, %v9685_v24  ;;  %v2355_v40 = vmul.f32 %v9688_v31, %v11459_v6  ;;  %v2391_v8 = vmul.f32 %v9691_v33, %v999_v59  ;;  %v11463_v10 = vld [vmem:[#allocation56_spill] sm:$0xff]  ;;  %v11464_v6 = vld [vmem:[#allocation59_spill] sm:$0xff] }
 0x31e   : > { %v4796_v53 = vsel %vm1687_vm2, 1.0, %v10886_v58  ;;  %v2971_v5 = vmul.f32 %v9694_v37, %v11460_v51  ;;  %v3493_v15 = vadd.f32 %v3477_v21, %v3441_v56  ;;  %v3442_v7 = vmul.f32 %v3426_v45, %v11461_v63  ;;  %v5449_v56 = vld [vmem:[%s6026_s16 + $0x8] sm:$0xff]  ;;  %v11469_v63 = vld [vmem:[#allocation102_spill] sm:$0xff] }
 0x31f   : > { %v9712_v12 = vrot.slane %v5448_v52, %v11458_v39  ;;  %v9714_v60 = vadd.f32 %v2950_v28, %v2914_v48  ;;  %v2371_v18 = vmul.f32 %v11463_v10, %v2355_v40  ;;  %v2407_v35 = vmul.f32 %v4796_v53, %v2391_v8  ;;  %v11466_v10 = vld [vmem:[#allocation84_spill] sm:$0xff]  ;;  %v11468_v8 = vld [vmem:[#allocation138_spill] sm:$0xff] }
 0x320   : > { %v3007_v24 = vmul.f32 %v9699_v17, %v999_v59  ;;  %3661 = vst [vmem:[#allocation2 + $0x68] sm:$0xff] %v3493_v15  ;;  %v2987_v30 = vmul.f32 %v2971_v5, %v11464_v6  ;;  %v3499_v51 = vmul.f32 %v9702_v13, %v11465_v62  ;;  %v1000_v45 = vsub.f32 %v5449_v56, %v11454_v36  ;;  %v11467_v62 = vld [vmem:[#allocation121_spill] sm:$0xff] }
 0x321   : > { %11462 = vst [vmem:[#allocation90_spill] sm:$0xff] %v9714_v60  ;;  %vm1656_vm3 = vcmp.ge.f32.partialorder %v5449_v56, %v11345_v44  ;;  %v3478_v21 = vmul.f32 %v3462_v32, %v9714_v60  ;;  %v2423_v48 = vadd.f32 %v2407_v35, %v2371_v18  ;;  %vm1672_vm4 = vcmp.lt.f32.partialorder %v5449_v56, %v11454_v36  ;;  %v11470_v56 = vld [vmem:[#allocation146_spill] sm:$0xff] }
 0x322   : > { %v2356_v53 = vmul.f32 %v9688_v31, %v11466_v10  ;;  %v3535_v39 = vmul.f32 %v9712_v12, %v999_v59  ;;  %vm1688_vm5 = vmand %vm1656_vm3, %vm1672_vm4  ;;  %v2392_v28 = vmul.f32 %v9691_v33, %v1000_v45  ;;  %v2972_v40 = vmul.f32 %v9694_v37, %v11467_v62 }
 0x323   : > { %v3500_v5 = vmul.f32 %v9702_v13, %v11468_v8  ;;  %v3494_v15 = vadd.f32 %v3478_v21, %v3442_v7  ;;  %v3023_v32 = vmul.f32 %v3007_v24, %v2423_v48  ;;  %v4797_v18 = vsel %vm1688_vm5, 1.0, %v10886_v58  ;;  %v11471_v24 = vld [vmem:[#allocation64_spill] sm:$0xff]  ;;  %v11474_v8 = vld [vmem:[#allocation141_spill] sm:$0xff] }
 0x324   : > { %v2372_v52 = vmul.f32 %v11469_v63, %v2356_v53  ;;  %v3515_v35 = vmul.f32 %v3499_v51, %v9276_v42  ;;  %v2408_v6 = vmul.f32 %v4797_v18, %v2392_v28  ;;  %v2988_v59 = vmul.f32 %v2972_v40, %v11470_v56  ;;  %v11472_v42 = vld [vmem:[#allocation91_spill] sm:$0xff]  ;;  %v11473_v48 = vld [vmem:[#allocation124_spill] sm:$0xff]  ;;  %v11475_v18 = vld [vmem:[#allocation66_spill] sm:$0xff] }
 0x325   : > { %v3008_v10 = vmul.f32 %v9699_v17, %v1000_v45  ;;  %3662 = vst [vmem:[#allocation2 + $0x98] sm:$0xff] %v3494_v15  ;;  %v3039_v60 = vadd.f32 %v3023_v32, %v2987_v30  ;;  %v1001_v62 = vsub.f32 %v5450_v22, %v11454_v36  ;;  %vm1657_vm6 = vcmp.ge.f32.partialorder %v5450_v22, %v11345_v44  ;;  %v11476_v56 = vld [vmem:[#allocation69_spill] sm:$0xff] }
 0x326   : > { %vm1673_vm7 = vcmp.lt.f32.partialorder %v5450_v22, %v11454_v36  ;;  %v2424_v7 = vadd.f32 %v2408_v6, %v2372_v52  ;;  %v3516_v21 = vmul.f32 %v3500_v5, %v11471_v24  ;;  %v2357_v51 = vmul.f32 %v9688_v31, %v11472_v42  ;;  %v5451_v42 = vld [vmem:[%s6026_s16 + $0x18] sm:$0xff] }
 0x327   : > { %vm1689_vm8 = vmand %vm1657_vm6, %vm1673_vm7  ;;  %v2973_v53 = vmul.f32 %v9694_v37, %v11473_v48  ;;  %v3551_v28 = vmul.f32 %v3535_v39, %v3039_v60  ;;  %v2393_v40 = vmul.f32 %v9691_v33, %v1001_v62  ;;  %v3501_v15 = vmul.f32 %v9702_v13, %v11474_v8  ;;  %v11477_v48 = vld [vmem:[#allocation99_spill] sm:$0xff]  ;;  %v11480_v8 = vld [vmem:[#allocation110_spill] sm:$0xff] }
 0x328   : > { %v4798_v30 = vsel %vm1689_vm8, 1.0, %v10886_v58  ;;  %v3024_v22 = vmul.f32 %v3008_v10, %v2424_v7  ;;  %v3536_v32 = vmul.f32 %v9712_v12, %v1000_v45  ;;  %v2373_v5 = vmul.f32 %v11475_v18, %v2357_v51  ;;  %v11478_v7 = vld [vmem:[#allocation76_spill] sm:$0xff] }
 0x329   : > { %v3009_v63 = vmul.f32 %v9699_v17, %v1001_v62  ;;  %v3567_v52 = vadd.f32 %v3551_v28, %v3515_v35  ;;  %v2409_v6 = vmul.f32 %v4798_v30, %v2393_v40  ;;  %v2989_v24 = vmul.f32 %v2973_v53, %v11476_v56  ;;  %v11479_v53 = vld [vmem:[#allocation122_spill] sm:$0xff] }
 0x32a   : > { %v1002_v60 = vsub.f32 %v5451_v42, %v11454_v36  ;;  %v3040_v39 = vadd.f32 %v3024_v22, %v2988_v59  ;;  %vm1658_vm9 = vcmp.ge.f32.partialorder %v5451_v42, %v11345_v44  ;;  %vm1674_vm10 = vcmp.lt.f32.partialorder %v5451_v42, %v11454_v36 }
 0x32b   : > { %v2358_v10 = vmul.f32 %v9688_v31, %v11477_v48  ;;  %3663 = vst [vmem:[#allocation2 + $0x1e0] sm:$0xff] %v3567_v52  ;;  %v2425_v45 = vadd.f32 %v2409_v6, %v2373_v5  ;;  %v3517_v51 = vmul.f32 %v3501_v15, %v11478_v7  ;;  %vm1690_vm11 = vmand %vm1658_vm9, %vm1674_vm10  ;;  %v2974_v28 = vmul.f32 %v9694_v37, %v11479_v53  ;;  %v11481_v5 = vld [vmem:[#allocation49_spill] sm:$0xff]  ;;  %v5452_v48 = vld [vmem:[%s6026_s16 + $0x20] sm:$0xff] }
 0x32c   : > { %v2394_v35 = vmul.f32 %v9691_v33, %v1002_v60  ;;  %v3552_v30 = vmul.f32 %v3536_v32, %v3040_v39  ;;  %v3537_v59 = vmul.f32 %v9712_v12, %v1001_v62  ;;  %v4799_v40 = vsel %vm1690_vm11, 1.0, %v10886_v58  ;;  %v11482_v39 = vld [vmem:[#allocation109_spill] sm:$0xff] }
 0x32d   : > { %v2374_v22 = vmul.f32 %v11480_v8, %v2358_v10  ;;  %v3025_v18 = vmul.f32 %v3009_v63, %v2425_v45  ;;  %v3010_v52 = vmul.f32 %v9699_v17, %v1002_v60  ;;  %v3502_v15 = vmul.f32 %v9702_v13, %v11481_v5  ;;  %v11485_v8 = vld [vmem:[#allocation118_spill] sm:$0xff] }
 0x32e   : > { %v2410_v56 = vmul.f32 %v4799_v40, %v2394_v35  ;;  %v3568_v6 = vadd.f32 %v3552_v30, %v3516_v21  ;;  %v2990_v42 = vmul.f32 %v2974_v28, %v9336_v2  ;;  %v1003_v7 = vsub.f32 %v5452_v48, %v11454_v36  ;;  %v11483_v2 = vld [vmem:[#allocation134_spill] sm:$0xff]  ;;  %v11484_v35 = vld [vmem:[#allocation57_spill] sm:$0xff] }
 0x32f   : > { %vm1659_vm12 = vcmp.ge.f32.partialorder %v5452_v48, %v11345_v44  ;;  %v3041_v62 = vadd.f32 %v3025_v18, %v2989_v24  ;;  %vm1675_vm13 = vcmp.lt.f32.partialorder %v5452_v48, %v11454_v36  ;;  %v2359_v63 = vmul.f32 %v9688_v31, %v11482_v39  ;;  %v5453_v39 = vld [vmem:[%s6026_s16 + $0x28] sm:$0xff] }
 0x330   : > { %v2426_v32 = vadd.f32 %v2410_v56, %v2374_v22  ;;  %3664 = vst [vmem:[#allocation2 + $0x288] sm:$0xff] %v3568_v6  ;;  %v3538_v10 = vmul.f32 %v9712_v12, %v1002_v60  ;;  %vm1691_vm14 = vmand %vm1659_vm12, %vm1675_vm13  ;;  %v2395_v21 = vmul.f32 %v9691_v33, %v1003_v7  ;;  %v2975_v45 = vmul.f32 %v9694_v37, %v11483_v2  ;;  %v11486_v56 = vld [vmem:[#allocation126_spill] sm:$0xff] }
 0x331   : > { %v3503_v53 = vmul.f32 %v9702_v13, %v11484_v35  ;;  %v3553_v24 = vmul.f32 %v3537_v59, %v3041_v62  ;;  %v4800_v30 = vsel %vm1691_vm14, 1.0, %v10886_v58  ;;  %v2375_v40 = vmul.f32 %v9347_v34, %v2359_v63  ;;  %v11488_v62 = vld [vmem:[#allocation38_spill] sm:$0xff]  ;;  %v11489_v63 = vld [vmem:[#allocation65_spill] sm:$0xff] }
 0x332   : > { %v3026_v28 = vmul.f32 %v3010_v52, %v2426_v32  ;;  %v3518_v22 = vmul.f32 %v3502_v15, %v11485_v8  ;;  %v2411_v18 = vmul.f32 %v4800_v30, %v2395_v21  ;;  %v2991_v60 = vmul.f32 %v2975_v45, %v11486_v56  ;;  %v11487_v52 = vld [vmem:[#allocation135_spill] sm:$0xff] }
 0x333   : > { %v3011_v5 = vmul.f32 %v9699_v17, %v1003_v7  ;;  %v3569_v6 = vadd.f32 %v3553_v24, %v3517_v51  ;;  %v1004_v2 = vsub.f32 %v5453_v39, %v11454_v36  ;;  %vm1660_vm15 = vcmp.ge.f32.partialorder %v5453_v39, %v11345_v44 }
 0x334   : > { %v3042_v48 = vadd.f32 %v3026_v28, %v2990_v42  ;;  %v2427_v59 = vadd.f32 %v2411_v18, %v2375_v40  ;;  %vm1676_vm0 = vcmp.lt.f32.partialorder %v5453_v39, %v11454_v36  ;;  %v2360_v34 = vmul.f32 %v9688_v31, %v11487_v52  ;;  %v11490_v28 = vld [vmem:[#allocation132_spill] sm:$0xff]  ;;  %v11493_v52 = vld [vmem:[#allocation71_spill] sm:$0xff] }
 0x335   : > { %v2976_v15 = vmul.f32 %v9694_v37, %v11488_v62  ;;  %3665 = vst [vmem:[#allocation2 + $0x1a0] sm:$0xff] %v3569_v6  ;;  %v3519_v51 = vmul.f32 %v3503_v53, %v9388_v27  ;;  %vm1692_vm1 = vmand %vm1660_vm15, %vm1676_vm0  ;;  %v2396_v42 = vmul.f32 %v9691_v33, %v1004_v2  ;;  %v3504_v21 = vmul.f32 %v9702_v13, %v11489_v63  ;;  %v5454_v53 = vld [vmem:[%s6026_s16 + $0x30] sm:$0xff] }
 0x336   : > { %v3554_v32 = vmul.f32 %v3538_v10, %v3042_v48  ;;  %v3027_v45 = vmul.f32 %v3011_v5, %v2427_v59  ;;  %v3539_v35 = vmul.f32 %v9712_v12, %v1003_v7  ;;  %v4801_v24 = vsel %vm1692_vm1, 1.0, %v10886_v58 }
 0x337   : > { %v2376_v30 = vmul.f32 %v11490_v28, %v2360_v34  ;;  %v2412_v8 = vmul.f32 %v4801_v24, %v2396_v42  ;;  %v2992_v18 = vmul.f32 %v2976_v15, %v9390_v46  ;;  %v3012_v10 = vmul.f32 %v9699_v17, %v1004_v2  ;;  %v11492_v46 = vld [vmem:[#allocation139_spill] sm:$0xff]  ;;  %v5455_v28 = vld [vmem:[%s6026_s16 + $0x38] sm:$0xff] }
 0x338   : > { %v3570_v40 = vadd.f32 %v3554_v32, %v3518_v22  ;;  %v3043_v27 = vadd.f32 %v3027_v45, %v2991_v60  ;;  %v1005_v56 = vsub.f32 %v5454_v53, %v11454_v36  ;;  %vm1661_vm2 = vcmp.ge.f32.partialorder %v5454_v53, %v11345_v44  ;;  %v11491_v22 = vld [vmem:[#allocation123_spill] sm:$0xff]  ;;  %v11494_v32 = vld [vmem:[#allocation40_spill] sm:$0xff]  ;;  %v11495_v45 = vld [vmem:[#allocation85_spill] sm:$0xff] }
 0x339   : > { %vm1677_vm3 = vcmp.lt.f32.partialorder %v5454_v53, %v11454_v36  ;;  %v2428_v7 = vadd.f32 %v2412_v8, %v2376_v30  ;;  %v3520_v5 = vmul.f32 %v3504_v21, %v9412_v50  ;;  %v2361_v6 = vmul.f32 %v9688_v31, %v11491_v22  ;;  %v11498_v53 = vld [vmem:[#allocation143_spill] sm:$0xff] }
 0x33a   : > { %3666 = vst [vmem:[#allocation2 + $0xb8] sm:$0xff] %v3570_v40  ;;  %vm1693_vm4 = vmand %vm1661_vm2, %vm1677_vm3  ;;  %v2977_v48 = vmul.f32 %v9694_v37, %v11492_v46  ;;  %v3555_v60 = vmul.f32 %v3539_v35, %v3043_v27  ;;  %v2397_v59 = vmul.f32 %v9691_v33, %v1005_v56  ;;  %v3505_v34 = vmul.f32 %v9702_v13, %v11493_v52  ;;  %v11496_v40 = vld [vmem:[#allocation53_spill] sm:$0xff]  ;;  %v11500_v52 = vld [vmem:[#allocation78_spill] sm:$0xff] }
 0x33b   : > { %v4802_v39 = vsel %vm1693_vm4, 1.0, %v10886_v58  ;;  %v3028_v62 = vmul.f32 %v3012_v10, %v2428_v7  ;;  %v3540_v15 = vmul.f32 %v9712_v12, %v1004_v2  ;;  %v2377_v50 = vmul.f32 %v11494_v32, %v2361_v6  ;;  %v11497_v10 = vld [vmem:[#allocation34_spill] sm:$0xff]  ;;  %v11499_v46 = vld [vmem:[#allocation77_spill] sm:$0xff] }
 0x33c   : > { %v3013_v42 = vmul.f32 %v9699_v17, %v1005_v56  ;;  %v3571_v63 = vadd.f32 %v3555_v60, %v3519_v51  ;;  %v2413_v21 = vmul.f32 %v4802_v39, %v2397_v59  ;;  %v2993_v24 = vmul.f32 %v2977_v48, %v11495_v45 }
 0x33d   : > { %v1006_v35 = vsub.f32 %v5455_v28, %v11454_v36  ;;  %v3044_v30 = vadd.f32 %v3028_v62, %v2992_v18  ;;  %vm1662_vm5 = vcmp.ge.f32.partialorder %v5455_v28, %v11345_v44  ;;  %vm1678_vm6 = vcmp.lt.f32.partialorder %v5455_v28, %v11454_v36 }
 0x33e   : > { %v2362_v8 = vmul.f32 %v9688_v31, %v11496_v40  ;;  %3667 = vst [vmem:[#allocation2 + $0x40] sm:$0xff] %v3571_v63  ;;  %v2429_v2 = vadd.f32 %v2413_v21, %v2377_v50  ;;  %v3521_v27 = vmul.f32 %v3505_v34, %v11497_v10  ;;  %vm1694_vm7 = vmand %vm1662_vm5, %vm1678_vm6  ;;  %v2978_v7 = vmul.f32 %v9694_v37, %v11498_v53  ;;  %v5456_v50 = vld [vmem:[%s6026_s16 + $0x40] sm:$0xff]  ;;  %v11501_v21 = vld [vmem:[#allocation39_spill] sm:$0xff] }
 0x33f   : > { %v2398_v51 = vmul.f32 %v9691_v33, %v1006_v35  ;;  %v3556_v22 = vmul.f32 %v3540_v15, %v3044_v30  ;;  %v3541_v18 = vmul.f32 %v9712_v12, %v1005_v56  ;;  %v4803_v6 = vsel %vm1694_vm7, 1.0, %v10886_v58  ;;  %v11503_v30 = vld [vmem:[#allocation79_spill] sm:$0xff] }
 0x340   : > { %v2378_v48 = vmul.f32 %v11499_v46, %v2362_v8  ;;  %v3029_v60 = vmul.f32 %v3013_v42, %v2429_v2  ;;  %v3014_v59 = vmul.f32 %v9699_v17, %v1006_v35  ;;  %v3506_v34 = vmul.f32 %v9702_v13, %v11500_v52 }
 0x341   : > { %v2414_v39 = vmul.f32 %v4803_v6, %v2398_v51  ;;  %v3572_v62 = vadd.f32 %v3556_v22, %v3520_v5  ;;  %v2994_v32 = vmul.f32 %v2978_v7, %v9448_v47  ;;  %v1007_v63 = vsub.f32 %v5456_v50, %v11454_v36  ;;  %v11502_v47 = vld [vmem:[#allocation52_spill] sm:$0xff] }
 0x342   : > { %vm1663_vm8 = vcmp.ge.f32.partialorder %v5456_v50, %v11345_v44  ;;  %v3045_v56 = vadd.f32 %v3029_v60, %v2993_v24  ;;  %vm1679_vm9 = vcmp.lt.f32.partialorder %v5456_v50, %v11454_v36  ;;  %v2363_v42 = vmul.f32 %v9688_v31, %v11501_v21  ;;  %v11504_v51 = vld [vmem:[#allocation80_spill] sm:$0xff] }
 0x343   : > { %v2430_v15 = vadd.f32 %v2414_v39, %v2378_v48  ;;  %3668 = vst [vmem:[#allocation2 + $0x308] sm:$0xff] %v3572_v62  ;;  %v3542_v45 = vmul.f32 %v9712_v12, %v1006_v35  ;;  %vm1695_vm10 = vmand %vm1663_vm8, %vm1679_vm9  ;;  %v2399_v5 = vmul.f32 %v9691_v33, %v1007_v63  ;;  %v2979_v28 = vmul.f32 %v9694_v37, %v11502_v47  ;;  %v5457_v48 = vld [vmem:[%s6026_s16 + $0x48] sm:$0xff]  ;;  %v11507_v62 = vld [vmem:[#allocation93_spill] sm:$0xff] }
 0x344   : > { %v3507_v40 = vmul.f32 %v9702_v13, %v11503_v30  ;;  %v3557_v24 = vmul.f32 %v3541_v18, %v3045_v56  ;;  %v4804_v2 = vsel %vm1695_vm10, 1.0, %v10886_v58  ;;  %v2379_v10 = vmul.f32 %v9459_v49, %v2363_v42  ;;  %v11505_v39 = vld [vmem:[#allocation67_spill] sm:$0xff]  ;;  %v11508_v21 = vld [vmem:[#allocation148_spill] sm:$0xff] }
 0x345   : > { %v3030_v8 = vmul.f32 %v3014_v59, %v2430_v15  ;;  %v3522_v53 = vmul.f32 %v3506_v34, %v11504_v51  ;;  %v2415_v7 = vmul.f32 %v4804_v2, %v2399_v5  ;;  %v2995_v35 = vmul.f32 %v2979_v28, %v9478_v0  ;;  %v11506_v59 = vld [vmem:[#allocation145_spill] sm:$0xff]  ;;  %v5458_v30 = vld [vmem:[%s6026_s16 + $0x50] sm:$0xff] }
 0x346   : > { %v3015_v22 = vmul.f32 %v9699_v17, %v1007_v63  ;;  %v3573_v6 = vadd.f32 %v3557_v24, %v3521_v27  ;;  %v1008_v60 = vsub.f32 %v5457_v48, %v11454_v36  ;;  %vm1664_vm11 = vcmp.ge.f32.partialorder %v5457_v48, %v11345_v44 }
 0x347   : > { %v3046_v46 = vadd.f32 %v3030_v8, %v2994_v32  ;;  %v2431_v18 = vadd.f32 %v2415_v7, %v2379_v10  ;;  %vm1680_vm12 = vcmp.lt.f32.partialorder %v5457_v48, %v11454_v36  ;;  %v2364_v49 = vmul.f32 %v9688_v31, %v11505_v39  ;;  %v11509_v8 = vld [vmem:[#allocation140_spill] sm:$0xff]  ;;  %v11510_v10 = vld [vmem:[#allocation62_spill] sm:$0xff] }
 0x348   : > { %v2980_v52 = vmul.f32 %v9694_v37, %v11506_v59  ;;  %3669 = vst [vmem:[#allocation2 + $0x18] sm:$0xff] %v3573_v6  ;;  %v3523_v27 = vmul.f32 %v3507_v40, %v9500_v3  ;;  %vm1696_vm13 = vmand %vm1664_vm11, %vm1680_vm12  ;;  %v2400_v34 = vmul.f32 %v9691_v33, %v1008_v60  ;;  %v3508_v32 = vmul.f32 %v9702_v13, %v11507_v62  ;;  %v11512_v59 = vld [vmem:[#allocation32_spill] sm:$0xff]  ;;  %v11514_v62 = vld [vmem:[#allocation58_spill] sm:$0xff] }
 0x349   : > { %v3558_v0 = vmul.f32 %v3542_v45, %v3046_v46  ;;  %v3031_v50 = vmul.f32 %v3015_v22, %v2431_v18  ;;  %v3543_v56 = vmul.f32 %v9712_v12, %v1007_v63  ;;  %v4805_v15 = vsel %vm1696_vm13, 1.0, %v10886_v58 }
 0x34a   : > { %v2380_v42 = vmul.f32 %v11508_v21, %v2364_v49  ;;  %v2416_v47 = vmul.f32 %v4805_v15, %v2400_v34  ;;  %v2996_v28 = vmul.f32 %v2980_v52, %v9502_v25  ;;  %v3016_v45 = vmul.f32 %v9699_v17, %v1008_v60  ;;  %v11513_v34 = vld [vmem:[#allocation45_spill] sm:$0xff] }
 0x34b   : > { %v3574_v5 = vadd.f32 %v3558_v0, %v3522_v53  ;;  %v3047_v3 = vadd.f32 %v3031_v50, %v2995_v35  ;;  %v1009_v40 = vsub.f32 %v5458_v30, %v11454_v36  ;;  %vm1665_vm14 = vcmp.ge.f32.partialorder %v5458_v30, %v11345_v44  ;;  %v11511_v35 = vld [vmem:[#allocation104_spill] sm:$0xff] }
 0x34c   : > { %vm1681_vm15 = vcmp.lt.f32.partialorder %v5458_v30, %v11454_v36  ;;  %v2432_v63 = vadd.f32 %v2416_v47, %v2380_v42  ;;  %v3524_v24 = vmul.f32 %v3508_v32, %v9524_v19  ;;  %v2365_v2 = vmul.f32 %v9688_v31, %v11509_v8 }
 0x34d   : > { %3670 = vst [vmem:[#allocation2 + $0x250] sm:$0xff] %v3574_v5  ;;  %vm1697_vm0 = vmand %vm1665_vm14, %vm1681_vm15  ;;  %v2981_v25 = vmul.f32 %v9694_v37, %v11510_v10  ;;  %v3559_v51 = vmul.f32 %v3543_v56, %v3047_v3  ;;  %v2401_v7 = vmul.f32 %v9691_v33, %v1009_v40  ;;  %v3509_v22 = vmul.f32 %v9702_v13, %v11511_v35 }
 0x34e   : > { %v4806_v53 = vsel %vm1697_vm0, 1.0, %v10886_v58  ;;  %v3032_v6 = vmul.f32 %v3016_v45, %v2432_v63  ;;  %v3544_v46 = vmul.f32 %v9712_v12, %v1008_v60  ;;  %v2381_v19 = vmul.f32 %v9517_v4, %v2365_v2 }
 0x34f   : > { %v3017_v48 = vmul.f32 %v9699_v17, %v1009_v40  ;;  %v3575_v18 = vadd.f32 %v3559_v51, %v3523_v27  ;;  %v2417_v39 = vmul.f32 %v4806_v53, %v2401_v7  ;;  %v2997_v49 = vmul.f32 %v2981_v25, %v9533_v23 }
 0x350   : > { %v1010_v52 = vsub.f32 %v11512_v59, %v11454_v36  ;;  %v3048_v0 = vadd.f32 %v3032_v6, %v2996_v28  ;;  %vm1666_vm1 = vcmp.ge.f32.partialorder %v11512_v59, %v11345_v44  ;;  %vm1682_vm2 = vcmp.lt.f32.partialorder %v11512_v59, %v11454_v36  ;;  %v11515_v28 = vld [vmem:[#allocation105_spill] sm:$0xff] }
 0x351   : > { %v2366_v60 = vmul.f32 %v9688_v31, %v11513_v34  ;;  %3671 = vst [vmem:[#allocation2 + $0x88] sm:$0xff] %v3575_v18  ;;  %v2433_v4 = vadd.f32 %v2417_v39, %v2381_v19  ;;  %v3525_v27 = vmul.f32 %v3509_v22, %v9555_v55  ;;  %vm1698_vm3 = vmand %vm1666_vm1, %vm1682_vm2  ;;  %v2982_v32 = vmul.f32 %v9694_v37, %v11514_v62  ;;  %v11518_v6 = vld [vmem:[#allocation113_spill] sm:$0xff] }
 0x352   : > { %v2402_v23 = vmul.f32 %v9691_v33, %v1010_v52  ;;  %v3560_v50 = vmul.f32 %v3544_v46, %v3048_v0  ;;  %v3545_v56 = vmul.f32 %v9712_v12, %v1009_v40  ;;  %v4807_v15 = vsel %vm1698_vm3, 1.0, %v10886_v58  ;;  %v11520_v0 = vld [vmem:[#allocation83_spill] sm:$0xff] }
 0x353   : > { %v2382_v21 = vmul.f32 %v9548_v16, %v2366_v60  ;;  %v3033_v42 = vmul.f32 %v3017_v48, %v2433_v4  ;;  %v3018_v47 = vmul.f32 %v9699_v17, %v1010_v52  ;;  %v3510_v55 = vmul.f32 %v9702_v13, %v11515_v28  ;;  %v11516_v16 = vld [vmem:[#allocation51_spill] sm:$0xff] }
 0x354   : > { %v2418_v5 = vmul.f32 %v4807_v15, %v2402_v23  ;;  %v3576_v45 = vadd.f32 %v3560_v50, %v3524_v24  ;;  %v2998_v3 = vmul.f32 %v2982_v32, %v9566_v57  ;;  %v1011_v30 = vsub.f32 %v9558_v38, %v11454_v36  ;;  %v11517_v24 = vld [vmem:[#allocation70_spill] sm:$0xff]  ;;  %v11521_v60 = vld [vmem:[#allocation115_spill] sm:$0xff] }
 0x355   : > { %vm1667_vm4 = vcmp.ge.f32.partialorder %v9558_v38, %v11345_v44  ;;  %v3049_v40 = vadd.f32 %v3033_v42, %v2997_v49  ;;  %vm1683_vm5 = vcmp.lt.f32.partialorder %v9558_v38, %v11454_v36  ;;  %v2367_v8 = vmul.f32 %v9688_v31, %v11516_v16 }
 0x356   : > { %v2434_v63 = vadd.f32 %v2418_v5, %v2382_v21  ;;  %3672 = vst [vmem:[#allocation2 + $0x100] sm:$0xff] %v3576_v45  ;;  %v3546_v2 = vmul.f32 %v9712_v12, %v1010_v52  ;;  %vm1699_vm6 = vmand %vm1667_vm4, %vm1683_vm5  ;;  %v2403_v57 = vmul.f32 %v9691_v33, %v1011_v30  ;;  %v2983_v10 = vmul.f32 %v9694_v37, %v11517_v24 }
 0x357   : > { %v3561_v25 = vmul.f32 %v3545_v56, %v3049_v40  ;;  %v4808_v53 = vsel %vm1699_vm6, 1.0, %v10886_v58  ;;  %v2383_v7 = vmul.f32 %v9577_v1, %v2367_v8  ;;  %v3526_v38 = vmul.f32 %v3510_v55, %v9591_v61  ;;  %v11519_v61 = vld [vmem:[#allocation81_spill] sm:$0xff] }
 0x358   : > { %v3034_v51 = vmul.f32 %v3018_v47, %v2434_v63  ;;  %v2419_v35 = vmul.f32 %v4808_v53, %v2403_v57  ;;  %v3019_v22 = vmul.f32 %v9699_v17, %v1011_v30  ;;  %v3511_v46 = vmul.f32 %v9702_v13, %v11518_v6 }
 0x359   : > { %v3577_v19 = vadd.f32 %v3561_v25, %v3525_v27  ;;  %v1012_v18 = vsub.f32 %v9587_v11, %v11454_v36  ;;  %vm1668_vm7 = vcmp.ge.f32.partialorder %v9587_v11, %v11345_v44  ;;  %v2999_v49 = vmul.f32 %v2983_v10, %v9599_v9  ;;  %v11526_v25 = vld [vmem:[#allocation87_spill] sm:$0xff] }
 0x35a   : > { %v3050_v48 = vadd.f32 %v3034_v51, %v2998_v3  ;;  %v2435_v39 = vadd.f32 %v2419_v35, %v2383_v7  ;;  %vm1684_vm8 = vcmp.lt.f32.partialorder %v9587_v11, %v11454_v36  ;;  %v2368_v1 = vmul.f32 %v9688_v31, %v11519_v61  ;;  %v11527_v7 = vld [vmem:[#allocation72_spill] sm:$0xff] }
 0x35b   : > { %3673 = vst [vmem:[#allocation2 + $0x38] sm:$0xff] %v3577_v19  ;;  %vm1700_vm9 = vmand %vm1668_vm7, %vm1684_vm8  ;;  %v2404_v52 = vmul.f32 %v9691_v33, %v1012_v18  ;;  %v2984_v34 = vmul.f32 %v9694_v37, %v11520_v0  ;;  %v3512_v4 = vmul.f32 %v9702_v13, %v11521_v60  ;;  %v3547_v9 = vmul.f32 %v9712_v12, %v1011_v30 }
 0x35c   : > { %v3562_v59 = vmul.f32 %v3546_v2, %v3050_v48  ;;  %v3035_v27 = vmul.f32 %v3019_v22, %v2435_v39  ;;  %v4809_v23 = vsel %vm1700_vm9, 1.0, %v10886_v58  ;;  %v2384_v11 = vmul.f32 %v9607_v54, %v2368_v1  ;;  %v11524_v2 = vld [vmem:[#allocation149_spill] sm:$0xff] }
 0x35d   : > { %v3527_v32 = vmul.f32 %v3511_v46, %v9624_v26  ;;  %v2420_v50 = vmul.f32 %v4809_v23, %v2404_v52  ;;  %v3020_v56 = vmul.f32 %v9699_v17, %v1012_v18  ;;  %v1013_v21 = vsub.f32 %v9618_v41, %v11454_v36  ;;  %v11522_v26 = vld [vmem:[#allocation63_spill] sm:$0xff] }
 0x35e   : > { %v3578_v62 = vadd.f32 %v3562_v59, %v3526_v38  ;;  %v3051_v15 = vadd.f32 %v3035_v27, %v2999_v49  ;;  %vm1669_vm10 = vcmp.ge.f32.partialorder %v9618_v41, %v11345_v44  ;;  %vm1685_vm11 = vcmp.lt.f32.partialorder %v9618_v41, %v11454_v36  ;;  %v11531_v59 = vld [vmem:[#allocation120_spill] sm:$0xff] }
 0x35f   : > { %v2436_v42 = vadd.f32 %v2420_v50, %v2384_v11  ;;  %v3000_v54 = vmul.f32 %v2984_v34, %v9626_v20  ;;  %v3528_v5 = vmul.f32 %v3512_v4, %v9648_v43  ;;  %vm1701_vm12 = vmand %vm1669_vm10, %vm1685_vm11  ;;  %v2369_v47 = vmul.f32 %v9688_v31, %v11522_v26  ;;  %v11523_v20 = vld [vmem:[#allocation114_spill] sm:$0xff] }
 0x360   : > { %3674 = vst [vmem:[#allocation2 + $0xa8] sm:$0xff] %v3578_v62  ;;  %v3563_v28 = vmul.f32 %v3547_v9, %v3051_v15  ;;  %v4810_v55 = vsel %vm1701_vm12, 1.0, %v10886_v58  ;;  %v2405_v45 = vmul.f32 %v9691_v33, %v1013_v21  ;;  %v2985_v3 = vmul.f32 %v9694_v37, %v11447_v29  ;;  %v11525_v29 = vld [vmem:[#allocation88_spill] sm:$0xff]  ;;  %v11532_v4 = vld [vmem:[#allocation90_spill] sm:$0xff] }
 0x361   : > { %v3036_v30 = vmul.f32 %v3020_v56, %v2436_v42  ;;  %v3548_v41 = vmul.f32 %v9712_v12, %v1012_v18  ;;  %v2385_v40 = vmul.f32 %v9641_v14, %v2369_v47  ;;  %v3513_v43 = vmul.f32 %v9702_v13, %v11523_v20  ;;  %v11529_v18 = vld [vmem:[#allocation97_spill] sm:$0xff] }
 0x362   : > { %v3579_v63 = vadd.f32 %v3563_v28, %v3527_v32  ;;  %v2421_v16 = vmul.f32 %v4810_v55, %v2405_v45  ;;  %v3021_v8 = vmul.f32 %v9699_v17, %v1013_v21  ;;  %v1014_v57 = vsub.f32 %v11524_v2, %v11454_v36 }
 0x363   : > { %v3052_v24 = vadd.f32 %v3036_v30, %v3000_v54  ;;  %vm1670_vm13 = vcmp.ge.f32.partialorder %v11524_v2, %v11345_v44  ;;  %vm1686_vm14 = vcmp.lt.f32.partialorder %v11524_v2, %v11454_v36  ;;  %v2370_v14 = vmul.f32 %v9688_v31, %v11525_v29  ;;  %v11528_v44 = vld [vmem:[#allocation86_spill] sm:$0xff] }
 0x364   : > { %3675 = vst [vmem:[#allocation2] sm:$0xff] %v3579_v63  ;;  %v2437_v10 = vadd.f32 %v2421_v16, %v2385_v40  ;;  %v3001_v51 = vmul.f32 %v2985_v3, %v11526_v25  ;;  %vm1702_vm15 = vmand %vm1670_vm13, %vm1686_vm14  ;;  %v2406_v53 = vmul.f32 %v9691_v33, %v1014_v57  ;;  %v2986_v38 = vmul.f32 %v9694_v37, %v11527_v7  ;;  %v11530_v33 = vld [vmem:[#allocation44_spill] sm:$0xff] }
 0x365   : > { %v3564_v35 = vmul.f32 %v3548_v41, %v3052_v24  ;;  %v4811_v22 = vsel %vm1702_vm15, 1.0, %v10886_v58  ;;  %v2386_v6 = vmul.f32 %v11528_v44, %v2370_v14  ;;  %v3549_v36 = vmul.f32 %v9712_v12, %v1013_v21 }
 0x366   : > { %v3037_v46 = vmul.f32 %v3021_v8, %v2437_v10  ;;  %v2422_v19 = vmul.f32 %v4811_v22, %v2406_v53  ;;  %v3022_v31 = vmul.f32 %v9699_v17, %v1014_v57  ;;  %v3529_v39 = vmul.f32 %v3513_v43, %v11529_v18 }
 0x367   : > { %v3580_v48 = vadd.f32 %v3564_v35, %v3528_v5  ;;  %v3002_v1 = vmul.f32 %v2986_v38, %v11530_v33  ;;  %v3514_v37 = vmul.f32 %v9702_v13, %v11531_v59  ;;  %v3550_v0 = vmul.f32 %v9712_v12, %v1014_v57 }
 0x368   : > { %v3053_v49 = vadd.f32 %v3037_v46, %v3001_v51  ;;  %v2438_v61 = vadd.f32 %v2422_v19, %v2386_v6 }
 0x369   : > { %3676 = vst [vmem:[#allocation2 + $0x108] sm:$0xff] %v3580_v48  ;;  %v3530_v27 = vmul.f32 %v3514_v37, %v11532_v4 }
 0x36a   : > { %v3565_v58 = vmul.f32 %v3549_v36, %v3053_v49  ;;  %v3038_v52 = vmul.f32 %v3022_v31, %v2438_v61 }
 0x36c   : > { %v3581_v34 = vadd.f32 %v3565_v58, %v3529_v39  ;;  %v3054_v60 = vadd.f32 %v3038_v52, %v3002_v1 }
 0x36e   : > { %3677 = vst [vmem:[#allocation2 + $0x168] sm:$0xff] %v3581_v34  ;;  %v3566_v17 = vmul.f32 %v3550_v0, %v3054_v60 }
 0x370   : > { %v3582_v9 = vadd.f32 %v3566_v17, %v3530_v27 }
 0x372   : > { %3678 = vst [vmem:[#allocation2 + $0x240] sm:$0xff] %v3582_v9 }
 0x373 PF: > { %v3822_v13 = vld [vmem:[%s6041_s27 + $0xf8] sm:$0xff]  ;;  %v3821_v62 = vld [vmem:[%s6041_s27 + $0xf0] sm:$0xff]  ;;  %v3820_v15 = vld [vmem:[%s6041_s27 + $0xe8] sm:$0xff]  ;;  %s11551_s10 = sld [smem:[#allocation23_spill]]  ;;  %s4515_s25 = sshll.u32 %s6050_s9, 4  ;;  %s10310_s25 = int_to_ptr.vmem [resolvable:$true] %s4515_s25 }
 0x374   : > { %v3854_v12 = vld [vmem:[%s6041_s27 + $0x1f8] sm:$0xff]  ;;  %4820 = vmatprep.subr.mxu0 %v3822_v13  ;;  %v3853_v32 = vld [vmem:[%s6041_s27 + $0x1f0] sm:$0xff]  ;;  %v3852_v21 = vld [vmem:[%s6041_s27 + $0x1e8] sm:$0xff]  ;;  %s11556_s14 = sld [smem:[#allocation22_spill]]  ;;  %s10315_s1 = scalar_lea.sflag [#allocation5], %s334_s15 }
 0x375   : > { %v3806_v23 = vld [vmem:[%s6041_s27 + $0x78] sm:$0xff]  ;;  %4900 = vmatprep.subr.mxu1 %v3854_v12  ;;  %v3805_v50 = vld [vmem:[%s6041_s27 + $0x70] sm:$0xff]  ;;  %v3804_v42 = vld [vmem:[%s6041_s27 + $0x68] sm:$0xff]  ;;  %s11562_s17 = sld [smem:[#allocation26_spill]]  ;;  %s5761_s22 = smov [#allocation12]  }
 0x376   : > { %v3838_v11 = vld [vmem:[%s6041_s27 + $0x178] sm:$0xff]  ;;  %4821 = vmatpush3.msra.mxu0 %v3806_v23  ;;  %v3837_v56 = vld [vmem:[%s6041_s27 + $0x170] sm:$0xff]  ;;  %v3836_v54 = vld [vmem:[%s6041_s27 + $0x168] sm:$0xff]  ;;  %s11563_s5 = sld [smem:[#allocation165_spill]]  ;;  %s5597_s24 = sshll.u32 %s5761_s22, 4  ;;  %s5598_s24 = int_to_ptr.vmem [resolvable:$false] %s5597_s24 }
 0x377   : > { %4901 = vmatpush3.msra.mxu1 %v3838_v11  ;;  %4822 = vmatprep.subr.mxu0 %v3821_v62  ;;  %v3819_v5 = vld [vmem:[%s6041_s27 + $0xe0] sm:$0xff]  ;;  %v3818_v55 = vld [vmem:[%s6041_s27 + $0xd8] sm:$0xff]  ;;  %v3817_v41 = vld [vmem:[%s6041_s27 + $0xd0] sm:$0xff]  ;;  %s5599_s7 = scalar_lea.vmem %s5598_s24, 4096  ;;  %p5600_p5 = scmp.lt.s32.totalorder %s10310_s25, %s5598_s24 }
 0x378   : > { %4902 = vmatprep.subr.mxu1 %v3853_v32  ;;  %4823 = vmatpush3.msra.mxu0 %v3805_v50  ;;  %v3851_v26 = vld [vmem:[%s6041_s27 + $0x1e0] sm:$0xff]  ;;  %v3850_v45 = vld [vmem:[%s6041_s27 + $0x1d8] sm:$0xff]  ;;  %v3849_v40 = vld [vmem:[%s6041_s27 + $0x1d0] sm:$0xff] }
 0x379   : > { %4903 = vmatpush3.msra.mxu1 %v3837_v56  ;;  %4824 = vmatprep.subr.mxu0 %v3820_v15  ;;  %v3803_v47 = vld [vmem:[%s6041_s27 + $0x60] sm:$0xff]  ;;  %v3802_v3 = vld [vmem:[%s6041_s27 + $0x58] sm:$0xff]  ;;  %v3801_v20 = vld [vmem:[%s6041_s27 + $0x50] sm:$0xff]  ;;  %s4819_s19 = sshll.u32 %s11551_s10, 5 }
 0x37a   : > { %4904 = vmatprep.subr.mxu1 %v3852_v21  ;;  %v3835_v28 = vld [vmem:[%s6041_s27 + $0x160] sm:$0xff]  ;;  %4825 = vmatpush3.msra.mxu0 %v3804_v42  ;;  %v3834_v30 = vld [vmem:[%s6041_s27 + $0x158] sm:$0xff]  ;;  %v3833_v43 = vld [vmem:[%s6041_s27 + $0x150] sm:$0xff]  ;;  %s4512_s12 = sadd.s32 %s11556_s14, %s4819_s19 }
 0x37b   : > { %4905 = vmatpush3.msra.mxu1 %v3836_v54  ;;  %4826 = vmatprep.subr.mxu0 %v3819_v5  ;;  %v3816_v63 = vld [vmem:[%s6041_s27 + $0xc8] sm:$0xff]  ;;  %v3815_v57 = vld [vmem:[%s6041_s27 + $0xc0] sm:$0xff]  ;;  %v3814_v10 = vld [vmem:[%s6041_s27 + $0xb8] sm:$0xff]  ;;  %s4815_s8 = sshll.u32 %s4512_s12, 7  ;;  %p11564_p6 = scmp.ne.s32.totalorder %s11562_s17, 0 }
 0x37c   : > { %4906 = vmatprep.subr.mxu1 %v3851_v26  ;;  %4827 = vmatpush3.msra.mxu0 %v3803_v47  ;;  %v3848_v16 = vld [vmem:[%s6041_s27 + $0x1c8] sm:$0xff]  ;;  %v3847_v24 = vld [vmem:[%s6041_s27 + $0x1c0] sm:$0xff]  ;;  %v3846_v25 = vld [vmem:[%s6041_s27 + $0x1b8] sm:$0xff]  ;;  %s10308_s18 = scalar_lea.hbm %s11563_s5, %s4815_s8 }
 0x37d   : > { %4907 = vmatpush3.msra.mxu1 %v3835_v28  ;;  %4828 = vmatprep.subr.mxu0 %v3818_v55  ;;  %v3800_v8 = vld [vmem:[%s6041_s27 + $0x48] sm:$0xff]  ;;  %v3799_v29 = vld [vmem:[%s6041_s27 + $0x40] sm:$0xff]  ;;  %v3798_v51 = vld [vmem:[%s6041_s27 + $0x38] sm:$0xff] }
 0x37e   : > { %4908 = vmatprep.subr.mxu1 %v3850_v45  ;;  %4829 = vmatpush3.msra.mxu0 %v3802_v3  ;;  %v3832_v2 = vld [vmem:[%s6041_s27 + $0x148] sm:$0xff]  ;;  %v3831_v14 = vld [vmem:[%s6041_s27 + $0x140] sm:$0xff]  ;;  %v3830_v53 = vld [vmem:[%s6041_s27 + $0x138] sm:$0xff] }
 0x37f   : > { %4909 = vmatpush3.msra.mxu1 %v3834_v30  ;;  %4830 = vmatprep.subr.mxu0 %v3817_v41  ;;  %v3813_v7 = vld [vmem:[%s6041_s27 + $0xb0] sm:$0xff]  ;;  %v3812_v44 = vld [vmem:[%s6041_s27 + $0xa8] sm:$0xff]  ;;  %v3811_v19 = vld [vmem:[%s6041_s27 + $0xa0] sm:$0xff] }
 0x380   : > { %4910 = vmatprep.subr.mxu1 %v3849_v40  ;;  %4831 = vmatpush3.msra.mxu0 %v3801_v20  ;;  %v3845_v38 = vld [vmem:[%s6041_s27 + $0x1b0] sm:$0xff]  ;;  %v3844_v6 = vld [vmem:[%s6041_s27 + $0x1a8] sm:$0xff]  ;;  %v3843_v31 = vld [vmem:[%s6041_s27 + $0x1a0] sm:$0xff] }
 0x381   : > { %4911 = vmatpush3.msra.mxu1 %v3833_v43  ;;  %4832 = vmatprep.subr.mxu0 %v3816_v63  ;;  %v3797_v35 = vld [vmem:[%s6041_s27 + $0x30] sm:$0xff]  ;;  %v3796_v46 = vld [vmem:[%s6041_s27 + $0x28] sm:$0xff]  ;;  %v3795_v48 = vld [vmem:[%s6041_s27 + $0x20] sm:$0xff] }
 0x382   : > { %4912 = vmatprep.subr.mxu1 %v3848_v16  ;;  %4833 = vmatpush3.msra.mxu0 %v3800_v8  ;;  %v3829_v22 = vld [vmem:[%s6041_s27 + $0x130] sm:$0xff]  ;;  %v3828_v36 = vld [vmem:[%s6041_s27 + $0x128] sm:$0xff]  ;;  %v3827_v18 = vld [vmem:[%s6041_s27 + $0x120] sm:$0xff] }
 0x383   : > { %4913 = vmatpush3.msra.mxu1 %v3832_v2  ;;  %4834 = vmatprep.subr.mxu0 %v3815_v57  ;;  %v3810_v39 = vld [vmem:[%s6041_s27 + $0x98] sm:$0xff]  ;;  %v3809_v1 = vld [vmem:[%s6041_s27 + $0x90] sm:$0xff]  ;;  %v3808_v52 = vld [vmem:[%s6041_s27 + $0x88] sm:$0xff] }
 0x384   : > { %4914 = vmatprep.subr.mxu1 %v3847_v24  ;;  %4835 = vmatpush3.msra.mxu0 %v3799_v29  ;;  %v3842_v49 = vld [vmem:[%s6041_s27 + $0x198] sm:$0xff]  ;;  %v3841_v59 = vld [vmem:[%s6041_s27 + $0x190] sm:$0xff]  ;;  %v3840_v0 = vld [vmem:[%s6041_s27 + $0x188] sm:$0xff] }
 0x385   : > { %4915 = vmatpush3.msra.mxu1 %v3831_v14  ;;  %4836 = vmatprep.subr.mxu0 %v3814_v10  ;;  %v3794_v61 = vld [vmem:[%s6041_s27 + $0x18] sm:$0xff]  ;;  %v3793_v37 = vld [vmem:[%s6041_s27 + $0x10] sm:$0xff]  ;;  %v3792_v34 = vld [vmem:[%s6041_s27 + $0x8] sm:$0xff] }
 0x386   : > { %4916 = vmatprep.subr.mxu1 %v3846_v25  ;;  %4837 = vmatpush3.msra.mxu0 %v3798_v51  ;;  %v3826_v33 = vld [vmem:[%s6041_s27 + $0x118] sm:$0xff]  ;;  %v3825_v58 = vld [vmem:[%s6041_s27 + $0x110] sm:$0xff]  ;;  %v3824_v60 = vld [vmem:[%s6041_s27 + $0x108] sm:$0xff] }
 0x387   : > { %4917 = vmatpush3.msra.mxu1 %v3830_v53  ;;  %4838 = vmatprep.subr.mxu0 %v3813_v7  ;;  %v3807_v4 = vld [vmem:[%s6041_s27 + $0x80] sm:$0xff]  ;;  %v3680_v9 = vld [vmem:[#allocation2 + $0x118] sm:$0xff]  ;;  %v3682_v12 = vld [vmem:[#allocation2 + $0x1b0] sm:$0xff] }
 0x388   : > { %4918 = vmatprep.subr.mxu1 %v3845_v38  ;;  %4839 = vmatpush3.msra.mxu0 %v3797_v35  ;;  %v3839_v27 = vld [vmem:[%s6041_s27 + $0x180] sm:$0xff]  ;;  %v3679_v23 = vld [vmem:[#allocation2 + $0x178] sm:$0xff]  ;;  %v3681_v11 = vld [vmem:[#allocation2 + $0x270] sm:$0xff] }
 0x389   : > { %4919 = vmatpush3.msra.mxu1 %v3829_v22  ;;  %4840 = vmatprep.subr.mxu0 %v3812_v44  ;;  %v3791_v17 = vld [vmem:[%s6041_s27] sm:$0xff]  ;;  %v3886_v62 = vld [vmem:[%s6041_s27 + $0x2f8] sm:$0xff]  ;;  %v3885_v15 = vld [vmem:[%s6041_s27 + $0x2f0] sm:$0xff] }
 0x38a   : > { %4920 = vmatprep.subr.mxu1 %v3844_v6  ;;  %4841 = vmatpush3.msra.mxu0 %v3796_v46  ;;  %v3823_v13 = vld [vmem:[%s6041_s27 + $0x100] sm:$0xff]  ;;  %v3870_v50 = vld [vmem:[%s6041_s27 + $0x278] sm:$0xff]  ;;  %v3688_v42 = vld [vmem:[#allocation2 + $0xd0] sm:$0xff] }
 0x38b   : > { %4921 = vmatpush3.msra.mxu1 %v3828_v36  ;;  %4842 = vmatprep.subr.mxu0 %v3811_v19  ;;  %v3687_v32 = vld [vmem:[#allocation2 + $0x180] sm:$0xff]  ;;  %v3689_v56 = vld [vmem:[#allocation2 + $0x138] sm:$0xff]  ;;  %v3869_v54 = vld [vmem:[%s6041_s27 + $0x270] sm:$0xff] }
 0x38c   : > { %4922 = vmatprep.subr.mxu1 %v3843_v31  ;;  %4843 = vmatpush3.msra.mxu0 %v3795_v48  ;;  %v3686_v21 = vld [vmem:[#allocation2 + $0x238] sm:$0xff]  ;;  %v3884_v47 = vld [vmem:[%s6041_s27 + $0x2e8] sm:$0xff]  ;;  %v3693_v55 = vld [vmem:[#allocation2 + $0x70] sm:$0xff] }
 0x38d   : > { %4923 = vmatpush3.msra.mxu1 %v3827_v18  ;;  %4844 = vmatprep.subr.mxu0 %v3810_v39  ;;  %v3694_v5 = vld [vmem:[#allocation2 + $0x258] sm:$0xff]  ;;  %v3868_v28 = vld [vmem:[%s6041_s27 + $0x268] sm:$0xff]  ;;  %v3695_v45 = vld [vmem:[#allocation2 + $0x190] sm:$0xff] }
 0x38e   : > { %4924 = vmatprep.subr.mxu1 %v3842_v49  ;;  %4845 = vmatpush3.msra.mxu0 %v3794_v61  ;;  %v3696_v26 = vld [vmem:[#allocation2 + $0x358] sm:$0xff]  ;;  %v3701_v3 = vld [vmem:[#allocation2 + $0xc0] sm:$0xff]  ;;  %v3708_v16 = vld [vmem:[#allocation2 + $0x130] sm:$0xff] }
 0x38f   : > { %4925 = vmatpush3.msra.mxu1 %v3826_v33  ;;  %4846 = vmatprep.subr.mxu0 %v3809_v1  ;;  %v3703_v30 = vld [vmem:[#allocation2 + $0x20] sm:$0xff]  ;;  %v3902_v40 = vld [vmem:[%s6041_s27 + $0x378] sm:$0xff]  ;;  %v3901_v57 = vld [vmem:[%s6041_s27 + $0x370] sm:$0xff] }
 0x390   : > { %4926 = vmatprep.subr.mxu1 %v3841_v59  ;;  %4847 = vmatpush3.msra.mxu0 %v3793_v37  ;;  %v3883_v41 = vld [vmem:[%s6041_s27 + $0x2e0] sm:$0xff]  ;;  %v3700_v43 = vld [vmem:[#allocation2 + $0x1f8] sm:$0xff]  ;;  %v3707_v29 = vld [vmem:[#allocation2 + $0x2d0] sm:$0xff] }
 0x391   : > { %4927 = vmatpush3.msra.mxu1 %v3825_v58  ;;  %4848 = vmatprep.subr.mxu0 %v3808_v52  ;;  %v3867_v20 = vld [vmem:[%s6041_s27 + $0x260] sm:$0xff]  ;;  %v3882_v2 = vld [vmem:[%s6041_s27 + $0x2d8] sm:$0xff]  ;;  %v3709_v14 = vld [vmem:[#allocation2 + $0xb0] sm:$0xff] }
 0x392   : > { %4928 = vmatprep.subr.mxu1 %v3840_v0  ;;  %4849 = vmatpush3.msra.mxu0 %v3792_v34  ;;  %v3702_v63 = vld [vmem:[#allocation2 + $0x320] sm:$0xff]  ;;  %v3866_v24 = vld [vmem:[%s6041_s27 + $0x258] sm:$0xff]  ;;  %v3881_v51 = vld [vmem:[%s6041_s27 + $0x2d0] sm:$0xff] }
 0x393   : > { %4929 = vmatpush3.msra.mxu1 %v3824_v60  ;;  %4850 = vmatprep.subr.mxu0 %v3807_v4  ;;  %v3710_v8 = vld [vmem:[#allocation2 + $0x300] sm:$0xff]  ;;  %v3715_v10 = vld [vmem:[#allocation2 + $0x278] sm:$0xff]  ;;  %v3900_v53 = vld [vmem:[%s6041_s27 + $0x368] sm:$0xff] }
 0x394   : > { %4930 = vmatprep.subr.mxu1 %v3839_v27  ;;  %4851 = vmatpush3.msra.mxu0 %v3791_v17  ;;  %v3717_v25 = vld [vmem:[#allocation2 + $0x58] sm:$0xff]  ;;  %v3865_v7 = vld [vmem:[%s6041_s27 + $0x250] sm:$0xff]  ;;  %v3714_v38 = vld [vmem:[#allocation2 + $0x148] sm:$0xff] }
 0x395   : > { %3967 = vmatprep.mubr.f32.mxu0 %v3680_v9  ;;  %4931 = vmatpush3.msra.mxu1 %v3823_v13  ;;  %v3716_v35 = vld [vmem:[#allocation2 + $0xe8] sm:$0xff]  ;;  %v3724_v44 = vld [vmem:[#allocation2 + $0x370] sm:$0xff]  ;;  %v3899_v46 = vld [vmem:[%s6041_s27 + $0x360] sm:$0xff] }
 0x396   : > { %4112 = vmatprep.mubr.f32.mxu1 %v3682_v12  ;;  %3968 = vmatmul.mubr.f32.vlgmr.msra.gmra.mxu0 %v3679_v23  ;;  %v3722_v22 = vld [vmem:[#allocation2 + $0x2c8] sm:$0xff]  ;;  %v3721_v19 = vld [vmem:[#allocation2 + $0x1c0] sm:$0xff]  ;;  %v3723_v31 = vld [vmem:[#allocation2 + $0x110] sm:$0xff] }
 0x397   : > { %4113 = vmatmul.mubr.f32.vlgmr.msra.gmra.mxu1 %v3681_v11  ;;  %4980 = vmatprep.subr.mxu0 %v3886_v62  ;;  %v3880_v6 = vld [vmem:[%s6041_s27 + $0x2c8] sm:$0xff]  ;;  %v3731_v18 = vld [vmem:[#allocation2 + $0x2f8] sm:$0xff]  ;;  %v3879_v39 = vld [vmem:[%s6041_s27 + $0x2c0] sm:$0xff] }
 0x398   : > { %3972 = vmatprep.mubr.f32.mxu0 %v3687_v32  ;;  %4981 = vmatpush3.msra.mxu0 %v3870_v50  ;;  %v3864_v36 = vld [vmem:[%s6041_s27 + $0x248] sm:$0xff]  ;;  %v3898_v49 = vld [vmem:[%s6041_s27 + $0x358] sm:$0xff]  ;;  %v3863_v61 = vld [vmem:[%s6041_s27 + $0x240] sm:$0xff] }
 0x399   : > { %4117 = vmatprep.mubr.f32.mxu1 %v3689_v56  ;;  %4982 = vmatprep.subr.mxu0 %v3885_v15  ;;  %v3729_v48 = vld [vmem:[#allocation2 + $0x368] sm:$0xff]  ;;  %v3728_v33 = vld [vmem:[#allocation2 + $0x378] sm:$0xff]  ;;  %v3736_v59 = vld [vmem:[#allocation2 + $0x260] sm:$0xff] }
 0x39a   : > { %3973 = vmatmul.mubr.f32.gmra.mxu0 %v3686_v21  ;;  %5092 = vmatprep.subr.mxu1 %v3902_v40  ;;  %v3730_v1 = vld [vmem:[#allocation2 + $0x318] sm:$0xff]  ;;  %v3738_v37 = vld [vmem:[#allocation2 + $0x330] sm:$0xff]  ;;  %v3735_v34 = vld [vmem:[#allocation2 + $0x48] sm:$0xff] }
 0x39b   : > { %4118 = vmatmul.mubr.f32.gmra.mxu1 %v3688_v42  ;;  %4983 = vmatpush3.msra.mxu0 %v3869_v54  ;;  %v3878_v58 = vld [vmem:[%s6041_s27 + $0x2b8] sm:$0xff]  ;;  %v3897_v52 = vld [vmem:[%s6041_s27 + $0x350] sm:$0xff]  ;;  %v3737_v60 = vld [vmem:[#allocation2 + $0x360] sm:$0xff] }
 0x39c   : > { %3977 = vmatprep.mubr.f32.mxu0 %v3694_v5  ;;  %4122 = vmatprep.mubr.f32.mxu1 %v3696_v26  ;;  %v3862_v0 = vld [vmem:[%s6041_s27 + $0x238] sm:$0xff]  ;;  %v3743_v4 = vld [vmem:[#allocation2 + $0xf0] sm:$0xff]  ;;  %v3896_v9 = vld [vmem:[%s6041_s27 + $0x348] sm:$0xff] }
 0x39d   : > { %4984 = vmatprep.subr.mxu0 %v3884_v47  ;;  %5093 = vmatpush3.msra.mxu1 %v3902_v40  ;;  %v3745_v27 = vld [vmem:[#allocation2 + $0x350] sm:$0xff]  ;;  %v3742_v12 = vld [vmem:[#allocation2 + $0x80] sm:$0xff]  ;;  %v3744_v23 = vld [vmem:[#allocation2 + $0x338] sm:$0xff] }
 0x39e   : > { %4985 = vmatpush3.msra.mxu0 %v3868_v28  ;;  %5094 = vmatprep.subr.mxu1 %v3901_v57  ;;  %v3877_v17 = vld [vmem:[%s6041_s27 + $0x2b0] sm:$0xff]  ;;  %v3750_v11 = vld [vmem:[#allocation2 + $0xf8] sm:$0xff]  ;;  %v3876_v32 = vld [vmem:[%s6041_s27 + $0x2a8] sm:$0xff] }
 0x39f   : > { %3978 = vmatmul.mubr.f32.gmra.mxu0 %v3693_v55  ;;  %4123 = vmatmul.mubr.f32.gmra.mxu1 %v3695_v45  ;;  %v3861_v13 = vld [vmem:[%s6041_s27 + $0x230] sm:$0xff]  ;;  %v3895_v50 = vld [vmem:[%s6041_s27 + $0x340] sm:$0xff]  ;;  %v3860_v56 = vld [vmem:[%s6041_s27 + $0x228] sm:$0xff] }
 0x3a0   : > { %3982 = vmatprep.mubr.f32.mxu0 %v3701_v3  ;;  %4127 = vmatprep.mubr.f32.mxu1 %v3703_v30  ;;  %v3752_v62 = vld [vmem:[#allocation2 + $0x210] sm:$0xff]  ;;  %v3749_v15 = vld [vmem:[#allocation2 + $0x78] sm:$0xff]  ;;  %v3757_v42 = vld [vmem:[#allocation2 + $0x2c0] sm:$0xff] }
 0x3a1   : > { %4986 = vmatprep.subr.mxu0 %v3883_v41  ;;  %5095 = vmatpush3.msra.mxu1 %v3901_v57  ;;  %v3751_v21 = vld [vmem:[#allocation2 + $0x298] sm:$0xff]  ;;  %v3875_v5 = vld [vmem:[%s6041_s27 + $0x2a0] sm:$0xff]  ;;  %v3764_v45 = vld [vmem:[#allocation2 + $0x2a8] sm:$0xff] }
 0x3a2   : > { %4987 = vmatpush3.msra.mxu0 %v3867_v20  ;;  %5096 = vmatprep.subr.mxu1 %v3900_v53  ;;  %v3759_v54 = vld [vmem:[#allocation2 + $0x158] sm:$0xff]  ;;  %v3859_v47 = vld [vmem:[%s6041_s27 + $0x220] sm:$0xff]  ;;  %v3893_v41 = vld [vmem:[%s6041_s27 + $0x330] sm:$0xff] }
 0x3a3   : > { %3983 = vmatmul.mubr.f32.gmra.mxu0 %v3700_v43  ;;  %4128 = vmatmul.mubr.f32.gmra.mxu1 %v3702_v63  ;;  %v3894_v26 = vld [vmem:[%s6041_s27 + $0x338] sm:$0xff]  ;;  %v3763_v20 = vld [vmem:[#allocation2 + $0x208] sm:$0xff]  ;;  %v3771_v63 = vld [vmem:[#allocation2 + $0x160] sm:$0xff] }
 0x3a4   : > { %3987 = vmatprep.mubr.f32.mxu0 %v3708_v16  ;;  %4132 = vmatprep.mubr.f32.mxu1 %v3710_v8  ;;  %v3756_v28 = vld [vmem:[#allocation2 + $0xd8] sm:$0xff]  ;;  %v3773_v16 = vld [vmem:[#allocation2 + $0x1e8] sm:$0xff]  ;;  %v3873_v8 = vld [vmem:[%s6041_s27 + $0x290] sm:$0xff] }
 0x3a5   : > { %4988 = vmatprep.subr.mxu0 %v3882_v2  ;;  %5097 = vmatpush3.msra.mxu1 %v3900_v53  ;;  %v3758_v55 = vld [vmem:[#allocation2 + $0x1d8] sm:$0xff]  ;;  %v3892_v2 = vld [vmem:[%s6041_s27 + $0x328] sm:$0xff]  ;;  %v3857_v57 = vld [vmem:[%s6041_s27 + $0x210] sm:$0xff] }
 0x3a6   : > { %4989 = vmatpush3.msra.mxu0 %v3866_v24  ;;  %5098 = vmatprep.subr.mxu1 %v3899_v46  ;;  %v3766_v3 = vld [vmem:[#allocation2 + $0x198] sm:$0xff]  ;;  %v3770_v24 = vld [vmem:[#allocation2 + $0x10] sm:$0xff]  ;;  %v3856_v53 = vld [vmem:[%s6041_s27 + $0x208] sm:$0xff] }
 0x3a7   : > { %3988 = vmatmul.mubr.f32.gmra.mxu0 %v3707_v29  ;;  %4133 = vmatmul.mubr.f32.gmra.mxu1 %v3709_v14  ;;  %v3874_v30 = vld [vmem:[%s6041_s27 + $0x298] sm:$0xff]  ;;  %v3772_v29 = vld [vmem:[#allocation2 + $0x1f0] sm:$0xff] }
 0x3a8   : > { %3992 = vmatprep.mubr.f32.mxu0 %v3715_v10  ;;  %4137 = vmatprep.mubr.f32.mxu1 %v3717_v25  ;;  %v3858_v40 = vld [vmem:[%s6041_s27 + $0x218] sm:$0xff]  ;;  %v3778_v14 = vld [vmem:[#allocation2 + $0x2f0] sm:$0xff]  ;;  %v3780_v10 = vld [vmem:[#allocation2 + $0x2e0] sm:$0xff] }
 0x3a9   : > { %4990 = vmatprep.subr.mxu0 %v3881_v51  ;;  %5099 = vmatpush3.msra.mxu1 %v3899_v46  ;;  %v3765_v43 = vld [vmem:[#allocation2 + $0x218] sm:$0xff]  ;;  %v3872_v25 = vld [vmem:[%s6041_s27 + $0x288] sm:$0xff]  ;;  %v3891_v51 = vld [vmem:[%s6041_s27 + $0x320] sm:$0xff] }
 0x3aa   : > { %4991 = vmatpush3.msra.mxu0 %v3865_v7  ;;  %5100 = vmatprep.subr.mxu1 %v3898_v49  ;;  %v3777_v7 = vld [vmem:[#allocation2 + $0x268] sm:$0xff]  ;;  %v3855_v46 = vld [vmem:[%s6041_s27 + $0x200] sm:$0xff] }
 0x3ab   : > { %3993 = vmatmul.mubr.f32.gmra.mxu0 %v3714_v38  ;;  %4138 = vmatmul.mubr.f32.gmra.mxu1 %v3716_v35  ;;  %v3779_v38 = vld [vmem:[#allocation2 + $0x140] sm:$0xff]  ;;  %v3785_v35 = vld [vmem:[#allocation2 + $0x188] sm:$0xff] }
 0x3ac   : > { %3997 = vmatprep.mubr.f32.mxu0 %v3722_v22  ;;  %4142 = vmatprep.mubr.f32.mxu1 %v3724_v44  ;;  %v3787_v22 = vld [vmem:[#allocation2 + $0x280] sm:$0xff] }
 0x3ad   : > { %4992 = vmatprep.subr.mxu0 %v3880_v6  ;;  %5101 = vmatpush3.msra.mxu1 %v3898_v49  ;;  %v3871_v44 = vld [vmem:[%s6041_s27 + $0x280] sm:$0xff]  ;;  %v3890_v6 = vld [vmem:[%s6041_s27 + $0x318] sm:$0xff]  ;;  %v3683_v49 = vld [vmem:[#allocation2 + $0xc8] sm:$0xff] }
 0x3ae   : > { %4993 = vmatpush3.msra.mxu0 %v3864_v36  ;;  %5102 = vmatprep.subr.mxu1 %v3897_v52  ;;  %v3784_v36 = vld [vmem:[#allocation2 + $0x290] sm:$0xff] }
 0x3af   : > { %3998 = vmatmul.mubr.f32.gmra.mxu0 %v3721_v19  ;;  %4143 = vmatmul.mubr.f32.gmra.mxu1 %v3723_v31  ;;  %v3786_v19 = vld [vmem:[#allocation2 + $0xa0] sm:$0xff]  ;;  %v3889_v31 = vld [vmem:[%s6041_s27 + $0x310] sm:$0xff] }
 0x3b0   : > { %4002 = vmatprep.mubr.f32.mxu0 %v3729_v48  ;;  %4147 = vmatprep.mubr.f32.mxu1 %v3731_v18  ;;  %v3684_v48 = vld [vmem:[#allocation2 + $0x1d0] sm:$0xff]  ;;  %v3685_v18 = vld [vmem:[#allocation2 + $0x1e0] sm:$0xff] }
 0x3b1   : > { %4994 = vmatprep.subr.mxu0 %v3879_v39  ;;  %5103 = vmatpush3.msra.mxu1 %v3897_v52  ;;  %v3888_v39 = vld [vmem:[%s6041_s27 + $0x308] sm:$0xff]  ;;  %v3706_v52 = vld [vmem:[#allocation2 + $0xb8] sm:$0xff] }
 0x3b2   : > { %4995 = vmatpush3.msra.mxu0 %v3863_v61  ;;  %5104 = vmatprep.subr.mxu1 %v3896_v9  ;;  %v3887_v61 = vld [vmem:[%s6041_s27 + $0x300] sm:$0xff]  ;;  %s5593_s27 = scalar_lea.vmem %s10310_s25, 2048 }
 0x3b3   : > { %4003 = vmatmul.mubr.f32.gmra.mxu0 %v3728_v33  ;;  %4148 = vmatmul.mubr.f32.gmra.mxu1 %v3730_v1  ;;  %v3691_v33 = vld [vmem:[#allocation2 + $0xe0] sm:$0xff]  ;;  %v3692_v1 = vld [vmem:[#allocation2 + $0x288] sm:$0xff]  ;;  %p5594_p4 = scmp.ne.s32.totalorder %s10310_s25, %s5593_s27  ;;  %p5601_p9 = scmp.lt.s32.totalorder %s5599_s7, %s5593_s27 }
 0x3b4   : > { %4007 = vmatprep.mubr.f32.mxu0 %v3736_v59  ;;  %4152 = vmatprep.mubr.f32.mxu1 %v3738_v37  ;;  %v3690_v59 = vld [vmem:[#allocation2 + $0x340] sm:$0xff] }
 0x3b5   : > { %4996 = vmatprep.subr.mxu0 %v3878_v58  ;;  %5105 = vmatpush3.msra.mxu1 %v3896_v9  ;;  %v3699_v37 = vld [vmem:[#allocation2 + $0x1a0] sm:$0xff]  ;;  %v3698_v58 = vld [vmem:[#allocation2 + $0x2d8] sm:$0xff]  ;;  %v3712_v9 = vld [vmem:[#allocation2 + $0x50] sm:$0xff]  ;;  %p5595_p12 = pnand %p5594_p4, %p11564_p6  ;;  %p5602_p13 = por %p5601_p9, %p5600_p5 }
 0x3b6   : > { %4997 = vmatpush3.msra.mxu0 %v3862_v0  ;;  %5106 = vmatprep.subr.mxu1 %v3895_v50  ;;  %v3697_v0 = vld [vmem:[#allocation2 + $0x120] sm:$0xff] }
 0x3b7   : > { %4008 = vmatmul.mubr.f32.gmra.mxu0 %v3735_v34  ;;  %4153 = vmatmul.mubr.f32.gmra.mxu1 %v3737_v60  ;;  %v3713_v34 = vld [vmem:[#allocation2 + $0x40] sm:$0xff]  ;;  %v3705_v60 = vld [vmem:[#allocation2 + $0x348] sm:$0xff]  ;;  %p5596_p10 = pneg %p5595_p12 }
 0x3b8   : > { %4012 = vmatprep.mubr.f32.mxu0 %v3743_v4  ;;  %4157 = vmatprep.mubr.f32.mxu1 %v3745_v27  ;;  %v3720_v4 = vld [vmem:[#allocation2 + $0x308] sm:$0xff]  ;;  %v3704_v27 = vld [vmem:[#allocation2 + $0x200] sm:$0xff] }
 0x3b9   : > { %4998 = vmatprep.subr.mxu0 %v3877_v17  ;;  %5107 = vmatpush3.msra.mxu1 %v3895_v50  ;;  %v3727_v17 = vld [vmem:[#allocation2 + $0x18] sm:$0xff]  ;;  %p5603_p3 = pnand %p5602_p13, %p5596_p10 }
 0x3ba   : > { %4999 = vmatpush3.msra.mxu0 %v3861_v13  ;;  %5108 = vmatprep.subr.mxu1 %v3894_v26  ;;  %v3734_v13 = vld [vmem:[#allocation2 + $0x250] sm:$0xff]  ;;  %v3755_v50 = vld [vmem:[#allocation2 + $0x38] sm:$0xff] }
 0x3bb   : > { %4013 = vmatmul.mubr.f32.gmra.mxu0 %v3742_v12  ;;  %4158 = vmatmul.mubr.f32.gmra.mxu1 %v3744_v23  ;;  %v3711_v12 = vld [vmem:[#allocation2 + $0x1b8] sm:$0xff]  ;;  %v3741_v23 = vld [vmem:[#allocation2 + $0x88] sm:$0xff] }
 0x3bc   : > { %4017 = vmatprep.mubr.f32.mxu0 %v3750_v11  ;;  %4162 = vmatprep.mubr.f32.mxu1 %v3752_v62  ;;  %v3719_v11 = vld [vmem:[#allocation2 + $0x1a8] sm:$0xff]  ;;  %v3748_v62 = vld [vmem:[#allocation2 + $0x100] sm:$0xff] }
 0x3bd   : > { %5000 = vmatprep.subr.mxu0 %v3876_v32  ;;  %5109 = vmatpush3.msra.mxu1 %v3894_v26  ;;  %v3718_v32 = vld [vmem:[#allocation2 + $0x170] sm:$0xff]  ;;  %v3732_v26 = vld [vmem:[#allocation2 + $0x128] sm:$0xff] }
 0x3be   : > { %5001 = vmatpush3.msra.mxu0 %v3860_v56  ;;  %5110 = vmatprep.subr.mxu1 %v3893_v41  ;;  %v3726_v56 = vld [vmem:[#allocation2 + $0x220] sm:$0xff] }
 0x3bf   : > { %4018 = vmatmul.mubr.f32.gmra.mxu0 %v3749_v15  ;;  %4163 = vmatmul.mubr.f32.gmra.mxu1 %v3751_v21  ;;  %v3762_v15 = vld [vmem:[#allocation2 + $0xa8] sm:$0xff] }
 0x3c0   : > { %4022 = vmatprep.mubr.f32.mxu0 %v3757_v42  ;;  %4167 = vmatprep.mubr.f32.mxu1 %v3759_v54  ;;  %v3725_v21 = vld [vmem:[#allocation2 + $0x1c8] sm:$0xff]  ;;  %v3769_v42 = vld [vmem:[#allocation2] sm:$0xff]  ;;  %v3733_v54 = vld [vmem:[#allocation2 + $0x310] sm:$0xff] }
 0x3c1   : > { %5002 = vmatprep.subr.mxu0 %v3875_v5  ;;  %5111 = vmatpush3.msra.mxu1 %v3893_v41  ;;  %v3776_v5 = vld [vmem:[#allocation2 + $0x108] sm:$0xff]  ;;  %v3754_v41 = vld [vmem:[#allocation2 + $0x60] sm:$0xff] }
 0x3c2   : > { %5003 = vmatpush3.msra.mxu0 %v3859_v47  ;;  %5112 = vmatprep.subr.mxu1 %v3892_v2  ;;  %v3783_v47 = vld [vmem:[#allocation2 + $0x168] sm:$0xff] }
 0x3c3   : > { %4023 = vmatmul.mubr.f32.gmra.mxu0 %v3756_v28  ;;  %4168 = vmatmul.mubr.f32.gmra.mxu1 %v3758_v55  ;;  %v3740_v28 = vld [vmem:[#allocation2 + $0x228] sm:$0xff]  ;;  %v3790_v55 = vld [vmem:[#allocation2 + $0x240] sm:$0xff] }
 0x3c4   : > { %4027 = vmatprep.mubr.f32.mxu0 %v3764_v45  ;;  %4172 = vmatprep.mubr.f32.mxu1 %v3766_v3  ;;  %v3739_v45 = vld [vmem:[#allocation2 + $0x150] sm:$0xff]  ;;  %v3747_v3 = vld [vmem:[#allocation2 + $0x2e8] sm:$0xff] }
 0x3c5   : > { %5004 = vmatprep.subr.mxu0 %v3874_v30  ;;  %5113 = vmatpush3.msra.mxu1 %v3892_v2  ;;  %v3746_v30 = vld [vmem:[#allocation2 + $0x90] sm:$0xff]  ;;  %v3774_v2 = vld [vmem:[#allocation2 + $0x328] sm:$0xff] }
 0x3c6   : > { %5005 = vmatpush3.msra.mxu0 %v3858_v40  ;;  %5114 = vmatprep.subr.mxu1 %v3891_v51  ;;  %v3753_v40 = vld [vmem:[#allocation2 + $0x2b8] sm:$0xff] }
 0x3c7   : > { %4028 = vmatmul.mubr.f32.gmra.mxu0 %v3763_v20  ;;  %4173 = vmatmul.mubr.f32.gmra.mxu1 %v3765_v43  ;;  %v3761_v20 = vld [vmem:[#allocation2 + $0x248] sm:$0xff]  ;;  %v3760_v43 = vld [vmem:[#allocation2 + $0x230] sm:$0xff] }
 0x3c8   : > { %4032 = vmatprep.mubr.f32.mxu0 %v3771_v63  ;;  %4177 = vmatprep.mubr.f32.mxu1 %v3773_v16  ;;  %v3768_v63 = vld [vmem:[#allocation2 + $0x28] sm:$0xff] }
 0x3c9   : > { %5006 = vmatprep.subr.mxu0 %v3873_v8  ;;  %5115 = vmatpush3.msra.mxu1 %v3891_v51  ;;  %v3767_v16 = vld [vmem:[#allocation2 + $0x8] sm:$0xff]  ;;  %v3775_v8 = vld [vmem:[#allocation2 + $0x30] sm:$0xff] }
 0x3ca   : > { %5007 = vmatpush3.msra.mxu0 %v3857_v57  ;;  %5116 = vmatprep.subr.mxu1 %v3890_v6  ;;  %v3782_v57 = vld [vmem:[#allocation2 + $0x68] sm:$0xff] }
 0x3cb   : > { %4033 = vmatmul.mubr.f32.gmra.mxu0 %v3770_v24  ;;  %4178 = vmatmul.mubr.f32.gmra.mxu1 %v3772_v29  ;;  %v3781_v24 = vld [vmem:[#allocation2 + $0x2b0] sm:$0xff]  ;;  %v3789_v29 = vld [vmem:[#allocation2 + $0x98] sm:$0xff] }
 0x3cc   : > { %4037 = vmatprep.mubr.f32.mxu0 %v3778_v14  ;;  %4182 = vmatprep.mubr.f32.mxu1 %v3780_v10  ;;  %v3788_v14 = vld [vmem:[#allocation2 + $0x2a0] sm:$0xff] }
 0x3cd   : > { %5008 = vmatprep.subr.mxu0 %v3872_v25  ;;  %5117 = vmatpush3.msra.mxu1 %v3890_v6 }
 0x3ce   : > { %5009 = vmatpush3.msra.mxu0 %v3856_v53  ;;  %5118 = vmatprep.subr.mxu1 %v3889_v31 }
 0x3cf   : > { %4038 = vmatmul.mubr.f32.gmra.mxu0 %v3777_v7  ;;  %4183 = vmatmul.mubr.f32.gmra.mxu1 %v3779_v38 }
 0x3d0   : > { %4042 = vmatprep.mubr.f32.mxu0 %v3785_v35  ;;  %4187 = vmatprep.mubr.f32.mxu1 %v3787_v22 }
 0x3d1   : > { %5010 = vmatprep.subr.mxu0 %v3871_v44  ;;  %5119 = vmatpush3.msra.mxu1 %v3889_v31 }
 0x3d2   : > { %5011 = vmatpush3.msra.mxu0 %v3855_v46  ;;  %5120 = vmatprep.subr.mxu1 %v3888_v39 }
 0x3d3   : > { %4043 = vmatmul.mubr.f32.gmra.mxu0 %v3784_v36  ;;  %4188 = vmatmul.mubr.f32.gmra.mxu1 %v3786_v19 }
 0x3d4   : > { %4257 = vmatprep.mubr.f32.mxu0 %v3684_v48  ;;  %5124 = vmatprep.mubr.f32.mxu1 %v3685_v18 }
 0x3d5   : > { %5121 = vmatpush3.msra.mxu1 %v3888_v39 }
 0x3d6   : > { %5122 = vmatprep.subr.mxu1 %v3887_v61 }
 0x3d7   : > { %4258 = vmatmul.mubr.f32.vlgmr.msra.gmra.mxu0 %v3683_v49  ;;  %5123 = vmatpush3.msra.mxu1 %v3887_v61 }
 0x3d8   : > { %4262 = vmatprep.mubr.f32.mxu0 %v3691_v33  ;;  %5125 = vmatmul.mubr.f32.vlgmr.msra.gmra.mxu1 %v3692_v1 }
 0x3d9   : > { %5127 = vmatprep.mubr.f32.mxu1 %v3699_v37 }
 0x3db   : > { %4263 = vmatmul.mubr.f32.gmra.mxu0 %v3690_v59 }
 0x3dc   : > { %4267 = vmatprep.mubr.f32.mxu0 %v3698_v58  ;;  %5128 = vmatmul.mubr.f32.gmra.mxu1 %v3706_v52 }
 0x3dd   : > { %5130 = vmatprep.mubr.f32.mxu1 %v3713_v34 }
 0x3df   : > { %4268 = vmatmul.mubr.f32.gmra.mxu0 %v3697_v0 }
 0x3e0   : > { %4272 = vmatprep.mubr.f32.mxu0 %v3705_v60  ;;  %5131 = vmatmul.mubr.f32.gmra.mxu1 %v3720_v4 }
 0x3e1   : > { %5133 = vmatprep.mubr.f32.mxu1 %v3727_v17 }
 0x3e3   : > { %4273 = vmatmul.mubr.f32.gmra.mxu0 %v3704_v27 }
 0x3e4   : > { %4277 = vmatprep.mubr.f32.mxu0 %v3712_v9  ;;  %5134 = vmatmul.mubr.f32.gmra.mxu1 %v3734_v13 }
 0x3e5   : > { %5136 = vmatprep.mubr.f32.mxu1 %v3741_v23 }
 0x3e7   : > { %4278 = vmatmul.mubr.f32.gmra.mxu0 %v3711_v12 }
 0x3e8   : > { %4282 = vmatprep.mubr.f32.mxu0 %v3719_v11  ;;  %5137 = vmatmul.mubr.f32.gmra.mxu1 %v3748_v62 }
 0x3e9   : > { %5139 = vmatprep.mubr.f32.mxu1 %v3755_v50 }
 0x3eb   : > { %4283 = vmatmul.mubr.f32.gmra.mxu0 %v3718_v32 }
 0x3ec   : > { %4287 = vmatprep.mubr.f32.mxu0 %v3726_v56  ;;  %5140 = vmatmul.mubr.f32.gmra.mxu1 %v3762_v15 }
 0x3ed   : > { %5142 = vmatprep.mubr.f32.mxu1 %v3769_v42 }
 0x3ef   : > { %4288 = vmatmul.mubr.f32.gmra.mxu0 %v3725_v21 }
 0x3f0   : > { %4292 = vmatprep.mubr.f32.mxu0 %v3733_v54  ;;  %5143 = vmatmul.mubr.f32.gmra.mxu1 %v3776_v5 }
 0x3f1   : > { %5145 = vmatprep.mubr.f32.mxu1 %v3783_v47 }
 0x3f3   : > { %4293 = vmatmul.mubr.f32.gmra.mxu0 %v3732_v26 }
 0x3f4   : > { %4297 = vmatprep.mubr.f32.mxu0 %v3740_v28  ;;  %5146 = vmatmul.mubr.f32.gmra.mxu1 %v3790_v55 }
 0x3f7   : > { %4298 = vmatmul.mubr.f32.gmra.mxu0 %v3739_v45 }
 0x3f8   : > { %4302 = vmatprep.mubr.f32.mxu0 %v3747_v3 }
 0x3fb   : > { %4303 = vmatmul.mubr.f32.gmra.mxu0 %v3746_v30 }
 0x3fc   : > { %4307 = vmatprep.mubr.f32.mxu0 %v3754_v41 }
 0x3ff   : > { %4308 = vmatmul.mubr.f32.gmra.mxu0 %v3753_v40 }
 0x400   : > { %4312 = vmatprep.mubr.f32.mxu0 %v3761_v20 }
 0x403   : > { %4313 = vmatmul.mubr.f32.gmra.mxu0 %v3760_v43 }
 0x404   : > { %4317 = vmatprep.mubr.f32.mxu0 %v3768_v63 }
 0x407   : > { %4318 = vmatmul.mubr.f32.gmra.mxu0 %v3767_v16 }
 0x408   : > { %4322 = vmatprep.mubr.f32.mxu0 %v3775_v8 }
 0x40b   : > { %4323 = vmatmul.mubr.f32.gmra.mxu0 %v3774_v2 }
 0x40c   : > { %4327 = vmatprep.mubr.f32.mxu0 %v3782_v57 }
 0x40f   : > { %4328 = vmatmul.mubr.f32.gmra.mxu0 %v3781_v24 }
 0x410   : > { %4332 = vmatprep.mubr.f32.mxu0 %v3789_v29 }
 0x413   : > { %4333 = vmatmul.mubr.f32.gmra.mxu0 %v3788_v14 }
 0x456   : > { %v10101_v10 = vpop.f32.mrf.mxu0 }
 0x457   : > { %v10103_v25 = vpop.f32.mrf.mxu1 }
 0x458   : > { %v4853_v51 = vpop.f32.mrf.mxu0 }
 0x459   : > { %v4933_v53 = vpop.f32.mrf.mxu1  ;;  %v4854_v14 = vadd.f32 %v4853_v51, %v10101_v10 }
 0x45a   : > { %v10105_v7 = vpop.f32.mrf.mxu0 }
 0x45b   : > { %v10107_v38 = vpop.f32.mrf.mxu1 }
 0x45c   : > { %v10109_v35 = vpop.f32.mrf.mxu0 }
 0x45d   : > { %v10111_v22 = vpop.f32.mrf.mxu1 }
 0x45f   : > { %v10113_v44 = vpop.f32.mrf.mxu0  ;;  %v10115_v6 = vpop.f32.mrf.mxu1 }
 0x461   : > { %v10117_v46 = vpop.f32.mrf.mxu0  ;;  %v10119_v36 = vpop.f32.mrf.mxu1 }
 0x462   : > { %v4860_v10 = vadd.f32 %v10117_v46, %v10113_v44 }
 0x463   : > { %v10121_v19 = vpop.f32.mrf.mxu0  ;;  %v10123_v31 = vpop.f32.mrf.mxu1 }
 0x465   : > { %v10125_v48 = vpop.f32.mrf.mxu0  ;;  %v10127_v18 = vpop.f32.mrf.mxu1 }
 0x466   : > { %v4943_v44 = vadd.f32 %v10127_v18, %v10123_v31 }
 0x467   : > { %v10129_v39 = vpop.f32.mrf.mxu0  ;;  %v10131_v49 = vpop.f32.mrf.mxu1 }
 0x469   : > { %v10133_v61 = vpop.f32.mrf.mxu0  ;;  %v10135_v33 = vpop.f32.mrf.mxu1 }
 0x46b   : > { %v10137_v1 = vpop.f32.mrf.mxu0  ;;  %v10139_v59 = vpop.f32.mrf.mxu1 }
 0x46d   : > { %v10141_v37 = vpop.f32.mrf.mxu0  ;;  %v10143_v58 = vpop.f32.mrf.mxu1 }
 0x46f   : > { %v10145_v52 = vpop.f32.mrf.mxu0  ;;  %v10147_v0 = vpop.f32.mrf.mxu1 }
 0x471   : > { %v10149_v34 = vpop.f32.mrf.mxu0  ;;  %v10151_v60 = vpop.f32.mrf.mxu1 }
 0x473   : > { %v10153_v4 = vpop.f32.mrf.mxu0  ;;  %v10155_v27 = vpop.f32.mrf.mxu1 }
 0x475   : > { %v10157_v17 = vpop.f32.mrf.mxu0  ;;  %v10159_v9 = vpop.f32.mrf.mxu1 }
 0x477   : > { %v10161_v13 = vpop.f32.mrf.mxu0  ;;  %v10163_v12 = vpop.f32.mrf.mxu1 }
 0x479   : > { %v10165_v23 = vpop.f32.mrf.mxu0  ;;  %v10167_v11 = vpop.f32.mrf.mxu1 }
 0x47b   : > { %v10169_v62 = vpop.f32.mrf.mxu0  ;;  %v10171_v32 = vpop.f32.mrf.mxu1 }
 0x47d   : > { %v10173_v50 = vpop.f32.mrf.mxu0  ;;  %v10175_v56 = vpop.f32.mrf.mxu1 }
 0x47f   : > { %v10177_v15 = vpop.f32.mrf.mxu0  ;;  %v10179_v21 = vpop.f32.mrf.mxu1 }
 0x481   : > { %v10181_v42 = vpop.f32.mrf.mxu0  ;;  %v10183_v54 = vpop.f32.mrf.mxu1 }
 0x483   : > { %v10185_v5 = vpop.f32.mrf.mxu0  ;;  %v10187_v26 = vpop.f32.mrf.mxu1 }
 0x485   : > { %v10189_v47 = vpop.f32.mrf.mxu0  ;;  %v10191_v28 = vpop.f32.mrf.mxu1 }
 0x487   : > { %v10193_v55 = vpop.f32.mrf.mxu0  ;;  %v10195_v45 = vpop.f32.mrf.mxu1 }
 0x489   : > { %v10197_v3 = vpop.f32.mrf.mxu0  ;;  %v10199_v30 = vpop.f32.mrf.mxu1 }
 0x48a   : > { %11533 = vst [vmem:[#allocation151_spill] sm:$0xff] %v10199_v30 }
 0x48b   : > { %v10201_v41 = vpop.f32.mrf.mxu0  ;;  %v10203_v40 = vpop.f32.mrf.mxu1 }
 0x48c   : > { %11534 = vst [vmem:[#allocation152_spill] sm:$0xff] %v10201_v41  ;;  %11535 = vst [vmem:[#allocation153_spill] sm:$0xff] %v10203_v40  ;;  %v4934_v40 = vadd.f32 %v4933_v53, %v10103_v25  ;;  %v4940_v25 = vadd.f32 %v10119_v36, %v10115_v6 }
 0x48d   : > { %v10205_v20 = vpop.f32.mrf.mxu0  ;;  %v10207_v43 = vpop.f32.mrf.mxu1 }
 0x48e   : > { %11536 = vst [vmem:[#allocation154_spill] sm:$0xff] %v10205_v20  ;;  %11537 = vst [vmem:[#allocation155_spill] sm:$0xff] %v10207_v43  ;;  %v4115_v41 = vadd.f32 %v4934_v40, %v4854_v14 }
 0x48f   : > { %v10209_v63 = vpop.f32.mrf.mxu0  ;;  %v10211_v16 = vpop.f32.mrf.mxu1 }
 0x490   : > { %11538 = vst [vmem:[#allocation156_spill] sm:$0xff] %v10209_v63  ;;  %11539 = vst [vmem:[#allocation157_spill] sm:$0xff] %v10211_v16  ;;  %v4857_v16 = vadd.f32 %v10109_v35, %v10105_v7 }
 0x491   : > { %v10213_v8 = vpop.f32.mrf.mxu0  ;;  %v10215_v2 = vpop.f32.mrf.mxu1 }
 0x492   : > { %11540 = vst [vmem:[#allocation158_spill] sm:$0xff] %v10213_v8  ;;  %11541 = vst [vmem:[#allocation159_spill] sm:$0xff] %v10215_v2 }
 0x493   : > { %v10217_v57 = vpop.f32.mrf.mxu0  ;;  %v10219_v24 = vpop.f32.mrf.mxu1 }
 0x494   : > { %11542 = vst [vmem:[#allocation160_spill] sm:$0xff] %v10217_v57  ;;  %11543 = vst [vmem:[#allocation161_spill] sm:$0xff] %v10219_v24  ;;  %v4937_v57 = vadd.f32 %v10111_v22, %v10107_v38  ;;  %v4125_v38 = vadd.f32 %v4940_v25, %v4860_v10 }
 0x495   : > { %v10221_v29 = vpop.f32.mrf.mxu0  ;;  %v10225_v43 = vpop.f32.mrf.mxu1 }
 0x496   : > { %11544 = vst [vmem:[#allocation162_spill] sm:$0xff] %v10221_v29  ;;  %11545 = vst [vmem:[#allocation163_spill] sm:$0xff] %v10225_v43  ;;  %v4120_v53 = vadd.f32 %v4937_v57, %v4857_v16  ;;  %v4946_v16 = vadd.f32 %v10135_v33, %v10131_v49 }
 0x497   : > { %v5012_v20 = vpop.f32.mrf.mxu0 }
 0x498   : > { %v5126_v24 = vpop.f32.mrf.mxu1 }
 0x499   : > { %v5013_v63 = vpop.f32.mrf.mxu0 }
 0x49a   : > { %v5014_v2 = vadd.f32 %v5013_v63, %v5012_v20  ;;  %v4404_v30 = vpop.f32.mrf.mxu1 }
 0x49b   : > { %v5015_v8 = vpop.f32.mrf.mxu0 }
 0x49c   : > { %v4260_v29 = vadd.f32 %v5014_v2, %v4115_v41  ;;  %v5129_v14 = vpop.f32.mrf.mxu1  ;;  %v4863_v41 = vadd.f32 %v10125_v48, %v10121_v19 }
 0x49d   : > { %v5016_v51 = vpop.f32.mrf.mxu0 }
 0x49e   : > { %v5017_v40 = vadd.f32 %v5016_v51, %v5015_v8  ;;  %v4405_v7 = vadd.f32 %v4404_v30, %v4260_v29  ;;  %v4414_v20 = vpop.f32.mrf.mxu1  ;;  %v4866_v30 = vadd.f32 %v10133_v61, %v10129_v39  ;;  %v4130_v2 = vadd.f32 %v4943_v44, %v4863_v41 }
 0x49f   : > { %v5018_v35 = vpop.f32.mrf.mxu0  ;;  %v4869_v29 = vadd.f32 %v10141_v37, %v10137_v1  ;;  %v4949_v39 = vadd.f32 %v10143_v58, %v10139_v59  ;;  %v4872_v51 = vadd.f32 %v10149_v34, %v10145_v52  ;;  %v4955_v52 = vadd.f32 %v10159_v9, %v10155_v27 }
 0x4a0   : > { %v4265_v43 = vadd.f32 %v5017_v40, %v4120_v53  ;;  %4483 = vst [vmem:[%s6050_s9] sm:$0xff] %v4405_v7  ;;  %v5132_v31 = vpop.f32.mrf.mxu1  ;;  %v4952_v53 = vadd.f32 %v10151_v60, %v10147_v0 }
 0x4a1   : > { %v5019_v22 = vpop.f32.mrf.mxu0  ;;  %v4140_v7 = vadd.f32 %v4949_v39, %v4869_v29  ;;  %v4887_v39 = vadd.f32 %v10189_v47, %v10185_v5 }
 0x4a2   : > { %v4410_v46 = vadd.f32 %v5126_v24, %v4265_v43  ;;  %v5020_v6 = vadd.f32 %v5019_v22, %v5018_v35  ;;  %v4135_v43 = vadd.f32 %v4946_v16, %v4866_v30  ;;  %v4424_v10 = vpop.f32.mrf.mxu1  ;;  %v4875_v22 = vadd.f32 %v10157_v17, %v10153_v4 }
 0x4a3   : > { %v5021_v36 = vpop.f32.mrf.mxu0 }
 0x4a4   : > { %4484 = vst [vmem:[%s6050_s9 + $0x8] sm:$0xff] %v4410_v46  ;;  %v4270_v63 = vadd.f32 %v5020_v6, %v4125_v38  ;;  %v5135_v59 = vpop.f32.mrf.mxu1  ;;  %v4878_v46 = vadd.f32 %v10165_v23, %v10161_v13  ;;  %v4958_v6 = vadd.f32 %v10167_v11, %v10163_v12  ;;  %v4961_v13 = vadd.f32 %v10175_v56, %v10171_v32 }
 0x4a5   : > { %v5022_v8 = vpop.f32.mrf.mxu0 }
 0x4a6   : > { %v5023_v19 = vadd.f32 %v5022_v8, %v5021_v36  ;;  %v4415_v48 = vadd.f32 %v4414_v20, %v4270_v63  ;;  %v4434_v41 = vpop.f32.mrf.mxu1  ;;  %v4150_v20 = vadd.f32 %v4955_v52, %v4875_v22  ;;  %v4155_v30 = vadd.f32 %v4958_v6, %v4878_v46 }
 0x4a7   : > { %v5024_v57 = vpop.f32.mrf.mxu0  ;;  %v4881_v8 = vadd.f32 %v10173_v50, %v10169_v62 }
 0x4a8   : > { %v4275_v18 = vadd.f32 %v5023_v19, %v4130_v2  ;;  %4485 = vst [vmem:[%s6050_s9 + $0x10] sm:$0xff] %v4415_v48  ;;  %v5138_v27 = vpop.f32.mrf.mxu1  ;;  %v4884_v48 = vadd.f32 %v10181_v42, %v10177_v15  ;;  %v4967_v15 = vadd.f32 %v10191_v28, %v10187_v26 }
 0x4a9   : > { %v5025_v24 = vpop.f32.mrf.mxu0 }
 0x4aa   : > { %v4420_v61 = vadd.f32 %v5129_v14, %v4275_v18  ;;  %v5026_v49 = vadd.f32 %v5025_v24, %v5024_v57  ;;  %v4145_v14 = vadd.f32 %v4952_v53, %v4872_v51  ;;  %v4444_v2 = vpop.f32.mrf.mxu1  ;;  %v4964_v57 = vadd.f32 %v10183_v54, %v10179_v21 }
 0x4ab   : > { %v5027_v33 = vpop.f32.mrf.mxu0  ;;  %v4160_v18 = vadd.f32 %v4961_v13, %v4881_v8  ;;  %v4170_v53 = vadd.f32 %v4967_v15, %v4887_v39  ;;  %v11558_v8 = vld [vmem:[#allocation162_spill] sm:$0xff] }
 0x4ac   : > { %4486 = vst [vmem:[%s6050_s9 + $0x18] sm:$0xff] %v4420_v61  ;;  %v4280_v25 = vadd.f32 %v5026_v49, %v4135_v43  ;;  %v5141_v32 = vpop.f32.mrf.mxu1  ;;  %v4165_v24 = vadd.f32 %v4964_v57, %v4884_v48 }
 0x4ad   : > { %v5028_v40 = vpop.f32.mrf.mxu0 }
 0x4ae   : > { %v5029_v1 = vadd.f32 %v5028_v40, %v5027_v33  ;;  %v4425_v37 = vadd.f32 %v4424_v10, %v4280_v25  ;;  %v4454_v61 = vpop.f32.mrf.mxu1  ;;  %v4890_v33 = vadd.f32 %v10197_v3, %v10193_v55  ;;  %v11546_v10 = vld [vmem:[#allocation151_spill] sm:$0xff] }
 0x4af   : > { %v5030_v35 = vpop.f32.mrf.mxu0  ;;  %v4970_v25 = vadd.f32 %v11546_v10, %v10195_v45 }
 0x4b0   : > { %v4285_v58 = vadd.f32 %v5029_v1, %v4140_v7  ;;  %4487 = vst [vmem:[%s6050_s9 + $0x20] sm:$0xff] %v4425_v37  ;;  %v5144_v26 = vpop.f32.mrf.mxu1  ;;  %v11547_v37 = vld [vmem:[#allocation152_spill] sm:$0xff] }
 0x4b1   : > { %v5031_v38 = vpop.f32.mrf.mxu0  ;;  %v4175_v7 = vadd.f32 %v4970_v25, %v4890_v33 }
 0x4b2   : > { %v4430_v34 = vadd.f32 %v5132_v31, %v4285_v58  ;;  %v5032_v0 = vadd.f32 %v5031_v38, %v5030_v35  ;;  %v11548_v35 = vld [vmem:[#allocation154_spill] sm:$0xff]  ;;  %v11549_v58 = vld [vmem:[#allocation153_spill] sm:$0xff]  ;;  %v4464_v22 = vpop.f32.mrf.mxu1 }
 0x4b3   : > { %v5033_v60 = vpop.f32.mrf.mxu0 }
 0x4b4   : > { %4488 = vst [vmem:[%s6050_s9 + $0x28] sm:$0xff] %v4430_v34  ;;  %v4290_v44 = vadd.f32 %v5032_v0, %v4145_v14  ;;  %v11550_v14 = vld [vmem:[#allocation155_spill] sm:$0xff]  ;;  %v11552_v34 = vld [vmem:[#allocation156_spill] sm:$0xff]  ;;  %v11553_v0 = vld [vmem:[#allocation158_spill] sm:$0xff] }
 0x4b5   : > { %v5034_v36 = vpop.f32.mrf.mxu0  ;;  %v4973_v55 = vadd.f32 %v11550_v14, %v11549_v58 }
 0x4b6   : > { %v5035_v4 = vadd.f32 %v5034_v36, %v5033_v60  ;;  %v4435_v17 = vadd.f32 %v4434_v41, %v4290_v44  ;;  %v4896_v60 = vadd.f32 %v11553_v0, %v11552_v34  ;;  %v11554_v41 = vld [vmem:[#allocation157_spill] sm:$0xff]  ;;  %v11555_v44 = vld [vmem:[#allocation159_spill] sm:$0xff] }
 0x4b7   : > { %v5036_v63 = vpop.f32.mrf.mxu0  ;;  %v4976_v46 = vadd.f32 %v11555_v44, %v11554_v41 }
 0x4b8   : > { %v4295_v9 = vadd.f32 %v5035_v4, %v4150_v20  ;;  %4489 = vst [vmem:[%s6050_s9 + $0x30] sm:$0xff] %v4435_v17 }
 0x4b9   : > { %v5037_v16 = vpop.f32.mrf.mxu0 }
 0x4ba   : > { %v4440_v23 = vadd.f32 %v5135_v59, %v4295_v9  ;;  %v5038_v12 = vadd.f32 %v5037_v16, %v5036_v63  ;;  %v4893_v59 = vadd.f32 %v11548_v35, %v11547_v37  ;;  %v5147_v63 = vpop.f32.mrf.mxu1  ;;  %v4185_v9 = vadd.f32 %v4976_v46, %v4896_v60  ;;  %v11557_v16 = vld [vmem:[#allocation160_spill] sm:$0xff] }
 0x4bb   : > { %v5039_v11 = vpop.f32.mrf.mxu0  ;;  %v4899_v13 = vadd.f32 %v11558_v8, %v11557_v16 }
 0x4bc   : > { %4490 = vst [vmem:[%s6050_s9 + $0x38] sm:$0xff] %v4440_v23  ;;  %v4300_v19 = vadd.f32 %v5038_v12, %v4155_v30  ;;  %v4180_v36 = vadd.f32 %v4973_v55, %v4893_v59  ;;  %v11559_v23 = vld [vmem:[#allocation161_spill] sm:$0xff]  ;;  %v11560_v12 = vld [vmem:[#allocation163_spill] sm:$0xff]  ;;  %v4474_v57 = vpop.f32.mrf.mxu1 }
 0x4bd   : > { %v5040_v31 = vpop.f32.mrf.mxu0 }
 0x4be   : > { %v5041_v62 = vadd.f32 %v5040_v31, %v5039_v11  ;;  %v4445_v50 = vadd.f32 %v4444_v2, %v4300_v19  ;;  %v4979_v11 = vadd.f32 %v11560_v12, %v11559_v23 }
 0x4bf   : > { %v5042_v43 = vpop.f32.mrf.mxu0 }
 0x4c0   : > { %v4305_v56 = vadd.f32 %v5041_v62, %v4160_v18  ;;  %4491 = vst [vmem:[%s6050_s9 + $0x40] sm:$0xff] %v4445_v50  ;;  %v4190_v62 = vadd.f32 %v4979_v11, %v4899_v13 }
 0x4c1   : > { %v5043_v29 = vpop.f32.mrf.mxu0 }
 0x4c2   : > { %v4450_v42 = vadd.f32 %v5138_v27, %v4305_v56  ;;  %v5044_v21 = vadd.f32 %v5043_v29, %v5042_v43 }
 0x4c3   : > { %v5045_v54 = vpop.f32.mrf.mxu0 }
 0x4c4   : > { %4492 = vst [vmem:[%s6050_s9 + $0x48] sm:$0xff] %v4450_v42  ;;  %v4310_v49 = vadd.f32 %v5044_v21, %v4165_v24 }
 0x4c5   : > { %v5046_v51 = vpop.f32.mrf.mxu0 }
 0x4c6   : > { %v5047_v5 = vadd.f32 %v5046_v51, %v5045_v54  ;;  %v4455_v47 = vadd.f32 %v4454_v61, %v4310_v49 }
 0x4c7   : > { %v5048_v40 = vpop.f32.mrf.mxu0 }
 0x4c8   : > { %v4315_v28 = vadd.f32 %v5047_v5, %v4170_v53  ;;  %4493 = vst [vmem:[%s6050_s9 + $0x50] sm:$0xff] %v4455_v47 }
 0x4c9   : > { %v5049_v1 = vpop.f32.mrf.mxu0 }
 0x4ca   : > { %v4460_v3 = vadd.f32 %v5141_v32, %v4315_v28  ;;  %v5050_v45 = vadd.f32 %v5049_v1, %v5048_v40 }
 0x4cb   : > { %v5051_v38 = vpop.f32.mrf.mxu0 }
 0x4cc   : > { %4494 = vst [vmem:[%s6050_s9 + $0x58] sm:$0xff] %v4460_v3  ;;  %v4320_v52 = vadd.f32 %v5050_v45, %v4175_v7 }
 0x4cd   : > { %v5052_v6 = vpop.f32.mrf.mxu0 }
 0x4ce   : > { %v5053_v20 = vadd.f32 %v5052_v6, %v5051_v38  ;;  %v4465_v4 = vadd.f32 %v4464_v22, %v4320_v52 }
 0x4cf   : > { %v5054_v17 = vpop.f32.mrf.mxu0 }
 0x4d0   : > { %v4325_v27 = vadd.f32 %v5053_v20, %v4180_v36  ;;  %4495 = vst [vmem:[%s6050_s9 + $0x60] sm:$0xff] %v4465_v4 }
 0x4d1   : > { %v5055_v30 = vpop.f32.mrf.mxu0 }
 0x4d2   : > { %v4470_v2 = vadd.f32 %v5144_v26, %v4325_v27  ;;  %v5056_v19 = vadd.f32 %v5055_v30, %v5054_v17 }
 0x4d3   : > { %v5057_v48 = vpop.f32.mrf.mxu0 }
 0x4d4   : > { %4496 = vst [vmem:[%s6050_s9 + $0x68] sm:$0xff] %v4470_v2  ;;  %v4330_v31 = vadd.f32 %v5056_v19, %v4185_v9 }
 0x4d5   : > { %v5058_v18 = vpop.f32.mrf.mxu0 }
 0x4d6   : > { %v5059_v50 = vadd.f32 %v5058_v18, %v5057_v48  ;;  %v4475_v43 = vadd.f32 %v4474_v57, %v4330_v31 }
 0x4d8   : > { %v4335_v32 = vadd.f32 %v5059_v50, %v4190_v62  ;;  %4497 = vst [vmem:[%s6050_s9 + $0x70] sm:$0xff] %v4475_v43 }
 0x4da   : > { %v4480_v56 = vadd.f32 %v5147_v63, %v4335_v32 }
 0x4dc   : > { %4498 = vst [vmem:[%s6050_s9 + $0x78] sm:$0xff] %v4480_v56 }
 0x4dd   : > { %5606 = shalt.err (!%p5603_p3)
}
 0x4de   : > { %s5607_s15 = scalar_lea.hbm %s10308_s18, 2048  ;;  %s5611_s14 = scalar_lea.hbm %s11563_s5, 8192 }
 0x4df   : > { %p5608_p11 = scmp.ne.s32.totalorder %s10308_s18, %s5607_s15  ;;  %p5612_p2 = scmp.lt.s32.totalorder %s10308_s18, %s11563_s5 }
 0x4e0   : > { %p5613_p7 = scmp.lt.s32.totalorder %s5611_s14, %s5607_s15 }
 0x4e1   : > { %p5609_p8 = pnand %p5608_p11, %p11564_p6 }
 0x4e2   : > { %p5614_p1 = por %p5613_p7, %p5612_p2 }
 0x4e3   : > { %p5610_p0 = pneg %p5609_p8 }
 0x4e5   : > { %p5615_p4 = pnand %p5614_p1, %p5610_p0 }
 0x4e7   : > { %5618 = shalt.err (!%p5615_p4)
}
 0x4e8   : > { %s5762_s21 = smov 128   ;;  %s5763_s8 = smov 256  }
 0x4e9   : > { %s5764_s16 = smov 8  }
 0x4ea   : > { %5166 = dma.vmem_to_hbm [thread:$0]  (%p11564_p6), %s10310_s25, 2048, %s10308_s18, %s10315_s1, %s5762_s21, %s5763_s8, %s5764_s16  }
 0x4eb PF: > { %s11565_s13 = sld [smem:[#allocation18_spill]]  ;;  %p5196_p12 = scmp.ge.s32.totalorder %s5749_s6, 2 }
 0x4ec   : > { %s11566_s27 = sld [smem:[#allocation27_spill]] }
 0x4f1   : > { %s4530_s22 = sand.u32 1, %s11565_s13  }
 0x4f2   : > { %p11567_p10 = scmp.ne.s32.totalorder %s11566_s27, 0  ;;  %s4531_s24 = scalar_lea.sflag [#allocation5], %s4530_s22 }
 0x4f4   : > { %p5186_p5 = pnand %p5196_p12, %p11567_p10 }
 0x4f6   : > { %p5187_p9 = pneg %p5186_p5 }
 0x4f8   : > { %5692 = dma.done.wait (%p5187_p9), %s4531_s24, 2048  }
 0x4f9   : > { %5694 = vsyncadd (%p5187_p9), %s4531_s24, 4294965248  ;;  %s23_s6 = sadd.s32 1, %s5749_s6   ;;  %s11569_s18 = sld [smem:[#allocation19_spill]] }
 0x4fa   : > { %p10343_p13 = scmp.ge.s32.totalorder %s23_s6, 6   ;;  %s11570_s21 = sld [smem:[#allocation20_spill]] }
 0x4fb   : > { %s11571_s17 = sld [smem:[#allocation30_spill]]  ;;  %s11575_s19 = smov %s5705_s20 }
 0x4fc   : > { %s11572_s24 = sld [smem:[#allocation21_spill]]  ;;  %s11576_s20 = smov %s5957_s28 }
 0x4fd   : > { %s11573_s1 = sld [smem:[#allocation28_spill]]  ;;  %s11577_s22 = smov %s5717_s23 }
 0x4fe   : > { %s11574_s15 = sld [smem:[#allocation29_spill]]  ;;  %s11579_s25 = smov %s5729_s26 }
 0x4ff   : > { %s11580_s26 = smov %s5954_s11  ;;  %s11581_s27 = smov %s5741_s29 }
 0x500   : > { %s11582_s28 = smov %s5745_s30  ;;  %22 = sbr.rel (!%p10343_p13) target bundleno = 15 (0xf), region = 112 }
 0x501   : > { %s11578_s23 = smov %s11571_s17 }
 0x503   : > { %s11583_s29 = smov %s11573_s1 }
 0x504   : > { %s11584_s30 = smov %s11574_s15 }
 0x505   :  { %4536 = vsyncpa [#allocation4], 1 }
 0x506   :  { %4538 = vsyncpa [#allocation4 + $0x1], 1 }
 0x507   :  { %4539 = vsyncpa [#allocation7], 1 }
 0x508   :  { %4540 = vsyncpa [#allocation10], 1 }
 0x509   :  { %4541 = vsyncpa [#allocation5], 1 }
 0x50a   :  { %4543 = vsyncpa [#allocation5 + $0x1], 1 }

</bundles_post_ra>
